<compile_context>
chip_gen: v5e
topology: v5e:2x2
jax: 0.10.0
libtpu: 0.0.40
codegen_flags: <defaults>
</compile_context>

<pallas_src>
import functools
import math

import jax
import jax.numpy as jnp
from jax.experimental import pallas as pl
from jax.experimental.pallas import tpu as pltpu


# ----------------------------------------------------------------------------
# Pallas kernel: run a whole segment of T recurrent steps in one kernel call.
#   r_t      = sigmoid(3*u_t - 2)
#   u_{t+1}  = u_t*(1 - dt/taus) + (r_t @ W_dale.T + ext_t) * (dt/taus)
#   usave[t] = u_{t+1}
# W_dale.T is passed pre-transposed so the matmul hits the MXU directly.
# ----------------------------------------------------------------------------
def _rnn_seg_kernel(ext_ref, wdaleT_ref, u0_ref, usave_ref, *, dt_tausinv, nsteps):
    wT = wdaleT_ref[...]
    keep = jnp.float32(1.0 - dt_tausinv)
    gain = jnp.float32(dt_tausinv)

    def body(t, u):
        r = jax.nn.sigmoid(3.0 * u - 2.0)
        rec = jnp.dot(r, wT, preferred_element_type=jnp.float32)
        u_new = u * keep + (rec + ext_ref[t]) * gain
        usave_ref[t] = u_new
        return u_new

    jax.lax.fori_loop(0, nsteps, body, u0_ref[...], unroll=True)


def rnn_scan(ext, wdaleT, u0, dt_tausinv):
    """Run T recurrent steps. ext: [T,B,N]. Returns usave[t] = u_{t+1}."""
    T, B, N = ext.shape
    kernel = functools.partial(_rnn_seg_kernel,
                               dt_tausinv=float(dt_tausinv), nsteps=T)
    return pl.pallas_call(
        kernel,
        out_shape=jax.ShapeDtypeStruct((T, B, N), jnp.float32),
        grid=(1,),
        in_specs=[
            pl.BlockSpec((T, B, N), lambda i: (0, 0, 0)),
            pl.BlockSpec((N, N), lambda i: (0, 0)),
            pl.BlockSpec((B, N), lambda i: (0, 0)),
        ],
        out_specs=pl.BlockSpec((T, B, N), lambda i: (0, 0, 0)),
        compiler_params=pltpu.CompilerParams(
            dimension_semantics=("arbitrary",)),
    )(ext, wdaleT, u0)


# ----------------------------------------------------------------------------
# Config / parameters (deterministic synthetic init, mirrors RNN.__init__)
# ----------------------------------------------------------------------------
class Cfg:
    dt = 1.0
    taum = 10.0
    taus = 10.0
    Ncells = 128
    Ne = 96
    Ni = 32
    Nout = 2
    batch_size = 8
    ntrials = 2
    feedback_duration = 4
    intertrial_duration = 4
    stim_duration = 4
    out_duration = 4
    trial_duration = 70          # per-trial length (choice window needs +50 offset)
    trial_duration_random = False  # TODO(synk): random-duration branch disabled (fixed durations)
    pr_fixed = 0.0
    pr_plastic = 0.1
    scale_plastic = 1.0
    scale_wout = 0.1
    mue = 0.5
    noise = 0.05
    fbnoise = 0.05


def init_params(cfg, key):
    N, Ne, Ni, Nout = cfg.Ncells, cfg.Ne, cfg.Ni, cfg.Nout
    k_rec, k_out = jax.random.split(key)

    # wfixed is all-zero in the reference, so every cell is a candidate pre-cell.
    L = int(N * cfg.pr_plastic)
    wrec_init = cfg.scale_plastic * cfg.taum / math.sqrt(N * cfg.pr_plastic)
    scores = jax.random.uniform(k_rec, (N, N))
    pre_idx = jnp.argsort(scores, axis=1)[:, :L]          # L random distinct pre-cells per row
    wrec = jnp.zeros((N, N), jnp.float32).at[
        jnp.arange(N)[:, None], pre_idx].set(jnp.float32(wrec_init))

    mask = (jnp.abs(wrec) > 0).astype(jnp.float32)
    wsign = jnp.concatenate([jnp.ones((Ne,), jnp.float32),
                             -jnp.ones((Ni,), jnp.float32)])
    wout = cfg.scale_wout * jax.random.normal(k_out, (N, Nout), dtype=jnp.float32)

    return dict(weight_rec=wrec, mask=mask, weight_sign=wsign, weight_out=wout)


# ----------------------------------------------------------------------------
# Forward pass (saved=False path): trial loop in JAX glue, dynamics in Pallas.
# ----------------------------------------------------------------------------
def rnn_forward(params, cfg, stim0, stim1, trialType, target,
                A_correct, A_wrong, B_correct, B_wrong, key):
    B, N, Nout, ntrials = cfg.batch_size, cfg.Ncells, cfg.Nout, cfg.ntrials
    fb, it, st, od = (cfg.feedback_duration, cfg.intertrial_duration,
                      cfg.stim_duration, cfg.out_duration)
    fbwin = fb + it + st                       # == feedback_end
    choice_start = fbwin + 50
    choice_end = choice_start + od
    D = cfg.trial_duration
    dt_tausinv = cfg.dt / cfg.taus

    # Dale's-law constrained recurrent weight, masked + transposed ONCE in
    # plain jnp (XLA fuses it; no separate kernel launch, no in-loop transpose).
    w_dale = (params["mask"] * jax.nn.relu(params["weight_rec"])
              * params["weight_sign"][None, :])
    wdaleT = w_dale.T
    wout = params["weight_out"]

    key, ku = jax.random.split(key)
    u = jax.random.normal(ku, (B, N), dtype=jnp.float32)    # initState

    outchoice = jnp.zeros((B, ntrials, Nout), jnp.float32)
    fixation = jnp.zeros((B, ntrials, Nout), jnp.float32)
    feedback_idx_all = jnp.zeros((B, ntrials), jnp.float32)

    prev_tail_sq = jnp.zeros((B, Nout), jnp.float32)  # tail-of-previous-trial out**2 sum
    feedback_input = jnp.zeros((B, N), jnp.float32)

    def readout(u_pre_slice):                 # [S,B,N] pre-update states -> out [S,B,Nout]
        r = jax.nn.sigmoid(3.0 * u_pre_slice - 2.0)
        return jnp.einsum('tbn,no->tbo', r, wout)

    seg_lens = [D] * ntrials + [fb]            # ntrials trials + trailing feedback window
    for seg in range(ntrials + 1):
        T = seg_lens[seg]
        key, k1, k2 = jax.random.split(key, 3)
        tvec = jnp.arange(T)

        # Feedback applied for ti_within in [1, fbwin) (the ti_within==0 step uses the
        # stale zero `feedback` variable in the reference), and never on trial 0.
        if seg == 0:
            fb_mask = jnp.zeros((T,), jnp.float32)
        else:
            fb_mask = ((tvec >= 1) & (tvec < fbwin)).astype(jnp.float32)
        # Stimulus applied for ti_within in (fb+it, fbwin) (first stim step uses stale zeros).
        stim_mask = ((tvec > fb + it) & (tvec < fbwin)).astype(jnp.float32)

        ext_noise = cfg.noise * jax.random.normal(k1, (T, B, N), dtype=jnp.float32)
        fb_noise = cfg.fbnoise * jax.random.normal(k2, (T, B, N), dtype=jnp.float32)

        feedback_t = fb_mask[:, None, None] * (feedback_input[None] + fb_noise)
        if seg < ntrials:
            tt = trialType[:, seg]
            stimt_on = ((1.0 - tt)[:, None] * stim0[None, :]
                        + tt[:, None] * stim1[None, :])
        else:
            stimt_on = jnp.zeros((B, N), jnp.float32)
        stim_t = stim_mask[:, None, None] * stimt_on[None]

        ext = cfg.mue + feedback_t + stim_t + ext_noise
        # TODO(synk): ext (incl. noise via pltpu.prng_*) could be generated in-kernel to
        # avoid materializing (T,B,N) arrays in HBM; kept outside (<1 MB per segment).

        usave = rnn_scan(ext, wdaleT, u, dt_tausinv)

        if seg < ntrials:
            # out_t uses the PRE-update state u_t: reconstruct from [u0, usave[:-1]].
            u_pre = jnp.concatenate([u[None], usave[:-1]], axis=0)

            # fixation[trial] = (tail-of-previous-trial + first fbwin steps) of out**2 / fbwin
            head_sq = jnp.sum(readout(u_pre[:fbwin]) ** 2, axis=0)
            fixation = fixation.at[:, seg, :].set((prev_tail_sq + head_sq) / fbwin)

            # outchoice = mean of out over the choice window
            outchoice = outchoice.at[:, seg, :].set(
                jnp.mean(readout(u_pre[choice_start:choice_end]), axis=0))

            if seg + 1 < ntrials:
                prev_tail_sq = jnp.sum(readout(u_pre[choice_end:]) ** 2, axis=0)

            # Feedback for the next segment (calcfeedback / calcfeedback_idx).
            # TODO(synk): tools_data.symmetric_output_onetrial is an external dependency
            # that is not available; the raw outchoice is used in its place.
            outsym = outchoice[:, seg, :]
            pred_i = jnp.argmax(outsym, axis=1)
            TF = (pred_i == target[:, seg]).astype(jnp.float32)
            pred = pred_i.astype(jnp.float32)
            fA = (1.0 - TF)[:, None] * A_wrong[None, :] + TF[:, None] * A_correct[None, :]
            fB = (1.0 - TF)[:, None] * B_wrong[None, :] + TF[:, None] * B_correct[None, :]
            f0 = (1.0 - pred)[:, None] * fA + pred[:, None] * fB
            f1 = pred[:, None] * fA + (1.0 - pred)[:, None] * fB
            ttp = trialType[:, seg]
            feedback_input = (1.0 - ttp)[:, None] * f0 + ttp[:, None] * f1

            fA_s = TF                 # (1-TF)*0 + TF*1
            fB_s = 2.0 + TF           # (1-TF)*2 + TF*3
            f0_s = (1.0 - pred) * fA_s + pred * fB_s
            f1_s = pred * fA_s + (1.0 - pred) * fB_s
            feedback_idx_all = feedback_idx_all.at[:, seg].set(
                (1.0 - ttp) * f0_s + ttp * f1_s)

        u = usave[-1]

    return outchoice, feedback_idx_all, fixation


# ----------------------------------------------------------------------------
# Driver
# ----------------------------------------------------------------------------
if __name__ == "__main__":
    cfg = Cfg()
    key = jax.random.PRNGKey(0)
    key, kp, k_stim0, k_stim1, k_tt, k_tg, kA0, kA1, kB0, kB1, k_fwd = \
        jax.random.split(key, 11)

    params = init_params(cfg, kp)

    N, B, nt = cfg.Ncells, cfg.batch_size, cfg.ntrials
    stim0 = jax.random.normal(k_stim0, (N,), dtype=jnp.float32)
    stim1 = jax.random.normal(k_stim1, (N,), dtype=jnp.float32)
    trialType = jax.random.bernoulli(k_tt, 0.5, (B, nt)).astype(jnp.float32)
    target = jax.random.randint(k_tg, (B, nt), 0, cfg.Nout, dtype=jnp.int32)
    A_correct = jax.random.normal(kA0, (N,), dtype=jnp.float32)
    A_wrong = jax.random.normal(kA1, (N,), dtype=jnp.float32)
    B_correct = jax.random.normal(kB0, (N,), dtype=jnp.float32)
    B_wrong = jax.random.normal(kB1, (N,), dtype=jnp.float32)

    @jax.jit
    def run(params, stim0, stim1, trialType, target, Ac, Aw, Bc, Bw, key):
        return rnn_forward(params, cfg, stim0, stim1, trialType, target,
                           Ac, Aw, Bc, Bw, key)

    outchoice, feedback_idx, fixation = run(
        params, stim0, stim1, trialType, target,
        A_correct, A_wrong, B_correct, B_wrong, k_fwd)

    jax.block_until_ready((outchoice, feedback_idx, fixation))
    assert outchoice.shape == (B, nt, cfg.Nout)
    assert feedback_idx.shape == (B, nt)
    assert fixation.shape == (B, nt, cfg.Nout)
    print("KERNEL_OK")
</pallas_src>

<mosaic_0001>
module attributes {stable_mosaic.version = 11 : i64} {
  func.func @_rnn_seg_kernel(%arg0: i32, %arg1: memref<70x8x128xf32, #tpu.memory_space<vmem>>, %arg2: memref<128x128xf32, #tpu.memory_space<vmem>>, %arg3: memref<8x128xf32, #tpu.memory_space<vmem>>, %arg4: memref<70x8x128xf32, #tpu.memory_space<vmem>>) attributes {dimension_semantics = [#tpu.dimension_semantics<arbitrary>], iteration_bounds = array<i64: 1>, scalar_prefetch = 0 : i64, scratch_operands = 0 : i64, tpu.core_type = #tpu.core_type<tc>, window_params = [{pipeline_mode = #tpu.pipeline_mode<synchronous>, transform_indices = @transform_0, window_bounds = array<i64: 70, 8, 128>}, {pipeline_mode = #tpu.pipeline_mode<synchronous>, transform_indices = @transform_1, window_bounds = array<i64: 128, 128>}, {pipeline_mode = #tpu.pipeline_mode<synchronous>, transform_indices = @transform_2, window_bounds = array<i64: 8, 128>}, {pipeline_mode = #tpu.pipeline_mode<synchronous>, transform_indices = @transform_3, window_bounds = array<i64: 70, 8, 128>}]} {
    %c0 = arith.constant 0 : index
    %c0_0 = arith.constant 0 : index
    %0 = vector.load %arg2[%c0, %c0_0] : memref<128x128xf32, #tpu.memory_space<vmem>>, vector<128x128xf32>
    %c0_1 = arith.constant 0 : index
    %c0_2 = arith.constant 0 : index
    %1 = vector.load %arg3[%c0_1, %c0_2] : memref<8x128xf32, #tpu.memory_space<vmem>>, vector<8x128xf32>
    %cst = arith.constant 0.899999976 : f32
    %cst_3 = arith.constant 1.000000e-01 : f32
    %c0_i32 = arith.constant 0 : i32
    %cst_4 = arith.constant 3.000000e+00 : f32
    %2 = vector.broadcast %cst_4 : f32 to vector<8x128xf32>
    %3 = arith.mulf %2, %1 : vector<8x128xf32>
    %cst_5 = arith.constant 2.000000e+00 : f32
    %4 = vector.broadcast %cst_5 : f32 to vector<8x128xf32>
    %5 = arith.subf %3, %4 : vector<8x128xf32>
    %6 = arith.negf %5 : vector<8x128xf32>
    %7 = math.exp %6 : vector<8x128xf32>
    %cst_6 = arith.constant 1.000000e+00 : f32
    %8 = vector.broadcast %cst_6 : f32 to vector<8x128xf32>
    %9 = arith.addf %8, %7 : vector<8x128xf32>
    %10 = arith.divf %8, %9 : vector<8x128xf32>
    %cst_7 = arith.constant dense<0.000000e+00> : vector<8x128xf32>
    %11 = tpu.matmul %10, %0, %cst_7 {dimension_numbers = #tpu.dot_dimension_numbers<[1], [0], [0], [1], [0, 0, 1, 1], [], []>} : vector<8x128xf32>, vector<128x128xf32>, vector<8x128xf32> -> vector<8x128xf32>
    %12 = vector.broadcast %cst : f32 to vector<8x128xf32>
    %13 = arith.mulf %1, %12 : vector<8x128xf32>
    %14 = arith.index_cast %c0_i32 : i32 to index
    %c0_8 = arith.constant 0 : index
    %c0_9 = arith.constant 0 : index
    %15 = vector.load %arg1[%14, %c0_8, %c0_9] : memref<70x8x128xf32, #tpu.memory_space<vmem>>, vector<1x8x128xf32>
    %16 = vector.shape_cast %15 : vector<1x8x128xf32> to vector<8x128xf32>
    %17 = arith.addf %11, %16 : vector<8x128xf32>
    %18 = vector.broadcast %cst_3 : f32 to vector<8x128xf32>
    %19 = arith.mulf %17, %18 : vector<8x128xf32>
    %20 = arith.addf %13, %19 : vector<8x128xf32>
    %21 = arith.index_cast %c0_i32 : i32 to index
    %c0_10 = arith.constant 0 : index
    %c0_11 = arith.constant 0 : index
    %22 = vector.load %arg4[%21, %c0_10, %c0_11] : memref<70x8x128xf32, #tpu.memory_space<vmem>>, vector<1x8x128xf32>
    %23 = vector.shape_cast %22 : vector<1x8x128xf32> to vector<8x128xf32>
    %24 = vector.shape_cast %20 : vector<8x128xf32> to vector<1x8x128xf32>
    tpu.vector_store %arg4[%21, %c0_10, %c0_11], %24 {strides = array<i32>} : memref<70x8x128xf32, #tpu.memory_space<vmem>>, vector<1x8x128xf32>,
    %c1_i32 = arith.constant 1 : i32
    %cst_12 = arith.constant 3.000000e+00 : f32
    %25 = vector.broadcast %cst_12 : f32 to vector<8x128xf32>
    %26 = arith.mulf %25, %20 : vector<8x128xf32>
    %cst_13 = arith.constant 2.000000e+00 : f32
    %27 = vector.broadcast %cst_13 : f32 to vector<8x128xf32>
    %28 = arith.subf %26, %27 : vector<8x128xf32>
    %29 = arith.negf %28 : vector<8x128xf32>
    %30 = math.exp %29 : vector<8x128xf32>
    %cst_14 = arith.constant 1.000000e+00 : f32
    %31 = vector.broadcast %cst_14 : f32 to vector<8x128xf32>
    %32 = arith.addf %31, %30 : vector<8x128xf32>
    %33 = arith.divf %31, %32 : vector<8x128xf32>
    %cst_15 = arith.constant dense<0.000000e+00> : vector<8x128xf32>
    %34 = tpu.matmul %33, %0, %cst_15 {dimension_numbers = #tpu.dot_dimension_numbers<[1], [0], [0], [1], [0, 0, 1, 1], [], []>} : vector<8x128xf32>, vector<128x128xf32>, vector<8x128xf32> -> vector<8x128xf32>
    %35 = vector.broadcast %cst : f32 to vector<8x128xf32>
    %36 = arith.mulf %20, %35 : vector<8x128xf32>
    %37 = arith.index_cast %c1_i32 : i32 to index
    %c0_16 = arith.constant 0 : index
    %c0_17 = arith.constant 0 : index
    %38 = vector.load %arg1[%37, %c0_16, %c0_17] : memref<70x8x128xf32, #tpu.memory_space<vmem>>, vector<1x8x128xf32>
    %39 = vector.shape_cast %38 : vector<1x8x128xf32> to vector<8x128xf32>
    %40 = arith.addf %34, %39 : vector<8x128xf32>
    %41 = vector.broadcast %cst_3 : f32 to vector<8x128xf32>
    %42 = arith.mulf %40, %41 : vector<8x128xf32>
    %43 = arith.addf %36, %42 : vector<8x128xf32>
    %44 = arith.index_cast %c1_i32 : i32 to index
    %c0_18 = arith.constant 0 : index
    %c0_19 = arith.constant 0 : index
    %45 = vector.load %arg4[%44, %c0_18, %c0_19] : memref<70x8x128xf32, #tpu.memory_space<vmem>>, vector<1x8x128xf32>
    %46 = vector.shape_cast %45 : vector<1x8x128xf32> to vector<8x128xf32>
    %47 = vector.shape_cast %43 : vector<8x128xf32> to vector<1x8x128xf32>
    tpu.vector_store %arg4[%44, %c0_18, %c0_19], %47 {strides = array<i32>} : memref<70x8x128xf32, #tpu.memory_space<vmem>>, vector<1x8x128xf32>,
    %c2_i32 = arith.constant 2 : i32
    %cst_20 = arith.constant 3.000000e+00 : f32
    %48 = vector.broadcast %cst_20 : f32 to vector<8x128xf32>
    %49 = arith.mulf %48, %43 : vector<8x128xf32>
    %cst_21 = arith.constant 2.000000e+00 : f32
    %50 = vector.broadcast %cst_21 : f32 to vector<8x128xf32>
    %51 = arith.subf %49, %50 : vector<8x128xf32>
    %52 = arith.negf %51 : vector<8x128xf32>
    %53 = math.exp %52 : vector<8x128xf32>
    %cst_22 = arith.constant 1.000000e+00 : f32
    %54 = vector.broadcast %cst_22 : f32 to vector<8x128xf32>
    %55 = arith.addf %54, %53 : vector<8x128xf32>
    %56 = arith.divf %54, %55 : vector<8x128xf32>
    %cst_23 = arith.constant dense<0.000000e+00> : vector<8x128xf32>
    %57 = tpu.matmul %56, %0, %cst_23 {dimension_numbers = #tpu.dot_dimension_numbers<[1], [0], [0], [1], [0, 0, 1, 1], [], []>} : vector<8x128xf32>, vector<128x128xf32>, vector<8x128xf32> -> vector<8x128xf32>
    %58 = vector.broadcast %cst : f32 to vector<8x128xf32>
    %59 = arith.mulf %43, %58 : vector<8x128xf32>
    %60 = arith.index_cast %c2_i32 : i32 to index
    %c0_24 = arith.constant 0 : index
    %c0_25 = arith.constant 0 : index
    %61 = vector.load %arg1[%60, %c0_24, %c0_25] : memref<70x8x128xf32, #tpu.memory_space<vmem>>, vector<1x8x128xf32>
    %62 = vector.shape_cast %61 : vector<1x8x128xf32> to vector<8x128xf32>
    %63 = arith.addf %57, %62 : vector<8x128xf32>
    %64 = vector.broadcast %cst_3 : f32 to vector<8x128xf32>
    %65 = arith.mulf %63, %64 : vector<8x128xf32>
    %66 = arith.addf %59, %65 : vector<8x128xf32>
    %67 = arith.index_cast %c2_i32 : i32 to index
    %c0_26 = arith.constant 0 : index
    %c0_27 = arith.constant 0 : index
    %68 = vector.load %arg4[%67, %c0_26, %c0_27] : memref<70x8x128xf32, #tpu.memory_space<vmem>>, vector<1x8x128xf32>
    %69 = vector.shape_cast %68 : vector<1x8x128xf32> to vector<8x128xf32>
    %70 = vector.shape_cast %66 : vector<8x128xf32> to vector<1x8x128xf32>
    tpu.vector_store %arg4[%67, %c0_26, %c0_27], %70 {strides = array<i32>} : memref<70x8x128xf32, #tpu.memory_space<vmem>>, vector<1x8x128xf32>,
    %c3_i32 = arith.constant 3 : i32
    %cst_28 = arith.constant 3.000000e+00 : f32
    %71 = vector.broadcast %cst_28 : f32 to vector<8x128xf32>
    %72 = arith.mulf %71, %66 : vector<8x128xf32>
    %cst_29 = arith.constant 2.000000e+00 : f32
    %73 = vector.broadcast %cst_29 : f32 to vector<8x128xf32>
    %74 = arith.subf %72, %73 : vector<8x128xf32>
    %75 = arith.negf %74 : vector<8x128xf32>
    %76 = math.exp %75 : vector<8x128xf32>
    %cst_30 = arith.constant 1.000000e+00 : f32
    %77 = vector.broadcast %cst_30 : f32 to vector<8x128xf32>
    %78 = arith.addf %77, %76 : vector<8x128xf32>
    %79 = arith.divf %77, %78 : vector<8x128xf32>
    %cst_31 = arith.constant dense<0.000000e+00> : vector<8x128xf32>
    %80 = tpu.matmul %79, %0, %cst_31 {dimension_numbers = #tpu.dot_dimension_numbers<[1], [0], [0], [1], [0, 0, 1, 1], [], []>} : vector<8x128xf32>, vector<128x128xf32>, vector<8x128xf32> -> vector<8x128xf32>
    %81 = vector.broadcast %cst : f32 to vector<8x128xf32>
    %82 = arith.mulf %66, %81 : vector<8x128xf32>
    %83 = arith.index_cast %c3_i32 : i32 to index
    %c0_32 = arith.constant 0 : index
    %c0_33 = arith.constant 0 : index
    %84 = vector.load %arg1[%83, %c0_32, %c0_33] : memref<70x8x128xf32, #tpu.memory_space<vmem>>, vector<1x8x128xf32>
    %85 = vector.shape_cast %84 : vector<1x8x128xf32> to vector<8x128xf32>
    %86 = arith.addf %80, %85 : vector<8x128xf32>
    %87 = vector.broadcast %cst_3 : f32 to vector<8x128xf32>
    %88 = arith.mulf %86, %87 : vector<8x128xf32>
    %89 = arith.addf %82, %88 : vector<8x128xf32>
    %90 = arith.index_cast %c3_i32 : i32 to index
    %c0_34 = arith.constant 0 : index
    %c0_35 = arith.constant 0 : index
    %91 = vector.load %arg4[%90, %c0_34, %c0_35] : memref<70x8x128xf32, #tpu.memory_space<vmem>>, vector<1x8x128xf32>
    %92 = vector.shape_cast %91 : vector<1x8x128xf32> to vector<8x128xf32>
    %93 = vector.shape_cast %89 : vector<8x128xf32> to vector<1x8x128xf32>
    tpu.vector_store %arg4[%90, %c0_34, %c0_35], %93 {strides = array<i32>} : memref<70x8x128xf32, #tpu.memory_space<vmem>>, vector<1x8x128xf32>,
    %c4_i32 = arith.constant 4 : i32
    %cst_36 = arith.constant 3.000000e+00 : f32
    %94 = vector.broadcast %cst_36 : f32 to vector<8x128xf32>
    %95 = arith.mulf %94, %89 : vector<8x128xf32>
    %cst_37 = arith.constant 2.000000e+00 : f32
    %96 = vector.broadcast %cst_37 : f32 to vector<8x128xf32>
    %97 = arith.subf %95, %96 : vector<8x128xf32>
    %98 = arith.negf %97 : vector<8x128xf32>
    %99 = math.exp %98 : vector<8x128xf32>
    %cst_38 = arith.constant 1.000000e+00 : f32
    %100 = vector.broadcast %cst_38 : f32 to vector<8x128xf32>
    %101 = arith.addf %100, %99 : vector<8x128xf32>
    %102 = arith.divf %100, %101 : vector<8x128xf32>
    %cst_39 = arith.constant dense<0.000000e+00> : vector<8x128xf32>
    %103 = tpu.matmul %102, %0, %cst_39 {dimension_numbers = #tpu.dot_dimension_numbers<[1], [0], [0], [1], [0, 0, 1, 1], [], []>} : vector<8x128xf32>, vector<128x128xf32>, vector<8x128xf32> -> vector<8x128xf32>
    %104 = vector.broadcast %cst : f32 to vector<8x128xf32>
    %105 = arith.mulf %89, %104 : vector<8x128xf32>
    %106 = arith.index_cast %c4_i32 : i32 to index
    %c0_40 = arith.constant 0 : index
    %c0_41 = arith.constant 0 : index
    %107 = vector.load %arg1[%106, %c0_40, %c0_41] : memref<70x8x128xf32, #tpu.memory_space<vmem>>, vector<1x8x128xf32>
    %108 = vector.shape_cast %107 : vector<1x8x128xf32> to vector<8x128xf32>
    %109 = arith.addf %103, %108 : vector<8x128xf32>
    %110 = vector.broadcast %cst_3 : f32 to vector<8x128xf32>
    %111 = arith.mulf %109, %110 : vector<8x128xf32>
    %112 = arith.addf %105, %111 : vector<8x128xf32>
    %113 = arith.index_cast %c4_i32 : i32 to index
    %c0_42 = arith.constant 0 : index
    %c0_43 = arith.constant 0 : index
    %114 = vector.load %arg4[%113, %c0_42, %c0_43] : memref<70x8x128xf32, #tpu.memory_space<vmem>>, vector<1x8x128xf32>
    %115 = vector.shape_cast %114 : vector<1x8x128xf32> to vector<8x128xf32>
    %116 = vector.shape_cast %112 : vector<8x128xf32> to vector<1x8x128xf32>
    tpu.vector_store %arg4[%113, %c0_42, %c0_43], %116 {strides = array<i32>} : memref<70x8x128xf32, #tpu.memory_space<vmem>>, vector<1x8x128xf32>,
    %c5_i32 = arith.constant 5 : i32
    %cst_44 = arith.constant 3.000000e+00 : f32
    %117 = vector.broadcast %cst_44 : f32 to vector<8x128xf32>
    %118 = arith.mulf %117, %112 : vector<8x128xf32>
    %cst_45 = arith.constant 2.000000e+00 : f32
    %119 = vector.broadcast %cst_45 : f32 to vector<8x128xf32>
    %120 = arith.subf %118, %119 : vector<8x128xf32>
    %121 = arith.negf %120 : vector<8x128xf32>
    %122 = math.exp %121 : vector<8x128xf32>
    %cst_46 = arith.constant 1.000000e+00 : f32
    %123 = vector.broadcast %cst_46 : f32 to vector<8x128xf32>
    %124 = arith.addf %123, %122 : vector<8x128xf32>
    %125 = arith.divf %123, %124 : vector<8x128xf32>
    %cst_47 = arith.constant dense<0.000000e+00> : vector<8x128xf32>
    %126 = tpu.matmul %125, %0, %cst_47 {dimension_numbers = #tpu.dot_dimension_numbers<[1], [0], [0], [1], [0, 0, 1, 1], [], []>} : vector<8x128xf32>, vector<128x128xf32>, vector<8x128xf32> -> vector<8x128xf32>
    %127 = vector.broadcast %cst : f32 to vector<8x128xf32>
    %128 = arith.mulf %112, %127 : vector<8x128xf32>
    %129 = arith.index_cast %c5_i32 : i32 to index
    %c0_48 = arith.constant 0 : index
    %c0_49 = arith.constant 0 : index
    %130 = vector.load %arg1[%129, %c0_48, %c0_49] : memref<70x8x128xf32, #tpu.memory_space<vmem>>, vector<1x8x128xf32>
    %131 = vector.shape_cast %130 : vector<1x8x128xf32> to vector<8x128xf32>
    %132 = arith.addf %126, %131 : vector<8x128xf32>
    %133 = vector.broadcast %cst_3 : f32 to vector<8x128xf32>
    %134 = arith.mulf %132, %133 : vector<8x128xf32>
    %135 = arith.addf %128, %134 : vector<8x128xf32>
    %136 = arith.index_cast %c5_i32 : i32 to index
    %c0_50 = arith.constant 0 : index
    %c0_51 = arith.constant 0 : index
    %137 = vector.load %arg4[%136, %c0_50, %c0_51] : memref<70x8x128xf32, #tpu.memory_space<vmem>>, vector<1x8x128xf32>
    %138 = vector.shape_cast %137 : vector<1x8x128xf32> to vector<8x128xf32>
    %139 = vector.shape_cast %135 : vector<8x128xf32> to vector<1x8x128xf32>
    tpu.vector_store %arg4[%136, %c0_50, %c0_51], %139 {strides = array<i32>} : memref<70x8x128xf32, #tpu.memory_space<vmem>>, vector<1x8x128xf32>,
    %c6_i32 = arith.constant 6 : i32
    %cst_52 = arith.constant 3.000000e+00 : f32
    %140 = vector.broadcast %cst_52 : f32 to vector<8x128xf32>
    %141 = arith.mulf %140, %135 : vector<8x128xf32>
    %cst_53 = arith.constant 2.000000e+00 : f32
    %142 = vector.broadcast %cst_53 : f32 to vector<8x128xf32>
    %143 = arith.subf %141, %142 : vector<8x128xf32>
    %144 = arith.negf %143 : vector<8x128xf32>
    %145 = math.exp %144 : vector<8x128xf32>
    %cst_54 = arith.constant 1.000000e+00 : f32
    %146 = vector.broadcast %cst_54 : f32 to vector<8x128xf32>
    %147 = arith.addf %146, %145 : vector<8x128xf32>
    %148 = arith.divf %146, %147 : vector<8x128xf32>
    %cst_55 = arith.constant dense<0.000000e+00> : vector<8x128xf32>
    %149 = tpu.matmul %148, %0, %cst_55 {dimension_numbers = #tpu.dot_dimension_numbers<[1], [0], [0], [1], [0, 0, 1, 1], [], []>} : vector<8x128xf32>, vector<128x128xf32>, vector<8x128xf32> -> vector<8x128xf32>
    %150 = vector.broadcast %cst : f32 to vector<8x128xf32>
    %151 = arith.mulf %135, %150 : vector<8x128xf32>
    %152 = arith.index_cast %c6_i32 : i32 to index
    %c0_56 = arith.constant 0 : index
    %c0_57 = arith.constant 0 : index
    %153 = vector.load %arg1[%152, %c0_56, %c0_57] : memref<70x8x128xf32, #tpu.memory_space<vmem>>, vector<1x8x128xf32>
    %154 = vector.shape_cast %153 : vector<1x8x128xf32> to vector<8x128xf32>
    %155 = arith.addf %149, %154 : vector<8x128xf32>
    %156 = vector.broadcast %cst_3 : f32 to vector<8x128xf32>
    %157 = arith.mulf %155, %156 : vector<8x128xf32>
    %158 = arith.addf %151, %157 : vector<8x128xf32>
    %159 = arith.index_cast %c6_i32 : i32 to index
    %c0_58 = arith.constant 0 : index
    %c0_59 = arith.constant 0 : index
    %160 = vector.load %arg4[%159, %c0_58, %c0_59] : memref<70x8x128xf32, #tpu.memory_space<vmem>>, vector<1x8x128xf32>
    %161 = vector.shape_cast %160 : vector<1x8x128xf32> to vector<8x128xf32>
    %162 = vector.shape_cast %158 : vector<8x128xf32> to vector<1x8x128xf32>
    tpu.vector_store %arg4[%159, %c0_58, %c0_59], %162 {strides = array<i32>} : memref<70x8x128xf32, #tpu.memory_space<vmem>>, vector<1x8x128xf32>,
    %c7_i32 = arith.constant 7 : i32
    %cst_60 = arith.constant 3.000000e+00 : f32
    %163 = vector.broadcast %cst_60 : f32 to vector<8x128xf32>
    %164 = arith.mulf %163, %158 : vector<8x128xf32>
    %cst_61 = arith.constant 2.000000e+00 : f32
    %165 = vector.broadcast %cst_61 : f32 to vector<8x128xf32>
    %166 = arith.subf %164, %165 : vector<8x128xf32>
    %167 = arith.negf %166 : vector<8x128xf32>
    %168 = math.exp %167 : vector<8x128xf32>
    %cst_62 = arith.constant 1.000000e+00 : f32
    %169 = vector.broadcast %cst_62 : f32 to vector<8x128xf32>
    %170 = arith.addf %169, %168 : vector<8x128xf32>
    %171 = arith.divf %169, %170 : vector<8x128xf32>
    %cst_63 = arith.constant dense<0.000000e+00> : vector<8x128xf32>
    %172 = tpu.matmul %171, %0, %cst_63 {dimension_numbers = #tpu.dot_dimension_numbers<[1], [0], [0], [1], [0, 0, 1, 1], [], []>} : vector<8x128xf32>, vector<128x128xf32>, vector<8x128xf32> -> vector<8x128xf32>
    %173 = vector.broadcast %cst : f32 to vector<8x128xf32>
    %174 = arith.mulf %158, %173 : vector<8x128xf32>
    %175 = arith.index_cast %c7_i32 : i32 to index
    %c0_64 = arith.constant 0 : index
    %c0_65 = arith.constant 0 : index
    %176 = vector.load %arg1[%175, %c0_64, %c0_65] : memref<70x8x128xf32, #tpu.memory_space<vmem>>, vector<1x8x128xf32>
    %177 = vector.shape_cast %176 : vector<1x8x128xf32> to vector<8x128xf32>
    %178 = arith.addf %172, %177 : vector<8x128xf32>
    %179 = vector.broadcast %cst_3 : f32 to vector<8x128xf32>
    %180 = arith.mulf %178, %179 : vector<8x128xf32>
    %181 = arith.addf %174, %180 : vector<8x128xf32>
    %182 = arith.index_cast %c7_i32 : i32 to index
    %c0_66 = arith.constant 0 : index
    %c0_67 = arith.constant 0 : index
    %183 = vector.load %arg4[%182, %c0_66, %c0_67] : memref<70x8x128xf32, #tpu.memory_space<vmem>>, vector<1x8x128xf32>
    %184 = vector.shape_cast %183 : vector<1x8x128xf32> to vector<8x128xf32>
    %185 = vector.shape_cast %181 : vector<8x128xf32> to vector<1x8x128xf32>
    tpu.vector_store %arg4[%182, %c0_66, %c0_67], %185 {strides = array<i32>} : memref<70x8x128xf32, #tpu.memory_space<vmem>>, vector<1x8x128xf32>,
    %c8_i32 = arith.constant 8 : i32
    %cst_68 = arith.constant 3.000000e+00 : f32
    %186 = vector.broadcast %cst_68 : f32 to vector<8x128xf32>
    %187 = arith.mulf %186, %181 : vector<8x128xf32>
    %cst_69 = arith.constant 2.000000e+00 : f32
    %188 = vector.broadcast %cst_69 : f32 to vector<8x128xf32>
    %189 = arith.subf %187, %188 : vector<8x128xf32>
    %190 = arith.negf %189 : vector<8x128xf32>
    %191 = math.exp %190 : vector<8x128xf32>
    %cst_70 = arith.constant 1.000000e+00 : f32
    %192 = vector.broadcast %cst_70 : f32 to vector<8x128xf32>
    %193 = arith.addf %192, %191 : vector<8x128xf32>
    %194 = arith.divf %192, %193 : vector<8x128xf32>
    %cst_71 = arith.constant dense<0.000000e+00> : vector<8x128xf32>
    %195 = tpu.matmul %194, %0, %cst_71 {dimension_numbers = #tpu.dot_dimension_numbers<[1], [0], [0], [1], [0, 0, 1, 1], [], []>} : vector<8x128xf32>, vector<128x128xf32>, vector<8x128xf32> -> vector<8x128xf32>
    %196 = vector.broadcast %cst : f32 to vector<8x128xf32>
    %197 = arith.mulf %181, %196 : vector<8x128xf32>
    %198 = arith.index_cast %c8_i32 : i32 to index
    %c0_72 = arith.constant 0 : index
    %c0_73 = arith.constant 0 : index
    %199 = vector.load %arg1[%198, %c0_72, %c0_73] : memref<70x8x128xf32, #tpu.memory_space<vmem>>, vector<1x8x128xf32>
    %200 = vector.shape_cast %199 : vector<1x8x128xf32> to vector<8x128xf32>
    %201 = arith.addf %195, %200 : vector<8x128xf32>
    %202 = vector.broadcast %cst_3 : f32 to vector<8x128xf32>
    %203 = arith.mulf %201, %202 : vector<8x128xf32>
    %204 = arith.addf %197, %203 : vector<8x128xf32>
    %205 = arith.index_cast %c8_i32 : i32 to index
    %c0_74 = arith.constant 0 : index
    %c0_75 = arith.constant 0 : index
    %206 = vector.load %arg4[%205, %c0_74, %c0_75] : memref<70x8x128xf32, #tpu.memory_space<vmem>>, vector<1x8x128xf32>
    %207 = vector.shape_cast %206 : vector<1x8x128xf32> to vector<8x128xf32>
    %208 = vector.shape_cast %204 : vector<8x128xf32> to vector<1x8x128xf32>
    tpu.vector_store %arg4[%205, %c0_74, %c0_75], %208 {strides = array<i32>} : memref<70x8x128xf32, #tpu.memory_space<vmem>>, vector<1x8x128xf32>,
    %c9_i32 = arith.constant 9 : i32
    %cst_76 = arith.constant 3.000000e+00 : f32
    %209 = vector.broadcast %cst_76 : f32 to vector<8x128xf32>
    %210 = arith.mulf %209, %204 : vector<8x128xf32>
    %cst_77 = arith.constant 2.000000e+00 : f32
    %211 = vector.broadcast %cst_77 : f32 to vector<8x128xf32>
    %212 = arith.subf %210, %211 : vector<8x128xf32>
    %213 = arith.negf %212 : vector<8x128xf32>
    %214 = math.exp %213 : vector<8x128xf32>
    %cst_78 = arith.constant 1.000000e+00 : f32
    %215 = vector.broadcast %cst_78 : f32 to vector<8x128xf32>
    %216 = arith.addf %215, %214 : vector<8x128xf32>
    %217 = arith.divf %215, %216 : vector<8x128xf32>
    %cst_79 = arith.constant dense<0.000000e+00> : vector<8x128xf32>
    %218 = tpu.matmul %217, %0, %cst_79 {dimension_numbers = #tpu.dot_dimension_numbers<[1], [0], [0], [1], [0, 0, 1, 1], [], []>} : vector<8x128xf32>, vector<128x128xf32>, vector<8x128xf32> -> vector<8x128xf32>
    %219 = vector.broadcast %cst : f32 to vector<8x128xf32>
    %220 = arith.mulf %204, %219 : vector<8x128xf32>
    %221 = arith.index_cast %c9_i32 : i32 to index
    %c0_80 = arith.constant 0 : index
    %c0_81 = arith.constant 0 : index
    %222 = vector.load %arg1[%221, %c0_80, %c0_81] : memref<70x8x128xf32, #tpu.memory_space<vmem>>, vector<1x8x128xf32>
    %223 = vector.shape_cast %222 : vector<1x8x128xf32> to vector<8x128xf32>
    %224 = arith.addf %218, %223 : vector<8x128xf32>
    %225 = vector.broadcast %cst_3 : f32 to vector<8x128xf32>
    %226 = arith.mulf %224, %225 : vector<8x128xf32>
    %227 = arith.addf %220, %226 : vector<8x128xf32>
    %228 = arith.index_cast %c9_i32 : i32 to index
    %c0_82 = arith.constant 0 : index
    %c0_83 = arith.constant 0 : index
    %229 = vector.load %arg4[%228, %c0_82, %c0_83] : memref<70x8x128xf32, #tpu.memory_space<vmem>>, vector<1x8x128xf32>
    %230 = vector.shape_cast %229 : vector<1x8x128xf32> to vector<8x128xf32>
    %231 = vector.shape_cast %227 : vector<8x128xf32> to vector<1x8x128xf32>
    tpu.vector_store %arg4[%228, %c0_82, %c0_83], %231 {strides = array<i32>} : memref<70x8x128xf32, #tpu.memory_space<vmem>>, vector<1x8x128xf32>,
    %c10_i32 = arith.constant 10 : i32
    %cst_84 = arith.constant 3.000000e+00 : f32
    %232 = vector.broadcast %cst_84 : f32 to vector<8x128xf32>
    %233 = arith.mulf %232, %227 : vector<8x128xf32>
    %cst_85 = arith.constant 2.000000e+00 : f32
    %234 = vector.broadcast %cst_85 : f32 to vector<8x128xf32>
    %235 = arith.subf %233, %234 : vector<8x128xf32>
    %236 = arith.negf %235 : vector<8x128xf32>
    %237 = math.exp %236 : vector<8x128xf32>
    %cst_86 = arith.constant 1.000000e+00 : f32
    %238 = vector.broadcast %cst_86 : f32 to vector<8x128xf32>
    %239 = arith.addf %238, %237 : vector<8x128xf32>
    %240 = arith.divf %238, %239 : vector<8x128xf32>
    %cst_87 = arith.constant dense<0.000000e+00> : vector<8x128xf32>
    %241 = tpu.matmul %240, %0, %cst_87 {dimension_numbers = #tpu.dot_dimension_numbers<[1], [0], [0], [1], [0, 0, 1, 1], [], []>} : vector<8x128xf32>, vector<128x128xf32>, vector<8x128xf32> -> vector<8x128xf32>
    %242 = vector.broadcast %cst : f32 to vector<8x128xf32>
    %243 = arith.mulf %227, %242 : vector<8x128xf32>
    %244 = arith.index_cast %c10_i32 : i32 to index
    %c0_88 = arith.constant 0 : index
    %c0_89 = arith.constant 0 : index
    %245 = vector.load %arg1[%244, %c0_88, %c0_89] : memref<70x8x128xf32, #tpu.memory_space<vmem>>, vector<1x8x128xf32>
    %246 = vector.shape_cast %245 : vector<1x8x128xf32> to vector<8x128xf32>
    %247 = arith.addf %241, %246 : vector<8x128xf32>
    %248 = vector.broadcast %cst_3 : f32 to vector<8x128xf32>
    %249 = arith.mulf %247, %248 : vector<8x128xf32>
    %250 = arith.addf %243, %249 : vector<8x128xf32>
    %251 = arith.index_cast %c10_i32 : i32 to index
    %c0_90 = arith.constant 0 : index
    %c0_91 = arith.constant 0 : index
    %252 = vector.load %arg4[%251, %c0_90, %c0_91] : memref<70x8x128xf32, #tpu.memory_space<vmem>>, vector<1x8x128xf32>
    %253 = vector.shape_cast %252 : vector<1x8x128xf32> to vector<8x128xf32>
    %254 = vector.shape_cast %250 : vector<8x128xf32> to vector<1x8x128xf32>
    tpu.vector_store %arg4[%251, %c0_90, %c0_91], %254 {strides = array<i32>} : memref<70x8x128xf32, #tpu.memory_space<vmem>>, vector<1x8x128xf32>,
    %c11_i32 = arith.constant 11 : i32
    %cst_92 = arith.constant 3.000000e+00 : f32
    %255 = vector.broadcast %cst_92 : f32 to vector<8x128xf32>
    %256 = arith.mulf %255, %250 : vector<8x128xf32>
    %cst_93 = arith.constant 2.000000e+00 : f32
    %257 = vector.broadcast %cst_93 : f32 to vector<8x128xf32>
    %258 = arith.subf %256, %257 : vector<8x128xf32>
    %259 = arith.negf %258 : vector<8x128xf32>
    %260 = math.exp %259 : vector<8x128xf32>
    %cst_94 = arith.constant 1.000000e+00 : f32
    %261 = vector.broadcast %cst_94 : f32 to vector<8x128xf32>
    %262 = arith.addf %261, %260 : vector<8x128xf32>
    %263 = arith.divf %261, %262 : vector<8x128xf32>
    %cst_95 = arith.constant dense<0.000000e+00> : vector<8x128xf32>
    %264 = tpu.matmul %263, %0, %cst_95 {dimension_numbers = #tpu.dot_dimension_numbers<[1], [0], [0], [1], [0, 0, 1, 1], [], []>} : vector<8x128xf32>, vector<128x128xf32>, vector<8x128xf32> -> vector<8x128xf32>
    %265 = vector.broadcast %cst : f32 to vector<8x128xf32>
    %266 = arith.mulf %250, %265 : vector<8x128xf32>
    %267 = arith.index_cast %c11_i32 : i32 to index
    %c0_96 = arith.constant 0 : index
    %c0_97 = arith.constant 0 : index
    %268 = vector.load %arg1[%267, %c0_96, %c0_97] : memref<70x8x128xf32, #tpu.memory_space<vmem>>, vector<1x8x128xf32>
    %269 = vector.shape_cast %268 : vector<1x8x128xf32> to vector<8x128xf32>
    %270 = arith.addf %264, %269 : vector<8x128xf32>
    %271 = vector.broadcast %cst_3 : f32 to vector<8x128xf32>
    %272 = arith.mulf %270, %271 : vector<8x128xf32>
    %273 = arith.addf %266, %272 : vector<8x128xf32>
    %274 = arith.index_cast %c11_i32 : i32 to index
    %c0_98 = arith.constant 0 : index
    %c0_99 = arith.constant 0 : index
    %275 = vector.load %arg4[%274, %c0_98, %c0_99] : memref<70x8x128xf32, #tpu.memory_space<vmem>>, vector<1x8x128xf32>
    %276 = vector.shape_cast %275 : vector<1x8x128xf32> to vector<8x128xf32>
    %277 = vector.shape_cast %273 : vector<8x128xf32> to vector<1x8x128xf32>
    tpu.vector_store %arg4[%274, %c0_98, %c0_99], %277 {strides = array<i32>} : memref<70x8x128xf32, #tpu.memory_space<vmem>>, vector<1x8x128xf32>,
    %c12_i32 = arith.constant 12 : i32
    %cst_100 = arith.constant 3.000000e+00 : f32
    %278 = vector.broadcast %cst_100 : f32 to vector<8x128xf32>
    %279 = arith.mulf %278, %273 : vector<8x128xf32>
    %cst_101 = arith.constant 2.000000e+00 : f32
    %280 = vector.broadcast %cst_101 : f32 to vector<8x128xf32>
    %281 = arith.subf %279, %280 : vector<8x128xf32>
    %282 = arith.negf %281 : vector<8x128xf32>
    %283 = math.exp %282 : vector<8x128xf32>
    %cst_102 = arith.constant 1.000000e+00 : f32
    %284 = vector.broadcast %cst_102 : f32 to vector<8x128xf32>
    %285 = arith.addf %284, %283 : vector<8x128xf32>
    %286 = arith.divf %284, %285 : vector<8x128xf32>
    %cst_103 = arith.constant dense<0.000000e+00> : vector<8x128xf32>
    %287 = tpu.matmul %286, %0, %cst_103 {dimension_numbers = #tpu.dot_dimension_numbers<[1], [0], [0], [1], [0, 0, 1, 1], [], []>} : vector<8x128xf32>, vector<128x128xf32>, vector<8x128xf32> -> vector<8x128xf32>
    %288 = vector.broadcast %cst : f32 to vector<8x128xf32>
    %289 = arith.mulf %273, %288 : vector<8x128xf32>
    %290 = arith.index_cast %c12_i32 : i32 to index
    %c0_104 = arith.constant 0 : index
    %c0_105 = arith.constant 0 : index
    %291 = vector.load %arg1[%290, %c0_104, %c0_105] : memref<70x8x128xf32, #tpu.memory_space<vmem>>, vector<1x8x128xf32>
    %292 = vector.shape_cast %291 : vector<1x8x128xf32> to vector<8x128xf32>
    %293 = arith.addf %287, %292 : vector<8x128xf32>
    %294 = vector.broadcast %cst_3 : f32 to vector<8x128xf32>
    %295 = arith.mulf %293, %294 : vector<8x128xf32>
    %296 = arith.addf %289, %295 : vector<8x128xf32>
    %297 = arith.index_cast %c12_i32 : i32 to index
    %c0_106 = arith.constant 0 : index
    %c0_107 = arith.constant 0 : index
    %298 = vector.load %arg4[%297, %c0_106, %c0_107] : memref<70x8x128xf32, #tpu.memory_space<vmem>>, vector<1x8x128xf32>
    %299 = vector.shape_cast %298 : vector<1x8x128xf32> to vector<8x128xf32>
    %300 = vector.shape_cast %296 : vector<8x128xf32> to vector<1x8x128xf32>
    tpu.vector_store %arg4[%297, %c0_106, %c0_107], %300 {strides = array<i32>} : memref<70x8x128xf32, #tpu.memory_space<vmem>>, vector<1x8x128xf32>,
    %c13_i32 = arith.constant 13 : i32
    %cst_108 = arith.constant 3.000000e+00 : f32
    %301 = vector.broadcast %cst_108 : f32 to vector<8x128xf32>
    %302 = arith.mulf %301, %296 : vector<8x128xf32>
    %cst_109 = arith.constant 2.000000e+00 : f32
    %303 = vector.broadcast %cst_109 : f32 to vector<8x128xf32>
    %304 = arith.subf %302, %303 : vector<8x128xf32>
    %305 = arith.negf %304 : vector<8x128xf32>
    %306 = math.exp %305 : vector<8x128xf32>
    %cst_110 = arith.constant 1.000000e+00 : f32
    %307 = vector.broadcast %cst_110 : f32 to vector<8x128xf32>
    %308 = arith.addf %307, %306 : vector<8x128xf32>
    %309 = arith.divf %307, %308 : vector<8x128xf32>
    %cst_111 = arith.constant dense<0.000000e+00> : vector<8x128xf32>
    %310 = tpu.matmul %309, %0, %cst_111 {dimension_numbers = #tpu.dot_dimension_numbers<[1], [0], [0], [1], [0, 0, 1, 1], [], []>} : vector<8x128xf32>, vector<128x128xf32>, vector<8x128xf32> -> vector<8x128xf32>
    %311 = vector.broadcast %cst : f32 to vector<8x128xf32>
    %312 = arith.mulf %296, %311 : vector<8x128xf32>
    %313 = arith.index_cast %c13_i32 : i32 to index
    %c0_112 = arith.constant 0 : index
    %c0_113 = arith.constant 0 : index
    %314 = vector.load %arg1[%313, %c0_112, %c0_113] : memref<70x8x128xf32, #tpu.memory_space<vmem>>, vector<1x8x128xf32>
    %315 = vector.shape_cast %314 : vector<1x8x128xf32> to vector<8x128xf32>
    %316 = arith.addf %310, %315 : vector<8x128xf32>
    %317 = vector.broadcast %cst_3 : f32 to vector<8x128xf32>
    %318 = arith.mulf %316, %317 : vector<8x128xf32>
    %319 = arith.addf %312, %318 : vector<8x128xf32>
    %320 = arith.index_cast %c13_i32 : i32 to index
    %c0_114 = arith.constant 0 : index
    %c0_115 = arith.constant 0 : index
    %321 = vector.load %arg4[%320, %c0_114, %c0_115] : memref<70x8x128xf32, #tpu.memory_space<vmem>>, vector<1x8x128xf32>
    %322 = vector.shape_cast %321 : vector<1x8x128xf32> to vector<8x128xf32>
    %323 = vector.shape_cast %319 : vector<8x128xf32> to vector<1x8x128xf32>
    tpu.vector_store %arg4[%320, %c0_114, %c0_115], %323 {strides = array<i32>} : memref<70x8x128xf32, #tpu.memory_space<vmem>>, vector<1x8x128xf32>,
    %c14_i32 = arith.constant 14 : i32
    %cst_116 = arith.constant 3.000000e+00 : f32
    %324 = vector.broadcast %cst_116 : f32 to vector<8x128xf32>
    %325 = arith.mulf %324, %319 : vector<8x128xf32>
    %cst_117 = arith.constant 2.000000e+00 : f32
    %326 = vector.broadcast %cst_117 : f32 to vector<8x128xf32>
    %327 = arith.subf %325, %326 : vector<8x128xf32>
    %328 = arith.negf %327 : vector<8x128xf32>
    %329 = math.exp %328 : vector<8x128xf32>
    %cst_118 = arith.constant 1.000000e+00 : f32
    %330 = vector.broadcast %cst_118 : f32 to vector<8x128xf32>
    %331 = arith.addf %330, %329 : vector<8x128xf32>
    %332 = arith.divf %330, %331 : vector<8x128xf32>
    %cst_119 = arith.constant dense<0.000000e+00> : vector<8x128xf32>
    %333 = tpu.matmul %332, %0, %cst_119 {dimension_numbers = #tpu.dot_dimension_numbers<[1], [0], [0], [1], [0, 0, 1, 1], [], []>} : vector<8x128xf32>, vector<128x128xf32>, vector<8x128xf32> -> vector<8x128xf32>
    %334 = vector.broadcast %cst : f32 to vector<8x128xf32>
    %335 = arith.mulf %319, %334 : vector<8x128xf32>
    %336 = arith.index_cast %c14_i32 : i32 to index
    %c0_120 = arith.constant 0 : index
    %c0_121 = arith.constant 0 : index
    %337 = vector.load %arg1[%336, %c0_120, %c0_121] : memref<70x8x128xf32, #tpu.memory_space<vmem>>, vector<1x8x128xf32>
    %338 = vector.shape_cast %337 : vector<1x8x128xf32> to vector<8x128xf32>
    %339 = arith.addf %333, %338 : vector<8x128xf32>
    %340 = vector.broadcast %cst_3 : f32 to vector<8x128xf32>
    %341 = arith.mulf %339, %340 : vector<8x128xf32>
    %342 = arith.addf %335, %341 : vector<8x128xf32>
    %343 = arith.index_cast %c14_i32 : i32 to index
    %c0_122 = arith.constant 0 : index
    %c0_123 = arith.constant 0 : index
    %344 = vector.load %arg4[%343, %c0_122, %c0_123] : memref<70x8x128xf32, #tpu.memory_space<vmem>>, vector<1x8x128xf32>
    %345 = vector.shape_cast %344 : vector<1x8x128xf32> to vector<8x128xf32>
    %346 = vector.shape_cast %342 : vector<8x128xf32> to vector<1x8x128xf32>
    tpu.vector_store %arg4[%343, %c0_122, %c0_123], %346 {strides = array<i32>} : memref<70x8x128xf32, #tpu.memory_space<vmem>>, vector<1x8x128xf32>,
    %c15_i32 = arith.constant 15 : i32
    %cst_124 = arith.constant 3.000000e+00 : f32
    %347 = vector.broadcast %cst_124 : f32 to vector<8x128xf32>
    %348 = arith.mulf %347, %342 : vector<8x128xf32>
    %cst_125 = arith.constant 2.000000e+00 : f32
    %349 = vector.broadcast %cst_125 : f32 to vector<8x128xf32>
    %350 = arith.subf %348, %349 : vector<8x128xf32>
    %351 = arith.negf %350 : vector<8x128xf32>
    %352 = math.exp %351 : vector<8x128xf32>
    %cst_126 = arith.constant 1.000000e+00 : f32
    %353 = vector.broadcast %cst_126 : f32 to vector<8x128xf32>
    %354 = arith.addf %353, %352 : vector<8x128xf32>
    %355 = arith.divf %353, %354 : vector<8x128xf32>
    %cst_127 = arith.constant dense<0.000000e+00> : vector<8x128xf32>
    %356 = tpu.matmul %355, %0, %cst_127 {dimension_numbers = #tpu.dot_dimension_numbers<[1], [0], [0], [1], [0, 0, 1, 1], [], []>} : vector<8x128xf32>, vector<128x128xf32>, vector<8x128xf32> -> vector<8x128xf32>
    %357 = vector.broadcast %cst : f32 to vector<8x128xf32>
    %358 = arith.mulf %342, %357 : vector<8x128xf32>
    %359 = arith.index_cast %c15_i32 : i32 to index
    %c0_128 = arith.constant 0 : index
    %c0_129 = arith.constant 0 : index
    %360 = vector.load %arg1[%359, %c0_128, %c0_129] : memref<70x8x128xf32, #tpu.memory_space<vmem>>, vector<1x8x128xf32>
    %361 = vector.shape_cast %360 : vector<1x8x128xf32> to vector<8x128xf32>
    %362 = arith.addf %356, %361 : vector<8x128xf32>
    %363 = vector.broadcast %cst_3 : f32 to vector<8x128xf32>
    %364 = arith.mulf %362, %363 : vector<8x128xf32>
    %365 = arith.addf %358, %364 : vector<8x128xf32>
    %366 = arith.index_cast %c15_i32 : i32 to index
    %c0_130 = arith.constant 0 : index
    %c0_131 = arith.constant 0 : index
    %367 = vector.load %arg4[%366, %c0_130, %c0_131] : memref<70x8x128xf32, #tpu.memory_space<vmem>>, vector<1x8x128xf32>
    %368 = vector.shape_cast %367 : vector<1x8x128xf32> to vector<8x128xf32>
    %369 = vector.shape_cast %365 : vector<8x128xf32> to vector<1x8x128xf32>
    tpu.vector_store %arg4[%366, %c0_130, %c0_131], %369 {strides = array<i32>} : memref<70x8x128xf32, #tpu.memory_space<vmem>>, vector<1x8x128xf32>,
    %c16_i32 = arith.constant 16 : i32
    %cst_132 = arith.constant 3.000000e+00 : f32
    %370 = vector.broadcast %cst_132 : f32 to vector<8x128xf32>
    %371 = arith.mulf %370, %365 : vector<8x128xf32>
    %cst_133 = arith.constant 2.000000e+00 : f32
    %372 = vector.broadcast %cst_133 : f32 to vector<8x128xf32>
    %373 = arith.subf %371, %372 : vector<8x128xf32>
    %374 = arith.negf %373 : vector<8x128xf32>
    %375 = math.exp %374 : vector<8x128xf32>
    %cst_134 = arith.constant 1.000000e+00 : f32
    %376 = vector.broadcast %cst_134 : f32 to vector<8x128xf32>
    %377 = arith.addf %376, %375 : vector<8x128xf32>
    %378 = arith.divf %376, %377 : vector<8x128xf32>
    %cst_135 = arith.constant dense<0.000000e+00> : vector<8x128xf32>
    %379 = tpu.matmul %378, %0, %cst_135 {dimension_numbers = #tpu.dot_dimension_numbers<[1], [0], [0], [1], [0, 0, 1, 1], [], []>} : vector<8x128xf32>, vector<128x128xf32>, vector<8x128xf32> -> vector<8x128xf32>
    %380 = vector.broadcast %cst : f32 to vector<8x128xf32>
    %381 = arith.mulf %365, %380 : vector<8x128xf32>
    %382 = arith.index_cast %c16_i32 : i32 to index
    %c0_136 = arith.constant 0 : index
    %c0_137 = arith.constant 0 : index
    %383 = vector.load %arg1[%382, %c0_136, %c0_137] : memref<70x8x128xf32, #tpu.memory_space<vmem>>, vector<1x8x128xf32>
    %384 = vector.shape_cast %383 : vector<1x8x128xf32> to vector<8x128xf32>
    %385 = arith.addf %379, %384 : vector<8x128xf32>
    %386 = vector.broadcast %cst_3 : f32 to vector<8x128xf32>
    %387 = arith.mulf %385, %386 : vector<8x128xf32>
    %388 = arith.addf %381, %387 : vector<8x128xf32>
    %389 = arith.index_cast %c16_i32 : i32 to index
    %c0_138 = arith.constant 0 : index
    %c0_139 = arith.constant 0 : index
    %390 = vector.load %arg4[%389, %c0_138, %c0_139] : memref<70x8x128xf32, #tpu.memory_space<vmem>>, vector<1x8x128xf32>
    %391 = vector.shape_cast %390 : vector<1x8x128xf32> to vector<8x128xf32>
    %392 = vector.shape_cast %388 : vector<8x128xf32> to vector<1x8x128xf32>
    tpu.vector_store %arg4[%389, %c0_138, %c0_139], %392 {strides = array<i32>} : memref<70x8x128xf32, #tpu.memory_space<vmem>>, vector<1x8x128xf32>,
    %c17_i32 = arith.constant 17 : i32
    %cst_140 = arith.constant 3.000000e+00 : f32
    %393 = vector.broadcast %cst_140 : f32 to vector<8x128xf32>
    %394 = arith.mulf %393, %388 : vector<8x128xf32>
    %cst_141 = arith.constant 2.000000e+00 : f32
    %395 = vector.broadcast %cst_141 : f32 to vector<8x128xf32>
    %396 = arith.subf %394, %395 : vector<8x128xf32>
    %397 = arith.negf %396 : vector<8x128xf32>
    %398 = math.exp %397 : vector<8x128xf32>
    %cst_142 = arith.constant 1.000000e+00 : f32
    %399 = vector.broadcast %cst_142 : f32 to vector<8x128xf32>
    %400 = arith.addf %399, %398 : vector<8x128xf32>
    %401 = arith.divf %399, %400 : vector<8x128xf32>
    %cst_143 = arith.constant dense<0.000000e+00> : vector<8x128xf32>
    %402 = tpu.matmul %401, %0, %cst_143 {dimension_numbers = #tpu.dot_dimension_numbers<[1], [0], [0], [1], [0, 0, 1, 1], [], []>} : vector<8x128xf32>, vector<128x128xf32>, vector<8x128xf32> -> vector<8x128xf32>
    %403 = vector.broadcast %cst : f32 to vector<8x128xf32>
    %404 = arith.mulf %388, %403 : vector<8x128xf32>
    %405 = arith.index_cast %c17_i32 : i32 to index
    %c0_144 = arith.constant 0 : index
    %c0_145 = arith.constant 0 : index
    %406 = vector.load %arg1[%405, %c0_144, %c0_145] : memref<70x8x128xf32, #tpu.memory_space<vmem>>, vector<1x8x128xf32>
    %407 = vector.shape_cast %406 : vector<1x8x128xf32> to vector<8x128xf32>
    %408 = arith.addf %402, %407 : vector<8x128xf32>
    %409 = vector.broadcast %cst_3 : f32 to vector<8x128xf32>
    %410 = arith.mulf %408, %409 : vector<8x128xf32>
    %411 = arith.addf %404, %410 : vector<8x128xf32>
    %412 = arith.index_cast %c17_i32 : i32 to index
    %c0_146 = arith.constant 0 : index
    %c0_147 = arith.constant 0 : index
    %413 = vector.load %arg4[%412, %c0_146, %c0_147] : memref<70x8x128xf32, #tpu.memory_space<vmem>>, vector<1x8x128xf32>
    %414 = vector.shape_cast %413 : vector<1x8x128xf32> to vector<8x128xf32>
    %415 = vector.shape_cast %411 : vector<8x128xf32> to vector<1x8x128xf32>
    tpu.vector_store %arg4[%412, %c0_146, %c0_147], %415 {strides = array<i32>} : memref<70x8x128xf32, #tpu.memory_space<vmem>>, vector<1x8x128xf32>,
    %c18_i32 = arith.constant 18 : i32
    %cst_148 = arith.constant 3.000000e+00 : f32
    %416 = vector.broadcast %cst_148 : f32 to vector<8x128xf32>
    %417 = arith.mulf %416, %411 : vector<8x128xf32>
    %cst_149 = arith.constant 2.000000e+00 : f32
    %418 = vector.broadcast %cst_149 : f32 to vector<8x128xf32>
    %419 = arith.subf %417, %418 : vector<8x128xf32>
    %420 = arith.negf %419 : vector<8x128xf32>
    %421 = math.exp %420 : vector<8x128xf32>
    %cst_150 = arith.constant 1.000000e+00 : f32
    %422 = vector.broadcast %cst_150 : f32 to vector<8x128xf32>
    %423 = arith.addf %422, %421 : vector<8x128xf32>
    %424 = arith.divf %422, %423 : vector<8x128xf32>
    %cst_151 = arith.constant dense<0.000000e+00> : vector<8x128xf32>
    %425 = tpu.matmul %424, %0, %cst_151 {dimension_numbers = #tpu.dot_dimension_numbers<[1], [0], [0], [1], [0, 0, 1, 1], [], []>} : vector<8x128xf32>, vector<128x128xf32>, vector<8x128xf32> -> vector<8x128xf32>
    %426 = vector.broadcast %cst : f32 to vector<8x128xf32>
    %427 = arith.mulf %411, %426 : vector<8x128xf32>
    %428 = arith.index_cast %c18_i32 : i32 to index
    %c0_152 = arith.constant 0 : index
    %c0_153 = arith.constant 0 : index
    %429 = vector.load %arg1[%428, %c0_152, %c0_153] : memref<70x8x128xf32, #tpu.memory_space<vmem>>, vector<1x8x128xf32>
    %430 = vector.shape_cast %429 : vector<1x8x128xf32> to vector<8x128xf32>
    %431 = arith.addf %425, %430 : vector<8x128xf32>
    %432 = vector.broadcast %cst_3 : f32 to vector<8x128xf32>
    %433 = arith.mulf %431, %432 : vector<8x128xf32>
    %434 = arith.addf %427, %433 : vector<8x128xf32>
    %435 = arith.index_cast %c18_i32 : i32 to index
    %c0_154 = arith.constant 0 : index
    %c0_155 = arith.constant 0 : index
    %436 = vector.load %arg4[%435, %c0_154, %c0_155] : memref<70x8x128xf32, #tpu.memory_space<vmem>>, vector<1x8x128xf32>
    %437 = vector.shape_cast %436 : vector<1x8x128xf32> to vector<8x128xf32>
    %438 = vector.shape_cast %434 : vector<8x128xf32> to vector<1x8x128xf32>
    tpu.vector_store %arg4[%435, %c0_154, %c0_155], %438 {strides = array<i32>} : memref<70x8x128xf32, #tpu.memory_space<vmem>>, vector<1x8x128xf32>,
    %c19_i32 = arith.constant 19 : i32
    %cst_156 = arith.constant 3.000000e+00 : f32
    %439 = vector.broadcast %cst_156 : f32 to vector<8x128xf32>
    %440 = arith.mulf %439, %434 : vector<8x128xf32>
    %cst_157 = arith.constant 2.000000e+00 : f32
    %441 = vector.broadcast %cst_157 : f32 to vector<8x128xf32>
    %442 = arith.subf %440, %441 : vector<8x128xf32>
    %443 = arith.negf %442 : vector<8x128xf32>
    %444 = math.exp %443 : vector<8x128xf32>
    %cst_158 = arith.constant 1.000000e+00 : f32
    %445 = vector.broadcast %cst_158 : f32 to vector<8x128xf32>
    %446 = arith.addf %445, %444 : vector<8x128xf32>
    %447 = arith.divf %445, %446 : vector<8x128xf32>
    %cst_159 = arith.constant dense<0.000000e+00> : vector<8x128xf32>
    %448 = tpu.matmul %447, %0, %cst_159 {dimension_numbers = #tpu.dot_dimension_numbers<[1], [0], [0], [1], [0, 0, 1, 1], [], []>} : vector<8x128xf32>, vector<128x128xf32>, vector<8x128xf32> -> vector<8x128xf32>
    %449 = vector.broadcast %cst : f32 to vector<8x128xf32>
    %450 = arith.mulf %434, %449 : vector<8x128xf32>
    %451 = arith.index_cast %c19_i32 : i32 to index
    %c0_160 = arith.constant 0 : index
    %c0_161 = arith.constant 0 : index
    %452 = vector.load %arg1[%451, %c0_160, %c0_161] : memref<70x8x128xf32, #tpu.memory_space<vmem>>, vector<1x8x128xf32>
    %453 = vector.shape_cast %452 : vector<1x8x128xf32> to vector<8x128xf32>
    %454 = arith.addf %448, %453 : vector<8x128xf32>
    %455 = vector.broadcast %cst_3 : f32 to vector<8x128xf32>
    %456 = arith.mulf %454, %455 : vector<8x128xf32>
    %457 = arith.addf %450, %456 : vector<8x128xf32>
    %458 = arith.index_cast %c19_i32 : i32 to index
    %c0_162 = arith.constant 0 : index
    %c0_163 = arith.constant 0 : index
    %459 = vector.load %arg4[%458, %c0_162, %c0_163] : memref<70x8x128xf32, #tpu.memory_space<vmem>>, vector<1x8x128xf32>
    %460 = vector.shape_cast %459 : vector<1x8x128xf32> to vector<8x128xf32>
    %461 = vector.shape_cast %457 : vector<8x128xf32> to vector<1x8x128xf32>
    tpu.vector_store %arg4[%458, %c0_162, %c0_163], %461 {strides = array<i32>} : memref<70x8x128xf32, #tpu.memory_space<vmem>>, vector<1x8x128xf32>,
    %c20_i32 = arith.constant 20 : i32
    %cst_164 = arith.constant 3.000000e+00 : f32
    %462 = vector.broadcast %cst_164 : f32 to vector<8x128xf32>
    %463 = arith.mulf %462, %457 : vector<8x128xf32>
    %cst_165 = arith.constant 2.000000e+00 : f32
    %464 = vector.broadcast %cst_165 : f32 to vector<8x128xf32>
    %465 = arith.subf %463, %464 : vector<8x128xf32>
    %466 = arith.negf %465 : vector<8x128xf32>
    %467 = math.exp %466 : vector<8x128xf32>
    %cst_166 = arith.constant 1.000000e+00 : f32
    %468 = vector.broadcast %cst_166 : f32 to vector<8x128xf32>
    %469 = arith.addf %468, %467 : vector<8x128xf32>
    %470 = arith.divf %468, %469 : vector<8x128xf32>
    %cst_167 = arith.constant dense<0.000000e+00> : vector<8x128xf32>
    %471 = tpu.matmul %470, %0, %cst_167 {dimension_numbers = #tpu.dot_dimension_numbers<[1], [0], [0], [1], [0, 0, 1, 1], [], []>} : vector<8x128xf32>, vector<128x128xf32>, vector<8x128xf32> -> vector<8x128xf32>
    %472 = vector.broadcast %cst : f32 to vector<8x128xf32>
    %473 = arith.mulf %457, %472 : vector<8x128xf32>
    %474 = arith.index_cast %c20_i32 : i32 to index
    %c0_168 = arith.constant 0 : index
    %c0_169 = arith.constant 0 : index
    %475 = vector.load %arg1[%474, %c0_168, %c0_169] : memref<70x8x128xf32, #tpu.memory_space<vmem>>, vector<1x8x128xf32>
    %476 = vector.shape_cast %475 : vector<1x8x128xf32> to vector<8x128xf32>
    %477 = arith.addf %471, %476 : vector<8x128xf32>
    %478 = vector.broadcast %cst_3 : f32 to vector<8x128xf32>
    %479 = arith.mulf %477, %478 : vector<8x128xf32>
    %480 = arith.addf %473, %479 : vector<8x128xf32>
    %481 = arith.index_cast %c20_i32 : i32 to index
    %c0_170 = arith.constant 0 : index
    %c0_171 = arith.constant 0 : index
    %482 = vector.load %arg4[%481, %c0_170, %c0_171] : memref<70x8x128xf32, #tpu.memory_space<vmem>>, vector<1x8x128xf32>
    %483 = vector.shape_cast %482 : vector<1x8x128xf32> to vector<8x128xf32>
    %484 = vector.shape_cast %480 : vector<8x128xf32> to vector<1x8x128xf32>
    tpu.vector_store %arg4[%481, %c0_170, %c0_171], %484 {strides = array<i32>} : memref<70x8x128xf32, #tpu.memory_space<vmem>>, vector<1x8x128xf32>,
    %c21_i32 = arith.constant 21 : i32
    %cst_172 = arith.constant 3.000000e+00 : f32
    %485 = vector.broadcast %cst_172 : f32 to vector<8x128xf32>
    %486 = arith.mulf %485, %480 : vector<8x128xf32>
    %cst_173 = arith.constant 2.000000e+00 : f32
    %487 = vector.broadcast %cst_173 : f32 to vector<8x128xf32>
    %488 = arith.subf %486, %487 : vector<8x128xf32>
    %489 = arith.negf %488 : vector<8x128xf32>
    %490 = math.exp %489 : vector<8x128xf32>
    %cst_174 = arith.constant 1.000000e+00 : f32
    %491 = vector.broadcast %cst_174 : f32 to vector<8x128xf32>
    %492 = arith.addf %491, %490 : vector<8x128xf32>
    %493 = arith.divf %491, %492 : vector<8x128xf32>
    %cst_175 = arith.constant dense<0.000000e+00> : vector<8x128xf32>
    %494 = tpu.matmul %493, %0, %cst_175 {dimension_numbers = #tpu.dot_dimension_numbers<[1], [0], [0], [1], [0, 0, 1, 1], [], []>} : vector<8x128xf32>, vector<128x128xf32>, vector<8x128xf32> -> vector<8x128xf32>
    %495 = vector.broadcast %cst : f32 to vector<8x128xf32>
    %496 = arith.mulf %480, %495 : vector<8x128xf32>
    %497 = arith.index_cast %c21_i32 : i32 to index
    %c0_176 = arith.constant 0 : index
    %c0_177 = arith.constant 0 : index
    %498 = vector.load %arg1[%497, %c0_176, %c0_177] : memref<70x8x128xf32, #tpu.memory_space<vmem>>, vector<1x8x128xf32>
    %499 = vector.shape_cast %498 : vector<1x8x128xf32> to vector<8x128xf32>
    %500 = arith.addf %494, %499 : vector<8x128xf32>
    %501 = vector.broadcast %cst_3 : f32 to vector<8x128xf32>
    %502 = arith.mulf %500, %501 : vector<8x128xf32>
    %503 = arith.addf %496, %502 : vector<8x128xf32>
    %504 = arith.index_cast %c21_i32 : i32 to index
    %c0_178 = arith.constant 0 : index
    %c0_179 = arith.constant 0 : index
    %505 = vector.load %arg4[%504, %c0_178, %c0_179] : memref<70x8x128xf32, #tpu.memory_space<vmem>>, vector<1x8x128xf32>
    %506 = vector.shape_cast %505 : vector<1x8x128xf32> to vector<8x128xf32>
    %507 = vector.shape_cast %503 : vector<8x128xf32> to vector<1x8x128xf32>
    tpu.vector_store %arg4[%504, %c0_178, %c0_179], %507 {strides = array<i32>} : memref<70x8x128xf32, #tpu.memory_space<vmem>>, vector<1x8x128xf32>,
    %c22_i32 = arith.constant 22 : i32
    %cst_180 = arith.constant 3.000000e+00 : f32
    %508 = vector.broadcast %cst_180 : f32 to vector<8x128xf32>
    %509 = arith.mulf %508, %503 : vector<8x128xf32>
    %cst_181 = arith.constant 2.000000e+00 : f32
    %510 = vector.broadcast %cst_181 : f32 to vector<8x128xf32>
    %511 = arith.subf %509, %510 : vector<8x128xf32>
    %512 = arith.negf %511 : vector<8x128xf32>
    %513 = math.exp %512 : vector<8x128xf32>
    %cst_182 = arith.constant 1.000000e+00 : f32
    %514 = vector.broadcast %cst_182 : f32 to vector<8x128xf32>
    %515 = arith.addf %514, %513 : vector<8x128xf32>
    %516 = arith.divf %514, %515 : vector<8x128xf32>
    %cst_183 = arith.constant dense<0.000000e+00> : vector<8x128xf32>
    %517 = tpu.matmul %516, %0, %cst_183 {dimension_numbers = #tpu.dot_dimension_numbers<[1], [0], [0], [1], [0, 0, 1, 1], [], []>} : vector<8x128xf32>, vector<128x128xf32>, vector<8x128xf32> -> vector<8x128xf32>
    %518 = vector.broadcast %cst : f32 to vector<8x128xf32>
    %519 = arith.mulf %503, %518 : vector<8x128xf32>
    %520 = arith.index_cast %c22_i32 : i32 to index
    %c0_184 = arith.constant 0 : index
    %c0_185 = arith.constant 0 : index
    %521 = vector.load %arg1[%520, %c0_184, %c0_185] : memref<70x8x128xf32, #tpu.memory_space<vmem>>, vector<1x8x128xf32>
    %522 = vector.shape_cast %521 : vector<1x8x128xf32> to vector<8x128xf32>
    %523 = arith.addf %517, %522 : vector<8x128xf32>
    %524 = vector.broadcast %cst_3 : f32 to vector<8x128xf32>
    %525 = arith.mulf %523, %524 : vector<8x128xf32>
    %526 = arith.addf %519, %525 : vector<8x128xf32>
    %527 = arith.index_cast %c22_i32 : i32 to index
    %c0_186 = arith.constant 0 : index
    %c0_187 = arith.constant 0 : index
    %528 = vector.load %arg4[%527, %c0_186, %c0_187] : memref<70x8x128xf32, #tpu.memory_space<vmem>>, vector<1x8x128xf32>
    %529 = vector.shape_cast %528 : vector<1x8x128xf32> to vector<8x128xf32>
    %530 = vector.shape_cast %526 : vector<8x128xf32> to vector<1x8x128xf32>
    tpu.vector_store %arg4[%527, %c0_186, %c0_187], %530 {strides = array<i32>} : memref<70x8x128xf32, #tpu.memory_space<vmem>>, vector<1x8x128xf32>,
    %c23_i32 = arith.constant 23 : i32
    %cst_188 = arith.constant 3.000000e+00 : f32
    %531 = vector.broadcast %cst_188 : f32 to vector<8x128xf32>
    %532 = arith.mulf %531, %526 : vector<8x128xf32>
    %cst_189 = arith.constant 2.000000e+00 : f32
    %533 = vector.broadcast %cst_189 : f32 to vector<8x128xf32>
    %534 = arith.subf %532, %533 : vector<8x128xf32>
    %535 = arith.negf %534 : vector<8x128xf32>
    %536 = math.exp %535 : vector<8x128xf32>
    %cst_190 = arith.constant 1.000000e+00 : f32
    %537 = vector.broadcast %cst_190 : f32 to vector<8x128xf32>
    %538 = arith.addf %537, %536 : vector<8x128xf32>
    %539 = arith.divf %537, %538 : vector<8x128xf32>
    %cst_191 = arith.constant dense<0.000000e+00> : vector<8x128xf32>
    %540 = tpu.matmul %539, %0, %cst_191 {dimension_numbers = #tpu.dot_dimension_numbers<[1], [0], [0], [1], [0, 0, 1, 1], [], []>} : vector<8x128xf32>, vector<128x128xf32>, vector<8x128xf32> -> vector<8x128xf32>
    %541 = vector.broadcast %cst : f32 to vector<8x128xf32>
    %542 = arith.mulf %526, %541 : vector<8x128xf32>
    %543 = arith.index_cast %c23_i32 : i32 to index
    %c0_192 = arith.constant 0 : index
    %c0_193 = arith.constant 0 : index
    %544 = vector.load %arg1[%543, %c0_192, %c0_193] : memref<70x8x128xf32, #tpu.memory_space<vmem>>, vector<1x8x128xf32>
    %545 = vector.shape_cast %544 : vector<1x8x128xf32> to vector<8x128xf32>
    %546 = arith.addf %540, %545 : vector<8x128xf32>
    %547 = vector.broadcast %cst_3 : f32 to vector<8x128xf32>
    %548 = arith.mulf %546, %547 : vector<8x128xf32>
    %549 = arith.addf %542, %548 : vector<8x128xf32>
    %550 = arith.index_cast %c23_i32 : i32 to index
    %c0_194 = arith.constant 0 : index
    %c0_195 = arith.constant 0 : index
    %551 = vector.load %arg4[%550, %c0_194, %c0_195] : memref<70x8x128xf32, #tpu.memory_space<vmem>>, vector<1x8x128xf32>
    %552 = vector.shape_cast %551 : vector<1x8x128xf32> to vector<8x128xf32>
    %553 = vector.shape_cast %549 : vector<8x128xf32> to vector<1x8x128xf32>
    tpu.vector_store %arg4[%550, %c0_194, %c0_195], %553 {strides = array<i32>} : memref<70x8x128xf32, #tpu.memory_space<vmem>>, vector<1x8x128xf32>,
    %c24_i32 = arith.constant 24 : i32
    %cst_196 = arith.constant 3.000000e+00 : f32
    %554 = vector.broadcast %cst_196 : f32 to vector<8x128xf32>
    %555 = arith.mulf %554, %549 : vector<8x128xf32>
    %cst_197 = arith.constant 2.000000e+00 : f32
    %556 = vector.broadcast %cst_197 : f32 to vector<8x128xf32>
    %557 = arith.subf %555, %556 : vector<8x128xf32>
    %558 = arith.negf %557 : vector<8x128xf32>
    %559 = math.exp %558 : vector<8x128xf32>
    %cst_198 = arith.constant 1.000000e+00 : f32
    %560 = vector.broadcast %cst_198 : f32 to vector<8x128xf32>
    %561 = arith.addf %560, %559 : vector<8x128xf32>
    %562 = arith.divf %560, %561 : vector<8x128xf32>
    %cst_199 = arith.constant dense<0.000000e+00> : vector<8x128xf32>
    %563 = tpu.matmul %562, %0, %cst_199 {dimension_numbers = #tpu.dot_dimension_numbers<[1], [0], [0], [1], [0, 0, 1, 1], [], []>} : vector<8x128xf32>, vector<128x128xf32>, vector<8x128xf32> -> vector<8x128xf32>
    %564 = vector.broadcast %cst : f32 to vector<8x128xf32>
    %565 = arith.mulf %549, %564 : vector<8x128xf32>
    %566 = arith.index_cast %c24_i32 : i32 to index
    %c0_200 = arith.constant 0 : index
    %c0_201 = arith.constant 0 : index
    %567 = vector.load %arg1[%566, %c0_200, %c0_201] : memref<70x8x128xf32, #tpu.memory_space<vmem>>, vector<1x8x128xf32>
    %568 = vector.shape_cast %567 : vector<1x8x128xf32> to vector<8x128xf32>
    %569 = arith.addf %563, %568 : vector<8x128xf32>
    %570 = vector.broadcast %cst_3 : f32 to vector<8x128xf32>
    %571 = arith.mulf %569, %570 : vector<8x128xf32>
    %572 = arith.addf %565, %571 : vector<8x128xf32>
    %573 = arith.index_cast %c24_i32 : i32 to index
    %c0_202 = arith.constant 0 : index
    %c0_203 = arith.constant 0 : index
    %574 = vector.load %arg4[%573, %c0_202, %c0_203] : memref<70x8x128xf32, #tpu.memory_space<vmem>>, vector<1x8x128xf32>
    %575 = vector.shape_cast %574 : vector<1x8x128xf32> to vector<8x128xf32>
    %576 = vector.shape_cast %572 : vector<8x128xf32> to vector<1x8x128xf32>
    tpu.vector_store %arg4[%573, %c0_202, %c0_203], %576 {strides = array<i32>} : memref<70x8x128xf32, #tpu.memory_space<vmem>>, vector<1x8x128xf32>,
    %c25_i32 = arith.constant 25 : i32
    %cst_204 = arith.constant 3.000000e+00 : f32
    %577 = vector.broadcast %cst_204 : f32 to vector<8x128xf32>
    %578 = arith.mulf %577, %572 : vector<8x128xf32>
    %cst_205 = arith.constant 2.000000e+00 : f32
    %579 = vector.broadcast %cst_205 : f32 to vector<8x128xf32>
    %580 = arith.subf %578, %579 : vector<8x128xf32>
    %581 = arith.negf %580 : vector<8x128xf32>
    %582 = math.exp %581 : vector<8x128xf32>
    %cst_206 = arith.constant 1.000000e+00 : f32
    %583 = vector.broadcast %cst_206 : f32 to vector<8x128xf32>
    %584 = arith.addf %583, %582 : vector<8x128xf32>
    %585 = arith.divf %583, %584 : vector<8x128xf32>
    %cst_207 = arith.constant dense<0.000000e+00> : vector<8x128xf32>
    %586 = tpu.matmul %585, %0, %cst_207 {dimension_numbers = #tpu.dot_dimension_numbers<[1], [0], [0], [1], [0, 0, 1, 1], [], []>} : vector<8x128xf32>, vector<128x128xf32>, vector<8x128xf32> -> vector<8x128xf32>
    %587 = vector.broadcast %cst : f32 to vector<8x128xf32>
    %588 = arith.mulf %572, %587 : vector<8x128xf32>
    %589 = arith.index_cast %c25_i32 : i32 to index
    %c0_208 = arith.constant 0 : index
    %c0_209 = arith.constant 0 : index
    %590 = vector.load %arg1[%589, %c0_208, %c0_209] : memref<70x8x128xf32, #tpu.memory_space<vmem>>, vector<1x8x128xf32>
    %591 = vector.shape_cast %590 : vector<1x8x128xf32> to vector<8x128xf32>
    %592 = arith.addf %586, %591 : vector<8x128xf32>
    %593 = vector.broadcast %cst_3 : f32 to vector<8x128xf32>
    %594 = arith.mulf %592, %593 : vector<8x128xf32>
    %595 = arith.addf %588, %594 : vector<8x128xf32>
    %596 = arith.index_cast %c25_i32 : i32 to index
    %c0_210 = arith.constant 0 : index
    %c0_211 = arith.constant 0 : index
    %597 = vector.load %arg4[%596, %c0_210, %c0_211] : memref<70x8x128xf32, #tpu.memory_space<vmem>>, vector<1x8x128xf32>
    %598 = vector.shape_cast %597 : vector<1x8x128xf32> to vector<8x128xf32>
    %599 = vector.shape_cast %595 : vector<8x128xf32> to vector<1x8x128xf32>
    tpu.vector_store %arg4[%596, %c0_210, %c0_211], %599 {strides = array<i32>} : memref<70x8x128xf32, #tpu.memory_space<vmem>>, vector<1x8x128xf32>,
    %c26_i32 = arith.constant 26 : i32
    %cst_212 = arith.constant 3.000000e+00 : f32
    %600 = vector.broadcast %cst_212 : f32 to vector<8x128xf32>
    %601 = arith.mulf %600, %595 : vector<8x128xf32>
    %cst_213 = arith.constant 2.000000e+00 : f32
    %602 = vector.broadcast %cst_213 : f32 to vector<8x128xf32>
    %603 = arith.subf %601, %602 : vector<8x128xf32>
    %604 = arith.negf %603 : vector<8x128xf32>
    %605 = math.exp %604 : vector<8x128xf32>
    %cst_214 = arith.constant 1.000000e+00 : f32
    %606 = vector.broadcast %cst_214 : f32 to vector<8x128xf32>
    %607 = arith.addf %606, %605 : vector<8x128xf32>
    %608 = arith.divf %606, %607 : vector<8x128xf32>
    %cst_215 = arith.constant dense<0.000000e+00> : vector<8x128xf32>
    %609 = tpu.matmul %608, %0, %cst_215 {dimension_numbers = #tpu.dot_dimension_numbers<[1], [0], [0], [1], [0, 0, 1, 1], [], []>} : vector<8x128xf32>, vector<128x128xf32>, vector<8x128xf32> -> vector<8x128xf32>
    %610 = vector.broadcast %cst : f32 to vector<8x128xf32>
    %611 = arith.mulf %595, %610 : vector<8x128xf32>
    %612 = arith.index_cast %c26_i32 : i32 to index
    %c0_216 = arith.constant 0 : index
    %c0_217 = arith.constant 0 : index
    %613 = vector.load %arg1[%612, %c0_216, %c0_217] : memref<70x8x128xf32, #tpu.memory_space<vmem>>, vector<1x8x128xf32>
    %614 = vector.shape_cast %613 : vector<1x8x128xf32> to vector<8x128xf32>
    %615 = arith.addf %609, %614 : vector<8x128xf32>
    %616 = vector.broadcast %cst_3 : f32 to vector<8x128xf32>
    %617 = arith.mulf %615, %616 : vector<8x128xf32>
    %618 = arith.addf %611, %617 : vector<8x128xf32>
    %619 = arith.index_cast %c26_i32 : i32 to index
    %c0_218 = arith.constant 0 : index
    %c0_219 = arith.constant 0 : index
    %620 = vector.load %arg4[%619, %c0_218, %c0_219] : memref<70x8x128xf32, #tpu.memory_space<vmem>>, vector<1x8x128xf32>
    %621 = vector.shape_cast %620 : vector<1x8x128xf32> to vector<8x128xf32>
    %622 = vector.shape_cast %618 : vector<8x128xf32> to vector<1x8x128xf32>
    tpu.vector_store %arg4[%619, %c0_218, %c0_219], %622 {strides = array<i32>} : memref<70x8x128xf32, #tpu.memory_space<vmem>>, vector<1x8x128xf32>,
    %c27_i32 = arith.constant 27 : i32
    %cst_220 = arith.constant 3.000000e+00 : f32
    %623 = vector.broadcast %cst_220 : f32 to vector<8x128xf32>
    %624 = arith.mulf %623, %618 : vector<8x128xf32>
    %cst_221 = arith.constant 2.000000e+00 : f32
    %625 = vector.broadcast %cst_221 : f32 to vector<8x128xf32>
    %626 = arith.subf %624, %625 : vector<8x128xf32>
    %627 = arith.negf %626 : vector<8x128xf32>
    %628 = math.exp %627 : vector<8x128xf32>
    %cst_222 = arith.constant 1.000000e+00 : f32
    %629 = vector.broadcast %cst_222 : f32 to vector<8x128xf32>
    %630 = arith.addf %629, %628 : vector<8x128xf32>
    %631 = arith.divf %629, %630 : vector<8x128xf32>
    %cst_223 = arith.constant dense<0.000000e+00> : vector<8x128xf32>
    %632 = tpu.matmul %631, %0, %cst_223 {dimension_numbers = #tpu.dot_dimension_numbers<[1], [0], [0], [1], [0, 0, 1, 1], [], []>} : vector<8x128xf32>, vector<128x128xf32>, vector<8x128xf32> -> vector<8x128xf32>
    %633 = vector.broadcast %cst : f32 to vector<8x128xf32>
    %634 = arith.mulf %618, %633 : vector<8x128xf32>
    %635 = arith.index_cast %c27_i32 : i32 to index
    %c0_224 = arith.constant 0 : index
    %c0_225 = arith.constant 0 : index
    %636 = vector.load %arg1[%635, %c0_224, %c0_225] : memref<70x8x128xf32, #tpu.memory_space<vmem>>, vector<1x8x128xf32>
    %637 = vector.shape_cast %636 : vector<1x8x128xf32> to vector<8x128xf32>
    %638 = arith.addf %632, %637 : vector<8x128xf32>
    %639 = vector.broadcast %cst_3 : f32 to vector<8x128xf32>
    %640 = arith.mulf %638, %639 : vector<8x128xf32>
    %641 = arith.addf %634, %640 : vector<8x128xf32>
    %642 = arith.index_cast %c27_i32 : i32 to index
    %c0_226 = arith.constant 0 : index
    %c0_227 = arith.constant 0 : index
    %643 = vector.load %arg4[%642, %c0_226, %c0_227] : memref<70x8x128xf32, #tpu.memory_space<vmem>>, vector<1x8x128xf32>
    %644 = vector.shape_cast %643 : vector<1x8x128xf32> to vector<8x128xf32>
    %645 = vector.shape_cast %641 : vector<8x128xf32> to vector<1x8x128xf32>
    tpu.vector_store %arg4[%642, %c0_226, %c0_227], %645 {strides = array<i32>} : memref<70x8x128xf32, #tpu.memory_space<vmem>>, vector<1x8x128xf32>,
    %c28_i32 = arith.constant 28 : i32
    %cst_228 = arith.constant 3.000000e+00 : f32
    %646 = vector.broadcast %cst_228 : f32 to vector<8x128xf32>
    %647 = arith.mulf %646, %641 : vector<8x128xf32>
    %cst_229 = arith.constant 2.000000e+00 : f32
    %648 = vector.broadcast %cst_229 : f32 to vector<8x128xf32>
    %649 = arith.subf %647, %648 : vector<8x128xf32>
    %650 = arith.negf %649 : vector<8x128xf32>
    %651 = math.exp %650 : vector<8x128xf32>
    %cst_230 = arith.constant 1.000000e+00 : f32
    %652 = vector.broadcast %cst_230 : f32 to vector<8x128xf32>
    %653 = arith.addf %652, %651 : vector<8x128xf32>
    %654 = arith.divf %652, %653 : vector<8x128xf32>
    %cst_231 = arith.constant dense<0.000000e+00> : vector<8x128xf32>
    %655 = tpu.matmul %654, %0, %cst_231 {dimension_numbers = #tpu.dot_dimension_numbers<[1], [0], [0], [1], [0, 0, 1, 1], [], []>} : vector<8x128xf32>, vector<128x128xf32>, vector<8x128xf32> -> vector<8x128xf32>
    %656 = vector.broadcast %cst : f32 to vector<8x128xf32>
    %657 = arith.mulf %641, %656 : vector<8x128xf32>
    %658 = arith.index_cast %c28_i32 : i32 to index
    %c0_232 = arith.constant 0 : index
    %c0_233 = arith.constant 0 : index
    %659 = vector.load %arg1[%658, %c0_232, %c0_233] : memref<70x8x128xf32, #tpu.memory_space<vmem>>, vector<1x8x128xf32>
    %660 = vector.shape_cast %659 : vector<1x8x128xf32> to vector<8x128xf32>
    %661 = arith.addf %655, %660 : vector<8x128xf32>
    %662 = vector.broadcast %cst_3 : f32 to vector<8x128xf32>
    %663 = arith.mulf %661, %662 : vector<8x128xf32>
    %664 = arith.addf %657, %663 : vector<8x128xf32>
    %665 = arith.index_cast %c28_i32 : i32 to index
    %c0_234 = arith.constant 0 : index
    %c0_235 = arith.constant 0 : index
    %666 = vector.load %arg4[%665, %c0_234, %c0_235] : memref<70x8x128xf32, #tpu.memory_space<vmem>>, vector<1x8x128xf32>
    %667 = vector.shape_cast %666 : vector<1x8x128xf32> to vector<8x128xf32>
    %668 = vector.shape_cast %664 : vector<8x128xf32> to vector<1x8x128xf32>
    tpu.vector_store %arg4[%665, %c0_234, %c0_235], %668 {strides = array<i32>} : memref<70x8x128xf32, #tpu.memory_space<vmem>>, vector<1x8x128xf32>,
    %c29_i32 = arith.constant 29 : i32
    %cst_236 = arith.constant 3.000000e+00 : f32
    %669 = vector.broadcast %cst_236 : f32 to vector<8x128xf32>
    %670 = arith.mulf %669, %664 : vector<8x128xf32>
    %cst_237 = arith.constant 2.000000e+00 : f32
    %671 = vector.broadcast %cst_237 : f32 to vector<8x128xf32>
    %672 = arith.subf %670, %671 : vector<8x128xf32>
    %673 = arith.negf %672 : vector<8x128xf32>
    %674 = math.exp %673 : vector<8x128xf32>
    %cst_238 = arith.constant 1.000000e+00 : f32
    %675 = vector.broadcast %cst_238 : f32 to vector<8x128xf32>
    %676 = arith.addf %675, %674 : vector<8x128xf32>
    %677 = arith.divf %675, %676 : vector<8x128xf32>
    %cst_239 = arith.constant dense<0.000000e+00> : vector<8x128xf32>
    %678 = tpu.matmul %677, %0, %cst_239 {dimension_numbers = #tpu.dot_dimension_numbers<[1], [0], [0], [1], [0, 0, 1, 1], [], []>} : vector<8x128xf32>, vector<128x128xf32>, vector<8x128xf32> -> vector<8x128xf32>
    %679 = vector.broadcast %cst : f32 to vector<8x128xf32>
    %680 = arith.mulf %664, %679 : vector<8x128xf32>
    %681 = arith.index_cast %c29_i32 : i32 to index
    %c0_240 = arith.constant 0 : index
    %c0_241 = arith.constant 0 : index
    %682 = vector.load %arg1[%681, %c0_240, %c0_241] : memref<70x8x128xf32, #tpu.memory_space<vmem>>, vector<1x8x128xf32>
    %683 = vector.shape_cast %682 : vector<1x8x128xf32> to vector<8x128xf32>
    %684 = arith.addf %678, %683 : vector<8x128xf32>
    %685 = vector.broadcast %cst_3 : f32 to vector<8x128xf32>
    %686 = arith.mulf %684, %685 : vector<8x128xf32>
    %687 = arith.addf %680, %686 : vector<8x128xf32>
    %688 = arith.index_cast %c29_i32 : i32 to index
    %c0_242 = arith.constant 0 : index
    %c0_243 = arith.constant 0 : index
    %689 = vector.load %arg4[%688, %c0_242, %c0_243] : memref<70x8x128xf32, #tpu.memory_space<vmem>>, vector<1x8x128xf32>
    %690 = vector.shape_cast %689 : vector<1x8x128xf32> to vector<8x128xf32>
    %691 = vector.shape_cast %687 : vector<8x128xf32> to vector<1x8x128xf32>
    tpu.vector_store %arg4[%688, %c0_242, %c0_243], %691 {strides = array<i32>} : memref<70x8x128xf32, #tpu.memory_space<vmem>>, vector<1x8x128xf32>,
    %c30_i32 = arith.constant 30 : i32
    %cst_244 = arith.constant 3.000000e+00 : f32
    %692 = vector.broadcast %cst_244 : f32 to vector<8x128xf32>
    %693 = arith.mulf %692, %687 : vector<8x128xf32>
    %cst_245 = arith.constant 2.000000e+00 : f32
    %694 = vector.broadcast %cst_245 : f32 to vector<8x128xf32>
    %695 = arith.subf %693, %694 : vector<8x128xf32>
    %696 = arith.negf %695 : vector<8x128xf32>
    %697 = math.exp %696 : vector<8x128xf32>
    %cst_246 = arith.constant 1.000000e+00 : f32
    %698 = vector.broadcast %cst_246 : f32 to vector<8x128xf32>
    %699 = arith.addf %698, %697 : vector<8x128xf32>
    %700 = arith.divf %698, %699 : vector<8x128xf32>
    %cst_247 = arith.constant dense<0.000000e+00> : vector<8x128xf32>
    %701 = tpu.matmul %700, %0, %cst_247 {dimension_numbers = #tpu.dot_dimension_numbers<[1], [0], [0], [1], [0, 0, 1, 1], [], []>} : vector<8x128xf32>, vector<128x128xf32>, vector<8x128xf32> -> vector<8x128xf32>
    %702 = vector.broadcast %cst : f32 to vector<8x128xf32>
    %703 = arith.mulf %687, %702 : vector<8x128xf32>
    %704 = arith.index_cast %c30_i32 : i32 to index
    %c0_248 = arith.constant 0 : index
    %c0_249 = arith.constant 0 : index
    %705 = vector.load %arg1[%704, %c0_248, %c0_249] : memref<70x8x128xf32, #tpu.memory_space<vmem>>, vector<1x8x128xf32>
    %706 = vector.shape_cast %705 : vector<1x8x128xf32> to vector<8x128xf32>
    %707 = arith.addf %701, %706 : vector<8x128xf32>
    %708 = vector.broadcast %cst_3 : f32 to vector<8x128xf32>
    %709 = arith.mulf %707, %708 : vector<8x128xf32>
    %710 = arith.addf %703, %709 : vector<8x128xf32>
    %711 = arith.index_cast %c30_i32 : i32 to index
    %c0_250 = arith.constant 0 : index
    %c0_251 = arith.constant 0 : index
    %712 = vector.load %arg4[%711, %c0_250, %c0_251] : memref<70x8x128xf32, #tpu.memory_space<vmem>>, vector<1x8x128xf32>
    %713 = vector.shape_cast %712 : vector<1x8x128xf32> to vector<8x128xf32>
    %714 = vector.shape_cast %710 : vector<8x128xf32> to vector<1x8x128xf32>
    tpu.vector_store %arg4[%711, %c0_250, %c0_251], %714 {strides = array<i32>} : memref<70x8x128xf32, #tpu.memory_space<vmem>>, vector<1x8x128xf32>,
    %c31_i32 = arith.constant 31 : i32
    %cst_252 = arith.constant 3.000000e+00 : f32
    %715 = vector.broadcast %cst_252 : f32 to vector<8x128xf32>
    %716 = arith.mulf %715, %710 : vector<8x128xf32>
    %cst_253 = arith.constant 2.000000e+00 : f32
    %717 = vector.broadcast %cst_253 : f32 to vector<8x128xf32>
    %718 = arith.subf %716, %717 : vector<8x128xf32>
    %719 = arith.negf %718 : vector<8x128xf32>
    %720 = math.exp %719 : vector<8x128xf32>
    %cst_254 = arith.constant 1.000000e+00 : f32
    %721 = vector.broadcast %cst_254 : f32 to vector<8x128xf32>
    %722 = arith.addf %721, %720 : vector<8x128xf32>
    %723 = arith.divf %721, %722 : vector<8x128xf32>
    %cst_255 = arith.constant dense<0.000000e+00> : vector<8x128xf32>
    %724 = tpu.matmul %723, %0, %cst_255 {dimension_numbers = #tpu.dot_dimension_numbers<[1], [0], [0], [1], [0, 0, 1, 1], [], []>} : vector<8x128xf32>, vector<128x128xf32>, vector<8x128xf32> -> vector<8x128xf32>
    %725 = vector.broadcast %cst : f32 to vector<8x128xf32>
    %726 = arith.mulf %710, %725 : vector<8x128xf32>
    %727 = arith.index_cast %c31_i32 : i32 to index
    %c0_256 = arith.constant 0 : index
    %c0_257 = arith.constant 0 : index
    %728 = vector.load %arg1[%727, %c0_256, %c0_257] : memref<70x8x128xf32, #tpu.memory_space<vmem>>, vector<1x8x128xf32>
    %729 = vector.shape_cast %728 : vector<1x8x128xf32> to vector<8x128xf32>
    %730 = arith.addf %724, %729 : vector<8x128xf32>
    %731 = vector.broadcast %cst_3 : f32 to vector<8x128xf32>
    %732 = arith.mulf %730, %731 : vector<8x128xf32>
    %733 = arith.addf %726, %732 : vector<8x128xf32>
    %734 = arith.index_cast %c31_i32 : i32 to index
    %c0_258 = arith.constant 0 : index
    %c0_259 = arith.constant 0 : index
    %735 = vector.load %arg4[%734, %c0_258, %c0_259] : memref<70x8x128xf32, #tpu.memory_space<vmem>>, vector<1x8x128xf32>
    %736 = vector.shape_cast %735 : vector<1x8x128xf32> to vector<8x128xf32>
    %737 = vector.shape_cast %733 : vector<8x128xf32> to vector<1x8x128xf32>
    tpu.vector_store %arg4[%734, %c0_258, %c0_259], %737 {strides = array<i32>} : memref<70x8x128xf32, #tpu.memory_space<vmem>>, vector<1x8x128xf32>,
    %c32_i32 = arith.constant 32 : i32
    %cst_260 = arith.constant 3.000000e+00 : f32
    %738 = vector.broadcast %cst_260 : f32 to vector<8x128xf32>
    %739 = arith.mulf %738, %733 : vector<8x128xf32>
    %cst_261 = arith.constant 2.000000e+00 : f32
    %740 = vector.broadcast %cst_261 : f32 to vector<8x128xf32>
    %741 = arith.subf %739, %740 : vector<8x128xf32>
    %742 = arith.negf %741 : vector<8x128xf32>
    %743 = math.exp %742 : vector<8x128xf32>
    %cst_262 = arith.constant 1.000000e+00 : f32
    %744 = vector.broadcast %cst_262 : f32 to vector<8x128xf32>
    %745 = arith.addf %744, %743 : vector<8x128xf32>
    %746 = arith.divf %744, %745 : vector<8x128xf32>
    %cst_263 = arith.constant dense<0.000000e+00> : vector<8x128xf32>
    %747 = tpu.matmul %746, %0, %cst_263 {dimension_numbers = #tpu.dot_dimension_numbers<[1], [0], [0], [1], [0, 0, 1, 1], [], []>} : vector<8x128xf32>, vector<128x128xf32>, vector<8x128xf32> -> vector<8x128xf32>
    %748 = vector.broadcast %cst : f32 to vector<8x128xf32>
    %749 = arith.mulf %733, %748 : vector<8x128xf32>
    %750 = arith.index_cast %c32_i32 : i32 to index
    %c0_264 = arith.constant 0 : index
    %c0_265 = arith.constant 0 : index
    %751 = vector.load %arg1[%750, %c0_264, %c0_265] : memref<70x8x128xf32, #tpu.memory_space<vmem>>, vector<1x8x128xf32>
    %752 = vector.shape_cast %751 : vector<1x8x128xf32> to vector<8x128xf32>
    %753 = arith.addf %747, %752 : vector<8x128xf32>
    %754 = vector.broadcast %cst_3 : f32 to vector<8x128xf32>
    %755 = arith.mulf %753, %754 : vector<8x128xf32>
    %756 = arith.addf %749, %755 : vector<8x128xf32>
    %757 = arith.index_cast %c32_i32 : i32 to index
    %c0_266 = arith.constant 0 : index
    %c0_267 = arith.constant 0 : index
    %758 = vector.load %arg4[%757, %c0_266, %c0_267] : memref<70x8x128xf32, #tpu.memory_space<vmem>>, vector<1x8x128xf32>
    %759 = vector.shape_cast %758 : vector<1x8x128xf32> to vector<8x128xf32>
    %760 = vector.shape_cast %756 : vector<8x128xf32> to vector<1x8x128xf32>
    tpu.vector_store %arg4[%757, %c0_266, %c0_267], %760 {strides = array<i32>} : memref<70x8x128xf32, #tpu.memory_space<vmem>>, vector<1x8x128xf32>,
    %c33_i32 = arith.constant 33 : i32
    %cst_268 = arith.constant 3.000000e+00 : f32
    %761 = vector.broadcast %cst_268 : f32 to vector<8x128xf32>
    %762 = arith.mulf %761, %756 : vector<8x128xf32>
    %cst_269 = arith.constant 2.000000e+00 : f32
    %763 = vector.broadcast %cst_269 : f32 to vector<8x128xf32>
    %764 = arith.subf %762, %763 : vector<8x128xf32>
    %765 = arith.negf %764 : vector<8x128xf32>
    %766 = math.exp %765 : vector<8x128xf32>
    %cst_270 = arith.constant 1.000000e+00 : f32
    %767 = vector.broadcast %cst_270 : f32 to vector<8x128xf32>
    %768 = arith.addf %767, %766 : vector<8x128xf32>
    %769 = arith.divf %767, %768 : vector<8x128xf32>
    %cst_271 = arith.constant dense<0.000000e+00> : vector<8x128xf32>
    %770 = tpu.matmul %769, %0, %cst_271 {dimension_numbers = #tpu.dot_dimension_numbers<[1], [0], [0], [1], [0, 0, 1, 1], [], []>} : vector<8x128xf32>, vector<128x128xf32>, vector<8x128xf32> -> vector<8x128xf32>
    %771 = vector.broadcast %cst : f32 to vector<8x128xf32>
    %772 = arith.mulf %756, %771 : vector<8x128xf32>
    %773 = arith.index_cast %c33_i32 : i32 to index
    %c0_272 = arith.constant 0 : index
    %c0_273 = arith.constant 0 : index
    %774 = vector.load %arg1[%773, %c0_272, %c0_273] : memref<70x8x128xf32, #tpu.memory_space<vmem>>, vector<1x8x128xf32>
    %775 = vector.shape_cast %774 : vector<1x8x128xf32> to vector<8x128xf32>
    %776 = arith.addf %770, %775 : vector<8x128xf32>
    %777 = vector.broadcast %cst_3 : f32 to vector<8x128xf32>
    %778 = arith.mulf %776, %777 : vector<8x128xf32>
    %779 = arith.addf %772, %778 : vector<8x128xf32>
    %780 = arith.index_cast %c33_i32 : i32 to index
    %c0_274 = arith.constant 0 : index
    %c0_275 = arith.constant 0 : index
    %781 = vector.load %arg4[%780, %c0_274, %c0_275] : memref<70x8x128xf32, #tpu.memory_space<vmem>>, vector<1x8x128xf32>
    %782 = vector.shape_cast %781 : vector<1x8x128xf32> to vector<8x128xf32>
    %783 = vector.shape_cast %779 : vector<8x128xf32> to vector<1x8x128xf32>
    tpu.vector_store %arg4[%780, %c0_274, %c0_275], %783 {strides = array<i32>} : memref<70x8x128xf32, #tpu.memory_space<vmem>>, vector<1x8x128xf32>,
    %c34_i32 = arith.constant 34 : i32
    %cst_276 = arith.constant 3.000000e+00 : f32
    %784 = vector.broadcast %cst_276 : f32 to vector<8x128xf32>
    %785 = arith.mulf %784, %779 : vector<8x128xf32>
    %cst_277 = arith.constant 2.000000e+00 : f32
    %786 = vector.broadcast %cst_277 : f32 to vector<8x128xf32>
    %787 = arith.subf %785, %786 : vector<8x128xf32>
    %788 = arith.negf %787 : vector<8x128xf32>
    %789 = math.exp %788 : vector<8x128xf32>
    %cst_278 = arith.constant 1.000000e+00 : f32
    %790 = vector.broadcast %cst_278 : f32 to vector<8x128xf32>
    %791 = arith.addf %790, %789 : vector<8x128xf32>
    %792 = arith.divf %790, %791 : vector<8x128xf32>
    %cst_279 = arith.constant dense<0.000000e+00> : vector<8x128xf32>
    %793 = tpu.matmul %792, %0, %cst_279 {dimension_numbers = #tpu.dot_dimension_numbers<[1], [0], [0], [1], [0, 0, 1, 1], [], []>} : vector<8x128xf32>, vector<128x128xf32>, vector<8x128xf32> -> vector<8x128xf32>
    %794 = vector.broadcast %cst : f32 to vector<8x128xf32>
    %795 = arith.mulf %779, %794 : vector<8x128xf32>
    %796 = arith.index_cast %c34_i32 : i32 to index
    %c0_280 = arith.constant 0 : index
    %c0_281 = arith.constant 0 : index
    %797 = vector.load %arg1[%796, %c0_280, %c0_281] : memref<70x8x128xf32, #tpu.memory_space<vmem>>, vector<1x8x128xf32>
    %798 = vector.shape_cast %797 : vector<1x8x128xf32> to vector<8x128xf32>
    %799 = arith.addf %793, %798 : vector<8x128xf32>
    %800 = vector.broadcast %cst_3 : f32 to vector<8x128xf32>
    %801 = arith.mulf %799, %800 : vector<8x128xf32>
    %802 = arith.addf %795, %801 : vector<8x128xf32>
    %803 = arith.index_cast %c34_i32 : i32 to index
    %c0_282 = arith.constant 0 : index
    %c0_283 = arith.constant 0 : index
    %804 = vector.load %arg4[%803, %c0_282, %c0_283] : memref<70x8x128xf32, #tpu.memory_space<vmem>>, vector<1x8x128xf32>
    %805 = vector.shape_cast %804 : vector<1x8x128xf32> to vector<8x128xf32>
    %806 = vector.shape_cast %802 : vector<8x128xf32> to vector<1x8x128xf32>
    tpu.vector_store %arg4[%803, %c0_282, %c0_283], %806 {strides = array<i32>} : memref<70x8x128xf32, #tpu.memory_space<vmem>>, vector<1x8x128xf32>,
    %c35_i32 = arith.constant 35 : i32
    %cst_284 = arith.constant 3.000000e+00 : f32
    %807 = vector.broadcast %cst_284 : f32 to vector<8x128xf32>
    %808 = arith.mulf %807, %802 : vector<8x128xf32>
    %cst_285 = arith.constant 2.000000e+00 : f32
    %809 = vector.broadcast %cst_285 : f32 to vector<8x128xf32>
    %810 = arith.subf %808, %809 : vector<8x128xf32>
    %811 = arith.negf %810 : vector<8x128xf32>
    %812 = math.exp %811 : vector<8x128xf32>
    %cst_286 = arith.constant 1.000000e+00 : f32
    %813 = vector.broadcast %cst_286 : f32 to vector<8x128xf32>
    %814 = arith.addf %813, %812 : vector<8x128xf32>
    %815 = arith.divf %813, %814 : vector<8x128xf32>
    %cst_287 = arith.constant dense<0.000000e+00> : vector<8x128xf32>
    %816 = tpu.matmul %815, %0, %cst_287 {dimension_numbers = #tpu.dot_dimension_numbers<[1], [0], [0], [1], [0, 0, 1, 1], [], []>} : vector<8x128xf32>, vector<128x128xf32>, vector<8x128xf32> -> vector<8x128xf32>
    %817 = vector.broadcast %cst : f32 to vector<8x128xf32>
    %818 = arith.mulf %802, %817 : vector<8x128xf32>
    %819 = arith.index_cast %c35_i32 : i32 to index
    %c0_288 = arith.constant 0 : index
    %c0_289 = arith.constant 0 : index
    %820 = vector.load %arg1[%819, %c0_288, %c0_289] : memref<70x8x128xf32, #tpu.memory_space<vmem>>, vector<1x8x128xf32>
    %821 = vector.shape_cast %820 : vector<1x8x128xf32> to vector<8x128xf32>
    %822 = arith.addf %816, %821 : vector<8x128xf32>
    %823 = vector.broadcast %cst_3 : f32 to vector<8x128xf32>
    %824 = arith.mulf %822, %823 : vector<8x128xf32>
    %825 = arith.addf %818, %824 : vector<8x128xf32>
    %826 = arith.index_cast %c35_i32 : i32 to index
    %c0_290 = arith.constant 0 : index
    %c0_291 = arith.constant 0 : index
    %827 = vector.load %arg4[%826, %c0_290, %c0_291] : memref<70x8x128xf32, #tpu.memory_space<vmem>>, vector<1x8x128xf32>
    %828 = vector.shape_cast %827 : vector<1x8x128xf32> to vector<8x128xf32>
    %829 = vector.shape_cast %825 : vector<8x128xf32> to vector<1x8x128xf32>
    tpu.vector_store %arg4[%826, %c0_290, %c0_291], %829 {strides = array<i32>} : memref<70x8x128xf32, #tpu.memory_space<vmem>>, vector<1x8x128xf32>,
    %c36_i32 = arith.constant 36 : i32
    %cst_292 = arith.constant 3.000000e+00 : f32
    %830 = vector.broadcast %cst_292 : f32 to vector<8x128xf32>
    %831 = arith.mulf %830, %825 : vector<8x128xf32>
    %cst_293 = arith.constant 2.000000e+00 : f32
    %832 = vector.broadcast %cst_293 : f32 to vector<8x128xf32>
    %833 = arith.subf %831, %832 : vector<8x128xf32>
    %834 = arith.negf %833 : vector<8x128xf32>
    %835 = math.exp %834 : vector<8x128xf32>
    %cst_294 = arith.constant 1.000000e+00 : f32
    %836 = vector.broadcast %cst_294 : f32 to vector<8x128xf32>
    %837 = arith.addf %836, %835 : vector<8x128xf32>
    %838 = arith.divf %836, %837 : vector<8x128xf32>
    %cst_295 = arith.constant dense<0.000000e+00> : vector<8x128xf32>
    %839 = tpu.matmul %838, %0, %cst_295 {dimension_numbers = #tpu.dot_dimension_numbers<[1], [0], [0], [1], [0, 0, 1, 1], [], []>} : vector<8x128xf32>, vector<128x128xf32>, vector<8x128xf32> -> vector<8x128xf32>
    %840 = vector.broadcast %cst : f32 to vector<8x128xf32>
    %841 = arith.mulf %825, %840 : vector<8x128xf32>
    %842 = arith.index_cast %c36_i32 : i32 to index
    %c0_296 = arith.constant 0 : index
    %c0_297 = arith.constant 0 : index
    %843 = vector.load %arg1[%842, %c0_296, %c0_297] : memref<70x8x128xf32, #tpu.memory_space<vmem>>, vector<1x8x128xf32>
    %844 = vector.shape_cast %843 : vector<1x8x128xf32> to vector<8x128xf32>
    %845 = arith.addf %839, %844 : vector<8x128xf32>
    %846 = vector.broadcast %cst_3 : f32 to vector<8x128xf32>
    %847 = arith.mulf %845, %846 : vector<8x128xf32>
    %848 = arith.addf %841, %847 : vector<8x128xf32>
    %849 = arith.index_cast %c36_i32 : i32 to index
    %c0_298 = arith.constant 0 : index
    %c0_299 = arith.constant 0 : index
    %850 = vector.load %arg4[%849, %c0_298, %c0_299] : memref<70x8x128xf32, #tpu.memory_space<vmem>>, vector<1x8x128xf32>
    %851 = vector.shape_cast %850 : vector<1x8x128xf32> to vector<8x128xf32>
    %852 = vector.shape_cast %848 : vector<8x128xf32> to vector<1x8x128xf32>
    tpu.vector_store %arg4[%849, %c0_298, %c0_299], %852 {strides = array<i32>} : memref<70x8x128xf32, #tpu.memory_space<vmem>>, vector<1x8x128xf32>,
    %c37_i32 = arith.constant 37 : i32
    %cst_300 = arith.constant 3.000000e+00 : f32
    %853 = vector.broadcast %cst_300 : f32 to vector<8x128xf32>
    %854 = arith.mulf %853, %848 : vector<8x128xf32>
    %cst_301 = arith.constant 2.000000e+00 : f32
    %855 = vector.broadcast %cst_301 : f32 to vector<8x128xf32>
    %856 = arith.subf %854, %855 : vector<8x128xf32>
    %857 = arith.negf %856 : vector<8x128xf32>
    %858 = math.exp %857 : vector<8x128xf32>
    %cst_302 = arith.constant 1.000000e+00 : f32
    %859 = vector.broadcast %cst_302 : f32 to vector<8x128xf32>
    %860 = arith.addf %859, %858 : vector<8x128xf32>
    %861 = arith.divf %859, %860 : vector<8x128xf32>
    %cst_303 = arith.constant dense<0.000000e+00> : vector<8x128xf32>
    %862 = tpu.matmul %861, %0, %cst_303 {dimension_numbers = #tpu.dot_dimension_numbers<[1], [0], [0], [1], [0, 0, 1, 1], [], []>} : vector<8x128xf32>, vector<128x128xf32>, vector<8x128xf32> -> vector<8x128xf32>
    %863 = vector.broadcast %cst : f32 to vector<8x128xf32>
    %864 = arith.mulf %848, %863 : vector<8x128xf32>
    %865 = arith.index_cast %c37_i32 : i32 to index
    %c0_304 = arith.constant 0 : index
    %c0_305 = arith.constant 0 : index
    %866 = vector.load %arg1[%865, %c0_304, %c0_305] : memref<70x8x128xf32, #tpu.memory_space<vmem>>, vector<1x8x128xf32>
    %867 = vector.shape_cast %866 : vector<1x8x128xf32> to vector<8x128xf32>
    %868 = arith.addf %862, %867 : vector<8x128xf32>
    %869 = vector.broadcast %cst_3 : f32 to vector<8x128xf32>
    %870 = arith.mulf %868, %869 : vector<8x128xf32>
    %871 = arith.addf %864, %870 : vector<8x128xf32>
    %872 = arith.index_cast %c37_i32 : i32 to index
    %c0_306 = arith.constant 0 : index
    %c0_307 = arith.constant 0 : index
    %873 = vector.load %arg4[%872, %c0_306, %c0_307] : memref<70x8x128xf32, #tpu.memory_space<vmem>>, vector<1x8x128xf32>
    %874 = vector.shape_cast %873 : vector<1x8x128xf32> to vector<8x128xf32>
    %875 = vector.shape_cast %871 : vector<8x128xf32> to vector<1x8x128xf32>
    tpu.vector_store %arg4[%872, %c0_306, %c0_307], %875 {strides = array<i32>} : memref<70x8x128xf32, #tpu.memory_space<vmem>>, vector<1x8x128xf32>,
    %c38_i32 = arith.constant 38 : i32
    %cst_308 = arith.constant 3.000000e+00 : f32
    %876 = vector.broadcast %cst_308 : f32 to vector<8x128xf32>
    %877 = arith.mulf %876, %871 : vector<8x128xf32>
    %cst_309 = arith.constant 2.000000e+00 : f32
    %878 = vector.broadcast %cst_309 : f32 to vector<8x128xf32>
    %879 = arith.subf %877, %878 : vector<8x128xf32>
    %880 = arith.negf %879 : vector<8x128xf32>
    %881 = math.exp %880 : vector<8x128xf32>
    %cst_310 = arith.constant 1.000000e+00 : f32
    %882 = vector.broadcast %cst_310 : f32 to vector<8x128xf32>
    %883 = arith.addf %882, %881 : vector<8x128xf32>
    %884 = arith.divf %882, %883 : vector<8x128xf32>
    %cst_311 = arith.constant dense<0.000000e+00> : vector<8x128xf32>
    %885 = tpu.matmul %884, %0, %cst_311 {dimension_numbers = #tpu.dot_dimension_numbers<[1], [0], [0], [1], [0, 0, 1, 1], [], []>} : vector<8x128xf32>, vector<128x128xf32>, vector<8x128xf32> -> vector<8x128xf32>
    %886 = vector.broadcast %cst : f32 to vector<8x128xf32>
    %887 = arith.mulf %871, %886 : vector<8x128xf32>
    %888 = arith.index_cast %c38_i32 : i32 to index
    %c0_312 = arith.constant 0 : index
    %c0_313 = arith.constant 0 : index
    %889 = vector.load %arg1[%888, %c0_312, %c0_313] : memref<70x8x128xf32, #tpu.memory_space<vmem>>, vector<1x8x128xf32>
    %890 = vector.shape_cast %889 : vector<1x8x128xf32> to vector<8x128xf32>
    %891 = arith.addf %885, %890 : vector<8x128xf32>
    %892 = vector.broadcast %cst_3 : f32 to vector<8x128xf32>
    %893 = arith.mulf %891, %892 : vector<8x128xf32>
    %894 = arith.addf %887, %893 : vector<8x128xf32>
    %895 = arith.index_cast %c38_i32 : i32 to index
    %c0_314 = arith.constant 0 : index
    %c0_315 = arith.constant 0 : index
    %896 = vector.load %arg4[%895, %c0_314, %c0_315] : memref<70x8x128xf32, #tpu.memory_space<vmem>>, vector<1x8x128xf32>
    %897 = vector.shape_cast %896 : vector<1x8x128xf32> to vector<8x128xf32>
    %898 = vector.shape_cast %894 : vector<8x128xf32> to vector<1x8x128xf32>
    tpu.vector_store %arg4[%895, %c0_314, %c0_315], %898 {strides = array<i32>} : memref<70x8x128xf32, #tpu.memory_space<vmem>>, vector<1x8x128xf32>,
    %c39_i32 = arith.constant 39 : i32
    %cst_316 = arith.constant 3.000000e+00 : f32
    %899 = vector.broadcast %cst_316 : f32 to vector<8x128xf32>
    %900 = arith.mulf %899, %894 : vector<8x128xf32>
    %cst_317 = arith.constant 2.000000e+00 : f32
    %901 = vector.broadcast %cst_317 : f32 to vector<8x128xf32>
    %902 = arith.subf %900, %901 : vector<8x128xf32>
    %903 = arith.negf %902 : vector<8x128xf32>
    %904 = math.exp %903 : vector<8x128xf32>
    %cst_318 = arith.constant 1.000000e+00 : f32
    %905 = vector.broadcast %cst_318 : f32 to vector<8x128xf32>
    %906 = arith.addf %905, %904 : vector<8x128xf32>
    %907 = arith.divf %905, %906 : vector<8x128xf32>
    %cst_319 = arith.constant dense<0.000000e+00> : vector<8x128xf32>
    %908 = tpu.matmul %907, %0, %cst_319 {dimension_numbers = #tpu.dot_dimension_numbers<[1], [0], [0], [1], [0, 0, 1, 1], [], []>} : vector<8x128xf32>, vector<128x128xf32>, vector<8x128xf32> -> vector<8x128xf32>
    %909 = vector.broadcast %cst : f32 to vector<8x128xf32>
    %910 = arith.mulf %894, %909 : vector<8x128xf32>
    %911 = arith.index_cast %c39_i32 : i32 to index
    %c0_320 = arith.constant 0 : index
    %c0_321 = arith.constant 0 : index
    %912 = vector.load %arg1[%911, %c0_320, %c0_321] : memref<70x8x128xf32, #tpu.memory_space<vmem>>, vector<1x8x128xf32>
    %913 = vector.shape_cast %912 : vector<1x8x128xf32> to vector<8x128xf32>
    %914 = arith.addf %908, %913 : vector<8x128xf32>
    %915 = vector.broadcast %cst_3 : f32 to vector<8x128xf32>
    %916 = arith.mulf %914, %915 : vector<8x128xf32>
    %917 = arith.addf %910, %916 : vector<8x128xf32>
    %918 = arith.index_cast %c39_i32 : i32 to index
    %c0_322 = arith.constant 0 : index
    %c0_323 = arith.constant 0 : index
    %919 = vector.load %arg4[%918, %c0_322, %c0_323] : memref<70x8x128xf32, #tpu.memory_space<vmem>>, vector<1x8x128xf32>
    %920 = vector.shape_cast %919 : vector<1x8x128xf32> to vector<8x128xf32>
    %921 = vector.shape_cast %917 : vector<8x128xf32> to vector<1x8x128xf32>
    tpu.vector_store %arg4[%918, %c0_322, %c0_323], %921 {strides = array<i32>} : memref<70x8x128xf32, #tpu.memory_space<vmem>>, vector<1x8x128xf32>,
    %c40_i32 = arith.constant 40 : i32
    %cst_324 = arith.constant 3.000000e+00 : f32
    %922 = vector.broadcast %cst_324 : f32 to vector<8x128xf32>
    %923 = arith.mulf %922, %917 : vector<8x128xf32>
    %cst_325 = arith.constant 2.000000e+00 : f32
    %924 = vector.broadcast %cst_325 : f32 to vector<8x128xf32>
    %925 = arith.subf %923, %924 : vector<8x128xf32>
    %926 = arith.negf %925 : vector<8x128xf32>
    %927 = math.exp %926 : vector<8x128xf32>
    %cst_326 = arith.constant 1.000000e+00 : f32
    %928 = vector.broadcast %cst_326 : f32 to vector<8x128xf32>
    %929 = arith.addf %928, %927 : vector<8x128xf32>
    %930 = arith.divf %928, %929 : vector<8x128xf32>
    %cst_327 = arith.constant dense<0.000000e+00> : vector<8x128xf32>
    %931 = tpu.matmul %930, %0, %cst_327 {dimension_numbers = #tpu.dot_dimension_numbers<[1], [0], [0], [1], [0, 0, 1, 1], [], []>} : vector<8x128xf32>, vector<128x128xf32>, vector<8x128xf32> -> vector<8x128xf32>
    %932 = vector.broadcast %cst : f32 to vector<8x128xf32>
    %933 = arith.mulf %917, %932 : vector<8x128xf32>
    %934 = arith.index_cast %c40_i32 : i32 to index
    %c0_328 = arith.constant 0 : index
    %c0_329 = arith.constant 0 : index
    %935 = vector.load %arg1[%934, %c0_328, %c0_329] : memref<70x8x128xf32, #tpu.memory_space<vmem>>, vector<1x8x128xf32>
    %936 = vector.shape_cast %935 : vector<1x8x128xf32> to vector<8x128xf32>
    %937 = arith.addf %931, %936 : vector<8x128xf32>
    %938 = vector.broadcast %cst_3 : f32 to vector<8x128xf32>
    %939 = arith.mulf %937, %938 : vector<8x128xf32>
    %940 = arith.addf %933, %939 : vector<8x128xf32>
    %941 = arith.index_cast %c40_i32 : i32 to index
    %c0_330 = arith.constant 0 : index
    %c0_331 = arith.constant 0 : index
    %942 = vector.load %arg4[%941, %c0_330, %c0_331] : memref<70x8x128xf32, #tpu.memory_space<vmem>>, vector<1x8x128xf32>
    %943 = vector.shape_cast %942 : vector<1x8x128xf32> to vector<8x128xf32>
    %944 = vector.shape_cast %940 : vector<8x128xf32> to vector<1x8x128xf32>
    tpu.vector_store %arg4[%941, %c0_330, %c0_331], %944 {strides = array<i32>} : memref<70x8x128xf32, #tpu.memory_space<vmem>>, vector<1x8x128xf32>,
    %c41_i32 = arith.constant 41 : i32
    %cst_332 = arith.constant 3.000000e+00 : f32
    %945 = vector.broadcast %cst_332 : f32 to vector<8x128xf32>
    %946 = arith.mulf %945, %940 : vector<8x128xf32>
    %cst_333 = arith.constant 2.000000e+00 : f32
    %947 = vector.broadcast %cst_333 : f32 to vector<8x128xf32>
    %948 = arith.subf %946, %947 : vector<8x128xf32>
    %949 = arith.negf %948 : vector<8x128xf32>
    %950 = math.exp %949 : vector<8x128xf32>
    %cst_334 = arith.constant 1.000000e+00 : f32
    %951 = vector.broadcast %cst_334 : f32 to vector<8x128xf32>
    %952 = arith.addf %951, %950 : vector<8x128xf32>
    %953 = arith.divf %951, %952 : vector<8x128xf32>
    %cst_335 = arith.constant dense<0.000000e+00> : vector<8x128xf32>
    %954 = tpu.matmul %953, %0, %cst_335 {dimension_numbers = #tpu.dot_dimension_numbers<[1], [0], [0], [1], [0, 0, 1, 1], [], []>} : vector<8x128xf32>, vector<128x128xf32>, vector<8x128xf32> -> vector<8x128xf32>
    %955 = vector.broadcast %cst : f32 to vector<8x128xf32>
    %956 = arith.mulf %940, %955 : vector<8x128xf32>
    %957 = arith.index_cast %c41_i32 : i32 to index
    %c0_336 = arith.constant 0 : index
    %c0_337 = arith.constant 0 : index
    %958 = vector.load %arg1[%957, %c0_336, %c0_337] : memref<70x8x128xf32, #tpu.memory_space<vmem>>, vector<1x8x128xf32>
    %959 = vector.shape_cast %958 : vector<1x8x128xf32> to vector<8x128xf32>
    %960 = arith.addf %954, %959 : vector<8x128xf32>
    %961 = vector.broadcast %cst_3 : f32 to vector<8x128xf32>
    %962 = arith.mulf %960, %961 : vector<8x128xf32>
    %963 = arith.addf %956, %962 : vector<8x128xf32>
    %964 = arith.index_cast %c41_i32 : i32 to index
    %c0_338 = arith.constant 0 : index
    %c0_339 = arith.constant 0 : index
    %965 = vector.load %arg4[%964, %c0_338, %c0_339] : memref<70x8x128xf32, #tpu.memory_space<vmem>>, vector<1x8x128xf32>
    %966 = vector.shape_cast %965 : vector<1x8x128xf32> to vector<8x128xf32>
    %967 = vector.shape_cast %963 : vector<8x128xf32> to vector<1x8x128xf32>
    tpu.vector_store %arg4[%964, %c0_338, %c0_339], %967 {strides = array<i32>} : memref<70x8x128xf32, #tpu.memory_space<vmem>>, vector<1x8x128xf32>,
    %c42_i32 = arith.constant 42 : i32
    %cst_340 = arith.constant 3.000000e+00 : f32
    %968 = vector.broadcast %cst_340 : f32 to vector<8x128xf32>
    %969 = arith.mulf %968, %963 : vector<8x128xf32>
    %cst_341 = arith.constant 2.000000e+00 : f32
    %970 = vector.broadcast %cst_341 : f32 to vector<8x128xf32>
    %971 = arith.subf %969, %970 : vector<8x128xf32>
    %972 = arith.negf %971 : vector<8x128xf32>
    %973 = math.exp %972 : vector<8x128xf32>
    %cst_342 = arith.constant 1.000000e+00 : f32
    %974 = vector.broadcast %cst_342 : f32 to vector<8x128xf32>
    %975 = arith.addf %974, %973 : vector<8x128xf32>
    %976 = arith.divf %974, %975 : vector<8x128xf32>
    %cst_343 = arith.constant dense<0.000000e+00> : vector<8x128xf32>
    %977 = tpu.matmul %976, %0, %cst_343 {dimension_numbers = #tpu.dot_dimension_numbers<[1], [0], [0], [1], [0, 0, 1, 1], [], []>} : vector<8x128xf32>, vector<128x128xf32>, vector<8x128xf32> -> vector<8x128xf32>
    %978 = vector.broadcast %cst : f32 to vector<8x128xf32>
    %979 = arith.mulf %963, %978 : vector<8x128xf32>
    %980 = arith.index_cast %c42_i32 : i32 to index
    %c0_344 = arith.constant 0 : index
    %c0_345 = arith.constant 0 : index
    %981 = vector.load %arg1[%980, %c0_344, %c0_345] : memref<70x8x128xf32, #tpu.memory_space<vmem>>, vector<1x8x128xf32>
    %982 = vector.shape_cast %981 : vector<1x8x128xf32> to vector<8x128xf32>
    %983 = arith.addf %977, %982 : vector<8x128xf32>
    %984 = vector.broadcast %cst_3 : f32 to vector<8x128xf32>
    %985 = arith.mulf %983, %984 : vector<8x128xf32>
    %986 = arith.addf %979, %985 : vector<8x128xf32>
    %987 = arith.index_cast %c42_i32 : i32 to index
    %c0_346 = arith.constant 0 : index
    %c0_347 = arith.constant 0 : index
    %988 = vector.load %arg4[%987, %c0_346, %c0_347] : memref<70x8x128xf32, #tpu.memory_space<vmem>>, vector<1x8x128xf32>
    %989 = vector.shape_cast %988 : vector<1x8x128xf32> to vector<8x128xf32>
    %990 = vector.shape_cast %986 : vector<8x128xf32> to vector<1x8x128xf32>
    tpu.vector_store %arg4[%987, %c0_346, %c0_347], %990 {strides = array<i32>} : memref<70x8x128xf32, #tpu.memory_space<vmem>>, vector<1x8x128xf32>,
    %c43_i32 = arith.constant 43 : i32
    %cst_348 = arith.constant 3.000000e+00 : f32
    %991 = vector.broadcast %cst_348 : f32 to vector<8x128xf32>
    %992 = arith.mulf %991, %986 : vector<8x128xf32>
    %cst_349 = arith.constant 2.000000e+00 : f32
    %993 = vector.broadcast %cst_349 : f32 to vector<8x128xf32>
    %994 = arith.subf %992, %993 : vector<8x128xf32>
    %995 = arith.negf %994 : vector<8x128xf32>
    %996 = math.exp %995 : vector<8x128xf32>
    %cst_350 = arith.constant 1.000000e+00 : f32
    %997 = vector.broadcast %cst_350 : f32 to vector<8x128xf32>
    %998 = arith.addf %997, %996 : vector<8x128xf32>
    %999 = arith.divf %997, %998 : vector<8x128xf32>
    %cst_351 = arith.constant dense<0.000000e+00> : vector<8x128xf32>
    %1000 = tpu.matmul %999, %0, %cst_351 {dimension_numbers = #tpu.dot_dimension_numbers<[1], [0], [0], [1], [0, 0, 1, 1], [], []>} : vector<8x128xf32>, vector<128x128xf32>, vector<8x128xf32> -> vector<8x128xf32>
    %1001 = vector.broadcast %cst : f32 to vector<8x128xf32>
    %1002 = arith.mulf %986, %1001 : vector<8x128xf32>
    %1003 = arith.index_cast %c43_i32 : i32 to index
    %c0_352 = arith.constant 0 : index
    %c0_353 = arith.constant 0 : index
    %1004 = vector.load %arg1[%1003, %c0_352, %c0_353] : memref<70x8x128xf32, #tpu.memory_space<vmem>>, vector<1x8x128xf32>
    %1005 = vector.shape_cast %1004 : vector<1x8x128xf32> to vector<8x128xf32>
    %1006 = arith.addf %1000, %1005 : vector<8x128xf32>
    %1007 = vector.broadcast %cst_3 : f32 to vector<8x128xf32>
    %1008 = arith.mulf %1006, %1007 : vector<8x128xf32>
    %1009 = arith.addf %1002, %1008 : vector<8x128xf32>
    %1010 = arith.index_cast %c43_i32 : i32 to index
    %c0_354 = arith.constant 0 : index
    %c0_355 = arith.constant 0 : index
    %1011 = vector.load %arg4[%1010, %c0_354, %c0_355] : memref<70x8x128xf32, #tpu.memory_space<vmem>>, vector<1x8x128xf32>
    %1012 = vector.shape_cast %1011 : vector<1x8x128xf32> to vector<8x128xf32>
    %1013 = vector.shape_cast %1009 : vector<8x128xf32> to vector<1x8x128xf32>
    tpu.vector_store %arg4[%1010, %c0_354, %c0_355], %1013 {strides = array<i32>} : memref<70x8x128xf32, #tpu.memory_space<vmem>>, vector<1x8x128xf32>,
    %c44_i32 = arith.constant 44 : i32
    %cst_356 = arith.constant 3.000000e+00 : f32
    %1014 = vector.broadcast %cst_356 : f32 to vector<8x128xf32>
    %1015 = arith.mulf %1014, %1009 : vector<8x128xf32>
    %cst_357 = arith.constant 2.000000e+00 : f32
    %1016 = vector.broadcast %cst_357 : f32 to vector<8x128xf32>
    %1017 = arith.subf %1015, %1016 : vector<8x128xf32>
    %1018 = arith.negf %1017 : vector<8x128xf32>
    %1019 = math.exp %1018 : vector<8x128xf32>
    %cst_358 = arith.constant 1.000000e+00 : f32
    %1020 = vector.broadcast %cst_358 : f32 to vector<8x128xf32>
    %1021 = arith.addf %1020, %1019 : vector<8x128xf32>
    %1022 = arith.divf %1020, %1021 : vector<8x128xf32>
    %cst_359 = arith.constant dense<0.000000e+00> : vector<8x128xf32>
    %1023 = tpu.matmul %1022, %0, %cst_359 {dimension_numbers = #tpu.dot_dimension_numbers<[1], [0], [0], [1], [0, 0, 1, 1], [], []>} : vector<8x128xf32>, vector<128x128xf32>, vector<8x128xf32> -> vector<8x128xf32>
    %1024 = vector.broadcast %cst : f32 to vector<8x128xf32>
    %1025 = arith.mulf %1009, %1024 : vector<8x128xf32>
    %1026 = arith.index_cast %c44_i32 : i32 to index
    %c0_360 = arith.constant 0 : index
    %c0_361 = arith.constant 0 : index
    %1027 = vector.load %arg1[%1026, %c0_360, %c0_361] : memref<70x8x128xf32, #tpu.memory_space<vmem>>, vector<1x8x128xf32>
    %1028 = vector.shape_cast %1027 : vector<1x8x128xf32> to vector<8x128xf32>
    %1029 = arith.addf %1023, %1028 : vector<8x128xf32>
    %1030 = vector.broadcast %cst_3 : f32 to vector<8x128xf32>
    %1031 = arith.mulf %1029, %1030 : vector<8x128xf32>
    %1032 = arith.addf %1025, %1031 : vector<8x128xf32>
    %1033 = arith.index_cast %c44_i32 : i32 to index
    %c0_362 = arith.constant 0 : index
    %c0_363 = arith.constant 0 : index
    %1034 = vector.load %arg4[%1033, %c0_362, %c0_363] : memref<70x8x128xf32, #tpu.memory_space<vmem>>, vector<1x8x128xf32>
    %1035 = vector.shape_cast %1034 : vector<1x8x128xf32> to vector<8x128xf32>
    %1036 = vector.shape_cast %1032 : vector<8x128xf32> to vector<1x8x128xf32>
    tpu.vector_store %arg4[%1033, %c0_362, %c0_363], %1036 {strides = array<i32>} : memref<70x8x128xf32, #tpu.memory_space<vmem>>, vector<1x8x128xf32>,
    %c45_i32 = arith.constant 45 : i32
    %cst_364 = arith.constant 3.000000e+00 : f32
    %1037 = vector.broadcast %cst_364 : f32 to vector<8x128xf32>
    %1038 = arith.mulf %1037, %1032 : vector<8x128xf32>
    %cst_365 = arith.constant 2.000000e+00 : f32
    %1039 = vector.broadcast %cst_365 : f32 to vector<8x128xf32>
    %1040 = arith.subf %1038, %1039 : vector<8x128xf32>
    %1041 = arith.negf %1040 : vector<8x128xf32>
    %1042 = math.exp %1041 : vector<8x128xf32>
    %cst_366 = arith.constant 1.000000e+00 : f32
    %1043 = vector.broadcast %cst_366 : f32 to vector<8x128xf32>
    %1044 = arith.addf %1043, %1042 : vector<8x128xf32>
    %1045 = arith.divf %1043, %1044 : vector<8x128xf32>
    %cst_367 = arith.constant dense<0.000000e+00> : vector<8x128xf32>
    %1046 = tpu.matmul %1045, %0, %cst_367 {dimension_numbers = #tpu.dot_dimension_numbers<[1], [0], [0], [1], [0, 0, 1, 1], [], []>} : vector<8x128xf32>, vector<128x128xf32>, vector<8x128xf32> -> vector<8x128xf32>
    %1047 = vector.broadcast %cst : f32 to vector<8x128xf32>
    %1048 = arith.mulf %1032, %1047 : vector<8x128xf32>
    %1049 = arith.index_cast %c45_i32 : i32 to index
    %c0_368 = arith.constant 0 : index
    %c0_369 = arith.constant 0 : index
    %1050 = vector.load %arg1[%1049, %c0_368, %c0_369] : memref<70x8x128xf32, #tpu.memory_space<vmem>>, vector<1x8x128xf32>
    %1051 = vector.shape_cast %1050 : vector<1x8x128xf32> to vector<8x128xf32>
    %1052 = arith.addf %1046, %1051 : vector<8x128xf32>
    %1053 = vector.broadcast %cst_3 : f32 to vector<8x128xf32>
    %1054 = arith.mulf %1052, %1053 : vector<8x128xf32>
    %1055 = arith.addf %1048, %1054 : vector<8x128xf32>
    %1056 = arith.index_cast %c45_i32 : i32 to index
    %c0_370 = arith.constant 0 : index
    %c0_371 = arith.constant 0 : index
    %1057 = vector.load %arg4[%1056, %c0_370, %c0_371] : memref<70x8x128xf32, #tpu.memory_space<vmem>>, vector<1x8x128xf32>
    %1058 = vector.shape_cast %1057 : vector<1x8x128xf32> to vector<8x128xf32>
    %1059 = vector.shape_cast %1055 : vector<8x128xf32> to vector<1x8x128xf32>
    tpu.vector_store %arg4[%1056, %c0_370, %c0_371], %1059 {strides = array<i32>} : memref<70x8x128xf32, #tpu.memory_space<vmem>>, vector<1x8x128xf32>,
    %c46_i32 = arith.constant 46 : i32
    %cst_372 = arith.constant 3.000000e+00 : f32
    %1060 = vector.broadcast %cst_372 : f32 to vector<8x128xf32>
    %1061 = arith.mulf %1060, %1055 : vector<8x128xf32>
    %cst_373 = arith.constant 2.000000e+00 : f32
    %1062 = vector.broadcast %cst_373 : f32 to vector<8x128xf32>
    %1063 = arith.subf %1061, %1062 : vector<8x128xf32>
    %1064 = arith.negf %1063 : vector<8x128xf32>
    %1065 = math.exp %1064 : vector<8x128xf32>
    %cst_374 = arith.constant 1.000000e+00 : f32
    %1066 = vector.broadcast %cst_374 : f32 to vector<8x128xf32>
    %1067 = arith.addf %1066, %1065 : vector<8x128xf32>
    %1068 = arith.divf %1066, %1067 : vector<8x128xf32>
    %cst_375 = arith.constant dense<0.000000e+00> : vector<8x128xf32>
    %1069 = tpu.matmul %1068, %0, %cst_375 {dimension_numbers = #tpu.dot_dimension_numbers<[1], [0], [0], [1], [0, 0, 1, 1], [], []>} : vector<8x128xf32>, vector<128x128xf32>, vector<8x128xf32> -> vector<8x128xf32>
    %1070 = vector.broadcast %cst : f32 to vector<8x128xf32>
    %1071 = arith.mulf %1055, %1070 : vector<8x128xf32>
    %1072 = arith.index_cast %c46_i32 : i32 to index
    %c0_376 = arith.constant 0 : index
    %c0_377 = arith.constant 0 : index
    %1073 = vector.load %arg1[%1072, %c0_376, %c0_377] : memref<70x8x128xf32, #tpu.memory_space<vmem>>, vector<1x8x128xf32>
    %1074 = vector.shape_cast %1073 : vector<1x8x128xf32> to vector<8x128xf32>
    %1075 = arith.addf %1069, %1074 : vector<8x128xf32>
    %1076 = vector.broadcast %cst_3 : f32 to vector<8x128xf32>
    %1077 = arith.mulf %1075, %1076 : vector<8x128xf32>
    %1078 = arith.addf %1071, %1077 : vector<8x128xf32>
    %1079 = arith.index_cast %c46_i32 : i32 to index
    %c0_378 = arith.constant 0 : index
    %c0_379 = arith.constant 0 : index
    %1080 = vector.load %arg4[%1079, %c0_378, %c0_379] : memref<70x8x128xf32, #tpu.memory_space<vmem>>, vector<1x8x128xf32>
    %1081 = vector.shape_cast %1080 : vector<1x8x128xf32> to vector<8x128xf32>
    %1082 = vector.shape_cast %1078 : vector<8x128xf32> to vector<1x8x128xf32>
    tpu.vector_store %arg4[%1079, %c0_378, %c0_379], %1082 {strides = array<i32>} : memref<70x8x128xf32, #tpu.memory_space<vmem>>, vector<1x8x128xf32>,
    %c47_i32 = arith.constant 47 : i32
    %cst_380 = arith.constant 3.000000e+00 : f32
    %1083 = vector.broadcast %cst_380 : f32 to vector<8x128xf32>
    %1084 = arith.mulf %1083, %1078 : vector<8x128xf32>
    %cst_381 = arith.constant 2.000000e+00 : f32
    %1085 = vector.broadcast %cst_381 : f32 to vector<8x128xf32>
    %1086 = arith.subf %1084, %1085 : vector<8x128xf32>
    %1087 = arith.negf %1086 : vector<8x128xf32>
    %1088 = math.exp %1087 : vector<8x128xf32>
    %cst_382 = arith.constant 1.000000e+00 : f32
    %1089 = vector.broadcast %cst_382 : f32 to vector<8x128xf32>
    %1090 = arith.addf %1089, %1088 : vector<8x128xf32>
    %1091 = arith.divf %1089, %1090 : vector<8x128xf32>
    %cst_383 = arith.constant dense<0.000000e+00> : vector<8x128xf32>
    %1092 = tpu.matmul %1091, %0, %cst_383 {dimension_numbers = #tpu.dot_dimension_numbers<[1], [0], [0], [1], [0, 0, 1, 1], [], []>} : vector<8x128xf32>, vector<128x128xf32>, vector<8x128xf32> -> vector<8x128xf32>
    %1093 = vector.broadcast %cst : f32 to vector<8x128xf32>
    %1094 = arith.mulf %1078, %1093 : vector<8x128xf32>
    %1095 = arith.index_cast %c47_i32 : i32 to index
    %c0_384 = arith.constant 0 : index
    %c0_385 = arith.constant 0 : index
    %1096 = vector.load %arg1[%1095, %c0_384, %c0_385] : memref<70x8x128xf32, #tpu.memory_space<vmem>>, vector<1x8x128xf32>
    %1097 = vector.shape_cast %1096 : vector<1x8x128xf32> to vector<8x128xf32>
    %1098 = arith.addf %1092, %1097 : vector<8x128xf32>
    %1099 = vector.broadcast %cst_3 : f32 to vector<8x128xf32>
    %1100 = arith.mulf %1098, %1099 : vector<8x128xf32>
    %1101 = arith.addf %1094, %1100 : vector<8x128xf32>
    %1102 = arith.index_cast %c47_i32 : i32 to index
    %c0_386 = arith.constant 0 : index
    %c0_387 = arith.constant 0 : index
    %1103 = vector.load %arg4[%1102, %c0_386, %c0_387] : memref<70x8x128xf32, #tpu.memory_space<vmem>>, vector<1x8x128xf32>
    %1104 = vector.shape_cast %1103 : vector<1x8x128xf32> to vector<8x128xf32>
    %1105 = vector.shape_cast %1101 : vector<8x128xf32> to vector<1x8x128xf32>
    tpu.vector_store %arg4[%1102, %c0_386, %c0_387], %1105 {strides = array<i32>} : memref<70x8x128xf32, #tpu.memory_space<vmem>>, vector<1x8x128xf32>,
    %c48_i32 = arith.constant 48 : i32
    %cst_388 = arith.constant 3.000000e+00 : f32
    %1106 = vector.broadcast %cst_388 : f32 to vector<8x128xf32>
    %1107 = arith.mulf %1106, %1101 : vector<8x128xf32>
    %cst_389 = arith.constant 2.000000e+00 : f32
    %1108 = vector.broadcast %cst_389 : f32 to vector<8x128xf32>
    %1109 = arith.subf %1107, %1108 : vector<8x128xf32>
    %1110 = arith.negf %1109 : vector<8x128xf32>
    %1111 = math.exp %1110 : vector<8x128xf32>
    %cst_390 = arith.constant 1.000000e+00 : f32
    %1112 = vector.broadcast %cst_390 : f32 to vector<8x128xf32>
    %1113 = arith.addf %1112, %1111 : vector<8x128xf32>
    %1114 = arith.divf %1112, %1113 : vector<8x128xf32>
    %cst_391 = arith.constant dense<0.000000e+00> : vector<8x128xf32>
    %1115 = tpu.matmul %1114, %0, %cst_391 {dimension_numbers = #tpu.dot_dimension_numbers<[1], [0], [0], [1], [0, 0, 1, 1], [], []>} : vector<8x128xf32>, vector<128x128xf32>, vector<8x128xf32> -> vector<8x128xf32>
    %1116 = vector.broadcast %cst : f32 to vector<8x128xf32>
    %1117 = arith.mulf %1101, %1116 : vector<8x128xf32>
    %1118 = arith.index_cast %c48_i32 : i32 to index
    %c0_392 = arith.constant 0 : index
    %c0_393 = arith.constant 0 : index
    %1119 = vector.load %arg1[%1118, %c0_392, %c0_393] : memref<70x8x128xf32, #tpu.memory_space<vmem>>, vector<1x8x128xf32>
    %1120 = vector.shape_cast %1119 : vector<1x8x128xf32> to vector<8x128xf32>
    %1121 = arith.addf %1115, %1120 : vector<8x128xf32>
    %1122 = vector.broadcast %cst_3 : f32 to vector<8x128xf32>
    %1123 = arith.mulf %1121, %1122 : vector<8x128xf32>
    %1124 = arith.addf %1117, %1123 : vector<8x128xf32>
    %1125 = arith.index_cast %c48_i32 : i32 to index
    %c0_394 = arith.constant 0 : index
    %c0_395 = arith.constant 0 : index
    %1126 = vector.load %arg4[%1125, %c0_394, %c0_395] : memref<70x8x128xf32, #tpu.memory_space<vmem>>, vector<1x8x128xf32>
    %1127 = vector.shape_cast %1126 : vector<1x8x128xf32> to vector<8x128xf32>
    %1128 = vector.shape_cast %1124 : vector<8x128xf32> to vector<1x8x128xf32>
    tpu.vector_store %arg4[%1125, %c0_394, %c0_395], %1128 {strides = array<i32>} : memref<70x8x128xf32, #tpu.memory_space<vmem>>, vector<1x8x128xf32>,
    %c49_i32 = arith.constant 49 : i32
    %cst_396 = arith.constant 3.000000e+00 : f32
    %1129 = vector.broadcast %cst_396 : f32 to vector<8x128xf32>
    %1130 = arith.mulf %1129, %1124 : vector<8x128xf32>
    %cst_397 = arith.constant 2.000000e+00 : f32
    %1131 = vector.broadcast %cst_397 : f32 to vector<8x128xf32>
    %1132 = arith.subf %1130, %1131 : vector<8x128xf32>
    %1133 = arith.negf %1132 : vector<8x128xf32>
    %1134 = math.exp %1133 : vector<8x128xf32>
    %cst_398 = arith.constant 1.000000e+00 : f32
    %1135 = vector.broadcast %cst_398 : f32 to vector<8x128xf32>
    %1136 = arith.addf %1135, %1134 : vector<8x128xf32>
    %1137 = arith.divf %1135, %1136 : vector<8x128xf32>
    %cst_399 = arith.constant dense<0.000000e+00> : vector<8x128xf32>
    %1138 = tpu.matmul %1137, %0, %cst_399 {dimension_numbers = #tpu.dot_dimension_numbers<[1], [0], [0], [1], [0, 0, 1, 1], [], []>} : vector<8x128xf32>, vector<128x128xf32>, vector<8x128xf32> -> vector<8x128xf32>
    %1139 = vector.broadcast %cst : f32 to vector<8x128xf32>
    %1140 = arith.mulf %1124, %1139 : vector<8x128xf32>
    %1141 = arith.index_cast %c49_i32 : i32 to index
    %c0_400 = arith.constant 0 : index
    %c0_401 = arith.constant 0 : index
    %1142 = vector.load %arg1[%1141, %c0_400, %c0_401] : memref<70x8x128xf32, #tpu.memory_space<vmem>>, vector<1x8x128xf32>
    %1143 = vector.shape_cast %1142 : vector<1x8x128xf32> to vector<8x128xf32>
    %1144 = arith.addf %1138, %1143 : vector<8x128xf32>
    %1145 = vector.broadcast %cst_3 : f32 to vector<8x128xf32>
    %1146 = arith.mulf %1144, %1145 : vector<8x128xf32>
    %1147 = arith.addf %1140, %1146 : vector<8x128xf32>
    %1148 = arith.index_cast %c49_i32 : i32 to index
    %c0_402 = arith.constant 0 : index
    %c0_403 = arith.constant 0 : index
    %1149 = vector.load %arg4[%1148, %c0_402, %c0_403] : memref<70x8x128xf32, #tpu.memory_space<vmem>>, vector<1x8x128xf32>
    %1150 = vector.shape_cast %1149 : vector<1x8x128xf32> to vector<8x128xf32>
    %1151 = vector.shape_cast %1147 : vector<8x128xf32> to vector<1x8x128xf32>
    tpu.vector_store %arg4[%1148, %c0_402, %c0_403], %1151 {strides = array<i32>} : memref<70x8x128xf32, #tpu.memory_space<vmem>>, vector<1x8x128xf32>,
    %c50_i32 = arith.constant 50 : i32
    %cst_404 = arith.constant 3.000000e+00 : f32
    %1152 = vector.broadcast %cst_404 : f32 to vector<8x128xf32>
    %1153 = arith.mulf %1152, %1147 : vector<8x128xf32>
    %cst_405 = arith.constant 2.000000e+00 : f32
    %1154 = vector.broadcast %cst_405 : f32 to vector<8x128xf32>
    %1155 = arith.subf %1153, %1154 : vector<8x128xf32>
    %1156 = arith.negf %1155 : vector<8x128xf32>
    %1157 = math.exp %1156 : vector<8x128xf32>
    %cst_406 = arith.constant 1.000000e+00 : f32
    %1158 = vector.broadcast %cst_406 : f32 to vector<8x128xf32>
    %1159 = arith.addf %1158, %1157 : vector<8x128xf32>
    %1160 = arith.divf %1158, %1159 : vector<8x128xf32>
    %cst_407 = arith.constant dense<0.000000e+00> : vector<8x128xf32>
    %1161 = tpu.matmul %1160, %0, %cst_407 {dimension_numbers = #tpu.dot_dimension_numbers<[1], [0], [0], [1], [0, 0, 1, 1], [], []>} : vector<8x128xf32>, vector<128x128xf32>, vector<8x128xf32> -> vector<8x128xf32>
    %1162 = vector.broadcast %cst : f32 to vector<8x128xf32>
    %1163 = arith.mulf %1147, %1162 : vector<8x128xf32>
    %1164 = arith.index_cast %c50_i32 : i32 to index
    %c0_408 = arith.constant 0 : index
    %c0_409 = arith.constant 0 : index
    %1165 = vector.load %arg1[%1164, %c0_408, %c0_409] : memref<70x8x128xf32, #tpu.memory_space<vmem>>, vector<1x8x128xf32>
    %1166 = vector.shape_cast %1165 : vector<1x8x128xf32> to vector<8x128xf32>
    %1167 = arith.addf %1161, %1166 : vector<8x128xf32>
    %1168 = vector.broadcast %cst_3 : f32 to vector<8x128xf32>
    %1169 = arith.mulf %1167, %1168 : vector<8x128xf32>
    %1170 = arith.addf %1163, %1169 : vector<8x128xf32>
    %1171 = arith.index_cast %c50_i32 : i32 to index
    %c0_410 = arith.constant 0 : index
    %c0_411 = arith.constant 0 : index
    %1172 = vector.load %arg4[%1171, %c0_410, %c0_411] : memref<70x8x128xf32, #tpu.memory_space<vmem>>, vector<1x8x128xf32>
    %1173 = vector.shape_cast %1172 : vector<1x8x128xf32> to vector<8x128xf32>
    %1174 = vector.shape_cast %1170 : vector<8x128xf32> to vector<1x8x128xf32>
    tpu.vector_store %arg4[%1171, %c0_410, %c0_411], %1174 {strides = array<i32>} : memref<70x8x128xf32, #tpu.memory_space<vmem>>, vector<1x8x128xf32>,
    %c51_i32 = arith.constant 51 : i32
    %cst_412 = arith.constant 3.000000e+00 : f32
    %1175 = vector.broadcast %cst_412 : f32 to vector<8x128xf32>
    %1176 = arith.mulf %1175, %1170 : vector<8x128xf32>
    %cst_413 = arith.constant 2.000000e+00 : f32
    %1177 = vector.broadcast %cst_413 : f32 to vector<8x128xf32>
    %1178 = arith.subf %1176, %1177 : vector<8x128xf32>
    %1179 = arith.negf %1178 : vector<8x128xf32>
    %1180 = math.exp %1179 : vector<8x128xf32>
    %cst_414 = arith.constant 1.000000e+00 : f32
    %1181 = vector.broadcast %cst_414 : f32 to vector<8x128xf32>
    %1182 = arith.addf %1181, %1180 : vector<8x128xf32>
    %1183 = arith.divf %1181, %1182 : vector<8x128xf32>
    %cst_415 = arith.constant dense<0.000000e+00> : vector<8x128xf32>
    %1184 = tpu.matmul %1183, %0, %cst_415 {dimension_numbers = #tpu.dot_dimension_numbers<[1], [0], [0], [1], [0, 0, 1, 1], [], []>} : vector<8x128xf32>, vector<128x128xf32>, vector<8x128xf32> -> vector<8x128xf32>
    %1185 = vector.broadcast %cst : f32 to vector<8x128xf32>
    %1186 = arith.mulf %1170, %1185 : vector<8x128xf32>
    %1187 = arith.index_cast %c51_i32 : i32 to index
    %c0_416 = arith.constant 0 : index
    %c0_417 = arith.constant 0 : index
    %1188 = vector.load %arg1[%1187, %c0_416, %c0_417] : memref<70x8x128xf32, #tpu.memory_space<vmem>>, vector<1x8x128xf32>
    %1189 = vector.shape_cast %1188 : vector<1x8x128xf32> to vector<8x128xf32>
    %1190 = arith.addf %1184, %1189 : vector<8x128xf32>
    %1191 = vector.broadcast %cst_3 : f32 to vector<8x128xf32>
    %1192 = arith.mulf %1190, %1191 : vector<8x128xf32>
    %1193 = arith.addf %1186, %1192 : vector<8x128xf32>
    %1194 = arith.index_cast %c51_i32 : i32 to index
    %c0_418 = arith.constant 0 : index
    %c0_419 = arith.constant 0 : index
    %1195 = vector.load %arg4[%1194, %c0_418, %c0_419] : memref<70x8x128xf32, #tpu.memory_space<vmem>>, vector<1x8x128xf32>
    %1196 = vector.shape_cast %1195 : vector<1x8x128xf32> to vector<8x128xf32>
    %1197 = vector.shape_cast %1193 : vector<8x128xf32> to vector<1x8x128xf32>
    tpu.vector_store %arg4[%1194, %c0_418, %c0_419], %1197 {strides = array<i32>} : memref<70x8x128xf32, #tpu.memory_space<vmem>>, vector<1x8x128xf32>,
    %c52_i32 = arith.constant 52 : i32
    %cst_420 = arith.constant 3.000000e+00 : f32
    %1198 = vector.broadcast %cst_420 : f32 to vector<8x128xf32>
    %1199 = arith.mulf %1198, %1193 : vector<8x128xf32>
    %cst_421 = arith.constant 2.000000e+00 : f32
    %1200 = vector.broadcast %cst_421 : f32 to vector<8x128xf32>
    %1201 = arith.subf %1199, %1200 : vector<8x128xf32>
    %1202 = arith.negf %1201 : vector<8x128xf32>
    %1203 = math.exp %1202 : vector<8x128xf32>
    %cst_422 = arith.constant 1.000000e+00 : f32
    %1204 = vector.broadcast %cst_422 : f32 to vector<8x128xf32>
    %1205 = arith.addf %1204, %1203 : vector<8x128xf32>
    %1206 = arith.divf %1204, %1205 : vector<8x128xf32>
    %cst_423 = arith.constant dense<0.000000e+00> : vector<8x128xf32>
    %1207 = tpu.matmul %1206, %0, %cst_423 {dimension_numbers = #tpu.dot_dimension_numbers<[1], [0], [0], [1], [0, 0, 1, 1], [], []>} : vector<8x128xf32>, vector<128x128xf32>, vector<8x128xf32> -> vector<8x128xf32>
    %1208 = vector.broadcast %cst : f32 to vector<8x128xf32>
    %1209 = arith.mulf %1193, %1208 : vector<8x128xf32>
    %1210 = arith.index_cast %c52_i32 : i32 to index
    %c0_424 = arith.constant 0 : index
    %c0_425 = arith.constant 0 : index
    %1211 = vector.load %arg1[%1210, %c0_424, %c0_425] : memref<70x8x128xf32, #tpu.memory_space<vmem>>, vector<1x8x128xf32>
    %1212 = vector.shape_cast %1211 : vector<1x8x128xf32> to vector<8x128xf32>
    %1213 = arith.addf %1207, %1212 : vector<8x128xf32>
    %1214 = vector.broadcast %cst_3 : f32 to vector<8x128xf32>
    %1215 = arith.mulf %1213, %1214 : vector<8x128xf32>
    %1216 = arith.addf %1209, %1215 : vector<8x128xf32>
    %1217 = arith.index_cast %c52_i32 : i32 to index
    %c0_426 = arith.constant 0 : index
    %c0_427 = arith.constant 0 : index
    %1218 = vector.load %arg4[%1217, %c0_426, %c0_427] : memref<70x8x128xf32, #tpu.memory_space<vmem>>, vector<1x8x128xf32>
    %1219 = vector.shape_cast %1218 : vector<1x8x128xf32> to vector<8x128xf32>
    %1220 = vector.shape_cast %1216 : vector<8x128xf32> to vector<1x8x128xf32>
    tpu.vector_store %arg4[%1217, %c0_426, %c0_427], %1220 {strides = array<i32>} : memref<70x8x128xf32, #tpu.memory_space<vmem>>, vector<1x8x128xf32>,
    %c53_i32 = arith.constant 53 : i32
    %cst_428 = arith.constant 3.000000e+00 : f32
    %1221 = vector.broadcast %cst_428 : f32 to vector<8x128xf32>
    %1222 = arith.mulf %1221, %1216 : vector<8x128xf32>
    %cst_429 = arith.constant 2.000000e+00 : f32
    %1223 = vector.broadcast %cst_429 : f32 to vector<8x128xf32>
    %1224 = arith.subf %1222, %1223 : vector<8x128xf32>
    %1225 = arith.negf %1224 : vector<8x128xf32>
    %1226 = math.exp %1225 : vector<8x128xf32>
    %cst_430 = arith.constant 1.000000e+00 : f32
    %1227 = vector.broadcast %cst_430 : f32 to vector<8x128xf32>
    %1228 = arith.addf %1227, %1226 : vector<8x128xf32>
    %1229 = arith.divf %1227, %1228 : vector<8x128xf32>
    %cst_431 = arith.constant dense<0.000000e+00> : vector<8x128xf32>
    %1230 = tpu.matmul %1229, %0, %cst_431 {dimension_numbers = #tpu.dot_dimension_numbers<[1], [0], [0], [1], [0, 0, 1, 1], [], []>} : vector<8x128xf32>, vector<128x128xf32>, vector<8x128xf32> -> vector<8x128xf32>
    %1231 = vector.broadcast %cst : f32 to vector<8x128xf32>
    %1232 = arith.mulf %1216, %1231 : vector<8x128xf32>
    %1233 = arith.index_cast %c53_i32 : i32 to index
    %c0_432 = arith.constant 0 : index
    %c0_433 = arith.constant 0 : index
    %1234 = vector.load %arg1[%1233, %c0_432, %c0_433] : memref<70x8x128xf32, #tpu.memory_space<vmem>>, vector<1x8x128xf32>
    %1235 = vector.shape_cast %1234 : vector<1x8x128xf32> to vector<8x128xf32>
    %1236 = arith.addf %1230, %1235 : vector<8x128xf32>
    %1237 = vector.broadcast %cst_3 : f32 to vector<8x128xf32>
    %1238 = arith.mulf %1236, %1237 : vector<8x128xf32>
    %1239 = arith.addf %1232, %1238 : vector<8x128xf32>
    %1240 = arith.index_cast %c53_i32 : i32 to index
    %c0_434 = arith.constant 0 : index
    %c0_435 = arith.constant 0 : index
    %1241 = vector.load %arg4[%1240, %c0_434, %c0_435] : memref<70x8x128xf32, #tpu.memory_space<vmem>>, vector<1x8x128xf32>
    %1242 = vector.shape_cast %1241 : vector<1x8x128xf32> to vector<8x128xf32>
    %1243 = vector.shape_cast %1239 : vector<8x128xf32> to vector<1x8x128xf32>
    tpu.vector_store %arg4[%1240, %c0_434, %c0_435], %1243 {strides = array<i32>} : memref<70x8x128xf32, #tpu.memory_space<vmem>>, vector<1x8x128xf32>,
    %c54_i32 = arith.constant 54 : i32
    %cst_436 = arith.constant 3.000000e+00 : f32
    %1244 = vector.broadcast %cst_436 : f32 to vector<8x128xf32>
    %1245 = arith.mulf %1244, %1239 : vector<8x128xf32>
    %cst_437 = arith.constant 2.000000e+00 : f32
    %1246 = vector.broadcast %cst_437 : f32 to vector<8x128xf32>
    %1247 = arith.subf %1245, %1246 : vector<8x128xf32>
    %1248 = arith.negf %1247 : vector<8x128xf32>
    %1249 = math.exp %1248 : vector<8x128xf32>
    %cst_438 = arith.constant 1.000000e+00 : f32
    %1250 = vector.broadcast %cst_438 : f32 to vector<8x128xf32>
    %1251 = arith.addf %1250, %1249 : vector<8x128xf32>
    %1252 = arith.divf %1250, %1251 : vector<8x128xf32>
    %cst_439 = arith.constant dense<0.000000e+00> : vector<8x128xf32>
    %1253 = tpu.matmul %1252, %0, %cst_439 {dimension_numbers = #tpu.dot_dimension_numbers<[1], [0], [0], [1], [0, 0, 1, 1], [], []>} : vector<8x128xf32>, vector<128x128xf32>, vector<8x128xf32> -> vector<8x128xf32>
    %1254 = vector.broadcast %cst : f32 to vector<8x128xf32>
    %1255 = arith.mulf %1239, %1254 : vector<8x128xf32>
    %1256 = arith.index_cast %c54_i32 : i32 to index
    %c0_440 = arith.constant 0 : index
    %c0_441 = arith.constant 0 : index
    %1257 = vector.load %arg1[%1256, %c0_440, %c0_441] : memref<70x8x128xf32, #tpu.memory_space<vmem>>, vector<1x8x128xf32>
    %1258 = vector.shape_cast %1257 : vector<1x8x128xf32> to vector<8x128xf32>
    %1259 = arith.addf %1253, %1258 : vector<8x128xf32>
    %1260 = vector.broadcast %cst_3 : f32 to vector<8x128xf32>
    %1261 = arith.mulf %1259, %1260 : vector<8x128xf32>
    %1262 = arith.addf %1255, %1261 : vector<8x128xf32>
    %1263 = arith.index_cast %c54_i32 : i32 to index
    %c0_442 = arith.constant 0 : index
    %c0_443 = arith.constant 0 : index
    %1264 = vector.load %arg4[%1263, %c0_442, %c0_443] : memref<70x8x128xf32, #tpu.memory_space<vmem>>, vector<1x8x128xf32>
    %1265 = vector.shape_cast %1264 : vector<1x8x128xf32> to vector<8x128xf32>
    %1266 = vector.shape_cast %1262 : vector<8x128xf32> to vector<1x8x128xf32>
    tpu.vector_store %arg4[%1263, %c0_442, %c0_443], %1266 {strides = array<i32>} : memref<70x8x128xf32, #tpu.memory_space<vmem>>, vector<1x8x128xf32>,
    %c55_i32 = arith.constant 55 : i32
    %cst_444 = arith.constant 3.000000e+00 : f32
    %1267 = vector.broadcast %cst_444 : f32 to vector<8x128xf32>
    %1268 = arith.mulf %1267, %1262 : vector<8x128xf32>
    %cst_445 = arith.constant 2.000000e+00 : f32
    %1269 = vector.broadcast %cst_445 : f32 to vector<8x128xf32>
    %1270 = arith.subf %1268, %1269 : vector<8x128xf32>
    %1271 = arith.negf %1270 : vector<8x128xf32>
    %1272 = math.exp %1271 : vector<8x128xf32>
    %cst_446 = arith.constant 1.000000e+00 : f32
    %1273 = vector.broadcast %cst_446 : f32 to vector<8x128xf32>
    %1274 = arith.addf %1273, %1272 : vector<8x128xf32>
    %1275 = arith.divf %1273, %1274 : vector<8x128xf32>
    %cst_447 = arith.constant dense<0.000000e+00> : vector<8x128xf32>
    %1276 = tpu.matmul %1275, %0, %cst_447 {dimension_numbers = #tpu.dot_dimension_numbers<[1], [0], [0], [1], [0, 0, 1, 1], [], []>} : vector<8x128xf32>, vector<128x128xf32>, vector<8x128xf32> -> vector<8x128xf32>
    %1277 = vector.broadcast %cst : f32 to vector<8x128xf32>
    %1278 = arith.mulf %1262, %1277 : vector<8x128xf32>
    %1279 = arith.index_cast %c55_i32 : i32 to index
    %c0_448 = arith.constant 0 : index
    %c0_449 = arith.constant 0 : index
    %1280 = vector.load %arg1[%1279, %c0_448, %c0_449] : memref<70x8x128xf32, #tpu.memory_space<vmem>>, vector<1x8x128xf32>
    %1281 = vector.shape_cast %1280 : vector<1x8x128xf32> to vector<8x128xf32>
    %1282 = arith.addf %1276, %1281 : vector<8x128xf32>
    %1283 = vector.broadcast %cst_3 : f32 to vector<8x128xf32>
    %1284 = arith.mulf %1282, %1283 : vector<8x128xf32>
    %1285 = arith.addf %1278, %1284 : vector<8x128xf32>
    %1286 = arith.index_cast %c55_i32 : i32 to index
    %c0_450 = arith.constant 0 : index
    %c0_451 = arith.constant 0 : index
    %1287 = vector.load %arg4[%1286, %c0_450, %c0_451] : memref<70x8x128xf32, #tpu.memory_space<vmem>>, vector<1x8x128xf32>
    %1288 = vector.shape_cast %1287 : vector<1x8x128xf32> to vector<8x128xf32>
    %1289 = vector.shape_cast %1285 : vector<8x128xf32> to vector<1x8x128xf32>
    tpu.vector_store %arg4[%1286, %c0_450, %c0_451], %1289 {strides = array<i32>} : memref<70x8x128xf32, #tpu.memory_space<vmem>>, vector<1x8x128xf32>,
    %c56_i32 = arith.constant 56 : i32
    %cst_452 = arith.constant 3.000000e+00 : f32
    %1290 = vector.broadcast %cst_452 : f32 to vector<8x128xf32>
    %1291 = arith.mulf %1290, %1285 : vector<8x128xf32>
    %cst_453 = arith.constant 2.000000e+00 : f32
    %1292 = vector.broadcast %cst_453 : f32 to vector<8x128xf32>
    %1293 = arith.subf %1291, %1292 : vector<8x128xf32>
    %1294 = arith.negf %1293 : vector<8x128xf32>
    %1295 = math.exp %1294 : vector<8x128xf32>
    %cst_454 = arith.constant 1.000000e+00 : f32
    %1296 = vector.broadcast %cst_454 : f32 to vector<8x128xf32>
    %1297 = arith.addf %1296, %1295 : vector<8x128xf32>
    %1298 = arith.divf %1296, %1297 : vector<8x128xf32>
    %cst_455 = arith.constant dense<0.000000e+00> : vector<8x128xf32>
    %1299 = tpu.matmul %1298, %0, %cst_455 {dimension_numbers = #tpu.dot_dimension_numbers<[1], [0], [0], [1], [0, 0, 1, 1], [], []>} : vector<8x128xf32>, vector<128x128xf32>, vector<8x128xf32> -> vector<8x128xf32>
    %1300 = vector.broadcast %cst : f32 to vector<8x128xf32>
    %1301 = arith.mulf %1285, %1300 : vector<8x128xf32>
    %1302 = arith.index_cast %c56_i32 : i32 to index
    %c0_456 = arith.constant 0 : index
    %c0_457 = arith.constant 0 : index
    %1303 = vector.load %arg1[%1302, %c0_456, %c0_457] : memref<70x8x128xf32, #tpu.memory_space<vmem>>, vector<1x8x128xf32>
    %1304 = vector.shape_cast %1303 : vector<1x8x128xf32> to vector<8x128xf32>
    %1305 = arith.addf %1299, %1304 : vector<8x128xf32>
    %1306 = vector.broadcast %cst_3 : f32 to vector<8x128xf32>
    %1307 = arith.mulf %1305, %1306 : vector<8x128xf32>
    %1308 = arith.addf %1301, %1307 : vector<8x128xf32>
    %1309 = arith.index_cast %c56_i32 : i32 to index
    %c0_458 = arith.constant 0 : index
    %c0_459 = arith.constant 0 : index
    %1310 = vector.load %arg4[%1309, %c0_458, %c0_459] : memref<70x8x128xf32, #tpu.memory_space<vmem>>, vector<1x8x128xf32>
    %1311 = vector.shape_cast %1310 : vector<1x8x128xf32> to vector<8x128xf32>
    %1312 = vector.shape_cast %1308 : vector<8x128xf32> to vector<1x8x128xf32>
    tpu.vector_store %arg4[%1309, %c0_458, %c0_459], %1312 {strides = array<i32>} : memref<70x8x128xf32, #tpu.memory_space<vmem>>, vector<1x8x128xf32>,
    %c57_i32 = arith.constant 57 : i32
    %cst_460 = arith.constant 3.000000e+00 : f32
    %1313 = vector.broadcast %cst_460 : f32 to vector<8x128xf32>
    %1314 = arith.mulf %1313, %1308 : vector<8x128xf32>
    %cst_461 = arith.constant 2.000000e+00 : f32
    %1315 = vector.broadcast %cst_461 : f32 to vector<8x128xf32>
    %1316 = arith.subf %1314, %1315 : vector<8x128xf32>
    %1317 = arith.negf %1316 : vector<8x128xf32>
    %1318 = math.exp %1317 : vector<8x128xf32>
    %cst_462 = arith.constant 1.000000e+00 : f32
    %1319 = vector.broadcast %cst_462 : f32 to vector<8x128xf32>
    %1320 = arith.addf %1319, %1318 : vector<8x128xf32>
    %1321 = arith.divf %1319, %1320 : vector<8x128xf32>
    %cst_463 = arith.constant dense<0.000000e+00> : vector<8x128xf32>
    %1322 = tpu.matmul %1321, %0, %cst_463 {dimension_numbers = #tpu.dot_dimension_numbers<[1], [0], [0], [1], [0, 0, 1, 1], [], []>} : vector<8x128xf32>, vector<128x128xf32>, vector<8x128xf32> -> vector<8x128xf32>
    %1323 = vector.broadcast %cst : f32 to vector<8x128xf32>
    %1324 = arith.mulf %1308, %1323 : vector<8x128xf32>
    %1325 = arith.index_cast %c57_i32 : i32 to index
    %c0_464 = arith.constant 0 : index
    %c0_465 = arith.constant 0 : index
    %1326 = vector.load %arg1[%1325, %c0_464, %c0_465] : memref<70x8x128xf32, #tpu.memory_space<vmem>>, vector<1x8x128xf32>
    %1327 = vector.shape_cast %1326 : vector<1x8x128xf32> to vector<8x128xf32>
    %1328 = arith.addf %1322, %1327 : vector<8x128xf32>
    %1329 = vector.broadcast %cst_3 : f32 to vector<8x128xf32>
    %1330 = arith.mulf %1328, %1329 : vector<8x128xf32>
    %1331 = arith.addf %1324, %1330 : vector<8x128xf32>
    %1332 = arith.index_cast %c57_i32 : i32 to index
    %c0_466 = arith.constant 0 : index
    %c0_467 = arith.constant 0 : index
    %1333 = vector.load %arg4[%1332, %c0_466, %c0_467] : memref<70x8x128xf32, #tpu.memory_space<vmem>>, vector<1x8x128xf32>
    %1334 = vector.shape_cast %1333 : vector<1x8x128xf32> to vector<8x128xf32>
    %1335 = vector.shape_cast %1331 : vector<8x128xf32> to vector<1x8x128xf32>
    tpu.vector_store %arg4[%1332, %c0_466, %c0_467], %1335 {strides = array<i32>} : memref<70x8x128xf32, #tpu.memory_space<vmem>>, vector<1x8x128xf32>,
    %c58_i32 = arith.constant 58 : i32
    %cst_468 = arith.constant 3.000000e+00 : f32
    %1336 = vector.broadcast %cst_468 : f32 to vector<8x128xf32>
    %1337 = arith.mulf %1336, %1331 : vector<8x128xf32>
    %cst_469 = arith.constant 2.000000e+00 : f32
    %1338 = vector.broadcast %cst_469 : f32 to vector<8x128xf32>
    %1339 = arith.subf %1337, %1338 : vector<8x128xf32>
    %1340 = arith.negf %1339 : vector<8x128xf32>
    %1341 = math.exp %1340 : vector<8x128xf32>
    %cst_470 = arith.constant 1.000000e+00 : f32
    %1342 = vector.broadcast %cst_470 : f32 to vector<8x128xf32>
    %1343 = arith.addf %1342, %1341 : vector<8x128xf32>
    %1344 = arith.divf %1342, %1343 : vector<8x128xf32>
    %cst_471 = arith.constant dense<0.000000e+00> : vector<8x128xf32>
    %1345 = tpu.matmul %1344, %0, %cst_471 {dimension_numbers = #tpu.dot_dimension_numbers<[1], [0], [0], [1], [0, 0, 1, 1], [], []>} : vector<8x128xf32>, vector<128x128xf32>, vector<8x128xf32> -> vector<8x128xf32>
    %1346 = vector.broadcast %cst : f32 to vector<8x128xf32>
    %1347 = arith.mulf %1331, %1346 : vector<8x128xf32>
    %1348 = arith.index_cast %c58_i32 : i32 to index
    %c0_472 = arith.constant 0 : index
    %c0_473 = arith.constant 0 : index
    %1349 = vector.load %arg1[%1348, %c0_472, %c0_473] : memref<70x8x128xf32, #tpu.memory_space<vmem>>, vector<1x8x128xf32>
    %1350 = vector.shape_cast %1349 : vector<1x8x128xf32> to vector<8x128xf32>
    %1351 = arith.addf %1345, %1350 : vector<8x128xf32>
    %1352 = vector.broadcast %cst_3 : f32 to vector<8x128xf32>
    %1353 = arith.mulf %1351, %1352 : vector<8x128xf32>
    %1354 = arith.addf %1347, %1353 : vector<8x128xf32>
    %1355 = arith.index_cast %c58_i32 : i32 to index
    %c0_474 = arith.constant 0 : index
    %c0_475 = arith.constant 0 : index
    %1356 = vector.load %arg4[%1355, %c0_474, %c0_475] : memref<70x8x128xf32, #tpu.memory_space<vmem>>, vector<1x8x128xf32>
    %1357 = vector.shape_cast %1356 : vector<1x8x128xf32> to vector<8x128xf32>
    %1358 = vector.shape_cast %1354 : vector<8x128xf32> to vector<1x8x128xf32>
    tpu.vector_store %arg4[%1355, %c0_474, %c0_475], %1358 {strides = array<i32>} : memref<70x8x128xf32, #tpu.memory_space<vmem>>, vector<1x8x128xf32>,
    %c59_i32 = arith.constant 59 : i32
    %cst_476 = arith.constant 3.000000e+00 : f32
    %1359 = vector.broadcast %cst_476 : f32 to vector<8x128xf32>
    %1360 = arith.mulf %1359, %1354 : vector<8x128xf32>
    %cst_477 = arith.constant 2.000000e+00 : f32
    %1361 = vector.broadcast %cst_477 : f32 to vector<8x128xf32>
    %1362 = arith.subf %1360, %1361 : vector<8x128xf32>
    %1363 = arith.negf %1362 : vector<8x128xf32>
    %1364 = math.exp %1363 : vector<8x128xf32>
    %cst_478 = arith.constant 1.000000e+00 : f32
    %1365 = vector.broadcast %cst_478 : f32 to vector<8x128xf32>
    %1366 = arith.addf %1365, %1364 : vector<8x128xf32>
    %1367 = arith.divf %1365, %1366 : vector<8x128xf32>
    %cst_479 = arith.constant dense<0.000000e+00> : vector<8x128xf32>
    %1368 = tpu.matmul %1367, %0, %cst_479 {dimension_numbers = #tpu.dot_dimension_numbers<[1], [0], [0], [1], [0, 0, 1, 1], [], []>} : vector<8x128xf32>, vector<128x128xf32>, vector<8x128xf32> -> vector<8x128xf32>
    %1369 = vector.broadcast %cst : f32 to vector<8x128xf32>
    %1370 = arith.mulf %1354, %1369 : vector<8x128xf32>
    %1371 = arith.index_cast %c59_i32 : i32 to index
    %c0_480 = arith.constant 0 : index
    %c0_481 = arith.constant 0 : index
    %1372 = vector.load %arg1[%1371, %c0_480, %c0_481] : memref<70x8x128xf32, #tpu.memory_space<vmem>>, vector<1x8x128xf32>
    %1373 = vector.shape_cast %1372 : vector<1x8x128xf32> to vector<8x128xf32>
    %1374 = arith.addf %1368, %1373 : vector<8x128xf32>
    %1375 = vector.broadcast %cst_3 : f32 to vector<8x128xf32>
    %1376 = arith.mulf %1374, %1375 : vector<8x128xf32>
    %1377 = arith.addf %1370, %1376 : vector<8x128xf32>
    %1378 = arith.index_cast %c59_i32 : i32 to index
    %c0_482 = arith.constant 0 : index
    %c0_483 = arith.constant 0 : index
    %1379 = vector.load %arg4[%1378, %c0_482, %c0_483] : memref<70x8x128xf32, #tpu.memory_space<vmem>>, vector<1x8x128xf32>
    %1380 = vector.shape_cast %1379 : vector<1x8x128xf32> to vector<8x128xf32>
    %1381 = vector.shape_cast %1377 : vector<8x128xf32> to vector<1x8x128xf32>
    tpu.vector_store %arg4[%1378, %c0_482, %c0_483], %1381 {strides = array<i32>} : memref<70x8x128xf32, #tpu.memory_space<vmem>>, vector<1x8x128xf32>,
    %c60_i32 = arith.constant 60 : i32
    %cst_484 = arith.constant 3.000000e+00 : f32
    %1382 = vector.broadcast %cst_484 : f32 to vector<8x128xf32>
    %1383 = arith.mulf %1382, %1377 : vector<8x128xf32>
    %cst_485 = arith.constant 2.000000e+00 : f32
    %1384 = vector.broadcast %cst_485 : f32 to vector<8x128xf32>
    %1385 = arith.subf %1383, %1384 : vector<8x128xf32>
    %1386 = arith.negf %1385 : vector<8x128xf32>
    %1387 = math.exp %1386 : vector<8x128xf32>
    %cst_486 = arith.constant 1.000000e+00 : f32
    %1388 = vector.broadcast %cst_486 : f32 to vector<8x128xf32>
    %1389 = arith.addf %1388, %1387 : vector<8x128xf32>
    %1390 = arith.divf %1388, %1389 : vector<8x128xf32>
    %cst_487 = arith.constant dense<0.000000e+00> : vector<8x128xf32>
    %1391 = tpu.matmul %1390, %0, %cst_487 {dimension_numbers = #tpu.dot_dimension_numbers<[1], [0], [0], [1], [0, 0, 1, 1], [], []>} : vector<8x128xf32>, vector<128x128xf32>, vector<8x128xf32> -> vector<8x128xf32>
    %1392 = vector.broadcast %cst : f32 to vector<8x128xf32>
    %1393 = arith.mulf %1377, %1392 : vector<8x128xf32>
    %1394 = arith.index_cast %c60_i32 : i32 to index
    %c0_488 = arith.constant 0 : index
    %c0_489 = arith.constant 0 : index
    %1395 = vector.load %arg1[%1394, %c0_488, %c0_489] : memref<70x8x128xf32, #tpu.memory_space<vmem>>, vector<1x8x128xf32>
    %1396 = vector.shape_cast %1395 : vector<1x8x128xf32> to vector<8x128xf32>
    %1397 = arith.addf %1391, %1396 : vector<8x128xf32>
    %1398 = vector.broadcast %cst_3 : f32 to vector<8x128xf32>
    %1399 = arith.mulf %1397, %1398 : vector<8x128xf32>
    %1400 = arith.addf %1393, %1399 : vector<8x128xf32>
    %1401 = arith.index_cast %c60_i32 : i32 to index
    %c0_490 = arith.constant 0 : index
    %c0_491 = arith.constant 0 : index
    %1402 = vector.load %arg4[%1401, %c0_490, %c0_491] : memref<70x8x128xf32, #tpu.memory_space<vmem>>, vector<1x8x128xf32>
    %1403 = vector.shape_cast %1402 : vector<1x8x128xf32> to vector<8x128xf32>
    %1404 = vector.shape_cast %1400 : vector<8x128xf32> to vector<1x8x128xf32>
    tpu.vector_store %arg4[%1401, %c0_490, %c0_491], %1404 {strides = array<i32>} : memref<70x8x128xf32, #tpu.memory_space<vmem>>, vector<1x8x128xf32>,
    %c61_i32 = arith.constant 61 : i32
    %cst_492 = arith.constant 3.000000e+00 : f32
    %1405 = vector.broadcast %cst_492 : f32 to vector<8x128xf32>
    %1406 = arith.mulf %1405, %1400 : vector<8x128xf32>
    %cst_493 = arith.constant 2.000000e+00 : f32
    %1407 = vector.broadcast %cst_493 : f32 to vector<8x128xf32>
    %1408 = arith.subf %1406, %1407 : vector<8x128xf32>
    %1409 = arith.negf %1408 : vector<8x128xf32>
    %1410 = math.exp %1409 : vector<8x128xf32>
    %cst_494 = arith.constant 1.000000e+00 : f32
    %1411 = vector.broadcast %cst_494 : f32 to vector<8x128xf32>
    %1412 = arith.addf %1411, %1410 : vector<8x128xf32>
    %1413 = arith.divf %1411, %1412 : vector<8x128xf32>
    %cst_495 = arith.constant dense<0.000000e+00> : vector<8x128xf32>
    %1414 = tpu.matmul %1413, %0, %cst_495 {dimension_numbers = #tpu.dot_dimension_numbers<[1], [0], [0], [1], [0, 0, 1, 1], [], []>} : vector<8x128xf32>, vector<128x128xf32>, vector<8x128xf32> -> vector<8x128xf32>
    %1415 = vector.broadcast %cst : f32 to vector<8x128xf32>
    %1416 = arith.mulf %1400, %1415 : vector<8x128xf32>
    %1417 = arith.index_cast %c61_i32 : i32 to index
    %c0_496 = arith.constant 0 : index
    %c0_497 = arith.constant 0 : index
    %1418 = vector.load %arg1[%1417, %c0_496, %c0_497] : memref<70x8x128xf32, #tpu.memory_space<vmem>>, vector<1x8x128xf32>
    %1419 = vector.shape_cast %1418 : vector<1x8x128xf32> to vector<8x128xf32>
    %1420 = arith.addf %1414, %1419 : vector<8x128xf32>
    %1421 = vector.broadcast %cst_3 : f32 to vector<8x128xf32>
    %1422 = arith.mulf %1420, %1421 : vector<8x128xf32>
    %1423 = arith.addf %1416, %1422 : vector<8x128xf32>
    %1424 = arith.index_cast %c61_i32 : i32 to index
    %c0_498 = arith.constant 0 : index
    %c0_499 = arith.constant 0 : index
    %1425 = vector.load %arg4[%1424, %c0_498, %c0_499] : memref<70x8x128xf32, #tpu.memory_space<vmem>>, vector<1x8x128xf32>
    %1426 = vector.shape_cast %1425 : vector<1x8x128xf32> to vector<8x128xf32>
    %1427 = vector.shape_cast %1423 : vector<8x128xf32> to vector<1x8x128xf32>
    tpu.vector_store %arg4[%1424, %c0_498, %c0_499], %1427 {strides = array<i32>} : memref<70x8x128xf32, #tpu.memory_space<vmem>>, vector<1x8x128xf32>,
    %c62_i32 = arith.constant 62 : i32
    %cst_500 = arith.constant 3.000000e+00 : f32
    %1428 = vector.broadcast %cst_500 : f32 to vector<8x128xf32>
    %1429 = arith.mulf %1428, %1423 : vector<8x128xf32>
    %cst_501 = arith.constant 2.000000e+00 : f32
    %1430 = vector.broadcast %cst_501 : f32 to vector<8x128xf32>
    %1431 = arith.subf %1429, %1430 : vector<8x128xf32>
    %1432 = arith.negf %1431 : vector<8x128xf32>
    %1433 = math.exp %1432 : vector<8x128xf32>
    %cst_502 = arith.constant 1.000000e+00 : f32
    %1434 = vector.broadcast %cst_502 : f32 to vector<8x128xf32>
    %1435 = arith.addf %1434, %1433 : vector<8x128xf32>
    %1436 = arith.divf %1434, %1435 : vector<8x128xf32>
    %cst_503 = arith.constant dense<0.000000e+00> : vector<8x128xf32>
    %1437 = tpu.matmul %1436, %0, %cst_503 {dimension_numbers = #tpu.dot_dimension_numbers<[1], [0], [0], [1], [0, 0, 1, 1], [], []>} : vector<8x128xf32>, vector<128x128xf32>, vector<8x128xf32> -> vector<8x128xf32>
    %1438 = vector.broadcast %cst : f32 to vector<8x128xf32>
    %1439 = arith.mulf %1423, %1438 : vector<8x128xf32>
    %1440 = arith.index_cast %c62_i32 : i32 to index
    %c0_504 = arith.constant 0 : index
    %c0_505 = arith.constant 0 : index
    %1441 = vector.load %arg1[%1440, %c0_504, %c0_505] : memref<70x8x128xf32, #tpu.memory_space<vmem>>, vector<1x8x128xf32>
    %1442 = vector.shape_cast %1441 : vector<1x8x128xf32> to vector<8x128xf32>
    %1443 = arith.addf %1437, %1442 : vector<8x128xf32>
    %1444 = vector.broadcast %cst_3 : f32 to vector<8x128xf32>
    %1445 = arith.mulf %1443, %1444 : vector<8x128xf32>
    %1446 = arith.addf %1439, %1445 : vector<8x128xf32>
    %1447 = arith.index_cast %c62_i32 : i32 to index
    %c0_506 = arith.constant 0 : index
    %c0_507 = arith.constant 0 : index
    %1448 = vector.load %arg4[%1447, %c0_506, %c0_507] : memref<70x8x128xf32, #tpu.memory_space<vmem>>, vector<1x8x128xf32>
    %1449 = vector.shape_cast %1448 : vector<1x8x128xf32> to vector<8x128xf32>
    %1450 = vector.shape_cast %1446 : vector<8x128xf32> to vector<1x8x128xf32>
    tpu.vector_store %arg4[%1447, %c0_506, %c0_507], %1450 {strides = array<i32>} : memref<70x8x128xf32, #tpu.memory_space<vmem>>, vector<1x8x128xf32>,
    %c63_i32 = arith.constant 63 : i32
    %cst_508 = arith.constant 3.000000e+00 : f32
    %1451 = vector.broadcast %cst_508 : f32 to vector<8x128xf32>
    %1452 = arith.mulf %1451, %1446 : vector<8x128xf32>
    %cst_509 = arith.constant 2.000000e+00 : f32
    %1453 = vector.broadcast %cst_509 : f32 to vector<8x128xf32>
    %1454 = arith.subf %1452, %1453 : vector<8x128xf32>
    %1455 = arith.negf %1454 : vector<8x128xf32>
    %1456 = math.exp %1455 : vector<8x128xf32>
    %cst_510 = arith.constant 1.000000e+00 : f32
    %1457 = vector.broadcast %cst_510 : f32 to vector<8x128xf32>
    %1458 = arith.addf %1457, %1456 : vector<8x128xf32>
    %1459 = arith.divf %1457, %1458 : vector<8x128xf32>
    %cst_511 = arith.constant dense<0.000000e+00> : vector<8x128xf32>
    %1460 = tpu.matmul %1459, %0, %cst_511 {dimension_numbers = #tpu.dot_dimension_numbers<[1], [0], [0], [1], [0, 0, 1, 1], [], []>} : vector<8x128xf32>, vector<128x128xf32>, vector<8x128xf32> -> vector<8x128xf32>
    %1461 = vector.broadcast %cst : f32 to vector<8x128xf32>
    %1462 = arith.mulf %1446, %1461 : vector<8x128xf32>
    %1463 = arith.index_cast %c63_i32 : i32 to index
    %c0_512 = arith.constant 0 : index
    %c0_513 = arith.constant 0 : index
    %1464 = vector.load %arg1[%1463, %c0_512, %c0_513] : memref<70x8x128xf32, #tpu.memory_space<vmem>>, vector<1x8x128xf32>
    %1465 = vector.shape_cast %1464 : vector<1x8x128xf32> to vector<8x128xf32>
    %1466 = arith.addf %1460, %1465 : vector<8x128xf32>
    %1467 = vector.broadcast %cst_3 : f32 to vector<8x128xf32>
    %1468 = arith.mulf %1466, %1467 : vector<8x128xf32>
    %1469 = arith.addf %1462, %1468 : vector<8x128xf32>
    %1470 = arith.index_cast %c63_i32 : i32 to index
    %c0_514 = arith.constant 0 : index
    %c0_515 = arith.constant 0 : index
    %1471 = vector.load %arg4[%1470, %c0_514, %c0_515] : memref<70x8x128xf32, #tpu.memory_space<vmem>>, vector<1x8x128xf32>
    %1472 = vector.shape_cast %1471 : vector<1x8x128xf32> to vector<8x128xf32>
    %1473 = vector.shape_cast %1469 : vector<8x128xf32> to vector<1x8x128xf32>
    tpu.vector_store %arg4[%1470, %c0_514, %c0_515], %1473 {strides = array<i32>} : memref<70x8x128xf32, #tpu.memory_space<vmem>>, vector<1x8x128xf32>,
    %c64_i32 = arith.constant 64 : i32
    %cst_516 = arith.constant 3.000000e+00 : f32
    %1474 = vector.broadcast %cst_516 : f32 to vector<8x128xf32>
    %1475 = arith.mulf %1474, %1469 : vector<8x128xf32>
    %cst_517 = arith.constant 2.000000e+00 : f32
    %1476 = vector.broadcast %cst_517 : f32 to vector<8x128xf32>
    %1477 = arith.subf %1475, %1476 : vector<8x128xf32>
    %1478 = arith.negf %1477 : vector<8x128xf32>
    %1479 = math.exp %1478 : vector<8x128xf32>
    %cst_518 = arith.constant 1.000000e+00 : f32
    %1480 = vector.broadcast %cst_518 : f32 to vector<8x128xf32>
    %1481 = arith.addf %1480, %1479 : vector<8x128xf32>
    %1482 = arith.divf %1480, %1481 : vector<8x128xf32>
    %cst_519 = arith.constant dense<0.000000e+00> : vector<8x128xf32>
    %1483 = tpu.matmul %1482, %0, %cst_519 {dimension_numbers = #tpu.dot_dimension_numbers<[1], [0], [0], [1], [0, 0, 1, 1], [], []>} : vector<8x128xf32>, vector<128x128xf32>, vector<8x128xf32> -> vector<8x128xf32>
    %1484 = vector.broadcast %cst : f32 to vector<8x128xf32>
    %1485 = arith.mulf %1469, %1484 : vector<8x128xf32>
    %1486 = arith.index_cast %c64_i32 : i32 to index
    %c0_520 = arith.constant 0 : index
    %c0_521 = arith.constant 0 : index
    %1487 = vector.load %arg1[%1486, %c0_520, %c0_521] : memref<70x8x128xf32, #tpu.memory_space<vmem>>, vector<1x8x128xf32>
    %1488 = vector.shape_cast %1487 : vector<1x8x128xf32> to vector<8x128xf32>
    %1489 = arith.addf %1483, %1488 : vector<8x128xf32>
    %1490 = vector.broadcast %cst_3 : f32 to vector<8x128xf32>
    %1491 = arith.mulf %1489, %1490 : vector<8x128xf32>
    %1492 = arith.addf %1485, %1491 : vector<8x128xf32>
    %1493 = arith.index_cast %c64_i32 : i32 to index
    %c0_522 = arith.constant 0 : index
    %c0_523 = arith.constant 0 : index
    %1494 = vector.load %arg4[%1493, %c0_522, %c0_523] : memref<70x8x128xf32, #tpu.memory_space<vmem>>, vector<1x8x128xf32>
    %1495 = vector.shape_cast %1494 : vector<1x8x128xf32> to vector<8x128xf32>
    %1496 = vector.shape_cast %1492 : vector<8x128xf32> to vector<1x8x128xf32>
    tpu.vector_store %arg4[%1493, %c0_522, %c0_523], %1496 {strides = array<i32>} : memref<70x8x128xf32, #tpu.memory_space<vmem>>, vector<1x8x128xf32>,
    %c65_i32 = arith.constant 65 : i32
    %cst_524 = arith.constant 3.000000e+00 : f32
    %1497 = vector.broadcast %cst_524 : f32 to vector<8x128xf32>
    %1498 = arith.mulf %1497, %1492 : vector<8x128xf32>
    %cst_525 = arith.constant 2.000000e+00 : f32
    %1499 = vector.broadcast %cst_525 : f32 to vector<8x128xf32>
    %1500 = arith.subf %1498, %1499 : vector<8x128xf32>
    %1501 = arith.negf %1500 : vector<8x128xf32>
    %1502 = math.exp %1501 : vector<8x128xf32>
    %cst_526 = arith.constant 1.000000e+00 : f32
    %1503 = vector.broadcast %cst_526 : f32 to vector<8x128xf32>
    %1504 = arith.addf %1503, %1502 : vector<8x128xf32>
    %1505 = arith.divf %1503, %1504 : vector<8x128xf32>
    %cst_527 = arith.constant dense<0.000000e+00> : vector<8x128xf32>
    %1506 = tpu.matmul %1505, %0, %cst_527 {dimension_numbers = #tpu.dot_dimension_numbers<[1], [0], [0], [1], [0, 0, 1, 1], [], []>} : vector<8x128xf32>, vector<128x128xf32>, vector<8x128xf32> -> vector<8x128xf32>
    %1507 = vector.broadcast %cst : f32 to vector<8x128xf32>
    %1508 = arith.mulf %1492, %1507 : vector<8x128xf32>
    %1509 = arith.index_cast %c65_i32 : i32 to index
    %c0_528 = arith.constant 0 : index
    %c0_529 = arith.constant 0 : index
    %1510 = vector.load %arg1[%1509, %c0_528, %c0_529] : memref<70x8x128xf32, #tpu.memory_space<vmem>>, vector<1x8x128xf32>
    %1511 = vector.shape_cast %1510 : vector<1x8x128xf32> to vector<8x128xf32>
    %1512 = arith.addf %1506, %1511 : vector<8x128xf32>
    %1513 = vector.broadcast %cst_3 : f32 to vector<8x128xf32>
    %1514 = arith.mulf %1512, %1513 : vector<8x128xf32>
    %1515 = arith.addf %1508, %1514 : vector<8x128xf32>
    %1516 = arith.index_cast %c65_i32 : i32 to index
    %c0_530 = arith.constant 0 : index
    %c0_531 = arith.constant 0 : index
    %1517 = vector.load %arg4[%1516, %c0_530, %c0_531] : memref<70x8x128xf32, #tpu.memory_space<vmem>>, vector<1x8x128xf32>
    %1518 = vector.shape_cast %1517 : vector<1x8x128xf32> to vector<8x128xf32>
    %1519 = vector.shape_cast %1515 : vector<8x128xf32> to vector<1x8x128xf32>
    tpu.vector_store %arg4[%1516, %c0_530, %c0_531], %1519 {strides = array<i32>} : memref<70x8x128xf32, #tpu.memory_space<vmem>>, vector<1x8x128xf32>,
    %c66_i32 = arith.constant 66 : i32
    %cst_532 = arith.constant 3.000000e+00 : f32
    %1520 = vector.broadcast %cst_532 : f32 to vector<8x128xf32>
    %1521 = arith.mulf %1520, %1515 : vector<8x128xf32>
    %cst_533 = arith.constant 2.000000e+00 : f32
    %1522 = vector.broadcast %cst_533 : f32 to vector<8x128xf32>
    %1523 = arith.subf %1521, %1522 : vector<8x128xf32>
    %1524 = arith.negf %1523 : vector<8x128xf32>
    %1525 = math.exp %1524 : vector<8x128xf32>
    %cst_534 = arith.constant 1.000000e+00 : f32
    %1526 = vector.broadcast %cst_534 : f32 to vector<8x128xf32>
    %1527 = arith.addf %1526, %1525 : vector<8x128xf32>
    %1528 = arith.divf %1526, %1527 : vector<8x128xf32>
    %cst_535 = arith.constant dense<0.000000e+00> : vector<8x128xf32>
    %1529 = tpu.matmul %1528, %0, %cst_535 {dimension_numbers = #tpu.dot_dimension_numbers<[1], [0], [0], [1], [0, 0, 1, 1], [], []>} : vector<8x128xf32>, vector<128x128xf32>, vector<8x128xf32> -> vector<8x128xf32>
    %1530 = vector.broadcast %cst : f32 to vector<8x128xf32>
    %1531 = arith.mulf %1515, %1530 : vector<8x128xf32>
    %1532 = arith.index_cast %c66_i32 : i32 to index
    %c0_536 = arith.constant 0 : index
    %c0_537 = arith.constant 0 : index
    %1533 = vector.load %arg1[%1532, %c0_536, %c0_537] : memref<70x8x128xf32, #tpu.memory_space<vmem>>, vector<1x8x128xf32>
    %1534 = vector.shape_cast %1533 : vector<1x8x128xf32> to vector<8x128xf32>
    %1535 = arith.addf %1529, %1534 : vector<8x128xf32>
    %1536 = vector.broadcast %cst_3 : f32 to vector<8x128xf32>
    %1537 = arith.mulf %1535, %1536 : vector<8x128xf32>
    %1538 = arith.addf %1531, %1537 : vector<8x128xf32>
    %1539 = arith.index_cast %c66_i32 : i32 to index
    %c0_538 = arith.constant 0 : index
    %c0_539 = arith.constant 0 : index
    %1540 = vector.load %arg4[%1539, %c0_538, %c0_539] : memref<70x8x128xf32, #tpu.memory_space<vmem>>, vector<1x8x128xf32>
    %1541 = vector.shape_cast %1540 : vector<1x8x128xf32> to vector<8x128xf32>
    %1542 = vector.shape_cast %1538 : vector<8x128xf32> to vector<1x8x128xf32>
    tpu.vector_store %arg4[%1539, %c0_538, %c0_539], %1542 {strides = array<i32>} : memref<70x8x128xf32, #tpu.memory_space<vmem>>, vector<1x8x128xf32>,
    %c67_i32 = arith.constant 67 : i32
    %cst_540 = arith.constant 3.000000e+00 : f32
    %1543 = vector.broadcast %cst_540 : f32 to vector<8x128xf32>
    %1544 = arith.mulf %1543, %1538 : vector<8x128xf32>
    %cst_541 = arith.constant 2.000000e+00 : f32
    %1545 = vector.broadcast %cst_541 : f32 to vector<8x128xf32>
    %1546 = arith.subf %1544, %1545 : vector<8x128xf32>
    %1547 = arith.negf %1546 : vector<8x128xf32>
    %1548 = math.exp %1547 : vector<8x128xf32>
    %cst_542 = arith.constant 1.000000e+00 : f32
    %1549 = vector.broadcast %cst_542 : f32 to vector<8x128xf32>
    %1550 = arith.addf %1549, %1548 : vector<8x128xf32>
    %1551 = arith.divf %1549, %1550 : vector<8x128xf32>
    %cst_543 = arith.constant dense<0.000000e+00> : vector<8x128xf32>
    %1552 = tpu.matmul %1551, %0, %cst_543 {dimension_numbers = #tpu.dot_dimension_numbers<[1], [0], [0], [1], [0, 0, 1, 1], [], []>} : vector<8x128xf32>, vector<128x128xf32>, vector<8x128xf32> -> vector<8x128xf32>
    %1553 = vector.broadcast %cst : f32 to vector<8x128xf32>
    %1554 = arith.mulf %1538, %1553 : vector<8x128xf32>
    %1555 = arith.index_cast %c67_i32 : i32 to index
    %c0_544 = arith.constant 0 : index
    %c0_545 = arith.constant 0 : index
    %1556 = vector.load %arg1[%1555, %c0_544, %c0_545] : memref<70x8x128xf32, #tpu.memory_space<vmem>>, vector<1x8x128xf32>
    %1557 = vector.shape_cast %1556 : vector<1x8x128xf32> to vector<8x128xf32>
    %1558 = arith.addf %1552, %1557 : vector<8x128xf32>
    %1559 = vector.broadcast %cst_3 : f32 to vector<8x128xf32>
    %1560 = arith.mulf %1558, %1559 : vector<8x128xf32>
    %1561 = arith.addf %1554, %1560 : vector<8x128xf32>
    %1562 = arith.index_cast %c67_i32 : i32 to index
    %c0_546 = arith.constant 0 : index
    %c0_547 = arith.constant 0 : index
    %1563 = vector.load %arg4[%1562, %c0_546, %c0_547] : memref<70x8x128xf32, #tpu.memory_space<vmem>>, vector<1x8x128xf32>
    %1564 = vector.shape_cast %1563 : vector<1x8x128xf32> to vector<8x128xf32>
    %1565 = vector.shape_cast %1561 : vector<8x128xf32> to vector<1x8x128xf32>
    tpu.vector_store %arg4[%1562, %c0_546, %c0_547], %1565 {strides = array<i32>} : memref<70x8x128xf32, #tpu.memory_space<vmem>>, vector<1x8x128xf32>,
    %c68_i32 = arith.constant 68 : i32
    %cst_548 = arith.constant 3.000000e+00 : f32
    %1566 = vector.broadcast %cst_548 : f32 to vector<8x128xf32>
    %1567 = arith.mulf %1566, %1561 : vector<8x128xf32>
    %cst_549 = arith.constant 2.000000e+00 : f32
    %1568 = vector.broadcast %cst_549 : f32 to vector<8x128xf32>
    %1569 = arith.subf %1567, %1568 : vector<8x128xf32>
    %1570 = arith.negf %1569 : vector<8x128xf32>
    %1571 = math.exp %1570 : vector<8x128xf32>
    %cst_550 = arith.constant 1.000000e+00 : f32
    %1572 = vector.broadcast %cst_550 : f32 to vector<8x128xf32>
    %1573 = arith.addf %1572, %1571 : vector<8x128xf32>
    %1574 = arith.divf %1572, %1573 : vector<8x128xf32>
    %cst_551 = arith.constant dense<0.000000e+00> : vector<8x128xf32>
    %1575 = tpu.matmul %1574, %0, %cst_551 {dimension_numbers = #tpu.dot_dimension_numbers<[1], [0], [0], [1], [0, 0, 1, 1], [], []>} : vector<8x128xf32>, vector<128x128xf32>, vector<8x128xf32> -> vector<8x128xf32>
    %1576 = vector.broadcast %cst : f32 to vector<8x128xf32>
    %1577 = arith.mulf %1561, %1576 : vector<8x128xf32>
    %1578 = arith.index_cast %c68_i32 : i32 to index
    %c0_552 = arith.constant 0 : index
    %c0_553 = arith.constant 0 : index
    %1579 = vector.load %arg1[%1578, %c0_552, %c0_553] : memref<70x8x128xf32, #tpu.memory_space<vmem>>, vector<1x8x128xf32>
    %1580 = vector.shape_cast %1579 : vector<1x8x128xf32> to vector<8x128xf32>
    %1581 = arith.addf %1575, %1580 : vector<8x128xf32>
    %1582 = vector.broadcast %cst_3 : f32 to vector<8x128xf32>
    %1583 = arith.mulf %1581, %1582 : vector<8x128xf32>
    %1584 = arith.addf %1577, %1583 : vector<8x128xf32>
    %1585 = arith.index_cast %c68_i32 : i32 to index
    %c0_554 = arith.constant 0 : index
    %c0_555 = arith.constant 0 : index
    %1586 = vector.load %arg4[%1585, %c0_554, %c0_555] : memref<70x8x128xf32, #tpu.memory_space<vmem>>, vector<1x8x128xf32>
    %1587 = vector.shape_cast %1586 : vector<1x8x128xf32> to vector<8x128xf32>
    %1588 = vector.shape_cast %1584 : vector<8x128xf32> to vector<1x8x128xf32>
    tpu.vector_store %arg4[%1585, %c0_554, %c0_555], %1588 {strides = array<i32>} : memref<70x8x128xf32, #tpu.memory_space<vmem>>, vector<1x8x128xf32>,
    %c69_i32 = arith.constant 69 : i32
    %cst_556 = arith.constant 3.000000e+00 : f32
    %1589 = vector.broadcast %cst_556 : f32 to vector<8x128xf32>
    %1590 = arith.mulf %1589, %1584 : vector<8x128xf32>
    %cst_557 = arith.constant 2.000000e+00 : f32
    %1591 = vector.broadcast %cst_557 : f32 to vector<8x128xf32>
    %1592 = arith.subf %1590, %1591 : vector<8x128xf32>
    %1593 = arith.negf %1592 : vector<8x128xf32>
    %1594 = math.exp %1593 : vector<8x128xf32>
    %cst_558 = arith.constant 1.000000e+00 : f32
    %1595 = vector.broadcast %cst_558 : f32 to vector<8x128xf32>
    %1596 = arith.addf %1595, %1594 : vector<8x128xf32>
    %1597 = arith.divf %1595, %1596 : vector<8x128xf32>
    %cst_559 = arith.constant dense<0.000000e+00> : vector<8x128xf32>
    %1598 = tpu.matmul %1597, %0, %cst_559 {dimension_numbers = #tpu.dot_dimension_numbers<[1], [0], [0], [1], [0, 0, 1, 1], [], []>} : vector<8x128xf32>, vector<128x128xf32>, vector<8x128xf32> -> vector<8x128xf32>
    %1599 = vector.broadcast %cst : f32 to vector<8x128xf32>
    %1600 = arith.mulf %1584, %1599 : vector<8x128xf32>
    %1601 = arith.index_cast %c69_i32 : i32 to index
    %c0_560 = arith.constant 0 : index
    %c0_561 = arith.constant 0 : index
    %1602 = vector.load %arg1[%1601, %c0_560, %c0_561] : memref<70x8x128xf32, #tpu.memory_space<vmem>>, vector<1x8x128xf32>
    %1603 = vector.shape_cast %1602 : vector<1x8x128xf32> to vector<8x128xf32>
    %1604 = arith.addf %1598, %1603 : vector<8x128xf32>
    %1605 = vector.broadcast %cst_3 : f32 to vector<8x128xf32>
    %1606 = arith.mulf %1604, %1605 : vector<8x128xf32>
    %1607 = arith.addf %1600, %1606 : vector<8x128xf32>
    %1608 = arith.index_cast %c69_i32 : i32 to index
    %c0_562 = arith.constant 0 : index
    %c0_563 = arith.constant 0 : index
    %1609 = vector.load %arg4[%1608, %c0_562, %c0_563] : memref<70x8x128xf32, #tpu.memory_space<vmem>>, vector<1x8x128xf32>
    %1610 = vector.shape_cast %1609 : vector<1x8x128xf32> to vector<8x128xf32>
    %1611 = vector.shape_cast %1607 : vector<8x128xf32> to vector<1x8x128xf32>
    tpu.vector_store %arg4[%1608, %c0_562, %c0_563], %1611 {strides = array<i32>} : memref<70x8x128xf32, #tpu.memory_space<vmem>>, vector<1x8x128xf32>,
    %c70_i32 = arith.constant 70 : i32
    return
  }
  func.func @transform_0(%arg0: i32) -> (i32, i32, i32) {
    %c0_i32 = arith.constant 0 : i32
    %c0_i32_0 = arith.constant 0 : i32
    %c0_i32_1 = arith.constant 0 : i32
    %c0_i32_2 = arith.constant 0 : i32
    return %c0_i32, %c0_i32_0, %c0_i32_1 : i32, i32, i32
  }
  func.func @transform_1(%arg0: i32) -> (i32, i32) {
    %c0_i32 = arith.constant 0 : i32
    %c0_i32_0 = arith.constant 0 : i32
    %c0_i32_1 = arith.constant 0 : i32
    return %c0_i32, %c0_i32_0 : i32, i32
  }
  func.func @transform_2(%arg0: i32) -> (i32, i32) {
    %c0_i32 = arith.constant 0 : i32
    %c0_i32_0 = arith.constant 0 : i32
    %c0_i32_1 = arith.constant 0 : i32
    return %c0_i32, %c0_i32_0 : i32, i32
  }
  func.func @transform_3(%arg0: i32) -> (i32, i32, i32) {
    %c0_i32 = arith.constant 0 : i32
    %c0_i32_0 = arith.constant 0 : i32
    %c0_i32_1 = arith.constant 0 : i32
    %c0_i32_2 = arith.constant 0 : i32
    return %c0_i32, %c0_i32_0, %c0_i32_1 : i32, i32, i32
  }
}

</mosaic_0001>

<bundles_post_ra>
// kernel: run.2
= control target key start
LH: loop header
LB: loop body
LE: loop exit
PB: predicated region body
PF: predicated region fallthrough
CT: control target
= control target key end

     0   :  { %s6078_s1 = inlined_call_operand.vmem [shape: f32[128,128], index: 1, kind: input, shape index: {}]   ;;  %s6079_s2 = inlined_call_operand.vmem [shape: f32[8,128], index: 2, kind: input, shape index: {}]   ;;  %s6080_s0 = inlined_call_operand.vmem [shape: f32[70,8,128], index: 0, kind: input, shape index: {}]   ;;  %s6081_s3 = inlined_call_operand.vmem [shape: f32[70,8,128], index: 3, kind: output, shape index: {}]  }
   0x1   :  { %v4054_v0 = vld [vmem:[%s6078_s1 + $0x78] sm:$0xff]  ;;  %v4059_v1 = vld [vmem:[%s6078_s1 + $0x70] sm:$0xff]  ;;  %v4066_v2 = vld [vmem:[%s6078_s1 + $0x68] sm:$0xff] }
   0x2   :  { %54 = vmatpush.msra.mxu0 %v4054_v0  ;;  %101 = vmatpush.msra.mxu1 %v4054_v0  ;;  %v4075_v3 = vld [vmem:[%s6078_s1 + $0x60] sm:$0xff]  ;;  %v4089_v5 = vld [vmem:[%s6078_s1 + $0x58] sm:$0xff]  ;;  %v4099_v7 = vld [vmem:[%s6078_s1 + $0x50] sm:$0xff] }
   0x3   :  { %149 = vmatpush.msra.mxu2 %v4054_v0  ;;  %197 = vmatpush.msra.mxu3 %v4054_v0  ;;  %v4083_v4 = vld [vmem:[%s6079_s2] sm:$0xff]  ;;  %v4108_v9 = vld [vmem:[%s6078_s1 + $0x48] sm:$0xff]  ;;  %v4126_v12 = vld [vmem:[%s6078_s1 + $0x38] sm:$0xff] }
   0x4   :  { %55 = vmatpush.msra.mxu0 %v4059_v1  ;;  %102 = vmatpush.msra.mxu1 %v4059_v1  ;;  %v31_v6 = vmul.f32 3.0, %v4083_v4  ;;  %v4117_v11 = vld [vmem:[%s6078_s1 + $0x40] sm:$0xff]  ;;  %v4135_v13 = vld [vmem:[%s6078_s1 + $0x30] sm:$0xff]  ;;  %v4144_v15 = vld [vmem:[%s6078_s1 + $0x28] sm:$0xff]  ;;  %v52_v34 = vmul.f32 0.9, %v4083_v4 }
   0x5   :  { %150 = vmatpush.msra.mxu2 %v4059_v1  ;;  %198 = vmatpush.msra.mxu3 %v4059_v1  ;;  %v4153_v17 = vld [vmem:[%s6078_s1 + $0x20] sm:$0xff]  ;;  %v4162_v18 = vld [vmem:[%s6078_s1 + $0x18] sm:$0xff]  ;;  %v4171_v19 = vld [vmem:[%s6078_s1 + $0x10] sm:$0xff] }
   0x6   :  { %56 = vmatpush.msra.mxu0 %v4066_v2  ;;  %103 = vmatpush.msra.mxu1 %v4066_v2  ;;  %v3393_v8 = vadd.f32 -2.0, %v31_v6  ;;  %v4180_v20 = vld [vmem:[%s6078_s1 + $0x8] sm:$0xff]  ;;  %v4189_v22 = vld [vmem:[%s6078_s1] sm:$0xff] }
   0x7   :  { %151 = vmatpush.msra.mxu2 %v4066_v2  ;;  %199 = vmatpush.msra.mxu3 %v4066_v2  ;;  %v53_v32 = vld [vmem:[%s6080_s0] sm:$0xff]  ;;  %v3397_v53 = vld [vmem:[%s6080_s0 + $0x8] sm:$0xff] }
   0x8   :  { %57 = vmatpush.msra.mxu0 %v4075_v3  ;;  %104 = vmatpush.msra.mxu1 %v4075_v3  ;;  %v3394_v10 = vmul.f32 -1.442695, %v3393_v8 }
   0x9   :  { %152 = vmatpush.msra.mxu2 %v4075_v3  ;;  %200 = vmatpush.msra.mxu3 %v4075_v3 }
   0xa   :  { %58 = vmatpush.msra.mxu0 %v4089_v5  ;;  %105 = vmatpush.msra.mxu1 %v4089_v5  ;;  %3671 = vpow2.f32 %v3394_v10 }
   0xb   :  { %153 = vmatpush.msra.mxu2 %v4089_v5  ;;  %201 = vmatpush.msra.mxu3 %v4089_v5 }
   0xc   :  { %59 = vmatpush.msra.mxu0 %v4099_v7  ;;  %106 = vmatpush.msra.mxu1 %v4099_v7 }
   0xd   :  { %154 = vmatpush.msra.mxu2 %v4099_v7  ;;  %202 = vmatpush.msra.mxu3 %v4099_v7 }
   0xe   :  { %60 = vmatpush.msra.mxu0 %v4108_v9  ;;  %107 = vmatpush.msra.mxu1 %v4108_v9 }
   0xf   :  { %155 = vmatpush.msra.mxu2 %v4108_v9  ;;  %203 = vmatpush.msra.mxu3 %v4108_v9 }
  0x10   :  { %61 = vmatpush.msra.mxu0 %v4117_v11  ;;  %108 = vmatpush.msra.mxu1 %v4117_v11  ;;  %v3672_v14 = vpop.eup %3671 }
  0x11   :  { %156 = vmatpush.msra.mxu2 %v4117_v11  ;;  %204 = vmatpush.msra.mxu3 %v4117_v11  ;;  %v36_v16 = vadd.f32 1.0, %v3672_v14 }
  0x12   :  { %62 = vmatpush.msra.mxu0 %v4126_v12  ;;  %109 = vmatpush.msra.mxu1 %v4126_v12 }
  0x13   :  { %157 = vmatpush.msra.mxu2 %v4126_v12  ;;  %205 = vmatpush.msra.mxu3 %v4126_v12  ;;  %3673 = vrcp.f32 %v36_v16  ;;  %v48_v24 = vand.u32 2147483648, %v36_v16  ;;  %vm42_vm0 = vweird.f32 %v36_v16  ;;  %v46_v26 = vand.u32 2147483647, %v36_v16 }
  0x14   :  { %63 = vmatpush.msra.mxu0 %v4135_v13  ;;  %110 = vmatpush.msra.mxu1 %v4135_v13 }
  0x15   :  { %158 = vmatpush.msra.mxu2 %v4135_v13  ;;  %206 = vmatpush.msra.mxu3 %v4135_v13  ;;  %v49_v28 = vor.u32 1.1754944e-38, %v48_v24  ;;  %vm47_vm3 = vcmp.eq.f32.partialorder %v46_v26, 8.507059e+37  ;;  %v3401_v26 = vld [vmem:[%s6080_s0 + $0x10] sm:$0xff] }
  0x16   :  { %64 = vmatpush.msra.mxu0 %v4144_v15  ;;  %111 = vmatpush.msra.mxu1 %v4144_v15 }
  0x17   :  { %159 = vmatpush.msra.mxu2 %v4144_v15  ;;  %207 = vmatpush.msra.mxu3 %v4144_v15 }
  0x18   :  { %65 = vmatpush.msra.mxu0 %v4153_v17  ;;  %112 = vmatpush.msra.mxu1 %v4153_v17 }
  0x19   :  { %160 = vmatpush.msra.mxu2 %v4153_v17  ;;  %208 = vmatpush.msra.mxu3 %v4153_v17  ;;  %v3674_v21 = vpop.eup %3673 }
  0x1a   :  { %66 = vmatpush.msra.mxu0 %v4162_v18  ;;  %113 = vmatpush.msra.mxu1 %v4162_v18  ;;  %v38_v23 = vmul.f32 %v3674_v21, %v36_v16  ;;  %vm43_vm1 = vweird.f32 %v3674_v21 }
  0x1b   :  { %161 = vmatpush.msra.mxu2 %v4162_v18  ;;  %209 = vmatpush.msra.mxu3 %v4162_v18  ;;  %vm44_vm2 = vmor %vm42_vm0, %vm43_vm1 }
  0x1c   :  { %67 = vmatpush.msra.mxu0 %v4171_v19  ;;  %114 = vmatpush.msra.mxu1 %v4171_v19  ;;  %v39_v25 = vsub.f32 1.0, %v38_v23 }
  0x1d   :  { %162 = vmatpush.msra.mxu2 %v4171_v19  ;;  %210 = vmatpush.msra.mxu3 %v4171_v19 }
  0x1e   :  { %68 = vmatpush.msra.mxu0 %v4180_v20  ;;  %115 = vmatpush.msra.mxu1 %v4180_v20  ;;  %v40_v27 = vmul.f32 %v3674_v21, %v39_v25 }
  0x1f   :  { %163 = vmatpush.msra.mxu2 %v4180_v20  ;;  %211 = vmatpush.msra.mxu3 %v4180_v20 }
  0x20   :  { %69 = vmatpush.msra.mxu0 %v4189_v22  ;;  %116 = vmatpush.msra.mxu1 %v4189_v22  ;;  %v41_v29 = vadd.f32 %v3674_v21, %v40_v27 }
  0x21   :  { %164 = vmatpush.msra.mxu2 %v4189_v22  ;;  %212 = vmatpush.msra.mxu3 %v4189_v22 }
  0x22   :  { %245 = vmatpush.msrb.mxu0 %v4054_v0  ;;  %293 = vmatpush.msrb.mxu1 %v4054_v0  ;;  %v45_v30 = vsel %vm44_vm2, %v3674_v21, %v41_v29 }
  0x23   :  { %341 = vmatpush.msrb.mxu2 %v4054_v0  ;;  %389 = vmatpush.msrb.mxu3 %v4054_v0  ;;  %v50_v31 = vsel %vm47_vm3, %v49_v28, %v45_v30 }
  0x24   :  { %246 = vmatpush.msrb.mxu0 %v4059_v1  ;;  %294 = vmatpush.msrb.mxu1 %v4059_v1 }
  0x25   :  { %342 = vmatpush.msrb.mxu2 %v4059_v1  ;;  %390 = vmatpush.msrb.mxu3 %v4059_v1 }
  0x26   :  { %247 = vmatpush.msrb.mxu0 %v4066_v2  ;;  %295 = vmatpush.msrb.mxu1 %v4066_v2 }
  0x27   :  { %70 = vmatmul.f32.vlgmr.msra.gmra.mxu0 %v50_v31  ;;  %343 = vmatpush.msrb.mxu2 %v4066_v2 }
  0x28   :  { %248 = vmatpush.msrb.mxu0 %v4075_v3  ;;  %296 = vmatpush.msrb.mxu1 %v4075_v3 }
  0x29   :  { %344 = vmatpush.msrb.mxu2 %v4075_v3  ;;  %391 = vmatpush.msrb.mxu3 %v4066_v2 }
  0x2a   :  { %249 = vmatpush.msrb.mxu0 %v4089_v5  ;;  %297 = vmatpush.msrb.mxu1 %v4089_v5 }
  0x2b   :  { %345 = vmatpush.msrb.mxu2 %v4089_v5  ;;  %392 = vmatpush.msrb.mxu3 %v4075_v3 }
  0x2c   :  { %250 = vmatpush.msrb.mxu0 %v4099_v7  ;;  %298 = vmatpush.msrb.mxu1 %v4099_v7 }
  0x2d   :  { %346 = vmatpush.msrb.mxu2 %v4099_v7  ;;  %393 = vmatpush.msrb.mxu3 %v4089_v5 }
  0x2e   :  { %251 = vmatpush.msrb.mxu0 %v4108_v9  ;;  %299 = vmatpush.msrb.mxu1 %v4108_v9 }
  0x2f   :  { %347 = vmatpush.msrb.mxu2 %v4108_v9  ;;  %394 = vmatpush.msrb.mxu3 %v4099_v7 }
  0x30   :  { %252 = vmatpush.msrb.mxu0 %v4117_v11  ;;  %300 = vmatpush.msrb.mxu1 %v4117_v11 }
  0x31   :  { %348 = vmatpush.msrb.mxu2 %v4117_v11  ;;  %395 = vmatpush.msrb.mxu3 %v4108_v9 }
  0x32   :  { %253 = vmatpush.msrb.mxu0 %v4126_v12  ;;  %301 = vmatpush.msrb.mxu1 %v4126_v12 }
  0x33   :  { %349 = vmatpush.msrb.mxu2 %v4126_v12  ;;  %396 = vmatpush.msrb.mxu3 %v4117_v11 }
  0x34   :  { %254 = vmatpush.msrb.mxu0 %v4135_v13  ;;  %302 = vmatpush.msrb.mxu1 %v4135_v13 }
  0x35   :  { %350 = vmatpush.msrb.mxu2 %v4135_v13  ;;  %397 = vmatpush.msrb.mxu3 %v4126_v12 }
  0x36   :  { %255 = vmatpush.msrb.mxu0 %v4144_v15  ;;  %303 = vmatpush.msrb.mxu1 %v4144_v15 }
  0x37   :  { %351 = vmatpush.msrb.mxu2 %v4144_v15  ;;  %398 = vmatpush.msrb.mxu3 %v4135_v13 }
  0x38   :  { %256 = vmatpush.msrb.mxu0 %v4153_v17  ;;  %304 = vmatpush.msrb.mxu1 %v4153_v17 }
  0x39   :  { %352 = vmatpush.msrb.mxu2 %v4153_v17  ;;  %399 = vmatpush.msrb.mxu3 %v4144_v15 }
  0x3a   :  { %257 = vmatpush.msrb.mxu0 %v4162_v18  ;;  %305 = vmatpush.msrb.mxu1 %v4162_v18 }
  0x3b   :  { %353 = vmatpush.msrb.mxu2 %v4162_v18  ;;  %400 = vmatpush.msrb.mxu3 %v4153_v17 }
  0x3c   :  { %258 = vmatpush.msrb.mxu0 %v4171_v19  ;;  %306 = vmatpush.msrb.mxu1 %v4171_v19 }
  0x3d   :  { %354 = vmatpush.msrb.mxu2 %v4171_v19  ;;  %401 = vmatpush.msrb.mxu3 %v4162_v18 }
  0x3e   :  { %259 = vmatpush.msrb.mxu0 %v4180_v20  ;;  %307 = vmatpush.msrb.mxu1 %v4180_v20 }
  0x3f   :  { %355 = vmatpush.msrb.mxu2 %v4180_v20  ;;  %402 = vmatpush.msrb.mxu3 %v4171_v19 }
  0x40   :  { %260 = vmatpush.msrb.mxu0 %v4189_v22  ;;  %308 = vmatpush.msrb.mxu1 %v4189_v22 }
  0x41   :  { %356 = vmatpush.msrb.mxu2 %v4189_v22  ;;  %403 = vmatpush.msrb.mxu3 %v4180_v20 }
  0x42   :  { %437 = vmatpush.msra.mxu0 %v4054_v0 }
  0x43   :  { %404 = vmatpush.msrb.mxu3 %v4189_v22 }
  0x44   :  { %438 = vmatpush.msra.mxu0 %v4059_v1 }
  0x46   :  { %439 = vmatpush.msra.mxu0 %v4066_v2 }
  0x48   :  { %440 = vmatpush.msra.mxu0 %v4075_v3 }
  0x4a   :  { %441 = vmatpush.msra.mxu0 %v4089_v5 }
  0x4c   :  { %442 = vmatpush.msra.mxu0 %v4099_v7 }
  0x4e   :  { %443 = vmatpush.msra.mxu0 %v4108_v9 }
  0x50   :  { %444 = vmatpush.msra.mxu0 %v4117_v11 }
  0x52   :  { %445 = vmatpush.msra.mxu0 %v4126_v12 }
  0x54   :  { %446 = vmatpush.msra.mxu0 %v4135_v13 }
  0x56   :  { %447 = vmatpush.msra.mxu0 %v4144_v15 }
  0x58   :  { %448 = vmatpush.msra.mxu0 %v4153_v17 }
  0x5a   :  { %449 = vmatpush.msra.mxu0 %v4162_v18 }
  0x5c   :  { %450 = vmatpush.msra.mxu0 %v4171_v19 }
  0x5e   :  { %451 = vmatpush.msra.mxu0 %v4180_v20 }
  0x60   :  { %452 = vmatpush.msra.mxu0 %v4189_v22 }
  0xa4   :  { %v71_v33 = vpop.f32.mrf.mxu0 }
  0xa5   :  { %v72_v35 = vadd.f32 %v71_v33, %v53_v32 }
  0xa7   :  { %v74_v36 = vmul.f32 0.1, %v72_v35 }
  0xa9   :  { %v75_v37 = vadd.f32 %v74_v36, %v52_v34 }
  0xab   :  { %76 = vst [vmem:[%s6081_s3] sm:$0xff] %v75_v37  ;;  %v77_v38 = vmul.f32 3.0, %v75_v37  ;;  %v98_v56 = vmul.f32 0.9, %v75_v37 }
  0xad   :  { %v3395_v39 = vadd.f32 -2.0, %v77_v38 }
  0xaf   :  { %v3396_v40 = vmul.f32 -1.442695, %v3395_v39 }
  0xb1   :  { %3675 = vpow2.f32 %v3396_v40 }
  0xb7   :  { %v3676_v41 = vpop.eup %3675 }
  0xb8   :  { %v82_v42 = vadd.f32 1.0, %v3676_v41 }
  0xba   :  { %3677 = vrcp.f32 %v82_v42  ;;  %v94_v46 = vand.u32 2147483648, %v82_v42  ;;  %v92_v48 = vand.u32 2147483647, %v82_v42  ;;  %vm88_vm5 = vweird.f32 %v82_v42 }
  0xbc   :  { %v95_v50 = vor.u32 1.1754944e-38, %v94_v46  ;;  %vm93_vm7 = vcmp.eq.f32.partialorder %v92_v48, 8.507059e+37 }
  0xc0   :  { %v3678_v43 = vpop.eup %3677 }
  0xc1   :  { %v84_v44 = vmul.f32 %v3678_v43, %v82_v42  ;;  %vm89_vm4 = vweird.f32 %v3678_v43 }
  0xc2   :  { %vm90_vm6 = vmor %vm88_vm5, %vm89_vm4 }
  0xc3   :  { %v85_v45 = vsub.f32 1.0, %v84_v44 }
  0xc5   :  { %v86_v47 = vmul.f32 %v3678_v43, %v85_v45 }
  0xc7   :  { %v87_v49 = vadd.f32 %v3678_v43, %v86_v47  ;;  %v3405_v47 = vld [vmem:[%s6080_s0 + $0x18] sm:$0xff] }
  0xc9   :  { %v91_v51 = vsel %vm90_vm6, %v3678_v43, %v87_v49 }
  0xca   :  { %v96_v52 = vsel %vm93_vm7, %v95_v50, %v91_v51 }
  0xcb   :  { %117 = vmatmul.f32.vlgmr.msra.gmra.mxu1 %v96_v52 }
  0xcc   :  { %485 = vmatpush.msra.mxu1 %v4054_v0 }
  0xce   :  { %486 = vmatpush.msra.mxu1 %v4059_v1 }
  0xd0   :  { %487 = vmatpush.msra.mxu1 %v4066_v2 }
  0xd2   :  { %488 = vmatpush.msra.mxu1 %v4075_v3 }
  0xd4   :  { %489 = vmatpush.msra.mxu1 %v4089_v5 }
  0xd6   :  { %490 = vmatpush.msra.mxu1 %v4099_v7 }
  0xd8   :  { %491 = vmatpush.msra.mxu1 %v4108_v9 }
  0xda   :  { %492 = vmatpush.msra.mxu1 %v4117_v11 }
  0xdc   :  { %493 = vmatpush.msra.mxu1 %v4126_v12 }
  0xde   :  { %494 = vmatpush.msra.mxu1 %v4135_v13 }
  0xe0   :  { %495 = vmatpush.msra.mxu1 %v4144_v15 }
  0xe2   :  { %496 = vmatpush.msra.mxu1 %v4153_v17 }
  0xe4   :  { %497 = vmatpush.msra.mxu1 %v4162_v18 }
  0xe6   :  { %498 = vmatpush.msra.mxu1 %v4171_v19 }
  0xe8   :  { %499 = vmatpush.msra.mxu1 %v4180_v20 }
  0xea   :  { %500 = vmatpush.msra.mxu1 %v4189_v22 }
 0x148   :  { %v118_v54 = vpop.f32.mrf.mxu1 }
 0x149   :  { %v119_v55 = vadd.f32 %v3397_v53, %v118_v54 }
 0x14b   :  { %v121_v57 = vmul.f32 0.1, %v119_v55 }
 0x14d   :  { %v122_v58 = vadd.f32 %v121_v57, %v98_v56 }
 0x14f   :  { %3398 = vst [vmem:[%s6081_s3 + $0x8] sm:$0xff] %v122_v58  ;;  %v125_v59 = vmul.f32 3.0, %v122_v58  ;;  %v146_v29 = vmul.f32 0.9, %v122_v58 }
 0x151   :  { %v3399_v60 = vadd.f32 -2.0, %v125_v59 }
 0x153   :  { %v3400_v61 = vmul.f32 -1.442695, %v3399_v60 }
 0x155   :  { %3679 = vpow2.f32 %v3400_v61 }
 0x15b   :  { %v3680_v62 = vpop.eup %3679 }
 0x15c   :  { %v130_v63 = vadd.f32 1.0, %v3680_v62 }
 0x15e   :  { %3681 = vrcp.f32 %v130_v63  ;;  %v142_v10 = vand.u32 2147483648, %v130_v63  ;;  %v140_v16 = vand.u32 2147483647, %v130_v63  ;;  %vm136_vm9 = vweird.f32 %v130_v63 }
 0x160   :  { %v143_v23 = vor.u32 1.1754944e-38, %v142_v10  ;;  %vm141_vm11 = vcmp.eq.f32.partialorder %v140_v16, 8.507059e+37 }
 0x164   :  { %v3682_v4 = vpop.eup %3681 }
 0x165   :  { %v132_v6 = vmul.f32 %v3682_v4, %v130_v63  ;;  %vm137_vm8 = vweird.f32 %v3682_v4 }
 0x166   :  { %vm138_vm10 = vmor %vm136_vm9, %vm137_vm8 }
 0x167   :  { %v133_v8 = vsub.f32 1.0, %v132_v6 }
 0x169   :  { %v134_v14 = vmul.f32 %v3682_v4, %v133_v8 }
 0x16b   :  { %v135_v21 = vadd.f32 %v3682_v4, %v134_v14  ;;  %v3409_v14 = vld [vmem:[%s6080_s0 + $0x20] sm:$0xff] }
 0x16d   :  { %v139_v24 = vsel %vm138_vm10, %v3682_v4, %v135_v21 }
 0x16e   :  { %v144_v25 = vsel %vm141_vm11, %v143_v23, %v139_v24 }
 0x16f   :  { %165 = vmatmul.f32.vlgmr.msra.gmra.mxu2 %v144_v25 }
 0x170   :  { %533 = vmatpush.msra.mxu2 %v4054_v0 }
 0x172   :  { %534 = vmatpush.msra.mxu2 %v4059_v1 }
 0x174   :  { %535 = vmatpush.msra.mxu2 %v4066_v2 }
 0x176   :  { %536 = vmatpush.msra.mxu2 %v4075_v3 }
 0x178   :  { %537 = vmatpush.msra.mxu2 %v4089_v5 }
 0x17a   :  { %538 = vmatpush.msra.mxu2 %v4099_v7 }
 0x17c   :  { %539 = vmatpush.msra.mxu2 %v4108_v9 }
 0x17e   :  { %540 = vmatpush.msra.mxu2 %v4117_v11 }
 0x180   :  { %541 = vmatpush.msra.mxu2 %v4126_v12 }
 0x182   :  { %542 = vmatpush.msra.mxu2 %v4135_v13 }
 0x184   :  { %543 = vmatpush.msra.mxu2 %v4144_v15 }
 0x186   :  { %544 = vmatpush.msra.mxu2 %v4153_v17 }
 0x188   :  { %545 = vmatpush.msra.mxu2 %v4162_v18 }
 0x18a   :  { %546 = vmatpush.msra.mxu2 %v4171_v19 }
 0x18c   :  { %547 = vmatpush.msra.mxu2 %v4180_v20 }
 0x18e   :  { %548 = vmatpush.msra.mxu2 %v4189_v22 }
 0x1f2   :  { %v166_v27 = vpop.f32.mrf.mxu2 }
 0x1f3   :  { %v167_v28 = vadd.f32 %v3401_v26, %v166_v27 }
 0x1f5   :  { %v169_v30 = vmul.f32 0.1, %v167_v28 }
 0x1f7   :  { %v170_v31 = vadd.f32 %v169_v30, %v146_v29 }
 0x1f9   :  { %3402 = vst [vmem:[%s6081_s3 + $0x10] sm:$0xff] %v170_v31  ;;  %v173_v32 = vmul.f32 3.0, %v170_v31  ;;  %v194_v50 = vmul.f32 0.9, %v170_v31 }
 0x1fb   :  { %v3403_v33 = vadd.f32 -2.0, %v173_v32 }
 0x1fd   :  { %v3404_v34 = vmul.f32 -1.442695, %v3403_v33 }
 0x1ff   :  { %3683 = vpow2.f32 %v3404_v34 }
 0x205   :  { %v3684_v35 = vpop.eup %3683 }
 0x206   :  { %v178_v36 = vadd.f32 1.0, %v3684_v35 }
 0x208   :  { %3685 = vrcp.f32 %v178_v36  ;;  %v190_v40 = vand.u32 2147483648, %v178_v36  ;;  %v188_v42 = vand.u32 2147483647, %v178_v36  ;;  %vm184_vm13 = vweird.f32 %v178_v36 }
 0x20a   :  { %v191_v44 = vor.u32 1.1754944e-38, %v190_v40  ;;  %vm189_vm15 = vcmp.eq.f32.partialorder %v188_v42, 8.507059e+37 }
 0x20e   :  { %v3686_v37 = vpop.eup %3685 }
 0x20f   :  { %v180_v38 = vmul.f32 %v3686_v37, %v178_v36  ;;  %vm185_vm12 = vweird.f32 %v3686_v37 }
 0x210   :  { %vm186_vm14 = vmor %vm184_vm13, %vm185_vm12 }
 0x211   :  { %v181_v39 = vsub.f32 1.0, %v180_v38 }
 0x213   :  { %v182_v41 = vmul.f32 %v3686_v37, %v181_v39 }
 0x215   :  { %v183_v43 = vadd.f32 %v3686_v37, %v182_v41  ;;  %v3413_v41 = vld [vmem:[%s6080_s0 + $0x28] sm:$0xff] }
 0x217   :  { %v187_v45 = vsel %vm186_vm14, %v3686_v37, %v183_v43 }
 0x218   :  { %v192_v46 = vsel %vm189_vm15, %v191_v44, %v187_v45 }
 0x219   :  { %213 = vmatmul.f32.vlgmr.msra.gmra.mxu3 %v192_v46 }
 0x21a   :  { %581 = vmatpush.msra.mxu3 %v4054_v0 }
 0x21c   :  { %582 = vmatpush.msra.mxu3 %v4059_v1 }
 0x21e   :  { %583 = vmatpush.msra.mxu3 %v4066_v2 }
 0x220   :  { %584 = vmatpush.msra.mxu3 %v4075_v3 }
 0x222   :  { %585 = vmatpush.msra.mxu3 %v4089_v5 }
 0x224   :  { %586 = vmatpush.msra.mxu3 %v4099_v7 }
 0x226   :  { %587 = vmatpush.msra.mxu3 %v4108_v9 }
 0x228   :  { %588 = vmatpush.msra.mxu3 %v4117_v11 }
 0x22a   :  { %589 = vmatpush.msra.mxu3 %v4126_v12 }
 0x22c   :  { %590 = vmatpush.msra.mxu3 %v4135_v13 }
 0x22e   :  { %591 = vmatpush.msra.mxu3 %v4144_v15 }
 0x230   :  { %592 = vmatpush.msra.mxu3 %v4153_v17 }
 0x232   :  { %593 = vmatpush.msra.mxu3 %v4162_v18 }
 0x234   :  { %594 = vmatpush.msra.mxu3 %v4171_v19 }
 0x236   :  { %595 = vmatpush.msra.mxu3 %v4180_v20 }
 0x238   :  { %596 = vmatpush.msra.mxu3 %v4189_v22 }
 0x29c   :  { %v214_v48 = vpop.f32.mrf.mxu3 }
 0x29d   :  { %v215_v49 = vadd.f32 %v3405_v47, %v214_v48 }
 0x29f   :  { %v217_v51 = vmul.f32 0.1, %v215_v49 }
 0x2a1   :  { %v218_v52 = vadd.f32 %v217_v51, %v194_v50 }
 0x2a3   :  { %3406 = vst [vmem:[%s6081_s3 + $0x18] sm:$0xff] %v218_v52  ;;  %v221_v53 = vmul.f32 3.0, %v218_v52  ;;  %v242_v23 = vmul.f32 0.9, %v218_v52 }
 0x2a5   :  { %v3407_v54 = vadd.f32 -2.0, %v221_v53 }
 0x2a7   :  { %v3408_v55 = vmul.f32 -1.442695, %v3407_v54 }
 0x2a9   :  { %3687 = vpow2.f32 %v3408_v55 }
 0x2af   :  { %v3688_v56 = vpop.eup %3687 }
 0x2b0   :  { %v226_v57 = vadd.f32 1.0, %v3688_v56 }
 0x2b2   :  { %3689 = vrcp.f32 %v226_v57  ;;  %v238_v61 = vand.u32 2147483648, %v226_v57  ;;  %v236_v63 = vand.u32 2147483647, %v226_v57  ;;  %vm232_vm1 = vweird.f32 %v226_v57 }
 0x2b4   :  { %v239_v6 = vor.u32 1.1754944e-38, %v238_v61  ;;  %vm237_vm3 = vcmp.eq.f32.partialorder %v236_v63, 8.507059e+37 }
 0x2b8   :  { %v3690_v58 = vpop.eup %3689 }
 0x2b9   :  { %v228_v59 = vmul.f32 %v3690_v58, %v226_v57  ;;  %vm233_vm0 = vweird.f32 %v3690_v58 }
 0x2ba   :  { %vm234_vm2 = vmor %vm232_vm1, %vm233_vm0 }
 0x2bb   :  { %v229_v60 = vsub.f32 1.0, %v228_v59 }
 0x2bd   :  { %v230_v62 = vmul.f32 %v3690_v58, %v229_v60 }
 0x2bf   :  { %v231_v4 = vadd.f32 %v3690_v58, %v230_v62  ;;  %v3417_v62 = vld [vmem:[%s6080_s0 + $0x30] sm:$0xff] }
 0x2c1   :  { %v235_v8 = vsel %vm234_vm2, %v3690_v58, %v231_v4 }
 0x2c2   :  { %v240_v10 = vsel %vm237_vm3, %v239_v6, %v235_v8 }
 0x2c3   :  { %261 = vmatmul.f32.vlgmr.msrb.gmra.mxu0 %v240_v10 }
 0x2c4   :  { %629 = vmatpush.msrb.mxu0 %v4054_v0 }
 0x2c6   :  { %630 = vmatpush.msrb.mxu0 %v4059_v1 }
 0x2c8   :  { %631 = vmatpush.msrb.mxu0 %v4066_v2 }
 0x2ca   :  { %632 = vmatpush.msrb.mxu0 %v4075_v3 }
 0x2cc   :  { %633 = vmatpush.msrb.mxu0 %v4089_v5 }
 0x2ce   :  { %634 = vmatpush.msrb.mxu0 %v4099_v7 }
 0x2d0   :  { %635 = vmatpush.msrb.mxu0 %v4108_v9 }
 0x2d2   :  { %636 = vmatpush.msrb.mxu0 %v4117_v11 }
 0x2d4   :  { %637 = vmatpush.msrb.mxu0 %v4126_v12 }
 0x2d6   :  { %638 = vmatpush.msrb.mxu0 %v4135_v13 }
 0x2d8   :  { %639 = vmatpush.msrb.mxu0 %v4144_v15 }
 0x2da   :  { %640 = vmatpush.msrb.mxu0 %v4153_v17 }
 0x2dc   :  { %641 = vmatpush.msrb.mxu0 %v4162_v18 }
 0x2de   :  { %642 = vmatpush.msrb.mxu0 %v4171_v19 }
 0x2e0   :  { %643 = vmatpush.msrb.mxu0 %v4180_v20 }
 0x2e2   :  { %644 = vmatpush.msrb.mxu0 %v4189_v22 }
 0x340   :  { %v262_v16 = vpop.f32.mrf.mxu0 }
 0x341   :  { %v263_v21 = vadd.f32 %v3409_v14, %v262_v16 }
 0x343   :  { %v265_v24 = vmul.f32 0.1, %v263_v21 }
 0x345   :  { %v266_v25 = vadd.f32 %v265_v24, %v242_v23 }
 0x347   :  { %3410 = vst [vmem:[%s6081_s3 + $0x20] sm:$0xff] %v266_v25  ;;  %v269_v26 = vmul.f32 3.0, %v266_v25  ;;  %v290_v44 = vmul.f32 0.9, %v266_v25 }
 0x349   :  { %v3411_v27 = vadd.f32 -2.0, %v269_v26 }
 0x34b   :  { %v3412_v28 = vmul.f32 -1.442695, %v3411_v27 }
 0x34d   :  { %3691 = vpow2.f32 %v3412_v28 }
 0x353   :  { %v3692_v29 = vpop.eup %3691 }
 0x354   :  { %v274_v30 = vadd.f32 1.0, %v3692_v29 }
 0x356   :  { %3693 = vrcp.f32 %v274_v30  ;;  %v286_v34 = vand.u32 2147483648, %v274_v30  ;;  %v284_v36 = vand.u32 2147483647, %v274_v30  ;;  %vm280_vm5 = vweird.f32 %v274_v30 }
 0x358   :  { %v287_v38 = vor.u32 1.1754944e-38, %v286_v34  ;;  %vm285_vm7 = vcmp.eq.f32.partialorder %v284_v36, 8.507059e+37 }
 0x35c   :  { %v3694_v31 = vpop.eup %3693 }
 0x35d   :  { %v276_v32 = vmul.f32 %v3694_v31, %v274_v30  ;;  %vm281_vm4 = vweird.f32 %v3694_v31 }
 0x35e   :  { %vm282_vm6 = vmor %vm280_vm5, %vm281_vm4 }
 0x35f   :  { %v277_v33 = vsub.f32 1.0, %v276_v32 }
 0x361   :  { %v278_v35 = vmul.f32 %v3694_v31, %v277_v33 }
 0x363   :  { %v279_v37 = vadd.f32 %v3694_v31, %v278_v35 }
 0x365   :  { %v283_v39 = vsel %vm282_vm6, %v3694_v31, %v279_v37 }
 0x366   :  { %v288_v40 = vsel %vm285_vm7, %v287_v38, %v283_v39 }
 0x367   :  { %309 = vmatmul.f32.vlgmr.msrb.gmra.mxu1 %v288_v40 }
 0x368   :  { %677 = vmatpush.msrb.mxu1 %v4054_v0 }
 0x36a   :  { %678 = vmatpush.msrb.mxu1 %v4059_v1 }
 0x36c   :  { %679 = vmatpush.msrb.mxu1 %v4066_v2 }
 0x36e   :  { %680 = vmatpush.msrb.mxu1 %v4075_v3 }
 0x370   :  { %681 = vmatpush.msrb.mxu1 %v4089_v5 }
 0x372   :  { %682 = vmatpush.msrb.mxu1 %v4099_v7 }
 0x374   :  { %683 = vmatpush.msrb.mxu1 %v4108_v9 }
 0x376   :  { %684 = vmatpush.msrb.mxu1 %v4117_v11 }
 0x378   :  { %685 = vmatpush.msrb.mxu1 %v4126_v12 }
 0x37a   :  { %686 = vmatpush.msrb.mxu1 %v4135_v13 }
 0x37c   :  { %687 = vmatpush.msrb.mxu1 %v4144_v15 }
 0x37e   :  { %688 = vmatpush.msrb.mxu1 %v4153_v17 }
 0x380   :  { %689 = vmatpush.msrb.mxu1 %v4162_v18 }
 0x382   :  { %690 = vmatpush.msrb.mxu1 %v4171_v19 }
 0x384   :  { %691 = vmatpush.msrb.mxu1 %v4180_v20 }
 0x386   :  { %692 = vmatpush.msrb.mxu1 %v4189_v22 }
 0x3e4   :  { %v310_v42 = vpop.f32.mrf.mxu1 }
 0x3e5   :  { %v311_v43 = vadd.f32 %v3413_v41, %v310_v42 }
 0x3e7   :  { %v313_v45 = vmul.f32 0.1, %v311_v43 }
 0x3e9   :  { %v314_v46 = vadd.f32 %v313_v45, %v290_v44 }
 0x3eb   :  { %3414 = vst [vmem:[%s6081_s3 + $0x28] sm:$0xff] %v314_v46  ;;  %v317_v47 = vmul.f32 3.0, %v314_v46  ;;  %v338_v6 = vmul.f32 0.9, %v314_v46 }
 0x3ed   :  { %v3415_v48 = vadd.f32 -2.0, %v317_v47 }
 0x3ef   :  { %v3416_v49 = vmul.f32 -1.442695, %v3415_v48 }
 0x3f1   :  { %3695 = vpow2.f32 %v3416_v49 }
 0x3f7   :  { %v3696_v50 = vpop.eup %3695 }
 0x3f8   :  { %v322_v51 = vadd.f32 1.0, %v3696_v50  ;;  %v4445_v50 = vld [vmem:[%s6078_s1 + $0x78] sm:$0xff] }
 0x3fa   :  { %3697 = vrcp.f32 %v322_v51  ;;  %v334_v55 = vand.u32 2147483648, %v322_v51  ;;  %v332_v57 = vand.u32 2147483647, %v322_v51  ;;  %vm328_vm9 = vweird.f32 %v322_v51 }
 0x3fc   :  { %v335_v59 = vor.u32 1.1754944e-38, %v334_v55  ;;  %vm333_vm11 = vcmp.eq.f32.partialorder %v332_v57, 8.507059e+37  ;;  %v4475_v55 = vld [vmem:[%s6078_s1 + $0x50] sm:$0xff] }
 0x400   :  { %v3698_v52 = vpop.eup %3697 }
 0x401   :  { %v324_v53 = vmul.f32 %v3698_v52, %v322_v51  ;;  %vm329_vm8 = vweird.f32 %v3698_v52  ;;  %v4451_v51 = vld [vmem:[%s6078_s1 + $0x70] sm:$0xff] }
 0x402   :  { %vm330_vm10 = vmor %vm328_vm9, %vm329_vm8 }
 0x403   :  { %v325_v54 = vsub.f32 1.0, %v324_v53  ;;  %v4463_v53 = vld [vmem:[%s6078_s1 + $0x60] sm:$0xff] }
 0x405   :  { %v326_v56 = vmul.f32 %v3698_v52, %v325_v54  ;;  %v4469_v54 = vld [vmem:[%s6078_s1 + $0x58] sm:$0xff] }
 0x407   :  { %v327_v58 = vadd.f32 %v3698_v52, %v326_v56 }
 0x409   :  { %v331_v60 = vsel %vm330_vm10, %v3698_v52, %v327_v58  ;;  %v4457_v52 = vld [vmem:[%s6078_s1 + $0x68] sm:$0xff] }
 0x40a   :  { %v336_v61 = vsel %vm333_vm11, %v335_v59, %v331_v60 }
 0x40b   :  { %357 = vmatmul.f32.vlgmr.msrb.gmra.mxu2 %v336_v61 }
 0x40c   :  { %725 = vmatpush.msrb.mxu2 %v4054_v0 }
 0x40e   :  { %726 = vmatpush.msrb.mxu2 %v4059_v1 }
 0x410   :  { %727 = vmatpush.msrb.mxu2 %v4066_v2 }
 0x412   :  { %728 = vmatpush.msrb.mxu2 %v4075_v3 }
 0x414   :  { %729 = vmatpush.msrb.mxu2 %v4089_v5 }
 0x416   :  { %730 = vmatpush.msrb.mxu2 %v4099_v7 }
 0x418   :  { %731 = vmatpush.msrb.mxu2 %v4108_v9 }
 0x41a   :  { %732 = vmatpush.msrb.mxu2 %v4117_v11 }
 0x41c   :  { %733 = vmatpush.msrb.mxu2 %v4126_v12 }
 0x41e   :  { %734 = vmatpush.msrb.mxu2 %v4135_v13 }
 0x420   :  { %735 = vmatpush.msrb.mxu2 %v4144_v15 }
 0x422   :  { %736 = vmatpush.msrb.mxu2 %v4153_v17 }
 0x424   :  { %737 = vmatpush.msrb.mxu2 %v4162_v18 }
 0x426   :  { %738 = vmatpush.msrb.mxu2 %v4171_v19 }
 0x428   :  { %739 = vmatpush.msrb.mxu2 %v4180_v20 }
 0x42a   :  { %740 = vmatpush.msrb.mxu2 %v4189_v22 }
 0x48e   :  { %v358_v63 = vpop.f32.mrf.mxu2 }
 0x48f   :  { %v359_v4 = vadd.f32 %v3417_v62, %v358_v63 }
 0x491   :  { %v361_v8 = vmul.f32 0.1, %v359_v4 }
 0x493   :  { %v362_v10 = vadd.f32 %v361_v8, %v338_v6 }
 0x495   :  { %3418 = vst [vmem:[%s6081_s3 + $0x30] sm:$0xff] %v362_v10  ;;  %v365_v14 = vmul.f32 3.0, %v362_v10 }
 0x497   :  { %v3419_v16 = vadd.f32 -2.0, %v365_v14  ;;  %v4503_v14 = vld [vmem:[%s6078_s1 + $0x48] sm:$0xff] }
 0x499   :  { %v3420_v21 = vmul.f32 -1.442695, %v3419_v16  ;;  %v4509_v16 = vld [vmem:[%s6078_s1 + $0x40] sm:$0xff] }
 0x49b   :  { %3699 = vpow2.f32 %v3420_v21  ;;  %v4515_v21 = vld [vmem:[%s6078_s1 + $0x38] sm:$0xff] }
 0x4a1   :  { %v3700_v23 = vpop.eup %3699 }
 0x4a2   :  { %v370_v24 = vadd.f32 1.0, %v3700_v23  ;;  %v4521_v23 = vld [vmem:[%s6078_s1 + $0x30] sm:$0xff] }
 0x4a4   :  { %3701 = vrcp.f32 %v370_v24  ;;  %v382_v28 = vand.u32 2147483648, %v370_v24  ;;  %v380_v30 = vand.u32 2147483647, %v370_v24  ;;  %vm376_vm13 = vweird.f32 %v370_v24 }
 0x4a6   :  { %v383_v32 = vor.u32 1.1754944e-38, %v382_v28  ;;  %vm381_vm15 = vcmp.eq.f32.partialorder %v380_v30, 8.507059e+37  ;;  %v4551_v28 = vld [vmem:[%s6078_s1 + $0x8] sm:$0xff] }
 0x4aa   :  { %v3702_v25 = vpop.eup %3701 }
 0x4ab   :  { %v372_v26 = vmul.f32 %v3702_v25, %v370_v24  ;;  %vm377_vm12 = vweird.f32 %v3702_v25  ;;  %v4527_v24 = vld [vmem:[%s6078_s1 + $0x28] sm:$0xff] }
 0x4ac   :  { %vm378_vm14 = vmor %vm376_vm13, %vm377_vm12 }
 0x4ad   :  { %v373_v27 = vsub.f32 1.0, %v372_v26  ;;  %v4539_v26 = vld [vmem:[%s6078_s1 + $0x18] sm:$0xff] }
 0x4af   :  { %v374_v29 = vmul.f32 %v3702_v25, %v373_v27  ;;  %v4545_v27 = vld [vmem:[%s6078_s1 + $0x10] sm:$0xff] }
 0x4b1   :  { %v375_v31 = vadd.f32 %v3702_v25, %v374_v29  ;;  %v3429_v29 = vld [vmem:[%s6080_s0 + $0x48] sm:$0xff] }
 0x4b3   :  { %v379_v33 = vsel %vm378_vm14, %v3702_v25, %v375_v31  ;;  %v4533_v25 = vld [vmem:[%s6078_s1 + $0x20] sm:$0xff] }
 0x4b4   :  { %v384_v34 = vsel %vm381_vm15, %v383_v32, %v379_v33 }
 0x4b5   :  { %405 = vmatmul.f32.vlgmr.msrb.gmra.mxu3 %v384_v34 }
 0x4b6   :  { %773 = vmatpush.msrb.mxu3 %v4054_v0  ;;  %v3421_v0 = vld [vmem:[%s6080_s0 + $0x38] sm:$0xff] }
 0x4b8   :  { %774 = vmatpush.msrb.mxu3 %v4059_v1 }
 0x4ba   :  { %775 = vmatpush.msrb.mxu3 %v4066_v2 }
 0x4bc   :  { %776 = vmatpush.msrb.mxu3 %v4075_v3  ;;  %v386_v3 = vmul.f32 0.9, %v362_v10 }
 0x4be   :  { %777 = vmatpush.msrb.mxu3 %v4089_v5 }
 0x4c0   :  { %778 = vmatpush.msrb.mxu3 %v4099_v7 }
 0x4c2   :  { %779 = vmatpush.msrb.mxu3 %v4108_v9 }
 0x4c4   :  { %780 = vmatpush.msrb.mxu3 %v4117_v11 }
 0x4c6   :  { %781 = vmatpush.msrb.mxu3 %v4126_v12 }
 0x4c8   :  { %782 = vmatpush.msrb.mxu3 %v4135_v13 }
 0x4ca   :  { %783 = vmatpush.msrb.mxu3 %v4144_v15 }
 0x4cc   :  { %784 = vmatpush.msrb.mxu3 %v4153_v17 }
 0x4ce   :  { %785 = vmatpush.msrb.mxu3 %v4162_v18 }
 0x4d0   :  { %786 = vmatpush.msrb.mxu3 %v4171_v19 }
 0x4d2   :  { %787 = vmatpush.msrb.mxu3 %v4180_v20 }
 0x4d4   :  { %788 = vmatpush.msrb.mxu3 %v4189_v22 }
 0x538   :  { %v406_v1 = vpop.f32.mrf.mxu3 }
 0x539   :  { %v407_v2 = vadd.f32 %v3421_v0, %v406_v1 }
 0x53b   :  { %v409_v5 = vmul.f32 0.1, %v407_v2 }
 0x53d   :  { %v410_v7 = vadd.f32 %v409_v5, %v386_v3 }
 0x53f   :  { %3422 = vst [vmem:[%s6081_s3 + $0x38] sm:$0xff] %v410_v7  ;;  %v413_v35 = vmul.f32 3.0, %v410_v7  ;;  %v434_v56 = vmul.f32 0.9, %v410_v7 }
 0x541   :  { %v3423_v36 = vadd.f32 -2.0, %v413_v35 }
 0x543   :  { %v3424_v37 = vmul.f32 -1.442695, %v3423_v36 }
 0x545   :  { %3703 = vpow2.f32 %v3424_v37 }
 0x54b   :  { %v3704_v38 = vpop.eup %3703 }
 0x54c   :  { %v418_v39 = vadd.f32 1.0, %v3704_v38 }
 0x54e   :  { %3705 = vrcp.f32 %v418_v39  ;;  %v430_v43 = vand.u32 2147483648, %v418_v39  ;;  %v428_v45 = vand.u32 2147483647, %v418_v39  ;;  %vm424_vm1 = vweird.f32 %v418_v39 }
 0x550   :  { %v431_v47 = vor.u32 1.1754944e-38, %v430_v43  ;;  %vm429_vm3 = vcmp.eq.f32.partialorder %v428_v45, 8.507059e+37  ;;  %v4579_v43 = vld [vmem:[%s6078_s1] sm:$0xff] }
 0x554   :  { %v3706_v40 = vpop.eup %3705 }
 0x555   :  { %v420_v41 = vmul.f32 %v3706_v40, %v418_v39  ;;  %vm425_vm0 = vweird.f32 %v3706_v40 }
 0x556   :  { %vm426_vm2 = vmor %vm424_vm1, %vm425_vm0 }
 0x557   :  { %v421_v42 = vsub.f32 1.0, %v420_v41 }
 0x559   :  { %v422_v44 = vmul.f32 %v3706_v40, %v421_v42 }
 0x55b   :  { %v423_v46 = vadd.f32 %v3706_v40, %v422_v44  ;;  %v3433_v44 = vld [vmem:[%s6080_s0 + $0x50] sm:$0xff] }
 0x55d   :  { %v427_v48 = vsel %vm426_vm2, %v3706_v40, %v423_v46 }
 0x55e   :  { %v432_v49 = vsel %vm429_vm3, %v431_v47, %v427_v48 }
 0x55f   :  { %453 = vmatmul.f32.vlgmr.msra.gmra.mxu0 %v432_v49 }
 0x560   :  { %821 = vmatpush.msra.mxu0 %v4445_v50 }
 0x562   :  { %822 = vmatpush.msra.mxu0 %v4451_v51 }
 0x564   :  { %823 = vmatpush.msra.mxu0 %v4457_v52 }
 0x566   :  { %824 = vmatpush.msra.mxu0 %v4463_v53 }
 0x568   :  { %825 = vmatpush.msra.mxu0 %v4469_v54 }
 0x56a   :  { %826 = vmatpush.msra.mxu0 %v4475_v55 }
 0x56c   :  { %827 = vmatpush.msra.mxu0 %v4108_v9  ;;  %v3425_v9 = vld [vmem:[%s6080_s0 + $0x40] sm:$0xff] }
 0x56e   :  { %828 = vmatpush.msra.mxu0 %v4117_v11 }
 0x570   :  { %829 = vmatpush.msra.mxu0 %v4126_v12 }
 0x572   :  { %830 = vmatpush.msra.mxu0 %v4135_v13 }
 0x574   :  { %831 = vmatpush.msra.mxu0 %v4144_v15 }
 0x576   :  { %832 = vmatpush.msra.mxu0 %v4153_v17 }
 0x578   :  { %833 = vmatpush.msra.mxu0 %v4162_v18 }
 0x57a   :  { %834 = vmatpush.msra.mxu0 %v4171_v19 }
 0x57c   :  { %835 = vmatpush.msra.mxu0 %v4180_v20 }
 0x57e   :  { %836 = vmatpush.msra.mxu0 %v4189_v22 }
 0x5dc   :  { %v454_v11 = vpop.f32.mrf.mxu0 }
 0x5dd   :  { %v455_v12 = vadd.f32 %v3425_v9, %v454_v11 }
 0x5df   :  { %v457_v13 = vmul.f32 0.1, %v455_v12 }
 0x5e1   :  { %v458_v57 = vadd.f32 %v457_v13, %v434_v56 }
 0x5e3   :  { %3426 = vst [vmem:[%s6081_s3 + $0x40] sm:$0xff] %v458_v57  ;;  %v461_v15 = vmul.f32 3.0, %v458_v57  ;;  %v482_v32 = vmul.f32 0.9, %v458_v57 }
 0x5e5   :  { %v3427_v17 = vadd.f32 -2.0, %v461_v15 }
 0x5e7   :  { %v3428_v18 = vmul.f32 -1.442695, %v3427_v17 }
 0x5e9   :  { %3707 = vpow2.f32 %v3428_v18 }
 0x5ef   :  { %v3708_v19 = vpop.eup %3707 }
 0x5f0   :  { %v466_v20 = vadd.f32 1.0, %v3708_v19 }
 0x5f2   :  { %3709 = vrcp.f32 %v466_v20  ;;  %v478_v61 = vand.u32 2147483648, %v466_v20  ;;  %v476_v63 = vand.u32 2147483647, %v466_v20  ;;  %vm472_vm5 = vweird.f32 %v466_v20 }
 0x5f4   :  { %v479_v6 = vor.u32 1.1754944e-38, %v478_v61  ;;  %vm477_vm7 = vcmp.eq.f32.partialorder %v476_v63, 8.507059e+37 }
 0x5f8   :  { %v3710_v58 = vpop.eup %3709 }
 0x5f9   :  { %v468_v59 = vmul.f32 %v3710_v58, %v466_v20  ;;  %vm473_vm4 = vweird.f32 %v3710_v58 }
 0x5fa   :  { %vm474_vm6 = vmor %vm472_vm5, %vm473_vm4 }
 0x5fb   :  { %v469_v60 = vsub.f32 1.0, %v468_v59 }
 0x5fd   :  { %v470_v62 = vmul.f32 %v3710_v58, %v469_v60 }
 0x5ff   :  { %v471_v4 = vadd.f32 %v3710_v58, %v470_v62  ;;  %v3437_v62 = vld [vmem:[%s6080_s0 + $0x58] sm:$0xff] }
 0x601   :  { %v475_v8 = vsel %vm474_vm6, %v3710_v58, %v471_v4 }
 0x602   :  { %v480_v10 = vsel %vm477_vm7, %v479_v6, %v475_v8 }
 0x603   :  { %501 = vmatmul.f32.vlgmr.msra.gmra.mxu1 %v480_v10 }
 0x604   :  { %869 = vmatpush.msra.mxu1 %v4445_v50 }
 0x606   :  { %870 = vmatpush.msra.mxu1 %v4451_v51 }
 0x608   :  { %871 = vmatpush.msra.mxu1 %v4457_v52 }
 0x60a   :  { %872 = vmatpush.msra.mxu1 %v4463_v53 }
 0x60c   :  { %873 = vmatpush.msra.mxu1 %v4469_v54 }
 0x60e   :  { %874 = vmatpush.msra.mxu1 %v4475_v55 }
 0x610   :  { %875 = vmatpush.msra.mxu1 %v4503_v14 }
 0x612   :  { %876 = vmatpush.msra.mxu1 %v4509_v16 }
 0x614   :  { %877 = vmatpush.msra.mxu1 %v4515_v21 }
 0x616   :  { %878 = vmatpush.msra.mxu1 %v4521_v23 }
 0x618   :  { %879 = vmatpush.msra.mxu1 %v4527_v24 }
 0x61a   :  { %880 = vmatpush.msra.mxu1 %v4533_v25 }
 0x61c   :  { %881 = vmatpush.msra.mxu1 %v4539_v26 }
 0x61e   :  { %882 = vmatpush.msra.mxu1 %v4545_v27 }
 0x620   :  { %883 = vmatpush.msra.mxu1 %v4551_v28 }
 0x622   :  { %884 = vmatpush.msra.mxu1 %v4189_v22 }
 0x680   :  { %v502_v30 = vpop.f32.mrf.mxu1 }
 0x681   :  { %v503_v31 = vadd.f32 %v3429_v29, %v502_v30 }
 0x683   :  { %v505_v33 = vmul.f32 0.1, %v503_v31 }
 0x685   :  { %v506_v34 = vadd.f32 %v505_v33, %v482_v32 }
 0x687   :  { %3430 = vst [vmem:[%s6081_s3 + $0x48] sm:$0xff] %v506_v34  ;;  %v509_v0 = vmul.f32 3.0, %v506_v34  ;;  %v530_v47 = vmul.f32 0.9, %v506_v34 }
 0x689   :  { %v3431_v1 = vadd.f32 -2.0, %v509_v0 }
 0x68b   :  { %v3432_v2 = vmul.f32 -1.442695, %v3431_v1 }
 0x68d   :  { %3711 = vpow2.f32 %v3432_v2 }
 0x693   :  { %v3712_v3 = vpop.eup %3711 }
 0x694   :  { %v514_v5 = vadd.f32 1.0, %v3712_v3 }
 0x696   :  { %3713 = vrcp.f32 %v514_v5  ;;  %v526_v36 = vand.u32 2147483648, %v514_v5  ;;  %v524_v38 = vand.u32 2147483647, %v514_v5  ;;  %vm520_vm9 = vweird.f32 %v514_v5 }
 0x698   :  { %v527_v40 = vor.u32 1.1754944e-38, %v526_v36  ;;  %vm525_vm11 = vcmp.eq.f32.partialorder %v524_v38, 8.507059e+37 }
 0x69c   :  { %v3714_v22 = vpop.eup %3713 }
 0x69d   :  { %v516_v7 = vmul.f32 %v3714_v22, %v514_v5  ;;  %vm521_vm8 = vweird.f32 %v3714_v22 }
 0x69e   :  { %vm522_vm10 = vmor %vm520_vm9, %vm521_vm8 }
 0x69f   :  { %v517_v35 = vsub.f32 1.0, %v516_v7 }
 0x6a1   :  { %v518_v37 = vmul.f32 %v3714_v22, %v517_v35 }
 0x6a3   :  { %v519_v39 = vadd.f32 %v3714_v22, %v518_v37  ;;  %v3441_v37 = vld [vmem:[%s6080_s0 + $0x60] sm:$0xff] }
 0x6a5   :  { %v523_v41 = vsel %vm522_vm10, %v3714_v22, %v519_v39 }
 0x6a6   :  { %v528_v42 = vsel %vm525_vm11, %v527_v40, %v523_v41 }
 0x6a7   :  { %549 = vmatmul.f32.vlgmr.msra.gmra.mxu2 %v528_v42 }
 0x6a8   :  { %917 = vmatpush.msra.mxu2 %v4445_v50 }
 0x6aa   :  { %918 = vmatpush.msra.mxu2 %v4451_v51 }
 0x6ac   :  { %919 = vmatpush.msra.mxu2 %v4457_v52 }
 0x6ae   :  { %920 = vmatpush.msra.mxu2 %v4463_v53 }
 0x6b0   :  { %921 = vmatpush.msra.mxu2 %v4469_v54 }
 0x6b2   :  { %922 = vmatpush.msra.mxu2 %v4475_v55 }
 0x6b4   :  { %923 = vmatpush.msra.mxu2 %v4503_v14 }
 0x6b6   :  { %924 = vmatpush.msra.mxu2 %v4509_v16 }
 0x6b8   :  { %925 = vmatpush.msra.mxu2 %v4515_v21 }
 0x6ba   :  { %926 = vmatpush.msra.mxu2 %v4521_v23 }
 0x6bc   :  { %927 = vmatpush.msra.mxu2 %v4527_v24 }
 0x6be   :  { %928 = vmatpush.msra.mxu2 %v4533_v25 }
 0x6c0   :  { %929 = vmatpush.msra.mxu2 %v4539_v26 }
 0x6c2   :  { %930 = vmatpush.msra.mxu2 %v4545_v27 }
 0x6c4   :  { %931 = vmatpush.msra.mxu2 %v4551_v28 }
 0x6c6   :  { %932 = vmatpush.msra.mxu2 %v4579_v43 }
 0x72a   :  { %v550_v45 = vpop.f32.mrf.mxu2 }
 0x72b   :  { %v551_v46 = vadd.f32 %v3433_v44, %v550_v45 }
 0x72d   :  { %v553_v48 = vmul.f32 0.1, %v551_v46 }
 0x72f   :  { %v554_v49 = vadd.f32 %v553_v48, %v530_v47 }
 0x731   :  { %3434 = vst [vmem:[%s6081_s3 + $0x50] sm:$0xff] %v554_v49  ;;  %v557_v9 = vmul.f32 3.0, %v554_v49  ;;  %v578_v6 = vmul.f32 0.9, %v554_v49 }
 0x733   :  { %v3435_v11 = vadd.f32 -2.0, %v557_v9 }
 0x735   :  { %v3436_v12 = vmul.f32 -1.442695, %v3435_v11 }
 0x737   :  { %3715 = vpow2.f32 %v3436_v12 }
 0x73d   :  { %v3716_v56 = vpop.eup %3715 }
 0x73e   :  { %v562_v13 = vadd.f32 1.0, %v3716_v56 }
 0x740   :  { %3717 = vrcp.f32 %v562_v13  ;;  %v574_v18 = vand.u32 2147483648, %v562_v13  ;;  %v572_v20 = vand.u32 2147483647, %v562_v13  ;;  %vm568_vm13 = vweird.f32 %v562_v13 }
 0x742   :  { %v575_v59 = vor.u32 1.1754944e-38, %v574_v18  ;;  %vm573_vm15 = vcmp.eq.f32.partialorder %v572_v20, 8.507059e+37 }
 0x746   :  { %v3718_v57 = vpop.eup %3717 }
 0x747   :  { %v564_v15 = vmul.f32 %v3718_v57, %v562_v13  ;;  %vm569_vm12 = vweird.f32 %v3718_v57 }
 0x748   :  { %vm570_vm14 = vmor %vm568_vm13, %vm569_vm12 }
 0x749   :  { %v565_v17 = vsub.f32 1.0, %v564_v15 }
 0x74b   :  { %v566_v19 = vmul.f32 %v3718_v57, %v565_v17 }
 0x74d   :  { %v567_v58 = vadd.f32 %v3718_v57, %v566_v19  ;;  %v3445_v19 = vld [vmem:[%s6080_s0 + $0x68] sm:$0xff] }
 0x74f   :  { %v571_v60 = vsel %vm570_vm14, %v3718_v57, %v567_v58 }
 0x750   :  { %v576_v61 = vsel %vm573_vm15, %v575_v59, %v571_v60 }
 0x751   :  { %597 = vmatmul.f32.vlgmr.msra.gmra.mxu3 %v576_v61 }
 0x752   :  { %965 = vmatpush.msra.mxu3 %v4445_v50 }
 0x754   :  { %966 = vmatpush.msra.mxu3 %v4451_v51 }
 0x756   :  { %967 = vmatpush.msra.mxu3 %v4457_v52 }
 0x758   :  { %968 = vmatpush.msra.mxu3 %v4463_v53 }
 0x75a   :  { %969 = vmatpush.msra.mxu3 %v4469_v54 }
 0x75c   :  { %970 = vmatpush.msra.mxu3 %v4475_v55 }
 0x75e   :  { %971 = vmatpush.msra.mxu3 %v4503_v14 }
 0x760   :  { %972 = vmatpush.msra.mxu3 %v4509_v16 }
 0x762   :  { %973 = vmatpush.msra.mxu3 %v4515_v21 }
 0x764   :  { %974 = vmatpush.msra.mxu3 %v4521_v23 }
 0x766   :  { %975 = vmatpush.msra.mxu3 %v4527_v24 }
 0x768   :  { %976 = vmatpush.msra.mxu3 %v4533_v25 }
 0x76a   :  { %977 = vmatpush.msra.mxu3 %v4539_v26 }
 0x76c   :  { %978 = vmatpush.msra.mxu3 %v4545_v27 }
 0x76e   :  { %979 = vmatpush.msra.mxu3 %v4551_v28 }
 0x770   :  { %980 = vmatpush.msra.mxu3 %v4579_v43 }
 0x7d4   :  { %v598_v63 = vpop.f32.mrf.mxu3 }
 0x7d5   :  { %v599_v4 = vadd.f32 %v3437_v62, %v598_v63 }
 0x7d7   :  { %v601_v8 = vmul.f32 0.1, %v599_v4 }
 0x7d9   :  { %v602_v10 = vadd.f32 %v601_v8, %v578_v6 }
 0x7db   :  { %3438 = vst [vmem:[%s6081_s3 + $0x58] sm:$0xff] %v602_v10  ;;  %v605_v29 = vmul.f32 3.0, %v602_v10  ;;  %v626_v40 = vmul.f32 0.9, %v602_v10 }
 0x7dd   :  { %v3439_v30 = vadd.f32 -2.0, %v605_v29 }
 0x7df   :  { %v3440_v31 = vmul.f32 -1.442695, %v3439_v30 }
 0x7e1   :  { %3719 = vpow2.f32 %v3440_v31 }
 0x7e7   :  { %v3720_v32 = vpop.eup %3719 }
 0x7e8   :  { %v610_v33 = vadd.f32 1.0, %v3720_v32 }
 0x7ea   :  { %3721 = vrcp.f32 %v610_v33  ;;  %v622_v2 = vand.u32 2147483648, %v610_v33  ;;  %v620_v5 = vand.u32 2147483647, %v610_v33  ;;  %vm616_vm1 = vweird.f32 %v610_v33 }
 0x7ec   :  { %v623_v7 = vor.u32 1.1754944e-38, %v622_v2  ;;  %vm621_vm3 = vcmp.eq.f32.partialorder %v620_v5, 8.507059e+37 }
 0x7f0   :  { %v3722_v34 = vpop.eup %3721 }
 0x7f1   :  { %v612_v0 = vmul.f32 %v3722_v34, %v610_v33  ;;  %vm617_vm0 = vweird.f32 %v3722_v34 }
 0x7f2   :  { %vm618_vm2 = vmor %vm616_vm1, %vm617_vm0 }
 0x7f3   :  { %v613_v1 = vsub.f32 1.0, %v612_v0 }
 0x7f5   :  { %v614_v3 = vmul.f32 %v3722_v34, %v613_v1 }
 0x7f7   :  { %v615_v22 = vadd.f32 %v3722_v34, %v614_v3  ;;  %v3449_v3 = vld [vmem:[%s6080_s0 + $0x70] sm:$0xff] }
 0x7f9   :  { %v619_v35 = vsel %vm618_vm2, %v3722_v34, %v615_v22 }
 0x7fa   :  { %v624_v36 = vsel %vm621_vm3, %v623_v7, %v619_v35 }
 0x7fb   :  { %645 = vmatmul.f32.vlgmr.msrb.gmra.mxu0 %v624_v36 }
 0x7fc   :  { %1013 = vmatpush.msrb.mxu0 %v4445_v50 }
 0x7fe   :  { %1014 = vmatpush.msrb.mxu0 %v4451_v51 }
 0x800   :  { %1015 = vmatpush.msrb.mxu0 %v4457_v52 }
 0x802   :  { %1016 = vmatpush.msrb.mxu0 %v4463_v53 }
 0x804   :  { %1017 = vmatpush.msrb.mxu0 %v4469_v54 }
 0x806   :  { %1018 = vmatpush.msrb.mxu0 %v4475_v55 }
 0x808   :  { %1019 = vmatpush.msrb.mxu0 %v4503_v14 }
 0x80a   :  { %1020 = vmatpush.msrb.mxu0 %v4509_v16 }
 0x80c   :  { %1021 = vmatpush.msrb.mxu0 %v4515_v21 }
 0x80e   :  { %1022 = vmatpush.msrb.mxu0 %v4521_v23 }
 0x810   :  { %1023 = vmatpush.msrb.mxu0 %v4527_v24 }
 0x812   :  { %1024 = vmatpush.msrb.mxu0 %v4533_v25 }
 0x814   :  { %1025 = vmatpush.msrb.mxu0 %v4539_v26 }
 0x816   :  { %1026 = vmatpush.msrb.mxu0 %v4545_v27 }
 0x818   :  { %1027 = vmatpush.msrb.mxu0 %v4551_v28 }
 0x81a   :  { %1028 = vmatpush.msrb.mxu0 %v4579_v43 }
 0x878   :  { %v646_v38 = vpop.f32.mrf.mxu0 }
 0x879   :  { %v647_v39 = vadd.f32 %v3441_v37, %v646_v38 }
 0x87b   :  { %v649_v41 = vmul.f32 0.1, %v647_v39 }
 0x87d   :  { %v650_v42 = vadd.f32 %v649_v41, %v626_v40 }
 0x87f   :  { %3442 = vst [vmem:[%s6081_s3 + $0x60] sm:$0xff] %v650_v42  ;;  %v653_v44 = vmul.f32 3.0, %v650_v42  ;;  %v674_v59 = vmul.f32 0.9, %v650_v42 }
 0x881   :  { %v3443_v45 = vadd.f32 -2.0, %v653_v44 }
 0x883   :  { %v3444_v46 = vmul.f32 -1.442695, %v3443_v45 }
 0x885   :  { %3723 = vpow2.f32 %v3444_v46 }
 0x88b   :  { %v3724_v47 = vpop.eup %3723 }
 0x88c   :  { %v658_v48 = vadd.f32 1.0, %v3724_v47 }
 0x88e   :  { %3725 = vrcp.f32 %v658_v48  ;;  %v670_v12 = vand.u32 2147483648, %v658_v48  ;;  %v668_v13 = vand.u32 2147483647, %v658_v48  ;;  %vm664_vm5 = vweird.f32 %v658_v48 }
 0x890   :  { %v671_v15 = vor.u32 1.1754944e-38, %v670_v12  ;;  %vm669_vm7 = vcmp.eq.f32.partialorder %v668_v13, 8.507059e+37 }
 0x894   :  { %v3726_v49 = vpop.eup %3725 }
 0x895   :  { %v660_v9 = vmul.f32 %v3726_v49, %v658_v48  ;;  %vm665_vm4 = vweird.f32 %v3726_v49 }
 0x896   :  { %vm666_vm6 = vmor %vm664_vm5, %vm665_vm4 }
 0x897   :  { %v661_v11 = vsub.f32 1.0, %v660_v9 }
 0x899   :  { %v662_v56 = vmul.f32 %v3726_v49, %v661_v11 }
 0x89b   :  { %v663_v57 = vadd.f32 %v3726_v49, %v662_v56  ;;  %v3453_v56 = vld [vmem:[%s6080_s0 + $0x78] sm:$0xff] }
 0x89d   :  { %v667_v17 = vsel %vm666_vm6, %v3726_v49, %v663_v57 }
 0x89e   :  { %v672_v18 = vsel %vm669_vm7, %v671_v15, %v667_v17 }
 0x89f   :  { %693 = vmatmul.f32.vlgmr.msrb.gmra.mxu1 %v672_v18 }
 0x8a0   :  { %1061 = vmatpush.msrb.mxu1 %v4445_v50 }
 0x8a2   :  { %1062 = vmatpush.msrb.mxu1 %v4451_v51 }
 0x8a4   :  { %1063 = vmatpush.msrb.mxu1 %v4457_v52 }
 0x8a6   :  { %1064 = vmatpush.msrb.mxu1 %v4463_v53 }
 0x8a8   :  { %1065 = vmatpush.msrb.mxu1 %v4469_v54 }
 0x8aa   :  { %1066 = vmatpush.msrb.mxu1 %v4475_v55 }
 0x8ac   :  { %1067 = vmatpush.msrb.mxu1 %v4503_v14 }
 0x8ae   :  { %1068 = vmatpush.msrb.mxu1 %v4509_v16 }
 0x8b0   :  { %1069 = vmatpush.msrb.mxu1 %v4515_v21 }
 0x8b2   :  { %1070 = vmatpush.msrb.mxu1 %v4521_v23 }
 0x8b4   :  { %1071 = vmatpush.msrb.mxu1 %v4527_v24 }
 0x8b6   :  { %1072 = vmatpush.msrb.mxu1 %v4533_v25 }
 0x8b8   :  { %1073 = vmatpush.msrb.mxu1 %v4539_v26 }
 0x8ba   :  { %1074 = vmatpush.msrb.mxu1 %v4545_v27 }
 0x8bc   :  { %1075 = vmatpush.msrb.mxu1 %v4551_v28 }
 0x8be   :  { %1076 = vmatpush.msrb.mxu1 %v4579_v43 }
 0x91c   :  { %v694_v20 = vpop.f32.mrf.mxu1 }
 0x91d   :  { %v695_v58 = vadd.f32 %v3445_v19, %v694_v20 }
 0x91f   :  { %v697_v60 = vmul.f32 0.1, %v695_v58 }
 0x921   :  { %v698_v61 = vadd.f32 %v697_v60, %v674_v59 }
 0x923   :  { %3446 = vst [vmem:[%s6081_s3 + $0x68] sm:$0xff] %v698_v61  ;;  %v701_v62 = vmul.f32 3.0, %v698_v61  ;;  %v722_v7 = vmul.f32 0.9, %v698_v61 }
 0x925   :  { %v3447_v63 = vadd.f32 -2.0, %v701_v62 }
 0x927   :  { %v3448_v4 = vmul.f32 -1.442695, %v3447_v63 }
 0x929   :  { %3727 = vpow2.f32 %v3448_v4 }
 0x92f   :  { %v3728_v6 = vpop.eup %3727 }
 0x930   :  { %v706_v8 = vadd.f32 1.0, %v3728_v6 }
 0x932   :  { %3729 = vrcp.f32 %v706_v8  ;;  %v718_v31 = vand.u32 2147483648, %v706_v8  ;;  %v716_v33 = vand.u32 2147483647, %v706_v8  ;;  %vm712_vm9 = vweird.f32 %v706_v8 }
 0x934   :  { %v719_v0 = vor.u32 1.1754944e-38, %v718_v31  ;;  %vm717_vm11 = vcmp.eq.f32.partialorder %v716_v33, 8.507059e+37 }
 0x938   :  { %v3730_v10 = vpop.eup %3729 }
 0x939   :  { %v708_v29 = vmul.f32 %v3730_v10, %v706_v8  ;;  %vm713_vm8 = vweird.f32 %v3730_v10 }
 0x93a   :  { %vm714_vm10 = vmor %vm712_vm9, %vm713_vm8 }
 0x93b   :  { %v709_v30 = vsub.f32 1.0, %v708_v29 }
 0x93d   :  { %v710_v32 = vmul.f32 %v3730_v10, %v709_v30 }
 0x93f   :  { %v711_v34 = vadd.f32 %v3730_v10, %v710_v32  ;;  %v3457_v32 = vld [vmem:[%s6080_s0 + $0x80] sm:$0xff] }
 0x941   :  { %v715_v1 = vsel %vm714_vm10, %v3730_v10, %v711_v34 }
 0x942   :  { %v720_v2 = vsel %vm717_vm11, %v719_v0, %v715_v1 }
 0x943   :  { %741 = vmatmul.f32.vlgmr.msrb.gmra.mxu2 %v720_v2 }
 0x944   :  { %1109 = vmatpush.msrb.mxu2 %v4445_v50 }
 0x946   :  { %1110 = vmatpush.msrb.mxu2 %v4451_v51 }
 0x948   :  { %1111 = vmatpush.msrb.mxu2 %v4457_v52 }
 0x94a   :  { %1112 = vmatpush.msrb.mxu2 %v4463_v53 }
 0x94c   :  { %1113 = vmatpush.msrb.mxu2 %v4469_v54 }
 0x94e   :  { %1114 = vmatpush.msrb.mxu2 %v4475_v55 }
 0x950   :  { %1115 = vmatpush.msrb.mxu2 %v4503_v14 }
 0x952   :  { %1116 = vmatpush.msrb.mxu2 %v4509_v16 }
 0x954   :  { %1117 = vmatpush.msrb.mxu2 %v4515_v21 }
 0x956   :  { %1118 = vmatpush.msrb.mxu2 %v4521_v23 }
 0x958   :  { %1119 = vmatpush.msrb.mxu2 %v4527_v24 }
 0x95a   :  { %1120 = vmatpush.msrb.mxu2 %v4533_v25 }
 0x95c   :  { %1121 = vmatpush.msrb.mxu2 %v4539_v26 }
 0x95e   :  { %1122 = vmatpush.msrb.mxu2 %v4545_v27 }
 0x960   :  { %1123 = vmatpush.msrb.mxu2 %v4551_v28 }
 0x962   :  { %1124 = vmatpush.msrb.mxu2 %v4579_v43 }
 0x9c6   :  { %v742_v5 = vpop.f32.mrf.mxu2 }
 0x9c7   :  { %v743_v22 = vadd.f32 %v3449_v3, %v742_v5 }
 0x9c9   :  { %v745_v35 = vmul.f32 0.1, %v743_v22 }
 0x9cb   :  { %v746_v36 = vadd.f32 %v745_v35, %v722_v7 }
 0x9cd   :  { %3450 = vst [vmem:[%s6081_s3 + $0x70] sm:$0xff] %v746_v36  ;;  %v749_v37 = vmul.f32 3.0, %v746_v36  ;;  %v770_v15 = vmul.f32 0.9, %v746_v36 }
 0x9cf   :  { %v3451_v38 = vadd.f32 -2.0, %v749_v37 }
 0x9d1   :  { %v3452_v39 = vmul.f32 -1.442695, %v3451_v38 }
 0x9d3   :  { %3731 = vpow2.f32 %v3452_v39 }
 0x9d9   :  { %v3732_v40 = vpop.eup %3731 }
 0x9da   :  { %v754_v41 = vadd.f32 1.0, %v3732_v40 }
 0x9dc   :  { %3733 = vrcp.f32 %v754_v41  ;;  %v766_v46 = vand.u32 2147483648, %v754_v41  ;;  %v764_v48 = vand.u32 2147483647, %v754_v41  ;;  %vm760_vm13 = vweird.f32 %v754_v41 }
 0x9de   :  { %v767_v9 = vor.u32 1.1754944e-38, %v766_v46  ;;  %vm765_vm15 = vcmp.eq.f32.partialorder %v764_v48, 8.507059e+37 }
 0x9e2   :  { %v3734_v42 = vpop.eup %3733 }
 0x9e3   :  { %v756_v44 = vmul.f32 %v3734_v42, %v754_v41  ;;  %vm761_vm12 = vweird.f32 %v3734_v42 }
 0x9e4   :  { %vm762_vm14 = vmor %vm760_vm13, %vm761_vm12 }
 0x9e5   :  { %v757_v45 = vsub.f32 1.0, %v756_v44 }
 0x9e7   :  { %v758_v47 = vmul.f32 %v3734_v42, %v757_v45 }
 0x9e9   :  { %v759_v49 = vadd.f32 %v3734_v42, %v758_v47  ;;  %v3461_v47 = vld [vmem:[%s6080_s0 + $0x88] sm:$0xff] }
 0x9eb   :  { %v763_v11 = vsel %vm762_vm14, %v3734_v42, %v759_v49 }
 0x9ec   :  { %v768_v12 = vsel %vm765_vm15, %v767_v9, %v763_v11 }
 0x9ed   :  { %789 = vmatmul.f32.vlgmr.msrb.gmra.mxu3 %v768_v12 }
 0x9ee   :  { %1157 = vmatpush.msrb.mxu3 %v4445_v50 }
 0x9f0   :  { %1158 = vmatpush.msrb.mxu3 %v4451_v51 }
 0x9f2   :  { %1159 = vmatpush.msrb.mxu3 %v4457_v52 }
 0x9f4   :  { %1160 = vmatpush.msrb.mxu3 %v4463_v53 }
 0x9f6   :  { %1161 = vmatpush.msrb.mxu3 %v4469_v54 }
 0x9f8   :  { %1162 = vmatpush.msrb.mxu3 %v4475_v55 }
 0x9fa   :  { %1163 = vmatpush.msrb.mxu3 %v4503_v14 }
 0x9fc   :  { %1164 = vmatpush.msrb.mxu3 %v4509_v16 }
 0x9fe   :  { %1165 = vmatpush.msrb.mxu3 %v4515_v21 }
 0xa00   :  { %1166 = vmatpush.msrb.mxu3 %v4521_v23 }
 0xa02   :  { %1167 = vmatpush.msrb.mxu3 %v4527_v24 }
 0xa04   :  { %1168 = vmatpush.msrb.mxu3 %v4533_v25 }
 0xa06   :  { %1169 = vmatpush.msrb.mxu3 %v4539_v26 }
 0xa08   :  { %1170 = vmatpush.msrb.mxu3 %v4545_v27 }
 0xa0a   :  { %1171 = vmatpush.msrb.mxu3 %v4551_v28 }
 0xa0c   :  { %1172 = vmatpush.msrb.mxu3 %v4579_v43 }
 0xa70   :  { %v790_v13 = vpop.f32.mrf.mxu3 }
 0xa71   :  { %v791_v57 = vadd.f32 %v3453_v56, %v790_v13 }
 0xa73   :  { %v793_v17 = vmul.f32 0.1, %v791_v57 }
 0xa75   :  { %v794_v18 = vadd.f32 %v793_v17, %v770_v15 }
 0xa77   :  { %3454 = vst [vmem:[%s6081_s3 + $0x78] sm:$0xff] %v794_v18  ;;  %v797_v19 = vmul.f32 3.0, %v794_v18  ;;  %v818_v0 = vmul.f32 0.9, %v794_v18 }
 0xa79   :  { %v3455_v20 = vadd.f32 -2.0, %v797_v19 }
 0xa7b   :  { %v3456_v58 = vmul.f32 -1.442695, %v3455_v20 }
 0xa7d   :  { %3735 = vpow2.f32 %v3456_v58 }
 0xa83   :  { %v3736_v59 = vpop.eup %3735 }
 0xa84   :  { %v802_v60 = vadd.f32 1.0, %v3736_v59 }
 0xa86   :  { %3737 = vrcp.f32 %v802_v60  ;;  %v814_v4 = vand.u32 2147483648, %v802_v60  ;;  %v812_v8 = vand.u32 2147483647, %v802_v60  ;;  %vm808_vm1 = vweird.f32 %v802_v60 }
 0xa88   :  { %v815_v29 = vor.u32 1.1754944e-38, %v814_v4  ;;  %vm813_vm3 = vcmp.eq.f32.partialorder %v812_v8, 8.507059e+37 }
 0xa8c   :  { %v3738_v61 = vpop.eup %3737 }
 0xa8d   :  { %v804_v62 = vmul.f32 %v3738_v61, %v802_v60  ;;  %vm809_vm0 = vweird.f32 %v3738_v61 }
 0xa8e   :  { %vm810_vm2 = vmor %vm808_vm1, %vm809_vm0 }
 0xa8f   :  { %v805_v63 = vsub.f32 1.0, %v804_v62 }
 0xa91   :  { %v806_v6 = vmul.f32 %v3738_v61, %v805_v63 }
 0xa93   :  { %v807_v10 = vadd.f32 %v3738_v61, %v806_v6  ;;  %v3465_v6 = vld [vmem:[%s6080_s0 + $0x90] sm:$0xff] }
 0xa95   :  { %v811_v30 = vsel %vm810_vm2, %v3738_v61, %v807_v10 }
 0xa96   :  { %v816_v31 = vsel %vm813_vm3, %v815_v29, %v811_v30 }
 0xa97   :  { %837 = vmatmul.f32.vlgmr.msra.gmra.mxu0 %v816_v31 }
 0xa98   :  { %1205 = vmatpush.msra.mxu0 %v4445_v50 }
 0xa9a   :  { %1206 = vmatpush.msra.mxu0 %v4451_v51 }
 0xa9c   :  { %1207 = vmatpush.msra.mxu0 %v4457_v52 }
 0xa9e   :  { %1208 = vmatpush.msra.mxu0 %v4463_v53 }
 0xaa0   :  { %1209 = vmatpush.msra.mxu0 %v4469_v54 }
 0xaa2   :  { %1210 = vmatpush.msra.mxu0 %v4475_v55 }
 0xaa4   :  { %1211 = vmatpush.msra.mxu0 %v4503_v14 }
 0xaa6   :  { %1212 = vmatpush.msra.mxu0 %v4509_v16 }
 0xaa8   :  { %1213 = vmatpush.msra.mxu0 %v4515_v21 }
 0xaaa   :  { %1214 = vmatpush.msra.mxu0 %v4521_v23 }
 0xaac   :  { %1215 = vmatpush.msra.mxu0 %v4527_v24 }
 0xaae   :  { %1216 = vmatpush.msra.mxu0 %v4533_v25 }
 0xab0   :  { %1217 = vmatpush.msra.mxu0 %v4539_v26 }
 0xab2   :  { %1218 = vmatpush.msra.mxu0 %v4545_v27 }
 0xab4   :  { %1219 = vmatpush.msra.mxu0 %v4551_v28 }
 0xab6   :  { %1220 = vmatpush.msra.mxu0 %v4579_v43 }
 0xb14   :  { %v838_v33 = vpop.f32.mrf.mxu0 }
 0xb15   :  { %v839_v34 = vadd.f32 %v3457_v32, %v838_v33 }
 0xb17   :  { %v841_v1 = vmul.f32 0.1, %v839_v34 }
 0xb19   :  { %v842_v2 = vadd.f32 %v841_v1, %v818_v0 }
 0xb1b   :  { %3458 = vst [vmem:[%s6081_s3 + $0x80] sm:$0xff] %v842_v2  ;;  %v845_v3 = vmul.f32 3.0, %v842_v2  ;;  %v866_v9 = vmul.f32 0.9, %v842_v2 }
 0xb1d   :  { %v3459_v5 = vadd.f32 -2.0, %v845_v3 }
 0xb1f   :  { %v3460_v22 = vmul.f32 -1.442695, %v3459_v5 }
 0xb21   :  { %3739 = vpow2.f32 %v3460_v22 }
 0xb27   :  { %v3740_v7 = vpop.eup %3739 }
 0xb28   :  { %v850_v35 = vadd.f32 1.0, %v3740_v7 }
 0xb2a   :  { %3741 = vrcp.f32 %v850_v35  ;;  %v862_v39 = vand.u32 2147483648, %v850_v35  ;;  %v860_v41 = vand.u32 2147483647, %v850_v35  ;;  %vm856_vm5 = vweird.f32 %v850_v35 }
 0xb2c   :  { %v863_v44 = vor.u32 1.1754944e-38, %v862_v39  ;;  %vm861_vm7 = vcmp.eq.f32.partialorder %v860_v41, 8.507059e+37 }
 0xb30   :  { %v3742_v36 = vpop.eup %3741 }
 0xb31   :  { %v852_v37 = vmul.f32 %v3742_v36, %v850_v35  ;;  %vm857_vm4 = vweird.f32 %v3742_v36 }
 0xb32   :  { %vm858_vm6 = vmor %vm856_vm5, %vm857_vm4 }
 0xb33   :  { %v853_v38 = vsub.f32 1.0, %v852_v37 }
 0xb35   :  { %v854_v40 = vmul.f32 %v3742_v36, %v853_v38 }
 0xb37   :  { %v855_v42 = vadd.f32 %v3742_v36, %v854_v40 }
 0xb39   :  { %v859_v45 = vsel %vm858_vm6, %v3742_v36, %v855_v42 }
 0xb3a   :  { %v864_v46 = vsel %vm861_vm7, %v863_v44, %v859_v45 }
 0xb3b   :  { %885 = vmatmul.f32.vlgmr.msra.gmra.mxu1 %v864_v46 }
 0xb3c   :  { %1253 = vmatpush.msra.mxu1 %v4445_v50 }
 0xb3e   :  { %1254 = vmatpush.msra.mxu1 %v4451_v51 }
 0xb40   :  { %1255 = vmatpush.msra.mxu1 %v4457_v52 }
 0xb42   :  { %1256 = vmatpush.msra.mxu1 %v4463_v53 }
 0xb44   :  { %1257 = vmatpush.msra.mxu1 %v4469_v54 }
 0xb46   :  { %1258 = vmatpush.msra.mxu1 %v4475_v55 }
 0xb48   :  { %1259 = vmatpush.msra.mxu1 %v4503_v14 }
 0xb4a   :  { %1260 = vmatpush.msra.mxu1 %v4509_v16 }
 0xb4c   :  { %1261 = vmatpush.msra.mxu1 %v4515_v21 }
 0xb4e   :  { %1262 = vmatpush.msra.mxu1 %v4521_v23 }
 0xb50   :  { %1263 = vmatpush.msra.mxu1 %v4527_v24 }
 0xb52   :  { %1264 = vmatpush.msra.mxu1 %v4533_v25 }
 0xb54   :  { %1265 = vmatpush.msra.mxu1 %v4539_v26 }
 0xb56   :  { %1266 = vmatpush.msra.mxu1 %v4545_v27 }
 0xb58   :  { %1267 = vmatpush.msra.mxu1 %v4551_v28 }
 0xb5a   :  { %1268 = vmatpush.msra.mxu1 %v4579_v43 }
 0xbb8   :  { %v886_v48 = vpop.f32.mrf.mxu1 }
 0xbb9   :  { %v887_v49 = vadd.f32 %v3461_v47, %v886_v48 }
 0xbbb   :  { %v889_v11 = vmul.f32 0.1, %v887_v49 }
 0xbbd   :  { %v890_v12 = vadd.f32 %v889_v11, %v866_v9 }
 0xbbf   :  { %3462 = vst [vmem:[%s6081_s3 + $0x88] sm:$0xff] %v890_v12  ;;  %v893_v56 = vmul.f32 3.0, %v890_v12  ;;  %v914_v29 = vmul.f32 0.9, %v890_v12 }
 0xbc1   :  { %v3463_v13 = vadd.f32 -2.0, %v893_v56 }
 0xbc3   :  { %v3464_v57 = vmul.f32 -1.442695, %v3463_v13 }
 0xbc5   :  { %3743 = vpow2.f32 %v3464_v57 }
 0xbcb   :  { %v3744_v15 = vpop.eup %3743 }
 0xbcc   :  { %v898_v17 = vadd.f32 1.0, %v3744_v15  ;;  %v4789_v15 = vld [vmem:[%s6078_s1 + $0x78] sm:$0xff] }
 0xbce   :  { %3745 = vrcp.f32 %v898_v17  ;;  %v910_v58 = vand.u32 2147483648, %v898_v17  ;;  %v908_v60 = vand.u32 2147483647, %v898_v17  ;;  %vm904_vm9 = vweird.f32 %v898_v17 }
 0xbd0   :  { %v911_v62 = vor.u32 1.1754944e-38, %v910_v58  ;;  %vm909_vm11 = vcmp.eq.f32.partialorder %v908_v60, 8.507059e+37  ;;  %v4819_v58 = vld [vmem:[%s6078_s1 + $0x50] sm:$0xff] }
 0xbd4   :  { %v3746_v18 = vpop.eup %3745 }
 0xbd5   :  { %v900_v19 = vmul.f32 %v3746_v18, %v898_v17  ;;  %vm905_vm8 = vweird.f32 %v3746_v18  ;;  %v4795_v17 = vld [vmem:[%s6078_s1 + $0x70] sm:$0xff] }
 0xbd6   :  { %vm906_vm10 = vmor %vm904_vm9, %vm905_vm8 }
 0xbd7   :  { %v901_v20 = vsub.f32 1.0, %v900_v19  ;;  %v4807_v19 = vld [vmem:[%s6078_s1 + $0x60] sm:$0xff] }
 0xbd9   :  { %v902_v59 = vmul.f32 %v3746_v18, %v901_v20  ;;  %v4813_v20 = vld [vmem:[%s6078_s1 + $0x58] sm:$0xff] }
 0xbdb   :  { %v903_v61 = vadd.f32 %v3746_v18, %v902_v59 }
 0xbdd   :  { %v907_v63 = vsel %vm906_vm10, %v3746_v18, %v903_v61  ;;  %v4801_v18 = vld [vmem:[%s6078_s1 + $0x68] sm:$0xff] }
 0xbde   :  { %v912_v4 = vsel %vm909_vm11, %v911_v62, %v907_v63 }
 0xbdf   :  { %933 = vmatmul.f32.vlgmr.msra.gmra.mxu2 %v912_v4 }
 0xbe0   :  { %1301 = vmatpush.msra.mxu2 %v4445_v50 }
 0xbe2   :  { %1302 = vmatpush.msra.mxu2 %v4451_v51 }
 0xbe4   :  { %1303 = vmatpush.msra.mxu2 %v4457_v52 }
 0xbe6   :  { %1304 = vmatpush.msra.mxu2 %v4463_v53 }
 0xbe8   :  { %1305 = vmatpush.msra.mxu2 %v4469_v54 }
 0xbea   :  { %1306 = vmatpush.msra.mxu2 %v4475_v55 }
 0xbec   :  { %1307 = vmatpush.msra.mxu2 %v4503_v14 }
 0xbee   :  { %1308 = vmatpush.msra.mxu2 %v4509_v16 }
 0xbf0   :  { %1309 = vmatpush.msra.mxu2 %v4515_v21 }
 0xbf2   :  { %1310 = vmatpush.msra.mxu2 %v4521_v23 }
 0xbf4   :  { %1311 = vmatpush.msra.mxu2 %v4527_v24 }
 0xbf6   :  { %1312 = vmatpush.msra.mxu2 %v4533_v25 }
 0xbf8   :  { %1313 = vmatpush.msra.mxu2 %v4539_v26 }
 0xbfa   :  { %1314 = vmatpush.msra.mxu2 %v4545_v27 }
 0xbfc   :  { %1315 = vmatpush.msra.mxu2 %v4551_v28 }
 0xbfe   :  { %1316 = vmatpush.msra.mxu2 %v4579_v43 }
 0xc62   :  { %v934_v8 = vpop.f32.mrf.mxu2 }
 0xc63   :  { %v935_v10 = vadd.f32 %v3465_v6, %v934_v8 }
 0xc65   :  { %v937_v30 = vmul.f32 0.1, %v935_v10 }
 0xc67   :  { %v938_v31 = vadd.f32 %v937_v30, %v914_v29 }
 0xc69   :  { %3466 = vst [vmem:[%s6081_s3 + $0x90] sm:$0xff] %v938_v31  ;;  %v941_v32 = vmul.f32 3.0, %v938_v31 }
 0xc6b   :  { %v3467_v33 = vadd.f32 -2.0, %v941_v32  ;;  %v4847_v32 = vld [vmem:[%s6078_s1 + $0x48] sm:$0xff] }
 0xc6d   :  { %v3468_v34 = vmul.f32 -1.442695, %v3467_v33  ;;  %v4853_v33 = vld [vmem:[%s6078_s1 + $0x40] sm:$0xff] }
 0xc6f   :  { %3747 = vpow2.f32 %v3468_v34  ;;  %v4859_v34 = vld [vmem:[%s6078_s1 + $0x38] sm:$0xff] }
 0xc75   :  { %v3748_v0 = vpop.eup %3747 }
 0xc76   :  { %v946_v1 = vadd.f32 1.0, %v3748_v0  ;;  %v4865_v0 = vld [vmem:[%s6078_s1 + $0x30] sm:$0xff] }
 0xc78   :  { %3749 = vrcp.f32 %v946_v1  ;;  %v958_v22 = vand.u32 2147483648, %v946_v1  ;;  %v956_v35 = vand.u32 2147483647, %v946_v1  ;;  %vm952_vm13 = vweird.f32 %v946_v1 }
 0xc7a   :  { %v959_v37 = vor.u32 1.1754944e-38, %v958_v22  ;;  %vm957_vm15 = vcmp.eq.f32.partialorder %v956_v35, 8.507059e+37  ;;  %v4895_v22 = vld [vmem:[%s6078_s1 + $0x8] sm:$0xff] }
 0xc7e   :  { %v3750_v2 = vpop.eup %3749 }
 0xc7f   :  { %v948_v3 = vmul.f32 %v3750_v2, %v946_v1  ;;  %vm953_vm12 = vweird.f32 %v3750_v2  ;;  %v4871_v1 = vld [vmem:[%s6078_s1 + $0x28] sm:$0xff] }
 0xc80   :  { %vm954_vm14 = vmor %vm952_vm13, %vm953_vm12 }
 0xc81   :  { %v949_v5 = vsub.f32 1.0, %v948_v3  ;;  %v4883_v3 = vld [vmem:[%s6078_s1 + $0x18] sm:$0xff] }
 0xc83   :  { %v950_v7 = vmul.f32 %v3750_v2, %v949_v5  ;;  %v4889_v5 = vld [vmem:[%s6078_s1 + $0x10] sm:$0xff] }
 0xc85   :  { %v951_v36 = vadd.f32 %v3750_v2, %v950_v7  ;;  %v3477_v7 = vld [vmem:[%s6080_s0 + $0xa8] sm:$0xff] }
 0xc87   :  { %v955_v38 = vsel %vm954_vm14, %v3750_v2, %v951_v36  ;;  %v4877_v2 = vld [vmem:[%s6078_s1 + $0x20] sm:$0xff] }
 0xc88   :  { %v960_v39 = vsel %vm957_vm15, %v959_v37, %v955_v38 }
 0xc89   :  { %981 = vmatmul.f32.vlgmr.msra.gmra.mxu3 %v960_v39 }
 0xc8a   :  { %1349 = vmatpush.msra.mxu3 %v4445_v50  ;;  %v3469_v50 = vld [vmem:[%s6080_s0 + $0x98] sm:$0xff] }
 0xc8c   :  { %1350 = vmatpush.msra.mxu3 %v4451_v51 }
 0xc8e   :  { %1351 = vmatpush.msra.mxu3 %v4457_v52 }
 0xc90   :  { %1352 = vmatpush.msra.mxu3 %v4463_v53  ;;  %v962_v53 = vmul.f32 0.9, %v938_v31 }
 0xc92   :  { %1353 = vmatpush.msra.mxu3 %v4469_v54 }
 0xc94   :  { %1354 = vmatpush.msra.mxu3 %v4475_v55 }
 0xc96   :  { %1355 = vmatpush.msra.mxu3 %v4503_v14 }
 0xc98   :  { %1356 = vmatpush.msra.mxu3 %v4509_v16 }
 0xc9a   :  { %1357 = vmatpush.msra.mxu3 %v4515_v21 }
 0xc9c   :  { %1358 = vmatpush.msra.mxu3 %v4521_v23 }
 0xc9e   :  { %1359 = vmatpush.msra.mxu3 %v4527_v24 }
 0xca0   :  { %1360 = vmatpush.msra.mxu3 %v4533_v25 }
 0xca2   :  { %1361 = vmatpush.msra.mxu3 %v4539_v26 }
 0xca4   :  { %1362 = vmatpush.msra.mxu3 %v4545_v27 }
 0xca6   :  { %1363 = vmatpush.msra.mxu3 %v4551_v28 }
 0xca8   :  { %1364 = vmatpush.msra.mxu3 %v4579_v43 }
 0xd0c   :  { %v982_v51 = vpop.f32.mrf.mxu3 }
 0xd0d   :  { %v983_v52 = vadd.f32 %v3469_v50, %v982_v51 }
 0xd0f   :  { %v985_v54 = vmul.f32 0.1, %v983_v52 }
 0xd11   :  { %v986_v55 = vadd.f32 %v985_v54, %v962_v53 }
 0xd13   :  { %3470 = vst [vmem:[%s6081_s3 + $0x98] sm:$0xff] %v986_v55  ;;  %v989_v40 = vmul.f32 3.0, %v986_v55  ;;  %v1010_v59 = vmul.f32 0.9, %v986_v55 }
 0xd15   :  { %v3471_v41 = vadd.f32 -2.0, %v989_v40 }
 0xd17   :  { %v3472_v42 = vmul.f32 -1.442695, %v3471_v41 }
 0xd19   :  { %3751 = vpow2.f32 %v3472_v42 }
 0xd1f   :  { %v3752_v44 = vpop.eup %3751 }
 0xd20   :  { %v994_v45 = vadd.f32 1.0, %v3752_v44 }
 0xd22   :  { %3753 = vrcp.f32 %v994_v45  ;;  %v1006_v49 = vand.u32 2147483648, %v994_v45  ;;  %v1004_v11 = vand.u32 2147483647, %v994_v45  ;;  %vm1000_vm1 = vweird.f32 %v994_v45 }
 0xd24   :  { %v1007_v56 = vor.u32 1.1754944e-38, %v1006_v49  ;;  %vm1005_vm3 = vcmp.eq.f32.partialorder %v1004_v11, 8.507059e+37  ;;  %v4923_v49 = vld [vmem:[%s6078_s1] sm:$0xff] }
 0xd28   :  { %v3754_v46 = vpop.eup %3753 }
 0xd29   :  { %v996_v47 = vmul.f32 %v3754_v46, %v994_v45  ;;  %vm1001_vm0 = vweird.f32 %v3754_v46 }
 0xd2a   :  { %vm1002_vm2 = vmor %vm1000_vm1, %vm1001_vm0 }
 0xd2b   :  { %v997_v48 = vsub.f32 1.0, %v996_v47 }
 0xd2d   :  { %v998_v9 = vmul.f32 %v3754_v46, %v997_v48 }
 0xd2f   :  { %v999_v12 = vadd.f32 %v3754_v46, %v998_v9  ;;  %v3481_v9 = vld [vmem:[%s6080_s0 + $0xb0] sm:$0xff] }
 0xd31   :  { %v1003_v13 = vsel %vm1002_vm2, %v3754_v46, %v999_v12 }
 0xd32   :  { %v1008_v57 = vsel %vm1005_vm3, %v1007_v56, %v1003_v13 }
 0xd33   :  { %1029 = vmatmul.f32.vlgmr.msrb.gmra.mxu0 %v1008_v57 }
 0xd34   :  { %1397 = vmatpush.msrb.mxu0 %v4789_v15 }
 0xd36   :  { %1398 = vmatpush.msrb.mxu0 %v4795_v17 }
 0xd38   :  { %1399 = vmatpush.msrb.mxu0 %v4801_v18 }
 0xd3a   :  { %1400 = vmatpush.msrb.mxu0 %v4807_v19 }
 0xd3c   :  { %1401 = vmatpush.msrb.mxu0 %v4813_v20 }
 0xd3e   :  { %1402 = vmatpush.msrb.mxu0 %v4819_v58 }
 0xd40   :  { %1403 = vmatpush.msrb.mxu0 %v4503_v14  ;;  %v3473_v14 = vld [vmem:[%s6080_s0 + $0xa0] sm:$0xff] }
 0xd42   :  { %1404 = vmatpush.msrb.mxu0 %v4509_v16 }
 0xd44   :  { %1405 = vmatpush.msrb.mxu0 %v4515_v21 }
 0xd46   :  { %1406 = vmatpush.msrb.mxu0 %v4521_v23 }
 0xd48   :  { %1407 = vmatpush.msrb.mxu0 %v4527_v24 }
 0xd4a   :  { %1408 = vmatpush.msrb.mxu0 %v4533_v25 }
 0xd4c   :  { %1409 = vmatpush.msrb.mxu0 %v4539_v26 }
 0xd4e   :  { %1410 = vmatpush.msrb.mxu0 %v4545_v27 }
 0xd50   :  { %1411 = vmatpush.msrb.mxu0 %v4551_v28 }
 0xd52   :  { %1412 = vmatpush.msrb.mxu0 %v4579_v43 }
 0xdb0   :  { %v1030_v16 = vpop.f32.mrf.mxu0 }
 0xdb1   :  { %v1031_v21 = vadd.f32 %v3473_v14, %v1030_v16 }
 0xdb3   :  { %v1033_v23 = vmul.f32 0.1, %v1031_v21 }
 0xdb5   :  { %v1034_v60 = vadd.f32 %v1033_v23, %v1010_v59 }
 0xdb7   :  { %3474 = vst [vmem:[%s6081_s3 + $0xa0] sm:$0xff] %v1034_v60  ;;  %v1037_v24 = vmul.f32 3.0, %v1034_v60  ;;  %v1058_v37 = vmul.f32 0.9, %v1034_v60 }
 0xdb9   :  { %v3475_v25 = vadd.f32 -2.0, %v1037_v24 }
 0xdbb   :  { %v3476_v26 = vmul.f32 -1.442695, %v3475_v25 }
 0xdbd   :  { %3755 = vpow2.f32 %v3476_v26 }
 0xdc3   :  { %v3756_v27 = vpop.eup %3755 }
 0xdc4   :  { %v1042_v28 = vadd.f32 1.0, %v3756_v27 }
 0xdc6   :  { %3757 = vrcp.f32 %v1042_v28  ;;  %v1054_v4 = vand.u32 2147483648, %v1042_v28  ;;  %v1052_v8 = vand.u32 2147483647, %v1042_v28  ;;  %vm1048_vm5 = vweird.f32 %v1042_v28 }
 0xdc8   :  { %v1055_v29 = vor.u32 1.1754944e-38, %v1054_v4  ;;  %vm1053_vm7 = vcmp.eq.f32.partialorder %v1052_v8, 8.507059e+37 }
 0xdcc   :  { %v3758_v61 = vpop.eup %3757 }
 0xdcd   :  { %v1044_v62 = vmul.f32 %v3758_v61, %v1042_v28  ;;  %vm1049_vm4 = vweird.f32 %v3758_v61 }
 0xdce   :  { %vm1050_vm6 = vmor %vm1048_vm5, %vm1049_vm4 }
 0xdcf   :  { %v1045_v63 = vsub.f32 1.0, %v1044_v62 }
 0xdd1   :  { %v1046_v6 = vmul.f32 %v3758_v61, %v1045_v63 }
 0xdd3   :  { %v1047_v10 = vadd.f32 %v3758_v61, %v1046_v6  ;;  %v3485_v6 = vld [vmem:[%s6080_s0 + $0xb8] sm:$0xff] }
 0xdd5   :  { %v1051_v30 = vsel %vm1050_vm6, %v3758_v61, %v1047_v10 }
 0xdd6   :  { %v1056_v31 = vsel %vm1053_vm7, %v1055_v29, %v1051_v30 }
 0xdd7   :  { %1077 = vmatmul.f32.vlgmr.msrb.gmra.mxu1 %v1056_v31 }
 0xdd8   :  { %1445 = vmatpush.msrb.mxu1 %v4789_v15 }
 0xdda   :  { %1446 = vmatpush.msrb.mxu1 %v4795_v17 }
 0xddc   :  { %1447 = vmatpush.msrb.mxu1 %v4801_v18 }
 0xdde   :  { %1448 = vmatpush.msrb.mxu1 %v4807_v19 }
 0xde0   :  { %1449 = vmatpush.msrb.mxu1 %v4813_v20 }
 0xde2   :  { %1450 = vmatpush.msrb.mxu1 %v4819_v58 }
 0xde4   :  { %1451 = vmatpush.msrb.mxu1 %v4847_v32 }
 0xde6   :  { %1452 = vmatpush.msrb.mxu1 %v4853_v33 }
 0xde8   :  { %1453 = vmatpush.msrb.mxu1 %v4859_v34 }
 0xdea   :  { %1454 = vmatpush.msrb.mxu1 %v4865_v0 }
 0xdec   :  { %1455 = vmatpush.msrb.mxu1 %v4871_v1 }
 0xdee   :  { %1456 = vmatpush.msrb.mxu1 %v4877_v2 }
 0xdf0   :  { %1457 = vmatpush.msrb.mxu1 %v4883_v3 }
 0xdf2   :  { %1458 = vmatpush.msrb.mxu1 %v4889_v5 }
 0xdf4   :  { %1459 = vmatpush.msrb.mxu1 %v4895_v22 }
 0xdf6   :  { %1460 = vmatpush.msrb.mxu1 %v4579_v43 }
 0xe54   :  { %v1078_v35 = vpop.f32.mrf.mxu1 }
 0xe55   :  { %v1079_v36 = vadd.f32 %v3477_v7, %v1078_v35 }
 0xe57   :  { %v1081_v38 = vmul.f32 0.1, %v1079_v36 }
 0xe59   :  { %v1082_v39 = vadd.f32 %v1081_v38, %v1058_v37 }
 0xe5b   :  { %3478 = vst [vmem:[%s6081_s3 + $0xa8] sm:$0xff] %v1082_v39  ;;  %v1085_v50 = vmul.f32 3.0, %v1082_v39  ;;  %v1106_v56 = vmul.f32 0.9, %v1082_v39 }
 0xe5d   :  { %v3479_v51 = vadd.f32 -2.0, %v1085_v50 }
 0xe5f   :  { %v3480_v52 = vmul.f32 -1.442695, %v3479_v51 }
 0xe61   :  { %3759 = vpow2.f32 %v3480_v52 }
 0xe67   :  { %v3760_v53 = vpop.eup %3759 }
 0xe68   :  { %v1090_v54 = vadd.f32 1.0, %v3760_v53 }
 0xe6a   :  { %3761 = vrcp.f32 %v1090_v54  ;;  %v1102_v41 = vand.u32 2147483648, %v1090_v54  ;;  %v1100_v44 = vand.u32 2147483647, %v1090_v54  ;;  %vm1096_vm9 = vweird.f32 %v1090_v54 }
 0xe6c   :  { %v1103_v46 = vor.u32 1.1754944e-38, %v1102_v41  ;;  %vm1101_vm11 = vcmp.eq.f32.partialorder %v1100_v44, 8.507059e+37 }
 0xe70   :  { %v3762_v43 = vpop.eup %3761 }
 0xe71   :  { %v1092_v55 = vmul.f32 %v3762_v43, %v1090_v54  ;;  %vm1097_vm8 = vweird.f32 %v3762_v43 }
 0xe72   :  { %vm1098_vm10 = vmor %vm1096_vm9, %vm1097_vm8 }
 0xe73   :  { %v1093_v40 = vsub.f32 1.0, %v1092_v55 }
 0xe75   :  { %v1094_v42 = vmul.f32 %v3762_v43, %v1093_v40 }
 0xe77   :  { %v1095_v45 = vadd.f32 %v3762_v43, %v1094_v42  ;;  %v3489_v42 = vld [vmem:[%s6080_s0 + $0xc0] sm:$0xff] }
 0xe79   :  { %v1099_v47 = vsel %vm1098_vm10, %v3762_v43, %v1095_v45 }
 0xe7a   :  { %v1104_v48 = vsel %vm1101_vm11, %v1103_v46, %v1099_v47 }
 0xe7b   :  { %1125 = vmatmul.f32.vlgmr.msrb.gmra.mxu2 %v1104_v48 }
 0xe7c   :  { %1493 = vmatpush.msrb.mxu2 %v4789_v15 }
 0xe7e   :  { %1494 = vmatpush.msrb.mxu2 %v4795_v17 }
 0xe80   :  { %1495 = vmatpush.msrb.mxu2 %v4801_v18 }
 0xe82   :  { %1496 = vmatpush.msrb.mxu2 %v4807_v19 }
 0xe84   :  { %1497 = vmatpush.msrb.mxu2 %v4813_v20 }
 0xe86   :  { %1498 = vmatpush.msrb.mxu2 %v4819_v58 }
 0xe88   :  { %1499 = vmatpush.msrb.mxu2 %v4847_v32 }
 0xe8a   :  { %1500 = vmatpush.msrb.mxu2 %v4853_v33 }
 0xe8c   :  { %1501 = vmatpush.msrb.mxu2 %v4859_v34 }
 0xe8e   :  { %1502 = vmatpush.msrb.mxu2 %v4865_v0 }
 0xe90   :  { %1503 = vmatpush.msrb.mxu2 %v4871_v1 }
 0xe92   :  { %1504 = vmatpush.msrb.mxu2 %v4877_v2 }
 0xe94   :  { %1505 = vmatpush.msrb.mxu2 %v4883_v3 }
 0xe96   :  { %1506 = vmatpush.msrb.mxu2 %v4889_v5 }
 0xe98   :  { %1507 = vmatpush.msrb.mxu2 %v4895_v22 }
 0xe9a   :  { %1508 = vmatpush.msrb.mxu2 %v4923_v49 }
 0xefe   :  { %v1126_v11 = vpop.f32.mrf.mxu2 }
 0xeff   :  { %v1127_v12 = vadd.f32 %v3481_v9, %v1126_v11 }
 0xf01   :  { %v1129_v13 = vmul.f32 0.1, %v1127_v12 }
 0xf03   :  { %v1130_v57 = vadd.f32 %v1129_v13, %v1106_v56 }
 0xf05   :  { %3482 = vst [vmem:[%s6081_s3 + $0xb0] sm:$0xff] %v1130_v57  ;;  %v1133_v14 = vmul.f32 3.0, %v1130_v57  ;;  %v1154_v29 = vmul.f32 0.9, %v1130_v57 }
 0xf07   :  { %v3483_v16 = vadd.f32 -2.0, %v1133_v14 }
 0xf09   :  { %v3484_v21 = vmul.f32 -1.442695, %v3483_v16 }
 0xf0b   :  { %3763 = vpow2.f32 %v3484_v21 }
 0xf11   :  { %v3764_v59 = vpop.eup %3763 }
 0xf12   :  { %v1138_v23 = vadd.f32 1.0, %v3764_v59 }
 0xf14   :  { %3765 = vrcp.f32 %v1138_v23  ;;  %v1150_v26 = vand.u32 2147483648, %v1138_v23  ;;  %v1148_v28 = vand.u32 2147483647, %v1138_v23  ;;  %vm1144_vm13 = vweird.f32 %v1138_v23 }
 0xf16   :  { %v1151_v62 = vor.u32 1.1754944e-38, %v1150_v26  ;;  %vm1149_vm15 = vcmp.eq.f32.partialorder %v1148_v28, 8.507059e+37 }
 0xf1a   :  { %v3766_v60 = vpop.eup %3765 }
 0xf1b   :  { %v1140_v24 = vmul.f32 %v3766_v60, %v1138_v23  ;;  %vm1145_vm12 = vweird.f32 %v3766_v60 }
 0xf1c   :  { %vm1146_vm14 = vmor %vm1144_vm13, %vm1145_vm12 }
 0xf1d   :  { %v1141_v25 = vsub.f32 1.0, %v1140_v24 }
 0xf1f   :  { %v1142_v27 = vmul.f32 %v3766_v60, %v1141_v25 }
 0xf21   :  { %v1143_v61 = vadd.f32 %v3766_v60, %v1142_v27  ;;  %v3493_v27 = vld [vmem:[%s6080_s0 + $0xc8] sm:$0xff] }
 0xf23   :  { %v1147_v63 = vsel %vm1146_vm14, %v3766_v60, %v1143_v61 }
 0xf24   :  { %v1152_v4 = vsel %vm1149_vm15, %v1151_v62, %v1147_v63 }
 0xf25   :  { %1173 = vmatmul.f32.vlgmr.msrb.gmra.mxu3 %v1152_v4 }
 0xf26   :  { %1541 = vmatpush.msrb.mxu3 %v4789_v15 }
 0xf28   :  { %1542 = vmatpush.msrb.mxu3 %v4795_v17 }
 0xf2a   :  { %1543 = vmatpush.msrb.mxu3 %v4801_v18 }
 0xf2c   :  { %1544 = vmatpush.msrb.mxu3 %v4807_v19 }
 0xf2e   :  { %1545 = vmatpush.msrb.mxu3 %v4813_v20 }
 0xf30   :  { %1546 = vmatpush.msrb.mxu3 %v4819_v58 }
 0xf32   :  { %1547 = vmatpush.msrb.mxu3 %v4847_v32 }
 0xf34   :  { %1548 = vmatpush.msrb.mxu3 %v4853_v33 }
 0xf36   :  { %1549 = vmatpush.msrb.mxu3 %v4859_v34 }
 0xf38   :  { %1550 = vmatpush.msrb.mxu3 %v4865_v0 }
 0xf3a   :  { %1551 = vmatpush.msrb.mxu3 %v4871_v1 }
 0xf3c   :  { %1552 = vmatpush.msrb.mxu3 %v4877_v2 }
 0xf3e   :  { %1553 = vmatpush.msrb.mxu3 %v4883_v3 }
 0xf40   :  { %1554 = vmatpush.msrb.mxu3 %v4889_v5 }
 0xf42   :  { %1555 = vmatpush.msrb.mxu3 %v4895_v22 }
 0xf44   :  { %1556 = vmatpush.msrb.mxu3 %v4923_v49 }
 0xfa8   :  { %v1174_v8 = vpop.f32.mrf.mxu3 }
 0xfa9   :  { %v1175_v10 = vadd.f32 %v3485_v6, %v1174_v8 }
 0xfab   :  { %v1177_v30 = vmul.f32 0.1, %v1175_v10 }
 0xfad   :  { %v1178_v31 = vadd.f32 %v1177_v30, %v1154_v29 }
 0xfaf   :  { %3486 = vst [vmem:[%s6081_s3 + $0xb8] sm:$0xff] %v1178_v31  ;;  %v1181_v7 = vmul.f32 3.0, %v1178_v31  ;;  %v1202_v46 = vmul.f32 0.9, %v1178_v31 }
 0xfb1   :  { %v3487_v35 = vadd.f32 -2.0, %v1181_v7 }
 0xfb3   :  { %v3488_v36 = vmul.f32 -1.442695, %v3487_v35 }
 0xfb5   :  { %3767 = vpow2.f32 %v3488_v36 }
 0xfbb   :  { %v3768_v37 = vpop.eup %3767 }
 0xfbc   :  { %v1186_v38 = vadd.f32 1.0, %v3768_v37 }
 0xfbe   :  { %3769 = vrcp.f32 %v1186_v38  ;;  %v1198_v52 = vand.u32 2147483648, %v1186_v38  ;;  %v1196_v54 = vand.u32 2147483647, %v1186_v38  ;;  %vm1192_vm1 = vweird.f32 %v1186_v38 }
 0xfc0   :  { %v1199_v55 = vor.u32 1.1754944e-38, %v1198_v52  ;;  %vm1197_vm3 = vcmp.eq.f32.partialorder %v1196_v54, 8.507059e+37 }
 0xfc4   :  { %v3770_v39 = vpop.eup %3769 }
 0xfc5   :  { %v1188_v50 = vmul.f32 %v3770_v39, %v1186_v38  ;;  %vm1193_vm0 = vweird.f32 %v3770_v39 }
 0xfc6   :  { %vm1194_vm2 = vmor %vm1192_vm1, %vm1193_vm0 }
 0xfc7   :  { %v1189_v51 = vsub.f32 1.0, %v1188_v50 }
 0xfc9   :  { %v1190_v53 = vmul.f32 %v3770_v39, %v1189_v51 }
 0xfcb   :  { %v1191_v43 = vadd.f32 %v3770_v39, %v1190_v53  ;;  %v3497_v53 = vld [vmem:[%s6080_s0 + $0xd0] sm:$0xff] }
 0xfcd   :  { %v1195_v40 = vsel %vm1194_vm2, %v3770_v39, %v1191_v43 }
 0xfce   :  { %v1200_v41 = vsel %vm1197_vm3, %v1199_v55, %v1195_v40 }
 0xfcf   :  { %1221 = vmatmul.f32.vlgmr.msra.gmra.mxu0 %v1200_v41 }
 0xfd0   :  { %1589 = vmatpush.msra.mxu0 %v4789_v15 }
 0xfd2   :  { %1590 = vmatpush.msra.mxu0 %v4795_v17 }
 0xfd4   :  { %1591 = vmatpush.msra.mxu0 %v4801_v18 }
 0xfd6   :  { %1592 = vmatpush.msra.mxu0 %v4807_v19 }
 0xfd8   :  { %1593 = vmatpush.msra.mxu0 %v4813_v20 }
 0xfda   :  { %1594 = vmatpush.msra.mxu0 %v4819_v58 }
 0xfdc   :  { %1595 = vmatpush.msra.mxu0 %v4847_v32 }
 0xfde   :  { %1596 = vmatpush.msra.mxu0 %v4853_v33 }
 0xfe0   :  { %1597 = vmatpush.msra.mxu0 %v4859_v34 }
 0xfe2   :  { %1598 = vmatpush.msra.mxu0 %v4865_v0 }
 0xfe4   :  { %1599 = vmatpush.msra.mxu0 %v4871_v1 }
 0xfe6   :  { %1600 = vmatpush.msra.mxu0 %v4877_v2 }
 0xfe8   :  { %1601 = vmatpush.msra.mxu0 %v4883_v3 }
 0xfea   :  { %1602 = vmatpush.msra.mxu0 %v4889_v5 }
 0xfec   :  { %1603 = vmatpush.msra.mxu0 %v4895_v22 }
 0xfee   :  { %1604 = vmatpush.msra.mxu0 %v4923_v49 }
0x104c   :  { %v1222_v44 = vpop.f32.mrf.mxu0 }
0x104d   :  { %v1223_v45 = vadd.f32 %v3489_v42, %v1222_v44 }
0x104f   :  { %v1225_v47 = vmul.f32 0.1, %v1223_v45 }
0x1051   :  { %v1226_v48 = vadd.f32 %v1225_v47, %v1202_v46 }
0x1053   :  { %3490 = vst [vmem:[%s6081_s3 + $0xc0] sm:$0xff] %v1226_v48  ;;  %v1229_v9 = vmul.f32 3.0, %v1226_v48  ;;  %v1250_v62 = vmul.f32 0.9, %v1226_v48 }
0x1055   :  { %v3491_v11 = vadd.f32 -2.0, %v1229_v9 }
0x1057   :  { %v3492_v12 = vmul.f32 -1.442695, %v3491_v11 }
0x1059   :  { %3771 = vpow2.f32 %v3492_v12 }
0x105f   :  { %v3772_v56 = vpop.eup %3771 }
0x1060   :  { %v1234_v13 = vadd.f32 1.0, %v3772_v56 }
0x1062   :  { %3773 = vrcp.f32 %v1234_v13  ;;  %v1246_v21 = vand.u32 2147483648, %v1234_v13  ;;  %v1244_v23 = vand.u32 2147483647, %v1234_v13  ;;  %vm1240_vm5 = vweird.f32 %v1234_v13 }
0x1064   :  { %v1247_v24 = vor.u32 1.1754944e-38, %v1246_v21  ;;  %vm1245_vm7 = vcmp.eq.f32.partialorder %v1244_v23, 8.507059e+37 }
0x1068   :  { %v3774_v57 = vpop.eup %3773 }
0x1069   :  { %v1236_v14 = vmul.f32 %v3774_v57, %v1234_v13  ;;  %vm1241_vm4 = vweird.f32 %v3774_v57 }
0x106a   :  { %vm1242_vm6 = vmor %vm1240_vm5, %vm1241_vm4 }
0x106b   :  { %v1237_v16 = vsub.f32 1.0, %v1236_v14 }
0x106d   :  { %v1238_v59 = vmul.f32 %v3774_v57, %v1237_v16 }
0x106f   :  { %v1239_v60 = vadd.f32 %v3774_v57, %v1238_v59  ;;  %v3501_v59 = vld [vmem:[%s6080_s0 + $0xd8] sm:$0xff] }
0x1071   :  { %v1243_v25 = vsel %vm1242_vm6, %v3774_v57, %v1239_v60 }
0x1072   :  { %v1248_v26 = vsel %vm1245_vm7, %v1247_v24, %v1243_v25 }
0x1073   :  { %1269 = vmatmul.f32.vlgmr.msra.gmra.mxu1 %v1248_v26 }
0x1074   :  { %1637 = vmatpush.msra.mxu1 %v4789_v15 }
0x1076   :  { %1638 = vmatpush.msra.mxu1 %v4795_v17 }
0x1078   :  { %1639 = vmatpush.msra.mxu1 %v4801_v18 }
0x107a   :  { %1640 = vmatpush.msra.mxu1 %v4807_v19 }
0x107c   :  { %1641 = vmatpush.msra.mxu1 %v4813_v20 }
0x107e   :  { %1642 = vmatpush.msra.mxu1 %v4819_v58 }
0x1080   :  { %1643 = vmatpush.msra.mxu1 %v4847_v32 }
0x1082   :  { %1644 = vmatpush.msra.mxu1 %v4853_v33 }
0x1084   :  { %1645 = vmatpush.msra.mxu1 %v4859_v34 }
0x1086   :  { %1646 = vmatpush.msra.mxu1 %v4865_v0 }
0x1088   :  { %1647 = vmatpush.msra.mxu1 %v4871_v1 }
0x108a   :  { %1648 = vmatpush.msra.mxu1 %v4877_v2 }
0x108c   :  { %1649 = vmatpush.msra.mxu1 %v4883_v3 }
0x108e   :  { %1650 = vmatpush.msra.mxu1 %v4889_v5 }
0x1090   :  { %1651 = vmatpush.msra.mxu1 %v4895_v22 }
0x1092   :  { %1652 = vmatpush.msra.mxu1 %v4923_v49 }
0x10f0   :  { %v1270_v28 = vpop.f32.mrf.mxu1 }
0x10f1   :  { %v1271_v61 = vadd.f32 %v3493_v27, %v1270_v28 }
0x10f3   :  { %v1273_v63 = vmul.f32 0.1, %v1271_v61 }
0x10f5   :  { %v1274_v4 = vadd.f32 %v1273_v63, %v1250_v62 }
0x10f7   :  { %3494 = vst [vmem:[%s6081_s3 + $0xc8] sm:$0xff] %v1274_v4  ;;  %v1277_v6 = vmul.f32 3.0, %v1274_v4  ;;  %v1298_v55 = vmul.f32 0.9, %v1274_v4 }
0x10f9   :  { %v3495_v8 = vadd.f32 -2.0, %v1277_v6 }
0x10fb   :  { %v3496_v10 = vmul.f32 -1.442695, %v3495_v8 }
0x10fd   :  { %3775 = vpow2.f32 %v3496_v10 }
0x1103   :  { %v3776_v29 = vpop.eup %3775 }
0x1104   :  { %v1282_v30 = vadd.f32 1.0, %v3776_v29 }
0x1106   :  { %3777 = vrcp.f32 %v1282_v30  ;;  %v1294_v36 = vand.u32 2147483648, %v1282_v30  ;;  %v1292_v38 = vand.u32 2147483647, %v1282_v30  ;;  %vm1288_vm9 = vweird.f32 %v1282_v30 }
0x1108   :  { %v1295_v50 = vor.u32 1.1754944e-38, %v1294_v36  ;;  %vm1293_vm11 = vcmp.eq.f32.partialorder %v1292_v38, 8.507059e+37 }
0x110c   :  { %v3778_v31 = vpop.eup %3777 }
0x110d   :  { %v1284_v7 = vmul.f32 %v3778_v31, %v1282_v30  ;;  %vm1289_vm8 = vweird.f32 %v3778_v31 }
0x110e   :  { %vm1290_vm10 = vmor %vm1288_vm9, %vm1289_vm8 }
0x110f   :  { %v1285_v35 = vsub.f32 1.0, %v1284_v7 }
0x1111   :  { %v1286_v37 = vmul.f32 %v3778_v31, %v1285_v35 }
0x1113   :  { %v1287_v39 = vadd.f32 %v3778_v31, %v1286_v37  ;;  %v3505_v37 = vld [vmem:[%s6080_s0 + $0xe0] sm:$0xff] }
0x1115   :  { %v1291_v51 = vsel %vm1290_vm10, %v3778_v31, %v1287_v39 }
0x1116   :  { %v1296_v52 = vsel %vm1293_vm11, %v1295_v50, %v1291_v51 }
0x1117   :  { %1317 = vmatmul.f32.vlgmr.msra.gmra.mxu2 %v1296_v52 }
0x1118   :  { %1685 = vmatpush.msra.mxu2 %v4789_v15 }
0x111a   :  { %1686 = vmatpush.msra.mxu2 %v4795_v17 }
0x111c   :  { %1687 = vmatpush.msra.mxu2 %v4801_v18 }
0x111e   :  { %1688 = vmatpush.msra.mxu2 %v4807_v19 }
0x1120   :  { %1689 = vmatpush.msra.mxu2 %v4813_v20 }
0x1122   :  { %1690 = vmatpush.msra.mxu2 %v4819_v58 }
0x1124   :  { %1691 = vmatpush.msra.mxu2 %v4847_v32 }
0x1126   :  { %1692 = vmatpush.msra.mxu2 %v4853_v33 }
0x1128   :  { %1693 = vmatpush.msra.mxu2 %v4859_v34 }
0x112a   :  { %1694 = vmatpush.msra.mxu2 %v4865_v0 }
0x112c   :  { %1695 = vmatpush.msra.mxu2 %v4871_v1 }
0x112e   :  { %1696 = vmatpush.msra.mxu2 %v4877_v2 }
0x1130   :  { %1697 = vmatpush.msra.mxu2 %v4883_v3 }
0x1132   :  { %1698 = vmatpush.msra.mxu2 %v4889_v5 }
0x1134   :  { %1699 = vmatpush.msra.mxu2 %v4895_v22 }
0x1136   :  { %1700 = vmatpush.msra.mxu2 %v4923_v49 }
0x119a   :  { %v1318_v54 = vpop.f32.mrf.mxu2 }
0x119b   :  { %v1319_v43 = vadd.f32 %v3497_v53, %v1318_v54 }
0x119d   :  { %v1321_v40 = vmul.f32 0.1, %v1319_v43 }
0x119f   :  { %v1322_v41 = vadd.f32 %v1321_v40, %v1298_v55 }
0x11a1   :  { %3498 = vst [vmem:[%s6081_s3 + $0xd0] sm:$0xff] %v1322_v41  ;;  %v1325_v42 = vmul.f32 3.0, %v1322_v41  ;;  %v1346_v24 = vmul.f32 0.9, %v1322_v41 }
0x11a3   :  { %v3499_v44 = vadd.f32 -2.0, %v1325_v42 }
0x11a5   :  { %v3500_v45 = vmul.f32 -1.442695, %v3499_v44 }
0x11a7   :  { %3779 = vpow2.f32 %v3500_v45 }
0x11ad   :  { %v3780_v46 = vpop.eup %3779 }
0x11ae   :  { %v1330_v47 = vadd.f32 1.0, %v3780_v46 }
0x11b0   :  { %3781 = vrcp.f32 %v1330_v47  ;;  %v1342_v12 = vand.u32 2147483648, %v1330_v47  ;;  %v1340_v13 = vand.u32 2147483647, %v1330_v47  ;;  %vm1336_vm13 = vweird.f32 %v1330_v47 }
0x11b2   :  { %v1343_v14 = vor.u32 1.1754944e-38, %v1342_v12  ;;  %vm1341_vm15 = vcmp.eq.f32.partialorder %v1340_v13, 8.507059e+37 }
0x11b6   :  { %v3782_v48 = vpop.eup %3781 }
0x11b7   :  { %v1332_v9 = vmul.f32 %v3782_v48, %v1330_v47  ;;  %vm1337_vm12 = vweird.f32 %v3782_v48 }
0x11b8   :  { %vm1338_vm14 = vmor %vm1336_vm13, %vm1337_vm12 }
0x11b9   :  { %v1333_v11 = vsub.f32 1.0, %v1332_v9 }
0x11bb   :  { %v1334_v56 = vmul.f32 %v3782_v48, %v1333_v11 }
0x11bd   :  { %v1335_v57 = vadd.f32 %v3782_v48, %v1334_v56  ;;  %v3509_v56 = vld [vmem:[%s6080_s0 + $0xe8] sm:$0xff] }
0x11bf   :  { %v1339_v16 = vsel %vm1338_vm14, %v3782_v48, %v1335_v57 }
0x11c0   :  { %v1344_v21 = vsel %vm1341_vm15, %v1343_v14, %v1339_v16 }
0x11c1   :  { %1365 = vmatmul.f32.vlgmr.msra.gmra.mxu3 %v1344_v21 }
0x11c2   :  { %1733 = vmatpush.msra.mxu3 %v4789_v15 }
0x11c4   :  { %1734 = vmatpush.msra.mxu3 %v4795_v17 }
0x11c6   :  { %1735 = vmatpush.msra.mxu3 %v4801_v18 }
0x11c8   :  { %1736 = vmatpush.msra.mxu3 %v4807_v19 }
0x11ca   :  { %1737 = vmatpush.msra.mxu3 %v4813_v20 }
0x11cc   :  { %1738 = vmatpush.msra.mxu3 %v4819_v58 }
0x11ce   :  { %1739 = vmatpush.msra.mxu3 %v4847_v32 }
0x11d0   :  { %1740 = vmatpush.msra.mxu3 %v4853_v33 }
0x11d2   :  { %1741 = vmatpush.msra.mxu3 %v4859_v34 }
0x11d4   :  { %1742 = vmatpush.msra.mxu3 %v4865_v0 }
0x11d6   :  { %1743 = vmatpush.msra.mxu3 %v4871_v1 }
0x11d8   :  { %1744 = vmatpush.msra.mxu3 %v4877_v2 }
0x11da   :  { %1745 = vmatpush.msra.mxu3 %v4883_v3 }
0x11dc   :  { %1746 = vmatpush.msra.mxu3 %v4889_v5 }
0x11de   :  { %1747 = vmatpush.msra.mxu3 %v4895_v22 }
0x11e0   :  { %1748 = vmatpush.msra.mxu3 %v4923_v49 }
0x1244   :  { %v1366_v23 = vpop.f32.mrf.mxu3 }
0x1245   :  { %v1367_v60 = vadd.f32 %v3501_v59, %v1366_v23 }
0x1247   :  { %v1369_v25 = vmul.f32 0.1, %v1367_v60 }
0x1249   :  { %v1370_v26 = vadd.f32 %v1369_v25, %v1346_v24 }
0x124b   :  { %3502 = vst [vmem:[%s6081_s3 + $0xd8] sm:$0xff] %v1370_v26  ;;  %v1373_v27 = vmul.f32 3.0, %v1370_v26  ;;  %v1394_v50 = vmul.f32 0.9, %v1370_v26 }
0x124d   :  { %v3503_v28 = vadd.f32 -2.0, %v1373_v27 }
0x124f   :  { %v3504_v61 = vmul.f32 -1.442695, %v3503_v28 }
0x1251   :  { %3783 = vpow2.f32 %v3504_v61 }
0x1257   :  { %v3784_v62 = vpop.eup %3783 }
0x1258   :  { %v1378_v63 = vadd.f32 1.0, %v3784_v62 }
0x125a   :  { %3785 = vrcp.f32 %v1378_v63  ;;  %v1390_v10 = vand.u32 2147483648, %v1378_v63  ;;  %v1388_v30 = vand.u32 2147483647, %v1378_v63  ;;  %vm1384_vm1 = vweird.f32 %v1378_v63 }
0x125c   :  { %v1391_v7 = vor.u32 1.1754944e-38, %v1390_v10  ;;  %vm1389_vm3 = vcmp.eq.f32.partialorder %v1388_v30, 8.507059e+37 }
0x1260   :  { %v3786_v4 = vpop.eup %3785 }
0x1261   :  { %v1380_v6 = vmul.f32 %v3786_v4, %v1378_v63  ;;  %vm1385_vm0 = vweird.f32 %v3786_v4 }
0x1262   :  { %vm1386_vm2 = vmor %vm1384_vm1, %vm1385_vm0 }
0x1263   :  { %v1381_v8 = vsub.f32 1.0, %v1380_v6 }
0x1265   :  { %v1382_v29 = vmul.f32 %v3786_v4, %v1381_v8 }
0x1267   :  { %v1383_v31 = vadd.f32 %v3786_v4, %v1382_v29  ;;  %v3513_v29 = vld [vmem:[%s6080_s0 + $0xf0] sm:$0xff] }
0x1269   :  { %v1387_v35 = vsel %vm1386_vm2, %v3786_v4, %v1383_v31 }
0x126a   :  { %v1392_v36 = vsel %vm1389_vm3, %v1391_v7, %v1387_v35 }
0x126b   :  { %1413 = vmatmul.f32.vlgmr.msrb.gmra.mxu0 %v1392_v36 }
0x126c   :  { %1781 = vmatpush.msrb.mxu0 %v4789_v15 }
0x126e   :  { %1782 = vmatpush.msrb.mxu0 %v4795_v17 }
0x1270   :  { %1783 = vmatpush.msrb.mxu0 %v4801_v18 }
0x1272   :  { %1784 = vmatpush.msrb.mxu0 %v4807_v19 }
0x1274   :  { %1785 = vmatpush.msrb.mxu0 %v4813_v20 }
0x1276   :  { %1786 = vmatpush.msrb.mxu0 %v4819_v58 }
0x1278   :  { %1787 = vmatpush.msrb.mxu0 %v4847_v32 }
0x127a   :  { %1788 = vmatpush.msrb.mxu0 %v4853_v33 }
0x127c   :  { %1789 = vmatpush.msrb.mxu0 %v4859_v34 }
0x127e   :  { %1790 = vmatpush.msrb.mxu0 %v4865_v0 }
0x1280   :  { %1791 = vmatpush.msrb.mxu0 %v4871_v1 }
0x1282   :  { %1792 = vmatpush.msrb.mxu0 %v4877_v2 }
0x1284   :  { %1793 = vmatpush.msrb.mxu0 %v4883_v3 }
0x1286   :  { %1794 = vmatpush.msrb.mxu0 %v4889_v5 }
0x1288   :  { %1795 = vmatpush.msrb.mxu0 %v4895_v22 }
0x128a   :  { %1796 = vmatpush.msrb.mxu0 %v4923_v49 }
0x12e8   :  { %v1414_v38 = vpop.f32.mrf.mxu0 }
0x12e9   :  { %v1415_v39 = vadd.f32 %v3505_v37, %v1414_v38 }
0x12eb   :  { %v1417_v51 = vmul.f32 0.1, %v1415_v39 }
0x12ed   :  { %v1418_v52 = vadd.f32 %v1417_v51, %v1394_v50 }
0x12ef   :  { %3506 = vst [vmem:[%s6081_s3 + $0xe0] sm:$0xff] %v1418_v52  ;;  %v1421_v53 = vmul.f32 3.0, %v1418_v52  ;;  %v1442_v14 = vmul.f32 0.9, %v1418_v52 }
0x12f1   :  { %v3507_v54 = vadd.f32 -2.0, %v1421_v53 }
0x12f3   :  { %v3508_v43 = vmul.f32 -1.442695, %v3507_v54 }
0x12f5   :  { %3787 = vpow2.f32 %v3508_v43 }
0x12fb   :  { %v3788_v55 = vpop.eup %3787 }
0x12fc   :  { %v1426_v40 = vadd.f32 1.0, %v3788_v55 }
0x12fe   :  { %3789 = vrcp.f32 %v1426_v40  ;;  %v1438_v45 = vand.u32 2147483648, %v1426_v40  ;;  %v1436_v47 = vand.u32 2147483647, %v1426_v40  ;;  %vm1432_vm5 = vweird.f32 %v1426_v40 }
0x1300   :  { %v1439_v9 = vor.u32 1.1754944e-38, %v1438_v45  ;;  %vm1437_vm7 = vcmp.eq.f32.partialorder %v1436_v47, 8.507059e+37 }
0x1304   :  { %v3790_v41 = vpop.eup %3789 }
0x1305   :  { %v1428_v42 = vmul.f32 %v3790_v41, %v1426_v40  ;;  %vm1433_vm4 = vweird.f32 %v3790_v41 }
0x1306   :  { %vm1434_vm6 = vmor %vm1432_vm5, %vm1433_vm4 }
0x1307   :  { %v1429_v44 = vsub.f32 1.0, %v1428_v42 }
0x1309   :  { %v1430_v46 = vmul.f32 %v3790_v41, %v1429_v44 }
0x130b   :  { %v1431_v48 = vadd.f32 %v3790_v41, %v1430_v46 }
0x130d   :  { %v1435_v11 = vsel %vm1434_vm6, %v3790_v41, %v1431_v48 }
0x130e   :  { %v1440_v12 = vsel %vm1437_vm7, %v1439_v9, %v1435_v11 }
0x130f   :  { %1461 = vmatmul.f32.vlgmr.msrb.gmra.mxu1 %v1440_v12 }
0x1310   :  { %1829 = vmatpush.msrb.mxu1 %v4789_v15 }
0x1312   :  { %1830 = vmatpush.msrb.mxu1 %v4795_v17 }
0x1314   :  { %1831 = vmatpush.msrb.mxu1 %v4801_v18 }
0x1316   :  { %1832 = vmatpush.msrb.mxu1 %v4807_v19 }
0x1318   :  { %1833 = vmatpush.msrb.mxu1 %v4813_v20 }
0x131a   :  { %1834 = vmatpush.msrb.mxu1 %v4819_v58 }
0x131c   :  { %1835 = vmatpush.msrb.mxu1 %v4847_v32 }
0x131e   :  { %1836 = vmatpush.msrb.mxu1 %v4853_v33 }
0x1320   :  { %1837 = vmatpush.msrb.mxu1 %v4859_v34 }
0x1322   :  { %1838 = vmatpush.msrb.mxu1 %v4865_v0 }
0x1324   :  { %1839 = vmatpush.msrb.mxu1 %v4871_v1 }
0x1326   :  { %1840 = vmatpush.msrb.mxu1 %v4877_v2 }
0x1328   :  { %1841 = vmatpush.msrb.mxu1 %v4883_v3 }
0x132a   :  { %1842 = vmatpush.msrb.mxu1 %v4889_v5 }
0x132c   :  { %1843 = vmatpush.msrb.mxu1 %v4895_v22 }
0x132e   :  { %1844 = vmatpush.msrb.mxu1 %v4923_v49 }
0x138c   :  { %v1462_v13 = vpop.f32.mrf.mxu1 }
0x138d   :  { %v1463_v57 = vadd.f32 %v3509_v56, %v1462_v13 }
0x138f   :  { %v1465_v16 = vmul.f32 0.1, %v1463_v57 }
0x1391   :  { %v1466_v21 = vadd.f32 %v1465_v16, %v1442_v14 }
0x1393   :  { %3510 = vst [vmem:[%s6081_s3 + $0xe8] sm:$0xff] %v1466_v21  ;;  %v1469_v59 = vmul.f32 3.0, %v1466_v21  ;;  %v1490_v7 = vmul.f32 0.9, %v1466_v21 }
0x1395   :  { %v3511_v23 = vadd.f32 -2.0, %v1469_v59 }
0x1397   :  { %v3512_v60 = vmul.f32 -1.442695, %v3511_v23 }
0x1399   :  { %3791 = vpow2.f32 %v3512_v60 }
0x139f   :  { %v3792_v24 = vpop.eup %3791 }
0x13a0   :  { %v1474_v25 = vadd.f32 1.0, %v3792_v24  ;;  %v5133_v24 = vld [vmem:[%s6078_s1 + $0x78] sm:$0xff] }
0x13a2   :  { %3793 = vrcp.f32 %v1474_v25  ;;  %v1486_v61 = vand.u32 2147483648, %v1474_v25  ;;  %v1484_v63 = vand.u32 2147483647, %v1474_v25  ;;  %vm1480_vm9 = vweird.f32 %v1474_v25 }
0x13a4   :  { %v1487_v6 = vor.u32 1.1754944e-38, %v1486_v61  ;;  %vm1485_vm11 = vcmp.eq.f32.partialorder %v1484_v63, 8.507059e+37  ;;  %v5163_v61 = vld [vmem:[%s6078_s1 + $0x50] sm:$0xff] }
0x13a8   :  { %v3794_v26 = vpop.eup %3793 }
0x13a9   :  { %v1476_v27 = vmul.f32 %v3794_v26, %v1474_v25  ;;  %vm1481_vm8 = vweird.f32 %v3794_v26  ;;  %v5139_v25 = vld [vmem:[%s6078_s1 + $0x70] sm:$0xff] }
0x13aa   :  { %vm1482_vm10 = vmor %vm1480_vm9, %vm1481_vm8 }
0x13ab   :  { %v1477_v28 = vsub.f32 1.0, %v1476_v27  ;;  %v5151_v27 = vld [vmem:[%s6078_s1 + $0x60] sm:$0xff] }
0x13ad   :  { %v1478_v62 = vmul.f32 %v3794_v26, %v1477_v28  ;;  %v5157_v28 = vld [vmem:[%s6078_s1 + $0x58] sm:$0xff] }
0x13af   :  { %v1479_v4 = vadd.f32 %v3794_v26, %v1478_v62 }
0x13b1   :  { %v1483_v8 = vsel %vm1482_vm10, %v3794_v26, %v1479_v4  ;;  %v5145_v26 = vld [vmem:[%s6078_s1 + $0x68] sm:$0xff] }
0x13b2   :  { %v1488_v10 = vsel %vm1485_vm11, %v1487_v6, %v1483_v8 }
0x13b3   :  { %1509 = vmatmul.f32.vlgmr.msrb.gmra.mxu2 %v1488_v10 }
0x13b4   :  { %1877 = vmatpush.msrb.mxu2 %v4789_v15 }
0x13b6   :  { %1878 = vmatpush.msrb.mxu2 %v4795_v17 }
0x13b8   :  { %1879 = vmatpush.msrb.mxu2 %v4801_v18 }
0x13ba   :  { %1880 = vmatpush.msrb.mxu2 %v4807_v19 }
0x13bc   :  { %1881 = vmatpush.msrb.mxu2 %v4813_v20 }
0x13be   :  { %1882 = vmatpush.msrb.mxu2 %v4819_v58 }
0x13c0   :  { %1883 = vmatpush.msrb.mxu2 %v4847_v32 }
0x13c2   :  { %1884 = vmatpush.msrb.mxu2 %v4853_v33 }
0x13c4   :  { %1885 = vmatpush.msrb.mxu2 %v4859_v34 }
0x13c6   :  { %1886 = vmatpush.msrb.mxu2 %v4865_v0 }
0x13c8   :  { %1887 = vmatpush.msrb.mxu2 %v4871_v1 }
0x13ca   :  { %1888 = vmatpush.msrb.mxu2 %v4877_v2 }
0x13cc   :  { %1889 = vmatpush.msrb.mxu2 %v4883_v3 }
0x13ce   :  { %1890 = vmatpush.msrb.mxu2 %v4889_v5 }
0x13d0   :  { %1891 = vmatpush.msrb.mxu2 %v4895_v22 }
0x13d2   :  { %1892 = vmatpush.msrb.mxu2 %v4923_v49 }
0x1436   :  { %v1510_v30 = vpop.f32.mrf.mxu2 }
0x1437   :  { %v1511_v31 = vadd.f32 %v3513_v29, %v1510_v30 }
0x1439   :  { %v1513_v35 = vmul.f32 0.1, %v1511_v31 }
0x143b   :  { %v1514_v36 = vadd.f32 %v1513_v35, %v1490_v7 }
0x143d   :  { %3514 = vst [vmem:[%s6081_s3 + $0xf0] sm:$0xff] %v1514_v36  ;;  %v1517_v37 = vmul.f32 3.0, %v1514_v36 }
0x143f   :  { %v3515_v38 = vadd.f32 -2.0, %v1517_v37  ;;  %v5191_v37 = vld [vmem:[%s6078_s1 + $0x48] sm:$0xff] }
0x1441   :  { %v3516_v39 = vmul.f32 -1.442695, %v3515_v38  ;;  %v5197_v38 = vld [vmem:[%s6078_s1 + $0x40] sm:$0xff] }
0x1443   :  { %3795 = vpow2.f32 %v3516_v39  ;;  %v5203_v39 = vld [vmem:[%s6078_s1 + $0x38] sm:$0xff] }
0x1449   :  { %v3796_v50 = vpop.eup %3795 }
0x144a   :  { %v1522_v51 = vadd.f32 1.0, %v3796_v50  ;;  %v5209_v50 = vld [vmem:[%s6078_s1 + $0x30] sm:$0xff] }
0x144c   :  { %3797 = vrcp.f32 %v1522_v51  ;;  %v1534_v43 = vand.u32 2147483648, %v1522_v51  ;;  %v1532_v40 = vand.u32 2147483647, %v1522_v51  ;;  %vm1528_vm13 = vweird.f32 %v1522_v51 }
0x144e   :  { %v1535_v42 = vor.u32 1.1754944e-38, %v1534_v43  ;;  %vm1533_vm15 = vcmp.eq.f32.partialorder %v1532_v40, 8.507059e+37  ;;  %v5239_v43 = vld [vmem:[%s6078_s1 + $0x8] sm:$0xff] }
0x1452   :  { %v3798_v52 = vpop.eup %3797 }
0x1453   :  { %v1524_v53 = vmul.f32 %v3798_v52, %v1522_v51  ;;  %vm1529_vm12 = vweird.f32 %v3798_v52  ;;  %v5215_v51 = vld [vmem:[%s6078_s1 + $0x28] sm:$0xff] }
0x1454   :  { %vm1530_vm14 = vmor %vm1528_vm13, %vm1529_vm12 }
0x1455   :  { %v1525_v54 = vsub.f32 1.0, %v1524_v53  ;;  %v5227_v53 = vld [vmem:[%s6078_s1 + $0x18] sm:$0xff] }
0x1457   :  { %v1526_v55 = vmul.f32 %v3798_v52, %v1525_v54  ;;  %v5233_v54 = vld [vmem:[%s6078_s1 + $0x10] sm:$0xff] }
0x1459   :  { %v1527_v41 = vadd.f32 %v3798_v52, %v1526_v55  ;;  %v3525_v55 = vld [vmem:[%s6080_s0 + $0x108] sm:$0xff] }
0x145b   :  { %v1531_v44 = vsel %vm1530_vm14, %v3798_v52, %v1527_v41  ;;  %v5221_v52 = vld [vmem:[%s6078_s1 + $0x20] sm:$0xff] }
0x145c   :  { %v1536_v45 = vsel %vm1533_vm15, %v1535_v42, %v1531_v44 }
0x145d   :  { %1557 = vmatmul.f32.vlgmr.msrb.gmra.mxu3 %v1536_v45 }
0x145e   :  { %1925 = vmatpush.msrb.mxu3 %v4789_v15  ;;  %v3517_v15 = vld [vmem:[%s6080_s0 + $0xf8] sm:$0xff] }
0x1460   :  { %1926 = vmatpush.msrb.mxu3 %v4795_v17 }
0x1462   :  { %1927 = vmatpush.msrb.mxu3 %v4801_v18 }
0x1464   :  { %1928 = vmatpush.msrb.mxu3 %v4807_v19  ;;  %v1538_v19 = vmul.f32 0.9, %v1514_v36 }
0x1466   :  { %1929 = vmatpush.msrb.mxu3 %v4813_v20 }
0x1468   :  { %1930 = vmatpush.msrb.mxu3 %v4819_v58 }
0x146a   :  { %1931 = vmatpush.msrb.mxu3 %v4847_v32 }
0x146c   :  { %1932 = vmatpush.msrb.mxu3 %v4853_v33 }
0x146e   :  { %1933 = vmatpush.msrb.mxu3 %v4859_v34 }
0x1470   :  { %1934 = vmatpush.msrb.mxu3 %v4865_v0 }
0x1472   :  { %1935 = vmatpush.msrb.mxu3 %v4871_v1 }
0x1474   :  { %1936 = vmatpush.msrb.mxu3 %v4877_v2 }
0x1476   :  { %1937 = vmatpush.msrb.mxu3 %v4883_v3 }
0x1478   :  { %1938 = vmatpush.msrb.mxu3 %v4889_v5 }
0x147a   :  { %1939 = vmatpush.msrb.mxu3 %v4895_v22 }
0x147c   :  { %1940 = vmatpush.msrb.mxu3 %v4923_v49 }
0x14e0   :  { %v1558_v17 = vpop.f32.mrf.mxu3 }
0x14e1   :  { %v1559_v18 = vadd.f32 %v3517_v15, %v1558_v17 }
0x14e3   :  { %v1561_v20 = vmul.f32 0.1, %v1559_v18 }
0x14e5   :  { %v1562_v58 = vadd.f32 %v1561_v20, %v1538_v19 }
0x14e7   :  { %3518 = vst [vmem:[%s6081_s3 + $0xf8] sm:$0xff] %v1562_v58  ;;  %v1565_v46 = vmul.f32 3.0, %v1562_v58  ;;  %v1586_v62 = vmul.f32 0.9, %v1562_v58 }
0x14e9   :  { %v3519_v47 = vadd.f32 -2.0, %v1565_v46 }
0x14eb   :  { %v3520_v48 = vmul.f32 -1.442695, %v3519_v47 }
0x14ed   :  { %3799 = vpow2.f32 %v3520_v48 }
0x14f3   :  { %v3800_v9 = vpop.eup %3799 }
0x14f4   :  { %v1570_v11 = vadd.f32 1.0, %v3800_v9 }
0x14f6   :  { %3801 = vrcp.f32 %v1570_v11  ;;  %v1582_v57 = vand.u32 2147483648, %v1570_v11  ;;  %v1580_v16 = vand.u32 2147483647, %v1570_v11  ;;  %vm1576_vm1 = vweird.f32 %v1570_v11 }
0x14f8   :  { %v1583_v59 = vor.u32 1.1754944e-38, %v1582_v57  ;;  %vm1581_vm3 = vcmp.eq.f32.partialorder %v1580_v16, 8.507059e+37  ;;  %v5267_v57 = vld [vmem:[%s6078_s1] sm:$0xff] }
0x14fc   :  { %v3802_v12 = vpop.eup %3801 }
0x14fd   :  { %v1572_v56 = vmul.f32 %v3802_v12, %v1570_v11  ;;  %vm1577_vm0 = vweird.f32 %v3802_v12 }
0x14fe   :  { %vm1578_vm2 = vmor %vm1576_vm1, %vm1577_vm0 }
0x14ff   :  { %v1573_v13 = vsub.f32 1.0, %v1572_v56 }
0x1501   :  { %v1574_v14 = vmul.f32 %v3802_v12, %v1573_v13 }
0x1503   :  { %v1575_v21 = vadd.f32 %v3802_v12, %v1574_v14  ;;  %v3529_v14 = vld [vmem:[%s6080_s0 + $0x110] sm:$0xff] }
0x1505   :  { %v1579_v23 = vsel %vm1578_vm2, %v3802_v12, %v1575_v21 }
0x1506   :  { %v1584_v60 = vsel %vm1581_vm3, %v1583_v59, %v1579_v23 }
0x1507   :  { %1605 = vmatmul.f32.vlgmr.msra.gmra.mxu0 %v1584_v60 }
0x1508   :  { %1973 = vmatpush.msra.mxu0 %v5133_v24 }
0x150a   :  { %1974 = vmatpush.msra.mxu0 %v5139_v25 }
0x150c   :  { %1975 = vmatpush.msra.mxu0 %v5145_v26 }
0x150e   :  { %1976 = vmatpush.msra.mxu0 %v5151_v27 }
0x1510   :  { %1977 = vmatpush.msra.mxu0 %v5157_v28 }
0x1512   :  { %1978 = vmatpush.msra.mxu0 %v5163_v61 }
0x1514   :  { %1979 = vmatpush.msra.mxu0 %v4847_v32  ;;  %v3521_v32 = vld [vmem:[%s6080_s0 + $0x100] sm:$0xff] }
0x1516   :  { %1980 = vmatpush.msra.mxu0 %v4853_v33 }
0x1518   :  { %1981 = vmatpush.msra.mxu0 %v4859_v34 }
0x151a   :  { %1982 = vmatpush.msra.mxu0 %v4865_v0 }
0x151c   :  { %1983 = vmatpush.msra.mxu0 %v4871_v1 }
0x151e   :  { %1984 = vmatpush.msra.mxu0 %v4877_v2 }
0x1520   :  { %1985 = vmatpush.msra.mxu0 %v4883_v3 }
0x1522   :  { %1986 = vmatpush.msra.mxu0 %v4889_v5 }
0x1524   :  { %1987 = vmatpush.msra.mxu0 %v4895_v22 }
0x1526   :  { %1988 = vmatpush.msra.mxu0 %v4923_v49 }
0x1584   :  { %v1606_v33 = vpop.f32.mrf.mxu0 }
0x1585   :  { %v1607_v34 = vadd.f32 %v3521_v32, %v1606_v33 }
0x1587   :  { %v1609_v0 = vmul.f32 0.1, %v1607_v34 }
0x1589   :  { %v1610_v63 = vadd.f32 %v1609_v0, %v1586_v62 }
0x158b   :  { %3522 = vst [vmem:[%s6081_s3 + $0x100] sm:$0xff] %v1610_v63  ;;  %v1613_v1 = vmul.f32 3.0, %v1610_v63  ;;  %v1634_v42 = vmul.f32 0.9, %v1610_v63 }
0x158d   :  { %v3523_v2 = vadd.f32 -2.0, %v1613_v1 }
0x158f   :  { %v3524_v3 = vmul.f32 -1.442695, %v3523_v2 }
0x1591   :  { %3803 = vpow2.f32 %v3524_v3 }
0x1597   :  { %v3804_v5 = vpop.eup %3803 }
0x1598   :  { %v1618_v22 = vadd.f32 1.0, %v3804_v5 }
0x159a   :  { %3805 = vrcp.f32 %v1618_v22  ;;  %v1630_v10 = vand.u32 2147483648, %v1618_v22  ;;  %v1628_v30 = vand.u32 2147483647, %v1618_v22  ;;  %vm1624_vm5 = vweird.f32 %v1618_v22 }
0x159c   :  { %v1631_v7 = vor.u32 1.1754944e-38, %v1630_v10  ;;  %vm1629_vm7 = vcmp.eq.f32.partialorder %v1628_v30, 8.507059e+37 }
0x15a0   :  { %v3806_v4 = vpop.eup %3805 }
0x15a1   :  { %v1620_v6 = vmul.f32 %v3806_v4, %v1618_v22  ;;  %vm1625_vm4 = vweird.f32 %v3806_v4 }
0x15a2   :  { %vm1626_vm6 = vmor %vm1624_vm5, %vm1625_vm4 }
0x15a3   :  { %v1621_v8 = vsub.f32 1.0, %v1620_v6 }
0x15a5   :  { %v1622_v29 = vmul.f32 %v3806_v4, %v1621_v8 }
0x15a7   :  { %v1623_v31 = vadd.f32 %v3806_v4, %v1622_v29  ;;  %v3533_v29 = vld [vmem:[%s6080_s0 + $0x118] sm:$0xff] }
0x15a9   :  { %v1627_v35 = vsel %vm1626_vm6, %v3806_v4, %v1623_v31 }
0x15aa   :  { %v1632_v36 = vsel %vm1629_vm7, %v1631_v7, %v1627_v35 }
0x15ab   :  { %1653 = vmatmul.f32.vlgmr.msra.gmra.mxu1 %v1632_v36 }
0x15ac   :  { %2021 = vmatpush.msra.mxu1 %v5133_v24 }
0x15ae   :  { %2022 = vmatpush.msra.mxu1 %v5139_v25 }
0x15b0   :  { %2023 = vmatpush.msra.mxu1 %v5145_v26 }
0x15b2   :  { %2024 = vmatpush.msra.mxu1 %v5151_v27 }
0x15b4   :  { %2025 = vmatpush.msra.mxu1 %v5157_v28 }
0x15b6   :  { %2026 = vmatpush.msra.mxu1 %v5163_v61 }
0x15b8   :  { %2027 = vmatpush.msra.mxu1 %v5191_v37 }
0x15ba   :  { %2028 = vmatpush.msra.mxu1 %v5197_v38 }
0x15bc   :  { %2029 = vmatpush.msra.mxu1 %v5203_v39 }
0x15be   :  { %2030 = vmatpush.msra.mxu1 %v5209_v50 }
0x15c0   :  { %2031 = vmatpush.msra.mxu1 %v5215_v51 }
0x15c2   :  { %2032 = vmatpush.msra.mxu1 %v5221_v52 }
0x15c4   :  { %2033 = vmatpush.msra.mxu1 %v5227_v53 }
0x15c6   :  { %2034 = vmatpush.msra.mxu1 %v5233_v54 }
0x15c8   :  { %2035 = vmatpush.msra.mxu1 %v5239_v43 }
0x15ca   :  { %2036 = vmatpush.msra.mxu1 %v4923_v49 }
0x1628   :  { %v1654_v40 = vpop.f32.mrf.mxu1 }
0x1629   :  { %v1655_v41 = vadd.f32 %v3525_v55, %v1654_v40 }
0x162b   :  { %v1657_v44 = vmul.f32 0.1, %v1655_v41 }
0x162d   :  { %v1658_v45 = vadd.f32 %v1657_v44, %v1634_v42 }
0x162f   :  { %3526 = vst [vmem:[%s6081_s3 + $0x108] sm:$0xff] %v1658_v45  ;;  %v1661_v15 = vmul.f32 3.0, %v1658_v45  ;;  %v1682_v59 = vmul.f32 0.9, %v1658_v45 }
0x1631   :  { %v3527_v17 = vadd.f32 -2.0, %v1661_v15 }
0x1633   :  { %v3528_v18 = vmul.f32 -1.442695, %v3527_v17 }
0x1635   :  { %3807 = vpow2.f32 %v3528_v18 }
0x163b   :  { %v3808_v19 = vpop.eup %3807 }
0x163c   :  { %v1666_v20 = vadd.f32 1.0, %v3808_v19 }
0x163e   :  { %3809 = vrcp.f32 %v1666_v20  ;;  %v1678_v47 = vand.u32 2147483648, %v1666_v20  ;;  %v1676_v9 = vand.u32 2147483647, %v1666_v20  ;;  %vm1672_vm9 = vweird.f32 %v1666_v20 }
0x1640   :  { %v1679_v12 = vor.u32 1.1754944e-38, %v1678_v47  ;;  %vm1677_vm11 = vcmp.eq.f32.partialorder %v1676_v9, 8.507059e+37 }
0x1644   :  { %v3810_v49 = vpop.eup %3809 }
0x1645   :  { %v1668_v58 = vmul.f32 %v3810_v49, %v1666_v20  ;;  %vm1673_vm8 = vweird.f32 %v3810_v49 }
0x1646   :  { %vm1674_vm10 = vmor %vm1672_vm9, %vm1673_vm8 }
0x1647   :  { %v1669_v46 = vsub.f32 1.0, %v1668_v58 }
0x1649   :  { %v1670_v48 = vmul.f32 %v3810_v49, %v1669_v46 }
0x164b   :  { %v1671_v11 = vadd.f32 %v3810_v49, %v1670_v48  ;;  %v3537_v48 = vld [vmem:[%s6080_s0 + $0x120] sm:$0xff] }
0x164d   :  { %v1675_v56 = vsel %vm1674_vm10, %v3810_v49, %v1671_v11 }
0x164e   :  { %v1680_v13 = vsel %vm1677_vm11, %v1679_v12, %v1675_v56 }
0x164f   :  { %1701 = vmatmul.f32.vlgmr.msra.gmra.mxu2 %v1680_v13 }
0x1650   :  { %2069 = vmatpush.msra.mxu2 %v5133_v24 }
0x1652   :  { %2070 = vmatpush.msra.mxu2 %v5139_v25 }
0x1654   :  { %2071 = vmatpush.msra.mxu2 %v5145_v26 }
0x1656   :  { %2072 = vmatpush.msra.mxu2 %v5151_v27 }
0x1658   :  { %2073 = vmatpush.msra.mxu2 %v5157_v28 }
0x165a   :  { %2074 = vmatpush.msra.mxu2 %v5163_v61 }
0x165c   :  { %2075 = vmatpush.msra.mxu2 %v5191_v37 }
0x165e   :  { %2076 = vmatpush.msra.mxu2 %v5197_v38 }
0x1660   :  { %2077 = vmatpush.msra.mxu2 %v5203_v39 }
0x1662   :  { %2078 = vmatpush.msra.mxu2 %v5209_v50 }
0x1664   :  { %2079 = vmatpush.msra.mxu2 %v5215_v51 }
0x1666   :  { %2080 = vmatpush.msra.mxu2 %v5221_v52 }
0x1668   :  { %2081 = vmatpush.msra.mxu2 %v5227_v53 }
0x166a   :  { %2082 = vmatpush.msra.mxu2 %v5233_v54 }
0x166c   :  { %2083 = vmatpush.msra.mxu2 %v5239_v43 }
0x166e   :  { %2084 = vmatpush.msra.mxu2 %v5267_v57 }
0x16d2   :  { %v1702_v16 = vpop.f32.mrf.mxu2 }
0x16d3   :  { %v1703_v21 = vadd.f32 %v3529_v14, %v1702_v16 }
0x16d5   :  { %v1705_v23 = vmul.f32 0.1, %v1703_v21 }
0x16d7   :  { %v1706_v60 = vadd.f32 %v1705_v23, %v1682_v59 }
0x16d9   :  { %3530 = vst [vmem:[%s6081_s3 + $0x110] sm:$0xff] %v1706_v60  ;;  %v1709_v32 = vmul.f32 3.0, %v1706_v60  ;;  %v1730_v7 = vmul.f32 0.9, %v1706_v60 }
0x16db   :  { %v3531_v33 = vadd.f32 -2.0, %v1709_v32 }
0x16dd   :  { %v3532_v34 = vmul.f32 -1.442695, %v3531_v33 }
0x16df   :  { %3811 = vpow2.f32 %v3532_v34 }
0x16e5   :  { %v3812_v62 = vpop.eup %3811 }
0x16e6   :  { %v1714_v0 = vadd.f32 1.0, %v3812_v62 }
0x16e8   :  { %3813 = vrcp.f32 %v1714_v0  ;;  %v1726_v3 = vand.u32 2147483648, %v1714_v0  ;;  %v1724_v22 = vand.u32 2147483647, %v1714_v0  ;;  %vm1720_vm13 = vweird.f32 %v1714_v0 }
0x16ea   :  { %v1727_v6 = vor.u32 1.1754944e-38, %v1726_v3  ;;  %vm1725_vm15 = vcmp.eq.f32.partialorder %v1724_v22, 8.507059e+37 }
0x16ee   :  { %v3814_v63 = vpop.eup %3813 }
0x16ef   :  { %v1716_v1 = vmul.f32 %v3814_v63, %v1714_v0  ;;  %vm1721_vm12 = vweird.f32 %v3814_v63 }
0x16f0   :  { %vm1722_vm14 = vmor %vm1720_vm13, %vm1721_vm12 }
0x16f1   :  { %v1717_v2 = vsub.f32 1.0, %v1716_v1 }
0x16f3   :  { %v1718_v5 = vmul.f32 %v3814_v63, %v1717_v2 }
0x16f5   :  { %v1719_v4 = vadd.f32 %v3814_v63, %v1718_v5  ;;  %v3541_v5 = vld [vmem:[%s6080_s0 + $0x128] sm:$0xff] }
0x16f7   :  { %v1723_v8 = vsel %vm1722_vm14, %v3814_v63, %v1719_v4 }
0x16f8   :  { %v1728_v10 = vsel %vm1725_vm15, %v1727_v6, %v1723_v8 }
0x16f9   :  { %1749 = vmatmul.f32.vlgmr.msra.gmra.mxu3 %v1728_v10 }
0x16fa   :  { %2117 = vmatpush.msra.mxu3 %v5133_v24 }
0x16fc   :  { %2118 = vmatpush.msra.mxu3 %v5139_v25 }
0x16fe   :  { %2119 = vmatpush.msra.mxu3 %v5145_v26 }
0x1700   :  { %2120 = vmatpush.msra.mxu3 %v5151_v27 }
0x1702   :  { %2121 = vmatpush.msra.mxu3 %v5157_v28 }
0x1704   :  { %2122 = vmatpush.msra.mxu3 %v5163_v61 }
0x1706   :  { %2123 = vmatpush.msra.mxu3 %v5191_v37 }
0x1708   :  { %2124 = vmatpush.msra.mxu3 %v5197_v38 }
0x170a   :  { %2125 = vmatpush.msra.mxu3 %v5203_v39 }
0x170c   :  { %2126 = vmatpush.msra.mxu3 %v5209_v50 }
0x170e   :  { %2127 = vmatpush.msra.mxu3 %v5215_v51 }
0x1710   :  { %2128 = vmatpush.msra.mxu3 %v5221_v52 }
0x1712   :  { %2129 = vmatpush.msra.mxu3 %v5227_v53 }
0x1714   :  { %2130 = vmatpush.msra.mxu3 %v5233_v54 }
0x1716   :  { %2131 = vmatpush.msra.mxu3 %v5239_v43 }
0x1718   :  { %2132 = vmatpush.msra.mxu3 %v5267_v57 }
0x177c   :  { %v1750_v30 = vpop.f32.mrf.mxu3 }
0x177d   :  { %v1751_v31 = vadd.f32 %v3533_v29, %v1750_v30 }
0x177f   :  { %v1753_v35 = vmul.f32 0.1, %v1751_v31 }
0x1781   :  { %v1754_v36 = vadd.f32 %v1753_v35, %v1730_v7 }
0x1783   :  { %3534 = vst [vmem:[%s6081_s3 + $0x118] sm:$0xff] %v1754_v36  ;;  %v1757_v55 = vmul.f32 3.0, %v1754_v36  ;;  %v1778_v12 = vmul.f32 0.9, %v1754_v36 }
0x1785   :  { %v3535_v40 = vadd.f32 -2.0, %v1757_v55 }
0x1787   :  { %v3536_v41 = vmul.f32 -1.442695, %v3535_v40 }
0x1789   :  { %3815 = vpow2.f32 %v3536_v41 }
0x178f   :  { %v3816_v42 = vpop.eup %3815 }
0x1790   :  { %v1762_v44 = vadd.f32 1.0, %v3816_v42 }
0x1792   :  { %3817 = vrcp.f32 %v1762_v44  ;;  %v1774_v18 = vand.u32 2147483648, %v1762_v44  ;;  %v1772_v20 = vand.u32 2147483647, %v1762_v44  ;;  %vm1768_vm1 = vweird.f32 %v1762_v44 }
0x1794   :  { %v1775_v58 = vor.u32 1.1754944e-38, %v1774_v18  ;;  %vm1773_vm3 = vcmp.eq.f32.partialorder %v1772_v20, 8.507059e+37 }
0x1798   :  { %v3818_v45 = vpop.eup %3817 }
0x1799   :  { %v1764_v15 = vmul.f32 %v3818_v45, %v1762_v44  ;;  %vm1769_vm0 = vweird.f32 %v3818_v45 }
0x179a   :  { %vm1770_vm2 = vmor %vm1768_vm1, %vm1769_vm0 }
0x179b   :  { %v1765_v17 = vsub.f32 1.0, %v1764_v15 }
0x179d   :  { %v1766_v19 = vmul.f32 %v3818_v45, %v1765_v17 }
0x179f   :  { %v1767_v49 = vadd.f32 %v3818_v45, %v1766_v19  ;;  %v3545_v19 = vld [vmem:[%s6080_s0 + $0x130] sm:$0xff] }
0x17a1   :  { %v1771_v46 = vsel %vm1770_vm2, %v3818_v45, %v1767_v49 }
0x17a2   :  { %v1776_v47 = vsel %vm1773_vm3, %v1775_v58, %v1771_v46 }
0x17a3   :  { %1797 = vmatmul.f32.vlgmr.msrb.gmra.mxu0 %v1776_v47 }
0x17a4   :  { %2165 = vmatpush.msrb.mxu0 %v5133_v24 }
0x17a6   :  { %2166 = vmatpush.msrb.mxu0 %v5139_v25 }
0x17a8   :  { %2167 = vmatpush.msrb.mxu0 %v5145_v26 }
0x17aa   :  { %2168 = vmatpush.msrb.mxu0 %v5151_v27 }
0x17ac   :  { %2169 = vmatpush.msrb.mxu0 %v5157_v28 }
0x17ae   :  { %2170 = vmatpush.msrb.mxu0 %v5163_v61 }
0x17b0   :  { %2171 = vmatpush.msrb.mxu0 %v5191_v37 }
0x17b2   :  { %2172 = vmatpush.msrb.mxu0 %v5197_v38 }
0x17b4   :  { %2173 = vmatpush.msrb.mxu0 %v5203_v39 }
0x17b6   :  { %2174 = vmatpush.msrb.mxu0 %v5209_v50 }
0x17b8   :  { %2175 = vmatpush.msrb.mxu0 %v5215_v51 }
0x17ba   :  { %2176 = vmatpush.msrb.mxu0 %v5221_v52 }
0x17bc   :  { %2177 = vmatpush.msrb.mxu0 %v5227_v53 }
0x17be   :  { %2178 = vmatpush.msrb.mxu0 %v5233_v54 }
0x17c0   :  { %2179 = vmatpush.msrb.mxu0 %v5239_v43 }
0x17c2   :  { %2180 = vmatpush.msrb.mxu0 %v5267_v57 }
0x1820   :  { %v1798_v9 = vpop.f32.mrf.mxu0 }
0x1821   :  { %v1799_v11 = vadd.f32 %v3537_v48, %v1798_v9 }
0x1823   :  { %v1801_v56 = vmul.f32 0.1, %v1799_v11 }
0x1825   :  { %v1802_v13 = vadd.f32 %v1801_v56, %v1778_v12 }
0x1827   :  { %3538 = vst [vmem:[%s6081_s3 + $0x120] sm:$0xff] %v1802_v13  ;;  %v1805_v14 = vmul.f32 3.0, %v1802_v13  ;;  %v1826_v6 = vmul.f32 0.9, %v1802_v13 }
0x1829   :  { %v3539_v16 = vadd.f32 -2.0, %v1805_v14 }
0x182b   :  { %v3540_v21 = vmul.f32 -1.442695, %v3539_v16 }
0x182d   :  { %3819 = vpow2.f32 %v3540_v21 }
0x1833   :  { %v3820_v59 = vpop.eup %3819 }
0x1834   :  { %v1810_v23 = vadd.f32 1.0, %v3820_v59 }
0x1836   :  { %3821 = vrcp.f32 %v1810_v23  ;;  %v1822_v34 = vand.u32 2147483648, %v1810_v23  ;;  %v1820_v0 = vand.u32 2147483647, %v1810_v23  ;;  %vm1816_vm5 = vweird.f32 %v1810_v23 }
0x1838   :  { %v1823_v1 = vor.u32 1.1754944e-38, %v1822_v34  ;;  %vm1821_vm7 = vcmp.eq.f32.partialorder %v1820_v0, 8.507059e+37 }
0x183c   :  { %v3822_v60 = vpop.eup %3821 }
0x183d   :  { %v1812_v32 = vmul.f32 %v3822_v60, %v1810_v23  ;;  %vm1817_vm4 = vweird.f32 %v3822_v60 }
0x183e   :  { %vm1818_vm6 = vmor %vm1816_vm5, %vm1817_vm4 }
0x183f   :  { %v1813_v33 = vsub.f32 1.0, %v1812_v32 }
0x1841   :  { %v1814_v62 = vmul.f32 %v3822_v60, %v1813_v33 }
0x1843   :  { %v1815_v63 = vadd.f32 %v3822_v60, %v1814_v62  ;;  %v3549_v62 = vld [vmem:[%s6080_s0 + $0x138] sm:$0xff] }
0x1845   :  { %v1819_v2 = vsel %vm1818_vm6, %v3822_v60, %v1815_v63 }
0x1846   :  { %v1824_v3 = vsel %vm1821_vm7, %v1823_v1, %v1819_v2 }
0x1847   :  { %1845 = vmatmul.f32.vlgmr.msrb.gmra.mxu1 %v1824_v3 }
0x1848   :  { %2213 = vmatpush.msrb.mxu1 %v5133_v24 }
0x184a   :  { %2214 = vmatpush.msrb.mxu1 %v5139_v25 }
0x184c   :  { %2215 = vmatpush.msrb.mxu1 %v5145_v26 }
0x184e   :  { %2216 = vmatpush.msrb.mxu1 %v5151_v27 }
0x1850   :  { %2217 = vmatpush.msrb.mxu1 %v5157_v28 }
0x1852   :  { %2218 = vmatpush.msrb.mxu1 %v5163_v61 }
0x1854   :  { %2219 = vmatpush.msrb.mxu1 %v5191_v37 }
0x1856   :  { %2220 = vmatpush.msrb.mxu1 %v5197_v38 }
0x1858   :  { %2221 = vmatpush.msrb.mxu1 %v5203_v39 }
0x185a   :  { %2222 = vmatpush.msrb.mxu1 %v5209_v50 }
0x185c   :  { %2223 = vmatpush.msrb.mxu1 %v5215_v51 }
0x185e   :  { %2224 = vmatpush.msrb.mxu1 %v5221_v52 }
0x1860   :  { %2225 = vmatpush.msrb.mxu1 %v5227_v53 }
0x1862   :  { %2226 = vmatpush.msrb.mxu1 %v5233_v54 }
0x1864   :  { %2227 = vmatpush.msrb.mxu1 %v5239_v43 }
0x1866   :  { %2228 = vmatpush.msrb.mxu1 %v5267_v57 }
0x18c4   :  { %v1846_v22 = vpop.f32.mrf.mxu1 }
0x18c5   :  { %v1847_v4 = vadd.f32 %v3541_v5, %v1846_v22 }
0x18c7   :  { %v1849_v8 = vmul.f32 0.1, %v1847_v4 }
0x18c9   :  { %v1850_v10 = vadd.f32 %v1849_v8, %v1826_v6 }
0x18cb   :  { %3542 = vst [vmem:[%s6081_s3 + $0x128] sm:$0xff] %v1850_v10  ;;  %v1853_v29 = vmul.f32 3.0, %v1850_v10  ;;  %v1874_v58 = vmul.f32 0.9, %v1850_v10 }
0x18cd   :  { %v3543_v30 = vadd.f32 -2.0, %v1853_v29 }
0x18cf   :  { %v3544_v31 = vmul.f32 -1.442695, %v3543_v30 }
0x18d1   :  { %3823 = vpow2.f32 %v3544_v31 }
0x18d7   :  { %v3824_v7 = vpop.eup %3823 }
0x18d8   :  { %v1858_v35 = vadd.f32 1.0, %v3824_v7 }
0x18da   :  { %3825 = vrcp.f32 %v1858_v35  ;;  %v1870_v41 = vand.u32 2147483648, %v1858_v35  ;;  %v1868_v44 = vand.u32 2147483647, %v1858_v35  ;;  %vm1864_vm9 = vweird.f32 %v1858_v35 }
0x18dc   :  { %v1871_v15 = vor.u32 1.1754944e-38, %v1870_v41  ;;  %vm1869_vm11 = vcmp.eq.f32.partialorder %v1868_v44, 8.507059e+37 }
0x18e0   :  { %v3826_v36 = vpop.eup %3825 }
0x18e1   :  { %v1860_v55 = vmul.f32 %v3826_v36, %v1858_v35  ;;  %vm1865_vm8 = vweird.f32 %v3826_v36 }
0x18e2   :  { %vm1866_vm10 = vmor %vm1864_vm9, %vm1865_vm8 }
0x18e3   :  { %v1861_v40 = vsub.f32 1.0, %v1860_v55 }
0x18e5   :  { %v1862_v42 = vmul.f32 %v3826_v36, %v1861_v40 }
0x18e7   :  { %v1863_v45 = vadd.f32 %v3826_v36, %v1862_v42  ;;  %v3553_v42 = vld [vmem:[%s6080_s0 + $0x140] sm:$0xff] }
0x18e9   :  { %v1867_v17 = vsel %vm1866_vm10, %v3826_v36, %v1863_v45 }
0x18ea   :  { %v1872_v18 = vsel %vm1869_vm11, %v1871_v15, %v1867_v17 }
0x18eb   :  { %1893 = vmatmul.f32.vlgmr.msrb.gmra.mxu2 %v1872_v18 }
0x18ec   :  { %2261 = vmatpush.msrb.mxu2 %v5133_v24 }
0x18ee   :  { %2262 = vmatpush.msrb.mxu2 %v5139_v25 }
0x18f0   :  { %2263 = vmatpush.msrb.mxu2 %v5145_v26 }
0x18f2   :  { %2264 = vmatpush.msrb.mxu2 %v5151_v27 }
0x18f4   :  { %2265 = vmatpush.msrb.mxu2 %v5157_v28 }
0x18f6   :  { %2266 = vmatpush.msrb.mxu2 %v5163_v61 }
0x18f8   :  { %2267 = vmatpush.msrb.mxu2 %v5191_v37 }
0x18fa   :  { %2268 = vmatpush.msrb.mxu2 %v5197_v38 }
0x18fc   :  { %2269 = vmatpush.msrb.mxu2 %v5203_v39 }
0x18fe   :  { %2270 = vmatpush.msrb.mxu2 %v5209_v50 }
0x1900   :  { %2271 = vmatpush.msrb.mxu2 %v5215_v51 }
0x1902   :  { %2272 = vmatpush.msrb.mxu2 %v5221_v52 }
0x1904   :  { %2273 = vmatpush.msrb.mxu2 %v5227_v53 }
0x1906   :  { %2274 = vmatpush.msrb.mxu2 %v5233_v54 }
0x1908   :  { %2275 = vmatpush.msrb.mxu2 %v5239_v43 }
0x190a   :  { %2276 = vmatpush.msrb.mxu2 %v5267_v57 }
0x196e   :  { %v1894_v20 = vpop.f32.mrf.mxu2 }
0x196f   :  { %v1895_v49 = vadd.f32 %v3545_v19, %v1894_v20 }
0x1971   :  { %v1897_v46 = vmul.f32 0.1, %v1895_v49 }
0x1973   :  { %v1898_v47 = vadd.f32 %v1897_v46, %v1874_v58 }
0x1975   :  { %3546 = vst [vmem:[%s6081_s3 + $0x130] sm:$0xff] %v1898_v47  ;;  %v1901_v48 = vmul.f32 3.0, %v1898_v47  ;;  %v1922_v1 = vmul.f32 0.9, %v1898_v47 }
0x1977   :  { %v3547_v9 = vadd.f32 -2.0, %v1901_v48 }
0x1979   :  { %v3548_v11 = vmul.f32 -1.442695, %v3547_v9 }
0x197b   :  { %3827 = vpow2.f32 %v3548_v11 }
0x1981   :  { %v3828_v12 = vpop.eup %3827 }
0x1982   :  { %v1906_v56 = vadd.f32 1.0, %v3828_v12 }
0x1984   :  { %3829 = vrcp.f32 %v1906_v56  ;;  %v1918_v21 = vand.u32 2147483648, %v1906_v56  ;;  %v1916_v23 = vand.u32 2147483647, %v1906_v56  ;;  %vm1912_vm13 = vweird.f32 %v1906_v56 }
0x1986   :  { %v1919_v32 = vor.u32 1.1754944e-38, %v1918_v21  ;;  %vm1917_vm15 = vcmp.eq.f32.partialorder %v1916_v23, 8.507059e+37 }
0x198a   :  { %v3830_v13 = vpop.eup %3829 }
0x198b   :  { %v1908_v14 = vmul.f32 %v3830_v13, %v1906_v56  ;;  %vm1913_vm12 = vweird.f32 %v3830_v13 }
0x198c   :  { %vm1914_vm14 = vmor %vm1912_vm13, %vm1913_vm12 }
0x198d   :  { %v1909_v16 = vsub.f32 1.0, %v1908_v14 }
0x198f   :  { %v1910_v59 = vmul.f32 %v3830_v13, %v1909_v16 }
0x1991   :  { %v1911_v60 = vadd.f32 %v3830_v13, %v1910_v59  ;;  %v3557_v59 = vld [vmem:[%s6080_s0 + $0x148] sm:$0xff] }
0x1993   :  { %v1915_v33 = vsel %vm1914_vm14, %v3830_v13, %v1911_v60 }
0x1994   :  { %v1920_v34 = vsel %vm1917_vm15, %v1919_v32, %v1915_v33 }
0x1995   :  { %1941 = vmatmul.f32.vlgmr.msrb.gmra.mxu3 %v1920_v34 }
0x1996   :  { %2309 = vmatpush.msrb.mxu3 %v5133_v24 }
0x1998   :  { %2310 = vmatpush.msrb.mxu3 %v5139_v25 }
0x199a   :  { %2311 = vmatpush.msrb.mxu3 %v5145_v26 }
0x199c   :  { %2312 = vmatpush.msrb.mxu3 %v5151_v27 }
0x199e   :  { %2313 = vmatpush.msrb.mxu3 %v5157_v28 }
0x19a0   :  { %2314 = vmatpush.msrb.mxu3 %v5163_v61 }
0x19a2   :  { %2315 = vmatpush.msrb.mxu3 %v5191_v37 }
0x19a4   :  { %2316 = vmatpush.msrb.mxu3 %v5197_v38 }
0x19a6   :  { %2317 = vmatpush.msrb.mxu3 %v5203_v39 }
0x19a8   :  { %2318 = vmatpush.msrb.mxu3 %v5209_v50 }
0x19aa   :  { %2319 = vmatpush.msrb.mxu3 %v5215_v51 }
0x19ac   :  { %2320 = vmatpush.msrb.mxu3 %v5221_v52 }
0x19ae   :  { %2321 = vmatpush.msrb.mxu3 %v5227_v53 }
0x19b0   :  { %2322 = vmatpush.msrb.mxu3 %v5233_v54 }
0x19b2   :  { %2323 = vmatpush.msrb.mxu3 %v5239_v43 }
0x19b4   :  { %2324 = vmatpush.msrb.mxu3 %v5267_v57 }
0x1a18   :  { %v1942_v0 = vpop.f32.mrf.mxu3 }
0x1a19   :  { %v1943_v63 = vadd.f32 %v3549_v62, %v1942_v0 }
0x1a1b   :  { %v1945_v2 = vmul.f32 0.1, %v1943_v63 }
0x1a1d   :  { %v1946_v3 = vadd.f32 %v1945_v2, %v1922_v1 }
0x1a1f   :  { %3550 = vst [vmem:[%s6081_s3 + $0x138] sm:$0xff] %v1946_v3  ;;  %v1949_v5 = vmul.f32 3.0, %v1946_v3  ;;  %v1970_v15 = vmul.f32 0.9, %v1946_v3 }
0x1a21   :  { %v3551_v22 = vadd.f32 -2.0, %v1949_v5 }
0x1a23   :  { %v3552_v4 = vmul.f32 -1.442695, %v3551_v22 }
0x1a25   :  { %3831 = vpow2.f32 %v3552_v4 }
0x1a2b   :  { %v3832_v6 = vpop.eup %3831 }
0x1a2c   :  { %v1954_v8 = vadd.f32 1.0, %v3832_v6 }
0x1a2e   :  { %3833 = vrcp.f32 %v1954_v8  ;;  %v1966_v31 = vand.u32 2147483648, %v1954_v8  ;;  %v1964_v35 = vand.u32 2147483647, %v1954_v8  ;;  %vm1960_vm1 = vweird.f32 %v1954_v8 }
0x1a30   :  { %v1967_v55 = vor.u32 1.1754944e-38, %v1966_v31  ;;  %vm1965_vm3 = vcmp.eq.f32.partialorder %v1964_v35, 8.507059e+37 }
0x1a34   :  { %v3834_v10 = vpop.eup %3833 }
0x1a35   :  { %v1956_v29 = vmul.f32 %v3834_v10, %v1954_v8  ;;  %vm1961_vm0 = vweird.f32 %v3834_v10 }
0x1a36   :  { %vm1962_vm2 = vmor %vm1960_vm1, %vm1961_vm0 }
0x1a37   :  { %v1957_v30 = vsub.f32 1.0, %v1956_v29 }
0x1a39   :  { %v1958_v7 = vmul.f32 %v3834_v10, %v1957_v30 }
0x1a3b   :  { %v1959_v36 = vadd.f32 %v3834_v10, %v1958_v7  ;;  %v3561_v7 = vld [vmem:[%s6080_s0 + $0x150] sm:$0xff] }
0x1a3d   :  { %v1963_v40 = vsel %vm1962_vm2, %v3834_v10, %v1959_v36 }
0x1a3e   :  { %v1968_v41 = vsel %vm1965_vm3, %v1967_v55, %v1963_v40 }
0x1a3f   :  { %1989 = vmatmul.f32.vlgmr.msra.gmra.mxu0 %v1968_v41 }
0x1a40   :  { %2357 = vmatpush.msra.mxu0 %v5133_v24 }
0x1a42   :  { %2358 = vmatpush.msra.mxu0 %v5139_v25 }
0x1a44   :  { %2359 = vmatpush.msra.mxu0 %v5145_v26 }
0x1a46   :  { %2360 = vmatpush.msra.mxu0 %v5151_v27 }
0x1a48   :  { %2361 = vmatpush.msra.mxu0 %v5157_v28 }
0x1a4a   :  { %2362 = vmatpush.msra.mxu0 %v5163_v61 }
0x1a4c   :  { %2363 = vmatpush.msra.mxu0 %v5191_v37 }
0x1a4e   :  { %2364 = vmatpush.msra.mxu0 %v5197_v38 }
0x1a50   :  { %2365 = vmatpush.msra.mxu0 %v5203_v39 }
0x1a52   :  { %2366 = vmatpush.msra.mxu0 %v5209_v50 }
0x1a54   :  { %2367 = vmatpush.msra.mxu0 %v5215_v51 }
0x1a56   :  { %2368 = vmatpush.msra.mxu0 %v5221_v52 }
0x1a58   :  { %2369 = vmatpush.msra.mxu0 %v5227_v53 }
0x1a5a   :  { %2370 = vmatpush.msra.mxu0 %v5233_v54 }
0x1a5c   :  { %2371 = vmatpush.msra.mxu0 %v5239_v43 }
0x1a5e   :  { %2372 = vmatpush.msra.mxu0 %v5267_v57 }
0x1abc   :  { %v1990_v44 = vpop.f32.mrf.mxu0 }
0x1abd   :  { %v1991_v45 = vadd.f32 %v3553_v42, %v1990_v44 }
0x1abf   :  { %v1993_v17 = vmul.f32 0.1, %v1991_v45 }
0x1ac1   :  { %v1994_v18 = vadd.f32 %v1993_v17, %v1970_v15 }
0x1ac3   :  { %3554 = vst [vmem:[%s6081_s3 + $0x140] sm:$0xff] %v1994_v18  ;;  %v1997_v19 = vmul.f32 3.0, %v1994_v18  ;;  %v2018_v32 = vmul.f32 0.9, %v1994_v18 }
0x1ac5   :  { %v3555_v20 = vadd.f32 -2.0, %v1997_v19 }
0x1ac7   :  { %v3556_v49 = vmul.f32 -1.442695, %v3555_v20 }
0x1ac9   :  { %3835 = vpow2.f32 %v3556_v49 }
0x1acf   :  { %v3836_v58 = vpop.eup %3835 }
0x1ad0   :  { %v2002_v46 = vadd.f32 1.0, %v3836_v58 }
0x1ad2   :  { %3837 = vrcp.f32 %v2002_v46  ;;  %v2014_v11 = vand.u32 2147483648, %v2002_v46  ;;  %v2012_v56 = vand.u32 2147483647, %v2002_v46  ;;  %vm2008_vm5 = vweird.f32 %v2002_v46 }
0x1ad4   :  { %v2015_v14 = vor.u32 1.1754944e-38, %v2014_v11  ;;  %vm2013_vm7 = vcmp.eq.f32.partialorder %v2012_v56, 8.507059e+37 }
0x1ad8   :  { %v3838_v47 = vpop.eup %3837 }
0x1ad9   :  { %v2004_v48 = vmul.f32 %v3838_v47, %v2002_v46  ;;  %vm2009_vm4 = vweird.f32 %v3838_v47 }
0x1ada   :  { %vm2010_vm6 = vmor %vm2008_vm5, %vm2009_vm4 }
0x1adb   :  { %v2005_v9 = vsub.f32 1.0, %v2004_v48 }
0x1add   :  { %v2006_v12 = vmul.f32 %v3838_v47, %v2005_v9 }
0x1adf   :  { %v2007_v13 = vadd.f32 %v3838_v47, %v2006_v12 }
0x1ae1   :  { %v2011_v16 = vsel %vm2010_vm6, %v3838_v47, %v2007_v13 }
0x1ae2   :  { %v2016_v21 = vsel %vm2013_vm7, %v2015_v14, %v2011_v16 }
0x1ae3   :  { %2037 = vmatmul.f32.vlgmr.msra.gmra.mxu1 %v2016_v21 }
0x1ae4   :  { %2405 = vmatpush.msra.mxu1 %v5133_v24 }
0x1ae6   :  { %2406 = vmatpush.msra.mxu1 %v5139_v25 }
0x1ae8   :  { %2407 = vmatpush.msra.mxu1 %v5145_v26 }
0x1aea   :  { %2408 = vmatpush.msra.mxu1 %v5151_v27 }
0x1aec   :  { %2409 = vmatpush.msra.mxu1 %v5157_v28 }
0x1aee   :  { %2410 = vmatpush.msra.mxu1 %v5163_v61 }
0x1af0   :  { %2411 = vmatpush.msra.mxu1 %v5191_v37 }
0x1af2   :  { %2412 = vmatpush.msra.mxu1 %v5197_v38 }
0x1af4   :  { %2413 = vmatpush.msra.mxu1 %v5203_v39 }
0x1af6   :  { %2414 = vmatpush.msra.mxu1 %v5209_v50 }
0x1af8   :  { %2415 = vmatpush.msra.mxu1 %v5215_v51 }
0x1afa   :  { %2416 = vmatpush.msra.mxu1 %v5221_v52 }
0x1afc   :  { %2417 = vmatpush.msra.mxu1 %v5227_v53 }
0x1afe   :  { %2418 = vmatpush.msra.mxu1 %v5233_v54 }
0x1b00   :  { %2419 = vmatpush.msra.mxu1 %v5239_v43 }
0x1b02   :  { %2420 = vmatpush.msra.mxu1 %v5267_v57 }
0x1b60   :  { %v2038_v23 = vpop.f32.mrf.mxu1 }
0x1b61   :  { %v2039_v60 = vadd.f32 %v3557_v59, %v2038_v23 }
0x1b63   :  { %v2041_v33 = vmul.f32 0.1, %v2039_v60 }
0x1b65   :  { %v2042_v34 = vadd.f32 %v2041_v33, %v2018_v32 }
0x1b67   :  { %3558 = vst [vmem:[%s6081_s3 + $0x148] sm:$0xff] %v2042_v34  ;;  %v2045_v62 = vmul.f32 3.0, %v2042_v34  ;;  %v2066_v55 = vmul.f32 0.9, %v2042_v34 }
0x1b69   :  { %v3559_v0 = vadd.f32 -2.0, %v2045_v62 }
0x1b6b   :  { %v3560_v63 = vmul.f32 -1.442695, %v3559_v0 }
0x1b6d   :  { %3839 = vpow2.f32 %v3560_v63 }
0x1b73   :  { %v3840_v1 = vpop.eup %3839 }
0x1b74   :  { %v2050_v2 = vadd.f32 1.0, %v3840_v1  ;;  %v5477_v1 = vld [vmem:[%s6078_s1 + $0x78] sm:$0xff] }
0x1b76   :  { %3841 = vrcp.f32 %v2050_v2  ;;  %v2062_v4 = vand.u32 2147483648, %v2050_v2  ;;  %v2060_v8 = vand.u32 2147483647, %v2050_v2  ;;  %vm2056_vm9 = vweird.f32 %v2050_v2 }
0x1b78   :  { %v2063_v29 = vor.u32 1.1754944e-38, %v2062_v4  ;;  %vm2061_vm11 = vcmp.eq.f32.partialorder %v2060_v8, 8.507059e+37  ;;  %v5507_v4 = vld [vmem:[%s6078_s1 + $0x50] sm:$0xff] }
0x1b7c   :  { %v3842_v3 = vpop.eup %3841 }
0x1b7d   :  { %v2052_v5 = vmul.f32 %v3842_v3, %v2050_v2  ;;  %vm2057_vm8 = vweird.f32 %v3842_v3  ;;  %v5483_v2 = vld [vmem:[%s6078_s1 + $0x70] sm:$0xff] }
0x1b7e   :  { %vm2058_vm10 = vmor %vm2056_vm9, %vm2057_vm8 }
0x1b7f   :  { %v2053_v22 = vsub.f32 1.0, %v2052_v5  ;;  %v5495_v5 = vld [vmem:[%s6078_s1 + $0x60] sm:$0xff] }
0x1b81   :  { %v2054_v6 = vmul.f32 %v3842_v3, %v2053_v22  ;;  %v5501_v22 = vld [vmem:[%s6078_s1 + $0x58] sm:$0xff] }
0x1b83   :  { %v2055_v10 = vadd.f32 %v3842_v3, %v2054_v6 }
0x1b85   :  { %v2059_v30 = vsel %vm2058_vm10, %v3842_v3, %v2055_v10  ;;  %v5489_v3 = vld [vmem:[%s6078_s1 + $0x68] sm:$0xff] }
0x1b86   :  { %v2064_v31 = vsel %vm2061_vm11, %v2063_v29, %v2059_v30 }
0x1b87   :  { %2085 = vmatmul.f32.vlgmr.msra.gmra.mxu2 %v2064_v31 }
0x1b88   :  { %2453 = vmatpush.msra.mxu2 %v5133_v24 }
0x1b8a   :  { %2454 = vmatpush.msra.mxu2 %v5139_v25 }
0x1b8c   :  { %2455 = vmatpush.msra.mxu2 %v5145_v26 }
0x1b8e   :  { %2456 = vmatpush.msra.mxu2 %v5151_v27 }
0x1b90   :  { %2457 = vmatpush.msra.mxu2 %v5157_v28 }
0x1b92   :  { %2458 = vmatpush.msra.mxu2 %v5163_v61 }
0x1b94   :  { %2459 = vmatpush.msra.mxu2 %v5191_v37 }
0x1b96   :  { %2460 = vmatpush.msra.mxu2 %v5197_v38 }
0x1b98   :  { %2461 = vmatpush.msra.mxu2 %v5203_v39 }
0x1b9a   :  { %2462 = vmatpush.msra.mxu2 %v5209_v50 }
0x1b9c   :  { %2463 = vmatpush.msra.mxu2 %v5215_v51 }
0x1b9e   :  { %2464 = vmatpush.msra.mxu2 %v5221_v52 }
0x1ba0   :  { %2465 = vmatpush.msra.mxu2 %v5227_v53 }
0x1ba2   :  { %2466 = vmatpush.msra.mxu2 %v5233_v54 }
0x1ba4   :  { %2467 = vmatpush.msra.mxu2 %v5239_v43 }
0x1ba6   :  { %2468 = vmatpush.msra.mxu2 %v5267_v57 }
0x1c0a   :  { %v2086_v35 = vpop.f32.mrf.mxu2 }
0x1c0b   :  { %v2087_v36 = vadd.f32 %v3561_v7, %v2086_v35 }
0x1c0d   :  { %v2089_v40 = vmul.f32 0.1, %v2087_v36 }
0x1c0f   :  { %v2090_v41 = vadd.f32 %v2089_v40, %v2066_v55 }
0x1c11   :  { %3562 = vst [vmem:[%s6081_s3 + $0x150] sm:$0xff] %v2090_v41  ;;  %v2093_v42 = vmul.f32 3.0, %v2090_v41 }
0x1c13   :  { %v3563_v44 = vadd.f32 -2.0, %v2093_v42  ;;  %v5535_v42 = vld [vmem:[%s6078_s1 + $0x48] sm:$0xff] }
0x1c15   :  { %v3564_v45 = vmul.f32 -1.442695, %v3563_v44  ;;  %v5541_v44 = vld [vmem:[%s6078_s1 + $0x40] sm:$0xff] }
0x1c17   :  { %3843 = vpow2.f32 %v3564_v45  ;;  %v5547_v45 = vld [vmem:[%s6078_s1 + $0x38] sm:$0xff] }
0x1c1d   :  { %v3844_v15 = vpop.eup %3843 }
0x1c1e   :  { %v2098_v17 = vadd.f32 1.0, %v3844_v15  ;;  %v5553_v15 = vld [vmem:[%s6078_s1 + $0x30] sm:$0xff] }
0x1c20   :  { %3845 = vrcp.f32 %v2098_v17  ;;  %v2110_v49 = vand.u32 2147483648, %v2098_v17  ;;  %v2108_v46 = vand.u32 2147483647, %v2098_v17  ;;  %vm2104_vm13 = vweird.f32 %v2098_v17 }
0x1c22   :  { %v2111_v48 = vor.u32 1.1754944e-38, %v2110_v49  ;;  %vm2109_vm15 = vcmp.eq.f32.partialorder %v2108_v46, 8.507059e+37  ;;  %v5583_v49 = vld [vmem:[%s6078_s1 + $0x8] sm:$0xff] }
0x1c26   :  { %v3846_v18 = vpop.eup %3845 }
0x1c27   :  { %v2100_v19 = vmul.f32 %v3846_v18, %v2098_v17  ;;  %vm2105_vm12 = vweird.f32 %v3846_v18  ;;  %v5559_v17 = vld [vmem:[%s6078_s1 + $0x28] sm:$0xff] }
0x1c28   :  { %vm2106_vm14 = vmor %vm2104_vm13, %vm2105_vm12 }
0x1c29   :  { %v2101_v20 = vsub.f32 1.0, %v2100_v19  ;;  %v5571_v19 = vld [vmem:[%s6078_s1 + $0x18] sm:$0xff] }
0x1c2b   :  { %v2102_v58 = vmul.f32 %v3846_v18, %v2101_v20  ;;  %v5577_v20 = vld [vmem:[%s6078_s1 + $0x10] sm:$0xff] }
0x1c2d   :  { %v2103_v47 = vadd.f32 %v3846_v18, %v2102_v58  ;;  %v3573_v58 = vld [vmem:[%s6080_s0 + $0x168] sm:$0xff] }
0x1c2f   :  { %v2107_v9 = vsel %vm2106_vm14, %v3846_v18, %v2103_v47  ;;  %v5565_v18 = vld [vmem:[%s6078_s1 + $0x20] sm:$0xff] }
0x1c30   :  { %v2112_v11 = vsel %vm2109_vm15, %v2111_v48, %v2107_v9 }
0x1c31   :  { %2133 = vmatmul.f32.vlgmr.msra.gmra.mxu3 %v2112_v11 }
0x1c32   :  { %2501 = vmatpush.msra.mxu3 %v5133_v24  ;;  %v3565_v24 = vld [vmem:[%s6080_s0 + $0x158] sm:$0xff] }
0x1c34   :  { %2502 = vmatpush.msra.mxu3 %v5139_v25 }
0x1c36   :  { %2503 = vmatpush.msra.mxu3 %v5145_v26 }
0x1c38   :  { %2504 = vmatpush.msra.mxu3 %v5151_v27  ;;  %v2114_v27 = vmul.f32 0.9, %v2090_v41 }
0x1c3a   :  { %2505 = vmatpush.msra.mxu3 %v5157_v28 }
0x1c3c   :  { %2506 = vmatpush.msra.mxu3 %v5163_v61 }
0x1c3e   :  { %2507 = vmatpush.msra.mxu3 %v5191_v37 }
0x1c40   :  { %2508 = vmatpush.msra.mxu3 %v5197_v38 }
0x1c42   :  { %2509 = vmatpush.msra.mxu3 %v5203_v39 }
0x1c44   :  { %2510 = vmatpush.msra.mxu3 %v5209_v50 }
0x1c46   :  { %2511 = vmatpush.msra.mxu3 %v5215_v51 }
0x1c48   :  { %2512 = vmatpush.msra.mxu3 %v5221_v52 }
0x1c4a   :  { %2513 = vmatpush.msra.mxu3 %v5227_v53 }
0x1c4c   :  { %2514 = vmatpush.msra.mxu3 %v5233_v54 }
0x1c4e   :  { %2515 = vmatpush.msra.mxu3 %v5239_v43 }
0x1c50   :  { %2516 = vmatpush.msra.mxu3 %v5267_v57 }
0x1cb4   :  { %v2134_v25 = vpop.f32.mrf.mxu3 }
0x1cb5   :  { %v2135_v26 = vadd.f32 %v3565_v24, %v2134_v25 }
0x1cb7   :  { %v2137_v28 = vmul.f32 0.1, %v2135_v26 }
0x1cb9   :  { %v2138_v61 = vadd.f32 %v2137_v28, %v2114_v27 }
0x1cbb   :  { %3566 = vst [vmem:[%s6081_s3 + $0x158] sm:$0xff] %v2138_v61  ;;  %v2141_v12 = vmul.f32 3.0, %v2138_v61  ;;  %v2162_v6 = vmul.f32 0.9, %v2138_v61 }
0x1cbd   :  { %v3567_v56 = vadd.f32 -2.0, %v2141_v12 }
0x1cbf   :  { %v3568_v13 = vmul.f32 -1.442695, %v3567_v56 }
0x1cc1   :  { %3847 = vpow2.f32 %v3568_v13 }
0x1cc7   :  { %v3848_v14 = vpop.eup %3847 }
0x1cc8   :  { %v2146_v16 = vadd.f32 1.0, %v3848_v14 }
0x1cca   :  { %3849 = vrcp.f32 %v2146_v16  ;;  %v2158_v60 = vand.u32 2147483648, %v2146_v16  ;;  %v2156_v33 = vand.u32 2147483647, %v2146_v16  ;;  %vm2152_vm1 = vweird.f32 %v2146_v16 }
0x1ccc   :  { %v2159_v62 = vor.u32 1.1754944e-38, %v2158_v60  ;;  %vm2157_vm3 = vcmp.eq.f32.partialorder %v2156_v33, 8.507059e+37  ;;  %v5611_v60 = vld [vmem:[%s6078_s1] sm:$0xff] }
0x1cd0   :  { %v3850_v21 = vpop.eup %3849 }
0x1cd1   :  { %v2148_v59 = vmul.f32 %v3850_v21, %v2146_v16  ;;  %vm2153_vm0 = vweird.f32 %v3850_v21 }
0x1cd2   :  { %vm2154_vm2 = vmor %vm2152_vm1, %vm2153_vm0 }
0x1cd3   :  { %v2149_v23 = vsub.f32 1.0, %v2148_v59 }
0x1cd5   :  { %v2150_v32 = vmul.f32 %v3850_v21, %v2149_v23 }
0x1cd7   :  { %v2151_v34 = vadd.f32 %v3850_v21, %v2150_v32  ;;  %v3577_v32 = vld [vmem:[%s6080_s0 + $0x170] sm:$0xff] }
0x1cd9   :  { %v2155_v0 = vsel %vm2154_vm2, %v3850_v21, %v2151_v34 }
0x1cda   :  { %v2160_v63 = vsel %vm2157_vm3, %v2159_v62, %v2155_v0 }
0x1cdb   :  { %2181 = vmatmul.f32.vlgmr.msrb.gmra.mxu0 %v2160_v63 }
0x1cdc   :  { %2549 = vmatpush.msrb.mxu0 %v5477_v1 }
0x1cde   :  { %2550 = vmatpush.msrb.mxu0 %v5483_v2 }
0x1ce0   :  { %2551 = vmatpush.msrb.mxu0 %v5489_v3 }
0x1ce2   :  { %2552 = vmatpush.msrb.mxu0 %v5495_v5 }
0x1ce4   :  { %2553 = vmatpush.msrb.mxu0 %v5501_v22 }
0x1ce6   :  { %2554 = vmatpush.msrb.mxu0 %v5507_v4 }
0x1ce8   :  { %2555 = vmatpush.msrb.mxu0 %v5191_v37  ;;  %v3569_v37 = vld [vmem:[%s6080_s0 + $0x160] sm:$0xff] }
0x1cea   :  { %2556 = vmatpush.msrb.mxu0 %v5197_v38 }
0x1cec   :  { %2557 = vmatpush.msrb.mxu0 %v5203_v39 }
0x1cee   :  { %2558 = vmatpush.msrb.mxu0 %v5209_v50 }
0x1cf0   :  { %2559 = vmatpush.msrb.mxu0 %v5215_v51 }
0x1cf2   :  { %2560 = vmatpush.msrb.mxu0 %v5221_v52 }
0x1cf4   :  { %2561 = vmatpush.msrb.mxu0 %v5227_v53 }
0x1cf6   :  { %2562 = vmatpush.msrb.mxu0 %v5233_v54 }
0x1cf8   :  { %2563 = vmatpush.msrb.mxu0 %v5239_v43 }
0x1cfa   :  { %2564 = vmatpush.msrb.mxu0 %v5267_v57 }
0x1d58   :  { %v2182_v38 = vpop.f32.mrf.mxu0 }
0x1d59   :  { %v2183_v39 = vadd.f32 %v3569_v37, %v2182_v38 }
0x1d5b   :  { %v2185_v50 = vmul.f32 0.1, %v2183_v39 }
0x1d5d   :  { %v2186_v8 = vadd.f32 %v2185_v50, %v2162_v6 }
0x1d5f   :  { %3570 = vst [vmem:[%s6081_s3 + $0x160] sm:$0xff] %v2186_v8  ;;  %v2189_v51 = vmul.f32 3.0, %v2186_v8  ;;  %v2210_v48 = vmul.f32 0.9, %v2186_v8 }
0x1d61   :  { %v3571_v52 = vadd.f32 -2.0, %v2189_v51 }
0x1d63   :  { %v3572_v53 = vmul.f32 -1.442695, %v3571_v52 }
0x1d65   :  { %3851 = vpow2.f32 %v3572_v53 }
0x1d6b   :  { %v3852_v54 = vpop.eup %3851 }
0x1d6c   :  { %v2194_v43 = vadd.f32 1.0, %v3852_v54 }
0x1d6e   :  { %3853 = vrcp.f32 %v2194_v43  ;;  %v2206_v31 = vand.u32 2147483648, %v2194_v43  ;;  %v2204_v35 = vand.u32 2147483647, %v2194_v43  ;;  %vm2200_vm5 = vweird.f32 %v2194_v43 }
0x1d70   :  { %v2207_v55 = vor.u32 1.1754944e-38, %v2206_v31  ;;  %vm2205_vm7 = vcmp.eq.f32.partialorder %v2204_v35, 8.507059e+37 }
0x1d74   :  { %v3854_v10 = vpop.eup %3853 }
0x1d75   :  { %v2196_v29 = vmul.f32 %v3854_v10, %v2194_v43  ;;  %vm2201_vm4 = vweird.f32 %v3854_v10 }
0x1d76   :  { %vm2202_vm6 = vmor %vm2200_vm5, %vm2201_vm4 }
0x1d77   :  { %v2197_v30 = vsub.f32 1.0, %v2196_v29 }
0x1d79   :  { %v2198_v7 = vmul.f32 %v3854_v10, %v2197_v30 }
0x1d7b   :  { %v2199_v36 = vadd.f32 %v3854_v10, %v2198_v7  ;;  %v3581_v7 = vld [vmem:[%s6080_s0 + $0x178] sm:$0xff] }
0x1d7d   :  { %v2203_v40 = vsel %vm2202_vm6, %v3854_v10, %v2199_v36 }
0x1d7e   :  { %v2208_v41 = vsel %vm2205_vm7, %v2207_v55, %v2203_v40 }
0x1d7f   :  { %2229 = vmatmul.f32.vlgmr.msrb.gmra.mxu1 %v2208_v41 }
0x1d80   :  { %2597 = vmatpush.msrb.mxu1 %v5477_v1 }
0x1d82   :  { %2598 = vmatpush.msrb.mxu1 %v5483_v2 }
0x1d84   :  { %2599 = vmatpush.msrb.mxu1 %v5489_v3 }
0x1d86   :  { %2600 = vmatpush.msrb.mxu1 %v5495_v5 }
0x1d88   :  { %2601 = vmatpush.msrb.mxu1 %v5501_v22 }
0x1d8a   :  { %2602 = vmatpush.msrb.mxu1 %v5507_v4 }
0x1d8c   :  { %2603 = vmatpush.msrb.mxu1 %v5535_v42 }
0x1d8e   :  { %2604 = vmatpush.msrb.mxu1 %v5541_v44 }
0x1d90   :  { %2605 = vmatpush.msrb.mxu1 %v5547_v45 }
0x1d92   :  { %2606 = vmatpush.msrb.mxu1 %v5553_v15 }
0x1d94   :  { %2607 = vmatpush.msrb.mxu1 %v5559_v17 }
0x1d96   :  { %2608 = vmatpush.msrb.mxu1 %v5565_v18 }
0x1d98   :  { %2609 = vmatpush.msrb.mxu1 %v5571_v19 }
0x1d9a   :  { %2610 = vmatpush.msrb.mxu1 %v5577_v20 }
0x1d9c   :  { %2611 = vmatpush.msrb.mxu1 %v5583_v49 }
0x1d9e   :  { %2612 = vmatpush.msrb.mxu1 %v5267_v57 }
0x1dfc   :  { %v2230_v46 = vpop.f32.mrf.mxu1 }
0x1dfd   :  { %v2231_v47 = vadd.f32 %v3573_v58, %v2230_v46 }
0x1dff   :  { %v2233_v9 = vmul.f32 0.1, %v2231_v47 }
0x1e01   :  { %v2234_v11 = vadd.f32 %v2233_v9, %v2210_v48 }
0x1e03   :  { %3574 = vst [vmem:[%s6081_s3 + $0x168] sm:$0xff] %v2234_v11  ;;  %v2237_v24 = vmul.f32 3.0, %v2234_v11  ;;  %v2258_v62 = vmul.f32 0.9, %v2234_v11 }
0x1e05   :  { %v3575_v25 = vadd.f32 -2.0, %v2237_v24 }
0x1e07   :  { %v3576_v26 = vmul.f32 -1.442695, %v3575_v25 }
0x1e09   :  { %3855 = vpow2.f32 %v3576_v26 }
0x1e0f   :  { %v3856_v27 = vpop.eup %3855 }
0x1e10   :  { %v2242_v28 = vadd.f32 1.0, %v3856_v27 }
0x1e12   :  { %3857 = vrcp.f32 %v2242_v28  ;;  %v2254_v56 = vand.u32 2147483648, %v2242_v28  ;;  %v2252_v14 = vand.u32 2147483647, %v2242_v28  ;;  %vm2248_vm9 = vweird.f32 %v2242_v28 }
0x1e14   :  { %v2255_v21 = vor.u32 1.1754944e-38, %v2254_v56  ;;  %vm2253_vm11 = vcmp.eq.f32.partialorder %v2252_v14, 8.507059e+37 }
0x1e18   :  { %v3858_v57 = vpop.eup %3857 }
0x1e19   :  { %v2244_v61 = vmul.f32 %v3858_v57, %v2242_v28  ;;  %vm2249_vm8 = vweird.f32 %v3858_v57 }
0x1e1a   :  { %vm2250_vm10 = vmor %vm2248_vm9, %vm2249_vm8 }
0x1e1b   :  { %v2245_v12 = vsub.f32 1.0, %v2244_v61 }
0x1e1d   :  { %v2246_v13 = vmul.f32 %v3858_v57, %v2245_v12 }
0x1e1f   :  { %v2247_v16 = vadd.f32 %v3858_v57, %v2246_v13  ;;  %v3585_v13 = vld [vmem:[%s6080_s0 + $0x180] sm:$0xff] }
0x1e21   :  { %v2251_v59 = vsel %vm2250_vm10, %v3858_v57, %v2247_v16 }
0x1e22   :  { %v2256_v23 = vsel %vm2253_vm11, %v2255_v21, %v2251_v59 }
0x1e23   :  { %2277 = vmatmul.f32.vlgmr.msrb.gmra.mxu2 %v2256_v23 }
0x1e24   :  { %2645 = vmatpush.msrb.mxu2 %v5477_v1 }
0x1e26   :  { %2646 = vmatpush.msrb.mxu2 %v5483_v2 }
0x1e28   :  { %2647 = vmatpush.msrb.mxu2 %v5489_v3 }
0x1e2a   :  { %2648 = vmatpush.msrb.mxu2 %v5495_v5 }
0x1e2c   :  { %2649 = vmatpush.msrb.mxu2 %v5501_v22 }
0x1e2e   :  { %2650 = vmatpush.msrb.mxu2 %v5507_v4 }
0x1e30   :  { %2651 = vmatpush.msrb.mxu2 %v5535_v42 }
0x1e32   :  { %2652 = vmatpush.msrb.mxu2 %v5541_v44 }
0x1e34   :  { %2653 = vmatpush.msrb.mxu2 %v5547_v45 }
0x1e36   :  { %2654 = vmatpush.msrb.mxu2 %v5553_v15 }
0x1e38   :  { %2655 = vmatpush.msrb.mxu2 %v5559_v17 }
0x1e3a   :  { %2656 = vmatpush.msrb.mxu2 %v5565_v18 }
0x1e3c   :  { %2657 = vmatpush.msrb.mxu2 %v5571_v19 }
0x1e3e   :  { %2658 = vmatpush.msrb.mxu2 %v5577_v20 }
0x1e40   :  { %2659 = vmatpush.msrb.mxu2 %v5583_v49 }
0x1e42   :  { %2660 = vmatpush.msrb.mxu2 %v5611_v60 }
0x1ea6   :  { %v2278_v33 = vpop.f32.mrf.mxu2 }
0x1ea7   :  { %v2279_v34 = vadd.f32 %v3577_v32, %v2278_v33 }
0x1ea9   :  { %v2281_v0 = vmul.f32 0.1, %v2279_v34 }
0x1eab   :  { %v2282_v63 = vadd.f32 %v2281_v0, %v2258_v62 }
0x1ead   :  { %3578 = vst [vmem:[%s6081_s3 + $0x170] sm:$0xff] %v2282_v63  ;;  %v2285_v37 = vmul.f32 3.0, %v2282_v63  ;;  %v2306_v55 = vmul.f32 0.9, %v2282_v63 }
0x1eaf   :  { %v3579_v38 = vadd.f32 -2.0, %v2285_v37 }
0x1eb1   :  { %v3580_v39 = vmul.f32 -1.442695, %v3579_v38 }
0x1eb3   :  { %3859 = vpow2.f32 %v3580_v39 }
0x1eb9   :  { %v3860_v6 = vpop.eup %3859 }
0x1eba   :  { %v2290_v50 = vadd.f32 1.0, %v3860_v6 }
0x1ebc   :  { %3861 = vrcp.f32 %v2290_v50  ;;  %v2302_v53 = vand.u32 2147483648, %v2290_v50  ;;  %v2300_v43 = vand.u32 2147483647, %v2290_v50  ;;  %vm2296_vm13 = vweird.f32 %v2290_v50 }
0x1ebe   :  { %v2303_v29 = vor.u32 1.1754944e-38, %v2302_v53  ;;  %vm2301_vm15 = vcmp.eq.f32.partialorder %v2300_v43, 8.507059e+37 }
0x1ec2   :  { %v3862_v8 = vpop.eup %3861 }
0x1ec3   :  { %v2292_v51 = vmul.f32 %v3862_v8, %v2290_v50  ;;  %vm2297_vm12 = vweird.f32 %v3862_v8 }
0x1ec4   :  { %vm2298_vm14 = vmor %vm2296_vm13, %vm2297_vm12 }
0x1ec5   :  { %v2293_v52 = vsub.f32 1.0, %v2292_v51 }
0x1ec7   :  { %v2294_v54 = vmul.f32 %v3862_v8, %v2293_v52 }
0x1ec9   :  { %v2295_v10 = vadd.f32 %v3862_v8, %v2294_v54  ;;  %v3589_v54 = vld [vmem:[%s6080_s0 + $0x188] sm:$0xff] }
0x1ecb   :  { %v2299_v30 = vsel %vm2298_vm14, %v3862_v8, %v2295_v10 }
0x1ecc   :  { %v2304_v31 = vsel %vm2301_vm15, %v2303_v29, %v2299_v30 }
0x1ecd   :  { %2325 = vmatmul.f32.vlgmr.msrb.gmra.mxu3 %v2304_v31 }
0x1ece   :  { %2693 = vmatpush.msrb.mxu3 %v5477_v1 }
0x1ed0   :  { %2694 = vmatpush.msrb.mxu3 %v5483_v2 }
0x1ed2   :  { %2695 = vmatpush.msrb.mxu3 %v5489_v3 }
0x1ed4   :  { %2696 = vmatpush.msrb.mxu3 %v5495_v5 }
0x1ed6   :  { %2697 = vmatpush.msrb.mxu3 %v5501_v22 }
0x1ed8   :  { %2698 = vmatpush.msrb.mxu3 %v5507_v4 }
0x1eda   :  { %2699 = vmatpush.msrb.mxu3 %v5535_v42 }
0x1edc   :  { %2700 = vmatpush.msrb.mxu3 %v5541_v44 }
0x1ede   :  { %2701 = vmatpush.msrb.mxu3 %v5547_v45 }
0x1ee0   :  { %2702 = vmatpush.msrb.mxu3 %v5553_v15 }
0x1ee2   :  { %2703 = vmatpush.msrb.mxu3 %v5559_v17 }
0x1ee4   :  { %2704 = vmatpush.msrb.mxu3 %v5565_v18 }
0x1ee6   :  { %2705 = vmatpush.msrb.mxu3 %v5571_v19 }
0x1ee8   :  { %2706 = vmatpush.msrb.mxu3 %v5577_v20 }
0x1eea   :  { %2707 = vmatpush.msrb.mxu3 %v5583_v49 }
0x1eec   :  { %2708 = vmatpush.msrb.mxu3 %v5611_v60 }
0x1f50   :  { %v2326_v35 = vpop.f32.mrf.mxu3 }
0x1f51   :  { %v2327_v36 = vadd.f32 %v3581_v7, %v2326_v35 }
0x1f53   :  { %v2329_v40 = vmul.f32 0.1, %v2327_v36 }
0x1f55   :  { %v2330_v41 = vadd.f32 %v2329_v40, %v2306_v55 }
0x1f57   :  { %3582 = vst [vmem:[%s6081_s3 + $0x178] sm:$0xff] %v2330_v41  ;;  %v2333_v58 = vmul.f32 3.0, %v2330_v41  ;;  %v2354_v21 = vmul.f32 0.9, %v2330_v41 }
0x1f59   :  { %v3583_v46 = vadd.f32 -2.0, %v2333_v58 }
0x1f5b   :  { %v3584_v47 = vmul.f32 -1.442695, %v3583_v46 }
0x1f5d   :  { %3863 = vpow2.f32 %v3584_v47 }
0x1f63   :  { %v3864_v48 = vpop.eup %3863 }
0x1f64   :  { %v2338_v9 = vadd.f32 1.0, %v3864_v48 }
0x1f66   :  { %3865 = vrcp.f32 %v2338_v9  ;;  %v2350_v26 = vand.u32 2147483648, %v2338_v9  ;;  %v2348_v28 = vand.u32 2147483647, %v2338_v9  ;;  %vm2344_vm1 = vweird.f32 %v2338_v9 }
0x1f68   :  { %v2351_v61 = vor.u32 1.1754944e-38, %v2350_v26  ;;  %vm2349_vm3 = vcmp.eq.f32.partialorder %v2348_v28, 8.507059e+37 }
0x1f6c   :  { %v3866_v11 = vpop.eup %3865 }
0x1f6d   :  { %v2340_v24 = vmul.f32 %v3866_v11, %v2338_v9  ;;  %vm2345_vm0 = vweird.f32 %v3866_v11 }
0x1f6e   :  { %vm2346_vm2 = vmor %vm2344_vm1, %vm2345_vm0 }
0x1f6f   :  { %v2341_v25 = vsub.f32 1.0, %v2340_v24 }
0x1f71   :  { %v2342_v27 = vmul.f32 %v3866_v11, %v2341_v25 }
0x1f73   :  { %v2343_v57 = vadd.f32 %v3866_v11, %v2342_v27  ;;  %v3593_v27 = vld [vmem:[%s6080_s0 + $0x190] sm:$0xff] }
0x1f75   :  { %v2347_v12 = vsel %vm2346_vm2, %v3866_v11, %v2343_v57 }
0x1f76   :  { %v2352_v56 = vsel %vm2349_vm3, %v2351_v61, %v2347_v12 }
0x1f77   :  { %2373 = vmatmul.f32.vlgmr.msra.gmra.mxu0 %v2352_v56 }
0x1f78   :  { %2741 = vmatpush.msra.mxu0 %v5477_v1 }
0x1f7a   :  { %2742 = vmatpush.msra.mxu0 %v5483_v2 }
0x1f7c   :  { %2743 = vmatpush.msra.mxu0 %v5489_v3 }
0x1f7e   :  { %2744 = vmatpush.msra.mxu0 %v5495_v5 }
0x1f80   :  { %2745 = vmatpush.msra.mxu0 %v5501_v22 }
0x1f82   :  { %2746 = vmatpush.msra.mxu0 %v5507_v4 }
0x1f84   :  { %2747 = vmatpush.msra.mxu0 %v5535_v42 }
0x1f86   :  { %2748 = vmatpush.msra.mxu0 %v5541_v44 }
0x1f88   :  { %2749 = vmatpush.msra.mxu0 %v5547_v45 }
0x1f8a   :  { %2750 = vmatpush.msra.mxu0 %v5553_v15 }
0x1f8c   :  { %2751 = vmatpush.msra.mxu0 %v5559_v17 }
0x1f8e   :  { %2752 = vmatpush.msra.mxu0 %v5565_v18 }
0x1f90   :  { %2753 = vmatpush.msra.mxu0 %v5571_v19 }
0x1f92   :  { %2754 = vmatpush.msra.mxu0 %v5577_v20 }
0x1f94   :  { %2755 = vmatpush.msra.mxu0 %v5583_v49 }
0x1f96   :  { %2756 = vmatpush.msra.mxu0 %v5611_v60 }
0x1ff4   :  { %v2374_v14 = vpop.f32.mrf.mxu0 }
0x1ff5   :  { %v2375_v16 = vadd.f32 %v3585_v13, %v2374_v14 }
0x1ff7   :  { %v2377_v59 = vmul.f32 0.1, %v2375_v16 }
0x1ff9   :  { %v2378_v23 = vadd.f32 %v2377_v59, %v2354_v21 }
0x1ffb   :  { %3586 = vst [vmem:[%s6081_s3 + $0x180] sm:$0xff] %v2378_v23  ;;  %v2381_v32 = vmul.f32 3.0, %v2378_v23  ;;  %v2402_v29 = vmul.f32 0.9, %v2378_v23 }
0x1ffd   :  { %v3587_v33 = vadd.f32 -2.0, %v2381_v32 }
0x1fff   :  { %v3588_v34 = vmul.f32 -1.442695, %v3587_v33 }
0x2001   :  { %3867 = vpow2.f32 %v3588_v34 }
0x2007   :  { %v3868_v62 = vpop.eup %3867 }
0x2008   :  { %v2386_v0 = vadd.f32 1.0, %v3868_v62 }
0x200a   :  { %3869 = vrcp.f32 %v2386_v0  ;;  %v2398_v39 = vand.u32 2147483648, %v2386_v0  ;;  %v2396_v50 = vand.u32 2147483647, %v2386_v0  ;;  %vm2392_vm5 = vweird.f32 %v2386_v0 }
0x200c   :  { %v2399_v51 = vor.u32 1.1754944e-38, %v2398_v39  ;;  %vm2397_vm7 = vcmp.eq.f32.partialorder %v2396_v50, 8.507059e+37 }
0x2010   :  { %v3870_v63 = vpop.eup %3869 }
0x2011   :  { %v2388_v37 = vmul.f32 %v3870_v63, %v2386_v0  ;;  %vm2393_vm4 = vweird.f32 %v3870_v63 }
0x2012   :  { %vm2394_vm6 = vmor %vm2392_vm5, %vm2393_vm4 }
0x2013   :  { %v2389_v38 = vsub.f32 1.0, %v2388_v37 }
0x2015   :  { %v2390_v6 = vmul.f32 %v3870_v63, %v2389_v38 }
0x2017   :  { %v2391_v8 = vadd.f32 %v3870_v63, %v2390_v6  ;;  %v3597_v6 = vld [vmem:[%s6080_s0 + $0x198] sm:$0xff] }
0x2019   :  { %v2395_v52 = vsel %vm2394_vm6, %v3870_v63, %v2391_v8 }
0x201a   :  { %v2400_v53 = vsel %vm2397_vm7, %v2399_v51, %v2395_v52 }
0x201b   :  { %2421 = vmatmul.f32.vlgmr.msra.gmra.mxu1 %v2400_v53 }
0x201c   :  { %2789 = vmatpush.msra.mxu1 %v5477_v1 }
0x201e   :  { %2790 = vmatpush.msra.mxu1 %v5483_v2 }
0x2020   :  { %2791 = vmatpush.msra.mxu1 %v5489_v3 }
0x2022   :  { %2792 = vmatpush.msra.mxu1 %v5495_v5 }
0x2024   :  { %2793 = vmatpush.msra.mxu1 %v5501_v22 }
0x2026   :  { %2794 = vmatpush.msra.mxu1 %v5507_v4 }
0x2028   :  { %2795 = vmatpush.msra.mxu1 %v5535_v42 }
0x202a   :  { %2796 = vmatpush.msra.mxu1 %v5541_v44 }
0x202c   :  { %2797 = vmatpush.msra.mxu1 %v5547_v45 }
0x202e   :  { %2798 = vmatpush.msra.mxu1 %v5553_v15 }
0x2030   :  { %2799 = vmatpush.msra.mxu1 %v5559_v17 }
0x2032   :  { %2800 = vmatpush.msra.mxu1 %v5565_v18 }
0x2034   :  { %2801 = vmatpush.msra.mxu1 %v5571_v19 }
0x2036   :  { %2802 = vmatpush.msra.mxu1 %v5577_v20 }
0x2038   :  { %2803 = vmatpush.msra.mxu1 %v5583_v49 }
0x203a   :  { %2804 = vmatpush.msra.mxu1 %v5611_v60 }
0x2098   :  { %v2422_v43 = vpop.f32.mrf.mxu1 }
0x2099   :  { %v2423_v10 = vadd.f32 %v3589_v54, %v2422_v43 }
0x209b   :  { %v2425_v30 = vmul.f32 0.1, %v2423_v10 }
0x209d   :  { %v2426_v31 = vadd.f32 %v2425_v30, %v2402_v29 }
0x209f   :  { %3590 = vst [vmem:[%s6081_s3 + $0x188] sm:$0xff] %v2426_v31  ;;  %v2429_v7 = vmul.f32 3.0, %v2426_v31  ;;  %v2450_v61 = vmul.f32 0.9, %v2426_v31 }
0x20a1   :  { %v3591_v35 = vadd.f32 -2.0, %v2429_v7 }
0x20a3   :  { %v3592_v36 = vmul.f32 -1.442695, %v3591_v35 }
0x20a5   :  { %3871 = vpow2.f32 %v3592_v36 }
0x20ab   :  { %v3872_v55 = vpop.eup %3871 }
0x20ac   :  { %v2434_v40 = vadd.f32 1.0, %v3872_v55 }
0x20ae   :  { %3873 = vrcp.f32 %v2434_v40  ;;  %v2446_v47 = vand.u32 2147483648, %v2434_v40  ;;  %v2444_v9 = vand.u32 2147483647, %v2434_v40  ;;  %vm2440_vm9 = vweird.f32 %v2434_v40 }
0x20b0   :  { %v2447_v24 = vor.u32 1.1754944e-38, %v2446_v47  ;;  %vm2445_vm11 = vcmp.eq.f32.partialorder %v2444_v9, 8.507059e+37 }
0x20b4   :  { %v3874_v41 = vpop.eup %3873 }
0x20b5   :  { %v2436_v58 = vmul.f32 %v3874_v41, %v2434_v40  ;;  %vm2441_vm8 = vweird.f32 %v3874_v41 }
0x20b6   :  { %vm2442_vm10 = vmor %vm2440_vm9, %vm2441_vm8 }
0x20b7   :  { %v2437_v46 = vsub.f32 1.0, %v2436_v58 }
0x20b9   :  { %v2438_v48 = vmul.f32 %v3874_v41, %v2437_v46 }
0x20bb   :  { %v2439_v11 = vadd.f32 %v3874_v41, %v2438_v48  ;;  %v3601_v48 = vld [vmem:[%s6080_s0 + $0x1a0] sm:$0xff] }
0x20bd   :  { %v2443_v25 = vsel %vm2442_vm10, %v3874_v41, %v2439_v11 }
0x20be   :  { %v2448_v26 = vsel %vm2445_vm11, %v2447_v24, %v2443_v25 }
0x20bf   :  { %2469 = vmatmul.f32.vlgmr.msra.gmra.mxu2 %v2448_v26 }
0x20c0   :  { %2837 = vmatpush.msra.mxu2 %v5477_v1 }
0x20c2   :  { %2838 = vmatpush.msra.mxu2 %v5483_v2 }
0x20c4   :  { %2839 = vmatpush.msra.mxu2 %v5489_v3 }
0x20c6   :  { %2840 = vmatpush.msra.mxu2 %v5495_v5 }
0x20c8   :  { %2841 = vmatpush.msra.mxu2 %v5501_v22 }
0x20ca   :  { %2842 = vmatpush.msra.mxu2 %v5507_v4 }
0x20cc   :  { %2843 = vmatpush.msra.mxu2 %v5535_v42 }
0x20ce   :  { %2844 = vmatpush.msra.mxu2 %v5541_v44 }
0x20d0   :  { %2845 = vmatpush.msra.mxu2 %v5547_v45 }
0x20d2   :  { %2846 = vmatpush.msra.mxu2 %v5553_v15 }
0x20d4   :  { %2847 = vmatpush.msra.mxu2 %v5559_v17 }
0x20d6   :  { %2848 = vmatpush.msra.mxu2 %v5565_v18 }
0x20d8   :  { %2849 = vmatpush.msra.mxu2 %v5571_v19 }
0x20da   :  { %2850 = vmatpush.msra.mxu2 %v5577_v20 }
0x20dc   :  { %2851 = vmatpush.msra.mxu2 %v5583_v49 }
0x20de   :  { %2852 = vmatpush.msra.mxu2 %v5611_v60 }
0x2142   :  { %v2470_v28 = vpop.f32.mrf.mxu2 }
0x2143   :  { %v2471_v57 = vadd.f32 %v3593_v27, %v2470_v28 }
0x2145   :  { %v2473_v12 = vmul.f32 0.1, %v2471_v57 }
0x2147   :  { %v2474_v56 = vadd.f32 %v2473_v12, %v2450_v61 }
0x2149   :  { %3594 = vst [vmem:[%s6081_s3 + $0x190] sm:$0xff] %v2474_v56  ;;  %v2477_v13 = vmul.f32 3.0, %v2474_v56  ;;  %v2498_v51 = vmul.f32 0.9, %v2474_v56 }
0x214b   :  { %v3595_v14 = vadd.f32 -2.0, %v2477_v13 }
0x214d   :  { %v3596_v16 = vmul.f32 -1.442695, %v3595_v14 }
0x214f   :  { %3875 = vpow2.f32 %v3596_v16 }
0x2155   :  { %v3876_v21 = vpop.eup %3875 }
0x2156   :  { %v2482_v59 = vadd.f32 1.0, %v3876_v21 }
0x2158   :  { %3877 = vrcp.f32 %v2482_v59  ;;  %v2494_v34 = vand.u32 2147483648, %v2482_v59  ;;  %v2492_v0 = vand.u32 2147483647, %v2482_v59  ;;  %vm2488_vm13 = vweird.f32 %v2482_v59 }
0x215a   :  { %v2495_v37 = vor.u32 1.1754944e-38, %v2494_v34  ;;  %vm2493_vm15 = vcmp.eq.f32.partialorder %v2492_v0, 8.507059e+37 }
0x215e   :  { %v3878_v23 = vpop.eup %3877 }
0x215f   :  { %v2484_v32 = vmul.f32 %v3878_v23, %v2482_v59  ;;  %vm2489_vm12 = vweird.f32 %v3878_v23 }
0x2160   :  { %vm2490_vm14 = vmor %vm2488_vm13, %vm2489_vm12 }
0x2161   :  { %v2485_v33 = vsub.f32 1.0, %v2484_v32 }
0x2163   :  { %v2486_v62 = vmul.f32 %v3878_v23, %v2485_v33 }
0x2165   :  { %v2487_v63 = vadd.f32 %v3878_v23, %v2486_v62  ;;  %v3605_v62 = vld [vmem:[%s6080_s0 + $0x1a8] sm:$0xff] }
0x2167   :  { %v2491_v38 = vsel %vm2490_vm14, %v3878_v23, %v2487_v63 }
0x2168   :  { %v2496_v39 = vsel %vm2493_vm15, %v2495_v37, %v2491_v38 }
0x2169   :  { %2517 = vmatmul.f32.vlgmr.msra.gmra.mxu3 %v2496_v39 }
0x216a   :  { %2885 = vmatpush.msra.mxu3 %v5477_v1 }
0x216c   :  { %2886 = vmatpush.msra.mxu3 %v5483_v2 }
0x216e   :  { %2887 = vmatpush.msra.mxu3 %v5489_v3 }
0x2170   :  { %2888 = vmatpush.msra.mxu3 %v5495_v5 }
0x2172   :  { %2889 = vmatpush.msra.mxu3 %v5501_v22 }
0x2174   :  { %2890 = vmatpush.msra.mxu3 %v5507_v4 }
0x2176   :  { %2891 = vmatpush.msra.mxu3 %v5535_v42 }
0x2178   :  { %2892 = vmatpush.msra.mxu3 %v5541_v44 }
0x217a   :  { %2893 = vmatpush.msra.mxu3 %v5547_v45 }
0x217c   :  { %2894 = vmatpush.msra.mxu3 %v5553_v15 }
0x217e   :  { %2895 = vmatpush.msra.mxu3 %v5559_v17 }
0x2180   :  { %2896 = vmatpush.msra.mxu3 %v5565_v18 }
0x2182   :  { %2897 = vmatpush.msra.mxu3 %v5571_v19 }
0x2184   :  { %2898 = vmatpush.msra.mxu3 %v5577_v20 }
0x2186   :  { %2899 = vmatpush.msra.mxu3 %v5583_v49 }
0x2188   :  { %2900 = vmatpush.msra.mxu3 %v5611_v60 }
0x21ec   :  { %v2518_v50 = vpop.f32.mrf.mxu3 }
0x21ed   :  { %v2519_v8 = vadd.f32 %v3597_v6, %v2518_v50 }
0x21ef   :  { %v2521_v52 = vmul.f32 0.1, %v2519_v8 }
0x21f1   :  { %v2522_v53 = vadd.f32 %v2521_v52, %v2498_v51 }
0x21f3   :  { %3598 = vst [vmem:[%s6081_s3 + $0x198] sm:$0xff] %v2522_v53  ;;  %v2525_v54 = vmul.f32 3.0, %v2522_v53  ;;  %v2546_v24 = vmul.f32 0.9, %v2522_v53 }
0x21f5   :  { %v3599_v43 = vadd.f32 -2.0, %v2525_v54 }
0x21f7   :  { %v3600_v10 = vmul.f32 -1.442695, %v3599_v43 }
0x21f9   :  { %3879 = vpow2.f32 %v3600_v10 }
0x21ff   :  { %v3880_v29 = vpop.eup %3879 }
0x2200   :  { %v2530_v30 = vadd.f32 1.0, %v3880_v29 }
0x2202   :  { %3881 = vrcp.f32 %v2530_v30  ;;  %v2542_v36 = vand.u32 2147483648, %v2530_v30  ;;  %v2540_v40 = vand.u32 2147483647, %v2530_v30  ;;  %vm2536_vm1 = vweird.f32 %v2530_v30 }
0x2204   :  { %v2543_v58 = vor.u32 1.1754944e-38, %v2542_v36  ;;  %vm2541_vm3 = vcmp.eq.f32.partialorder %v2540_v40, 8.507059e+37 }
0x2208   :  { %v3882_v31 = vpop.eup %3881 }
0x2209   :  { %v2532_v7 = vmul.f32 %v3882_v31, %v2530_v30  ;;  %vm2537_vm0 = vweird.f32 %v3882_v31 }
0x220a   :  { %vm2538_vm2 = vmor %vm2536_vm1, %vm2537_vm0 }
0x220b   :  { %v2533_v35 = vsub.f32 1.0, %v2532_v7 }
0x220d   :  { %v2534_v55 = vmul.f32 %v3882_v31, %v2533_v35 }
0x220f   :  { %v2535_v41 = vadd.f32 %v3882_v31, %v2534_v55  ;;  %v3609_v55 = vld [vmem:[%s6080_s0 + $0x1b0] sm:$0xff] }
0x2211   :  { %v2539_v46 = vsel %vm2538_vm2, %v3882_v31, %v2535_v41 }
0x2212   :  { %v2544_v47 = vsel %vm2541_vm3, %v2543_v58, %v2539_v46 }
0x2213   :  { %2565 = vmatmul.f32.vlgmr.msrb.gmra.mxu0 %v2544_v47 }
0x2214   :  { %2933 = vmatpush.msrb.mxu0 %v5477_v1 }
0x2216   :  { %2934 = vmatpush.msrb.mxu0 %v5483_v2 }
0x2218   :  { %2935 = vmatpush.msrb.mxu0 %v5489_v3 }
0x221a   :  { %2936 = vmatpush.msrb.mxu0 %v5495_v5 }
0x221c   :  { %2937 = vmatpush.msrb.mxu0 %v5501_v22 }
0x221e   :  { %2938 = vmatpush.msrb.mxu0 %v5507_v4 }
0x2220   :  { %2939 = vmatpush.msrb.mxu0 %v5535_v42 }
0x2222   :  { %2940 = vmatpush.msrb.mxu0 %v5541_v44 }
0x2224   :  { %2941 = vmatpush.msrb.mxu0 %v5547_v45 }
0x2226   :  { %2942 = vmatpush.msrb.mxu0 %v5553_v15 }
0x2228   :  { %2943 = vmatpush.msrb.mxu0 %v5559_v17 }
0x222a   :  { %2944 = vmatpush.msrb.mxu0 %v5565_v18 }
0x222c   :  { %2945 = vmatpush.msrb.mxu0 %v5571_v19 }
0x222e   :  { %2946 = vmatpush.msrb.mxu0 %v5577_v20 }
0x2230   :  { %2947 = vmatpush.msrb.mxu0 %v5583_v49 }
0x2232   :  { %2948 = vmatpush.msrb.mxu0 %v5611_v60 }
0x2290   :  { %v2566_v9 = vpop.f32.mrf.mxu0 }
0x2291   :  { %v2567_v11 = vadd.f32 %v3601_v48, %v2566_v9 }
0x2293   :  { %v2569_v25 = vmul.f32 0.1, %v2567_v11 }
0x2295   :  { %v2570_v26 = vadd.f32 %v2569_v25, %v2546_v24 }
0x2297   :  { %3602 = vst [vmem:[%s6081_s3 + $0x1a0] sm:$0xff] %v2570_v26  ;;  %v2573_v27 = vmul.f32 3.0, %v2570_v26  ;;  %v2594_v37 = vmul.f32 0.9, %v2570_v26 }
0x2299   :  { %v3603_v28 = vadd.f32 -2.0, %v2573_v27 }
0x229b   :  { %v3604_v57 = vmul.f32 -1.442695, %v3603_v28 }
0x229d   :  { %3883 = vpow2.f32 %v3604_v57 }
0x22a3   :  { %v3884_v61 = vpop.eup %3883 }
0x22a4   :  { %v2578_v12 = vadd.f32 1.0, %v3884_v61 }
0x22a6   :  { %3885 = vrcp.f32 %v2578_v12  ;;  %v2590_v16 = vand.u32 2147483648, %v2578_v12  ;;  %v2588_v59 = vand.u32 2147483647, %v2578_v12  ;;  %vm2584_vm5 = vweird.f32 %v2578_v12 }
0x22a8   :  { %v2591_v32 = vor.u32 1.1754944e-38, %v2590_v16  ;;  %vm2589_vm7 = vcmp.eq.f32.partialorder %v2588_v59, 8.507059e+37 }
0x22ac   :  { %v3886_v56 = vpop.eup %3885 }
0x22ad   :  { %v2580_v13 = vmul.f32 %v3886_v56, %v2578_v12  ;;  %vm2585_vm4 = vweird.f32 %v3886_v56 }
0x22ae   :  { %vm2586_vm6 = vmor %vm2584_vm5, %vm2585_vm4 }
0x22af   :  { %v2581_v14 = vsub.f32 1.0, %v2580_v13 }
0x22b1   :  { %v2582_v21 = vmul.f32 %v3886_v56, %v2581_v14 }
0x22b3   :  { %v2583_v23 = vadd.f32 %v3886_v56, %v2582_v21 }
0x22b5   :  { %v2587_v33 = vsel %vm2586_vm6, %v3886_v56, %v2583_v23 }
0x22b6   :  { %v2592_v34 = vsel %vm2589_vm7, %v2591_v32, %v2587_v33 }
0x22b7   :  { %2613 = vmatmul.f32.vlgmr.msrb.gmra.mxu1 %v2592_v34 }
0x22b8   :  { %2981 = vmatpush.msrb.mxu1 %v5477_v1 }
0x22ba   :  { %2982 = vmatpush.msrb.mxu1 %v5483_v2 }
0x22bc   :  { %2983 = vmatpush.msrb.mxu1 %v5489_v3 }
0x22be   :  { %2984 = vmatpush.msrb.mxu1 %v5495_v5 }
0x22c0   :  { %2985 = vmatpush.msrb.mxu1 %v5501_v22 }
0x22c2   :  { %2986 = vmatpush.msrb.mxu1 %v5507_v4 }
0x22c4   :  { %2987 = vmatpush.msrb.mxu1 %v5535_v42 }
0x22c6   :  { %2988 = vmatpush.msrb.mxu1 %v5541_v44 }
0x22c8   :  { %2989 = vmatpush.msrb.mxu1 %v5547_v45 }
0x22ca   :  { %2990 = vmatpush.msrb.mxu1 %v5553_v15 }
0x22cc   :  { %2991 = vmatpush.msrb.mxu1 %v5559_v17 }
0x22ce   :  { %2992 = vmatpush.msrb.mxu1 %v5565_v18 }
0x22d0   :  { %2993 = vmatpush.msrb.mxu1 %v5571_v19 }
0x22d2   :  { %2994 = vmatpush.msrb.mxu1 %v5577_v20 }
0x22d4   :  { %2995 = vmatpush.msrb.mxu1 %v5583_v49 }
0x22d6   :  { %2996 = vmatpush.msrb.mxu1 %v5611_v60 }
0x2334   :  { %v2614_v0 = vpop.f32.mrf.mxu1 }
0x2335   :  { %v2615_v63 = vadd.f32 %v3605_v62, %v2614_v0 }
0x2337   :  { %v2617_v38 = vmul.f32 0.1, %v2615_v63 }
0x2339   :  { %v2618_v39 = vadd.f32 %v2617_v38, %v2594_v37 }
0x233b   :  { %3606 = vst [vmem:[%s6081_s3 + $0x1a8] sm:$0xff] %v2618_v39  ;;  %v2621_v6 = vmul.f32 3.0, %v2618_v39  ;;  %v2642_v58 = vmul.f32 0.9, %v2618_v39 }
0x233d   :  { %v3607_v50 = vadd.f32 -2.0, %v2621_v6 }
0x233f   :  { %v3608_v8 = vmul.f32 -1.442695, %v3607_v50 }
0x2341   :  { %3887 = vpow2.f32 %v3608_v8 }
0x2347   :  { %v3888_v51 = vpop.eup %3887 }
0x2348   :  { %v2626_v52 = vadd.f32 1.0, %v3888_v51  ;;  %v5821_v51 = vld [vmem:[%s6078_s1 + $0x78] sm:$0xff] }
0x234a   :  { %3889 = vrcp.f32 %v2626_v52  ;;  %v2638_v10 = vand.u32 2147483648, %v2626_v52  ;;  %v2636_v30 = vand.u32 2147483647, %v2626_v52  ;;  %vm2632_vm9 = vweird.f32 %v2626_v52 }
0x234c   :  { %v2639_v7 = vor.u32 1.1754944e-38, %v2638_v10  ;;  %vm2637_vm11 = vcmp.eq.f32.partialorder %v2636_v30, 8.507059e+37  ;;  %v5851_v10 = vld [vmem:[%s6078_s1 + $0x50] sm:$0xff] }
0x2350   :  { %v3890_v53 = vpop.eup %3889 }
0x2351   :  { %v2628_v54 = vmul.f32 %v3890_v53, %v2626_v52  ;;  %vm2633_vm8 = vweird.f32 %v3890_v53  ;;  %v5827_v52 = vld [vmem:[%s6078_s1 + $0x70] sm:$0xff] }
0x2352   :  { %vm2634_vm10 = vmor %vm2632_vm9, %vm2633_vm8 }
0x2353   :  { %v2629_v43 = vsub.f32 1.0, %v2628_v54  ;;  %v5839_v54 = vld [vmem:[%s6078_s1 + $0x60] sm:$0xff] }
0x2355   :  { %v2630_v29 = vmul.f32 %v3890_v53, %v2629_v43  ;;  %v5845_v43 = vld [vmem:[%s6078_s1 + $0x58] sm:$0xff] }
0x2357   :  { %v2631_v31 = vadd.f32 %v3890_v53, %v2630_v29 }
0x2359   :  { %v2635_v35 = vsel %vm2634_vm10, %v3890_v53, %v2631_v31  ;;  %v5833_v53 = vld [vmem:[%s6078_s1 + $0x68] sm:$0xff] }
0x235a   :  { %v2640_v36 = vsel %vm2637_vm11, %v2639_v7, %v2635_v35 }
0x235b   :  { %2661 = vmatmul.f32.vlgmr.msrb.gmra.mxu2 %v2640_v36 }
0x235c   :  { %3029 = vmatpush.msrb.mxu2 %v5477_v1 }
0x235e   :  { %3030 = vmatpush.msrb.mxu2 %v5483_v2 }
0x2360   :  { %3031 = vmatpush.msrb.mxu2 %v5489_v3 }
0x2362   :  { %3032 = vmatpush.msrb.mxu2 %v5495_v5 }
0x2364   :  { %3033 = vmatpush.msrb.mxu2 %v5501_v22 }
0x2366   :  { %3034 = vmatpush.msrb.mxu2 %v5507_v4 }
0x2368   :  { %3035 = vmatpush.msrb.mxu2 %v5535_v42 }
0x236a   :  { %3036 = vmatpush.msrb.mxu2 %v5541_v44 }
0x236c   :  { %3037 = vmatpush.msrb.mxu2 %v5547_v45 }
0x236e   :  { %3038 = vmatpush.msrb.mxu2 %v5553_v15 }
0x2370   :  { %3039 = vmatpush.msrb.mxu2 %v5559_v17 }
0x2372   :  { %3040 = vmatpush.msrb.mxu2 %v5565_v18 }
0x2374   :  { %3041 = vmatpush.msrb.mxu2 %v5571_v19 }
0x2376   :  { %3042 = vmatpush.msrb.mxu2 %v5577_v20 }
0x2378   :  { %3043 = vmatpush.msrb.mxu2 %v5583_v49 }
0x237a   :  { %3044 = vmatpush.msrb.mxu2 %v5611_v60 }
0x23de   :  { %v2662_v40 = vpop.f32.mrf.mxu2 }
0x23df   :  { %v2663_v41 = vadd.f32 %v3609_v55, %v2662_v40 }
0x23e1   :  { %v2665_v46 = vmul.f32 0.1, %v2663_v41 }
0x23e3   :  { %v2666_v47 = vadd.f32 %v2665_v46, %v2642_v58 }
0x23e5   :  { %3610 = vst [vmem:[%s6081_s3 + $0x1b0] sm:$0xff] %v2666_v47  ;;  %v2669_v48 = vmul.f32 3.0, %v2666_v47 }
0x23e7   :  { %v3611_v9 = vadd.f32 -2.0, %v2669_v48  ;;  %v5879_v48 = vld [vmem:[%s6078_s1 + $0x48] sm:$0xff] }
0x23e9   :  { %v3612_v11 = vmul.f32 -1.442695, %v3611_v9  ;;  %v5885_v9 = vld [vmem:[%s6078_s1 + $0x40] sm:$0xff] }
0x23eb   :  { %3891 = vpow2.f32 %v3612_v11  ;;  %v5891_v11 = vld [vmem:[%s6078_s1 + $0x38] sm:$0xff] }
0x23f1   :  { %v3892_v24 = vpop.eup %3891 }
0x23f2   :  { %v2674_v25 = vadd.f32 1.0, %v3892_v24  ;;  %v5897_v24 = vld [vmem:[%s6078_s1 + $0x30] sm:$0xff] }
0x23f4   :  { %3893 = vrcp.f32 %v2674_v25  ;;  %v2686_v57 = vand.u32 2147483648, %v2674_v25  ;;  %v2684_v12 = vand.u32 2147483647, %v2674_v25  ;;  %vm2680_vm13 = vweird.f32 %v2674_v25 }
0x23f6   :  { %v2687_v13 = vor.u32 1.1754944e-38, %v2686_v57  ;;  %vm2685_vm15 = vcmp.eq.f32.partialorder %v2684_v12, 8.507059e+37  ;;  %v5927_v57 = vld [vmem:[%s6078_s1 + $0x8] sm:$0xff] }
0x23fa   :  { %v3894_v26 = vpop.eup %3893 }
0x23fb   :  { %v2676_v27 = vmul.f32 %v3894_v26, %v2674_v25  ;;  %vm2681_vm12 = vweird.f32 %v3894_v26  ;;  %v5903_v25 = vld [vmem:[%s6078_s1 + $0x28] sm:$0xff] }
0x23fc   :  { %vm2682_vm14 = vmor %vm2680_vm13, %vm2681_vm12 }
0x23fd   :  { %v2677_v28 = vsub.f32 1.0, %v2676_v27  ;;  %v5915_v27 = vld [vmem:[%s6078_s1 + $0x18] sm:$0xff] }
0x23ff   :  { %v2678_v61 = vmul.f32 %v3894_v26, %v2677_v28  ;;  %v5921_v28 = vld [vmem:[%s6078_s1 + $0x10] sm:$0xff] }
0x2401   :  { %v2679_v56 = vadd.f32 %v3894_v26, %v2678_v61  ;;  %v3621_v61 = vld [vmem:[%s6080_s0 + $0x1c8] sm:$0xff] }
0x2403   :  { %v2683_v14 = vsel %vm2682_vm14, %v3894_v26, %v2679_v56  ;;  %v5909_v26 = vld [vmem:[%s6078_s1 + $0x20] sm:$0xff] }
0x2404   :  { %v2688_v16 = vsel %vm2685_vm15, %v2687_v13, %v2683_v14 }
0x2405   :  { %2709 = vmatmul.f32.vlgmr.msrb.gmra.mxu3 %v2688_v16 }
0x2406   :  { %3077 = vmatpush.msrb.mxu3 %v5477_v1  ;;  %v3613_v1 = vld [vmem:[%s6080_s0 + $0x1b8] sm:$0xff] }
0x2408   :  { %3078 = vmatpush.msrb.mxu3 %v5483_v2 }
0x240a   :  { %3079 = vmatpush.msrb.mxu3 %v5489_v3 }
0x240c   :  { %3080 = vmatpush.msrb.mxu3 %v5495_v5  ;;  %v2690_v5 = vmul.f32 0.9, %v2666_v47 }
0x240e   :  { %3081 = vmatpush.msrb.mxu3 %v5501_v22 }
0x2410   :  { %3082 = vmatpush.msrb.mxu3 %v5507_v4 }
0x2412   :  { %3083 = vmatpush.msrb.mxu3 %v5535_v42 }
0x2414   :  { %3084 = vmatpush.msrb.mxu3 %v5541_v44 }
0x2416   :  { %3085 = vmatpush.msrb.mxu3 %v5547_v45 }
0x2418   :  { %3086 = vmatpush.msrb.mxu3 %v5553_v15 }
0x241a   :  { %3087 = vmatpush.msrb.mxu3 %v5559_v17 }
0x241c   :  { %3088 = vmatpush.msrb.mxu3 %v5565_v18 }
0x241e   :  { %3089 = vmatpush.msrb.mxu3 %v5571_v19 }
0x2420   :  { %3090 = vmatpush.msrb.mxu3 %v5577_v20 }
0x2422   :  { %3091 = vmatpush.msrb.mxu3 %v5583_v49 }
0x2424   :  { %3092 = vmatpush.msrb.mxu3 %v5611_v60 }
0x2488   :  { %v2710_v2 = vpop.f32.mrf.mxu3 }
0x2489   :  { %v2711_v3 = vadd.f32 %v3613_v1, %v2710_v2 }
0x248b   :  { %v2713_v22 = vmul.f32 0.1, %v2711_v3 }
0x248d   :  { %v2714_v4 = vadd.f32 %v2713_v22, %v2690_v5 }
0x248f   :  { %3614 = vst [vmem:[%s6081_s3 + $0x1b8] sm:$0xff] %v2714_v4  ;;  %v2717_v21 = vmul.f32 3.0, %v2714_v4  ;;  %v2738_v29 = vmul.f32 0.9, %v2714_v4 }
0x2491   :  { %v3615_v59 = vadd.f32 -2.0, %v2717_v21 }
0x2493   :  { %v3616_v23 = vmul.f32 -1.442695, %v3615_v59 }
0x2495   :  { %3895 = vpow2.f32 %v3616_v23 }
0x249b   :  { %v3896_v32 = vpop.eup %3895 }
0x249c   :  { %v2722_v33 = vadd.f32 1.0, %v3896_v32 }
0x249e   :  { %3897 = vrcp.f32 %v2722_v33  ;;  %v2734_v63 = vand.u32 2147483648, %v2722_v33  ;;  %v2732_v38 = vand.u32 2147483647, %v2722_v33  ;;  %vm2728_vm1 = vweird.f32 %v2722_v33 }
0x24a0   :  { %v2735_v6 = vor.u32 1.1754944e-38, %v2734_v63  ;;  %vm2733_vm3 = vcmp.eq.f32.partialorder %v2732_v38, 8.507059e+37  ;;  %v5955_v63 = vld [vmem:[%s6078_s1] sm:$0xff] }
0x24a4   :  { %v3898_v34 = vpop.eup %3897 }
0x24a5   :  { %v2724_v62 = vmul.f32 %v3898_v34, %v2722_v33  ;;  %vm2729_vm0 = vweird.f32 %v3898_v34 }
0x24a6   :  { %vm2730_vm2 = vmor %vm2728_vm1, %vm2729_vm0 }
0x24a7   :  { %v2725_v0 = vsub.f32 1.0, %v2724_v62 }
0x24a9   :  { %v2726_v37 = vmul.f32 %v3898_v34, %v2725_v0 }
0x24ab   :  { %v2727_v39 = vadd.f32 %v3898_v34, %v2726_v37  ;;  %v3625_v37 = vld [vmem:[%s6080_s0 + $0x1d0] sm:$0xff] }
0x24ad   :  { %v2731_v50 = vsel %vm2730_vm2, %v3898_v34, %v2727_v39 }
0x24ae   :  { %v2736_v8 = vsel %vm2733_vm3, %v2735_v6, %v2731_v50 }
0x24af   :  { %2757 = vmatmul.f32.vlgmr.msra.gmra.mxu0 %v2736_v8 }
0x24b0   :  { %3125 = vmatpush.msra.mxu0 %v5821_v51 }
0x24b2   :  { %3126 = vmatpush.msra.mxu0 %v5827_v52 }
0x24b4   :  { %3127 = vmatpush.msra.mxu0 %v5833_v53 }
0x24b6   :  { %3128 = vmatpush.msra.mxu0 %v5839_v54 }
0x24b8   :  { %3129 = vmatpush.msra.mxu0 %v5845_v43 }
0x24ba   :  { %3130 = vmatpush.msra.mxu0 %v5851_v10 }
0x24bc   :  { %3131 = vmatpush.msra.mxu0 %v5535_v42  ;;  %v3617_v42 = vld [vmem:[%s6080_s0 + $0x1c0] sm:$0xff] }
0x24be   :  { %3132 = vmatpush.msra.mxu0 %v5541_v44 }
0x24c0   :  { %3133 = vmatpush.msra.mxu0 %v5547_v45 }
0x24c2   :  { %3134 = vmatpush.msra.mxu0 %v5553_v15 }
0x24c4   :  { %3135 = vmatpush.msra.mxu0 %v5559_v17 }
0x24c6   :  { %3136 = vmatpush.msra.mxu0 %v5565_v18 }
0x24c8   :  { %3137 = vmatpush.msra.mxu0 %v5571_v19 }
0x24ca   :  { %3138 = vmatpush.msra.mxu0 %v5577_v20 }
0x24cc   :  { %3139 = vmatpush.msra.mxu0 %v5583_v49 }
0x24ce   :  { %3140 = vmatpush.msra.mxu0 %v5611_v60 }
0x252c   :  { %v2758_v44 = vpop.f32.mrf.mxu0 }
0x252d   :  { %v2759_v45 = vadd.f32 %v3617_v42, %v2758_v44 }
0x252f   :  { %v2761_v15 = vmul.f32 0.1, %v2759_v45 }
0x2531   :  { %v2762_v30 = vadd.f32 %v2761_v15, %v2738_v29 }
0x2533   :  { %3618 = vst [vmem:[%s6081_s3 + $0x1c0] sm:$0xff] %v2762_v30  ;;  %v2765_v17 = vmul.f32 3.0, %v2762_v30  ;;  %v2786_v13 = vmul.f32 0.9, %v2762_v30 }
0x2535   :  { %v3619_v18 = vadd.f32 -2.0, %v2765_v17 }
0x2537   :  { %v3620_v19 = vmul.f32 -1.442695, %v3619_v18 }
0x2539   :  { %3899 = vpow2.f32 %v3620_v19 }
0x253f   :  { %v3900_v20 = vpop.eup %3899 }
0x2540   :  { %v2770_v49 = vadd.f32 1.0, %v3900_v20 }
0x2542   :  { %3901 = vrcp.f32 %v2770_v49  ;;  %v2782_v36 = vand.u32 2147483648, %v2770_v49  ;;  %v2780_v40 = vand.u32 2147483647, %v2770_v49  ;;  %vm2776_vm5 = vweird.f32 %v2770_v49 }
0x2544   :  { %v2783_v58 = vor.u32 1.1754944e-38, %v2782_v36  ;;  %vm2781_vm7 = vcmp.eq.f32.partialorder %v2780_v40, 8.507059e+37 }
0x2548   :  { %v3902_v31 = vpop.eup %3901 }
0x2549   :  { %v2772_v7 = vmul.f32 %v3902_v31, %v2770_v49  ;;  %vm2777_vm4 = vweird.f32 %v3902_v31 }
0x254a   :  { %vm2778_vm6 = vmor %vm2776_vm5, %vm2777_vm4 }
0x254b   :  { %v2773_v35 = vsub.f32 1.0, %v2772_v7 }
0x254d   :  { %v2774_v55 = vmul.f32 %v3902_v31, %v2773_v35 }
0x254f   :  { %v2775_v41 = vadd.f32 %v3902_v31, %v2774_v55  ;;  %v3629_v55 = vld [vmem:[%s6080_s0 + $0x1d8] sm:$0xff] }
0x2551   :  { %v2779_v46 = vsel %vm2778_vm6, %v3902_v31, %v2775_v41 }
0x2552   :  { %v2784_v47 = vsel %vm2781_vm7, %v2783_v58, %v2779_v46 }
0x2553   :  { %2805 = vmatmul.f32.vlgmr.msra.gmra.mxu1 %v2784_v47 }
0x2554   :  { %3173 = vmatpush.msra.mxu1 %v5821_v51 }
0x2556   :  { %3174 = vmatpush.msra.mxu1 %v5827_v52 }
0x2558   :  { %3175 = vmatpush.msra.mxu1 %v5833_v53 }
0x255a   :  { %3176 = vmatpush.msra.mxu1 %v5839_v54 }
0x255c   :  { %3177 = vmatpush.msra.mxu1 %v5845_v43 }
0x255e   :  { %3178 = vmatpush.msra.mxu1 %v5851_v10 }
0x2560   :  { %3179 = vmatpush.msra.mxu1 %v5879_v48 }
0x2562   :  { %3180 = vmatpush.msra.mxu1 %v5885_v9 }
0x2564   :  { %3181 = vmatpush.msra.mxu1 %v5891_v11 }
0x2566   :  { %3182 = vmatpush.msra.mxu1 %v5897_v24 }
0x2568   :  { %3183 = vmatpush.msra.mxu1 %v5903_v25 }
0x256a   :  { %3184 = vmatpush.msra.mxu1 %v5909_v26 }
0x256c   :  { %3185 = vmatpush.msra.mxu1 %v5915_v27 }
0x256e   :  { %3186 = vmatpush.msra.mxu1 %v5921_v28 }
0x2570   :  { %3187 = vmatpush.msra.mxu1 %v5927_v57 }
0x2572   :  { %3188 = vmatpush.msra.mxu1 %v5611_v60 }
0x25d0   :  { %v2806_v12 = vpop.f32.mrf.mxu1 }
0x25d1   :  { %v2807_v56 = vadd.f32 %v3621_v61, %v2806_v12 }
0x25d3   :  { %v2809_v14 = vmul.f32 0.1, %v2807_v56 }
0x25d5   :  { %v2810_v16 = vadd.f32 %v2809_v14, %v2786_v13 }
0x25d7   :  { %3622 = vst [vmem:[%s6081_s3 + $0x1c8] sm:$0xff] %v2810_v16  ;;  %v2813_v1 = vmul.f32 3.0, %v2810_v16  ;;  %v2834_v6 = vmul.f32 0.9, %v2810_v16 }
0x25d9   :  { %v3623_v2 = vadd.f32 -2.0, %v2813_v1 }
0x25db   :  { %v3624_v3 = vmul.f32 -1.442695, %v3623_v2 }
0x25dd   :  { %3903 = vpow2.f32 %v3624_v3 }
0x25e3   :  { %v3904_v5 = vpop.eup %3903 }
0x25e4   :  { %v2818_v22 = vadd.f32 1.0, %v3904_v5 }
0x25e6   :  { %3905 = vrcp.f32 %v2818_v22  ;;  %v2830_v59 = vand.u32 2147483648, %v2818_v22  ;;  %v2828_v32 = vand.u32 2147483647, %v2818_v22  ;;  %vm2824_vm9 = vweird.f32 %v2818_v22 }
0x25e8   :  { %v2831_v34 = vor.u32 1.1754944e-38, %v2830_v59  ;;  %vm2829_vm11 = vcmp.eq.f32.partialorder %v2828_v32, 8.507059e+37 }
0x25ec   :  { %v3906_v60 = vpop.eup %3905 }
0x25ed   :  { %v2820_v4 = vmul.f32 %v3906_v60, %v2818_v22  ;;  %vm2825_vm8 = vweird.f32 %v3906_v60 }
0x25ee   :  { %vm2826_vm10 = vmor %vm2824_vm9, %vm2825_vm8 }
0x25ef   :  { %v2821_v21 = vsub.f32 1.0, %v2820_v4 }
0x25f1   :  { %v2822_v23 = vmul.f32 %v3906_v60, %v2821_v21 }
0x25f3   :  { %v2823_v33 = vadd.f32 %v3906_v60, %v2822_v23  ;;  %v3633_v23 = vld [vmem:[%s6080_s0 + $0x1e0] sm:$0xff] }
0x25f5   :  { %v2827_v62 = vsel %vm2826_vm10, %v3906_v60, %v2823_v33 }
0x25f6   :  { %v2832_v0 = vsel %vm2829_vm11, %v2831_v34, %v2827_v62 }
0x25f7   :  { %2853 = vmatmul.f32.vlgmr.msra.gmra.mxu2 %v2832_v0 }
0x25f8   :  { %3221 = vmatpush.msra.mxu2 %v5821_v51 }
0x25fa   :  { %3222 = vmatpush.msra.mxu2 %v5827_v52 }
0x25fc   :  { %3223 = vmatpush.msra.mxu2 %v5833_v53 }
0x25fe   :  { %3224 = vmatpush.msra.mxu2 %v5839_v54 }
0x2600   :  { %3225 = vmatpush.msra.mxu2 %v5845_v43 }
0x2602   :  { %3226 = vmatpush.msra.mxu2 %v5851_v10 }
0x2604   :  { %3227 = vmatpush.msra.mxu2 %v5879_v48 }
0x2606   :  { %3228 = vmatpush.msra.mxu2 %v5885_v9 }
0x2608   :  { %3229 = vmatpush.msra.mxu2 %v5891_v11 }
0x260a   :  { %3230 = vmatpush.msra.mxu2 %v5897_v24 }
0x260c   :  { %3231 = vmatpush.msra.mxu2 %v5903_v25 }
0x260e   :  { %3232 = vmatpush.msra.mxu2 %v5909_v26 }
0x2610   :  { %3233 = vmatpush.msra.mxu2 %v5915_v27 }
0x2612   :  { %3234 = vmatpush.msra.mxu2 %v5921_v28 }
0x2614   :  { %3235 = vmatpush.msra.mxu2 %v5927_v57 }
0x2616   :  { %3236 = vmatpush.msra.mxu2 %v5955_v63 }
0x267a   :  { %v2854_v38 = vpop.f32.mrf.mxu2 }
0x267b   :  { %v2855_v39 = vadd.f32 %v3625_v37, %v2854_v38 }
0x267d   :  { %v2857_v50 = vmul.f32 0.1, %v2855_v39 }
0x267f   :  { %v2858_v8 = vadd.f32 %v2857_v50, %v2834_v6 }
0x2681   :  { %3626 = vst [vmem:[%s6081_s3 + $0x1d0] sm:$0xff] %v2858_v8  ;;  %v2861_v42 = vmul.f32 3.0, %v2858_v8  ;;  %v2882_v58 = vmul.f32 0.9, %v2858_v8 }
0x2683   :  { %v3627_v44 = vadd.f32 -2.0, %v2861_v42 }
0x2685   :  { %v3628_v45 = vmul.f32 -1.442695, %v3627_v44 }
0x2687   :  { %3907 = vpow2.f32 %v3628_v45 }
0x268d   :  { %v3908_v29 = vpop.eup %3907 }
0x268e   :  { %v2866_v15 = vadd.f32 1.0, %v3908_v29 }
0x2690   :  { %3909 = vrcp.f32 %v2866_v15  ;;  %v2878_v19 = vand.u32 2147483648, %v2866_v15  ;;  %v2876_v49 = vand.u32 2147483647, %v2866_v15  ;;  %vm2872_vm13 = vweird.f32 %v2866_v15 }
0x2692   :  { %v2879_v7 = vor.u32 1.1754944e-38, %v2878_v19  ;;  %vm2877_vm15 = vcmp.eq.f32.partialorder %v2876_v49, 8.507059e+37 }
0x2696   :  { %v3910_v30 = vpop.eup %3909 }
0x2697   :  { %v2868_v17 = vmul.f32 %v3910_v30, %v2866_v15  ;;  %vm2873_vm12 = vweird.f32 %v3910_v30 }
0x2698   :  { %vm2874_vm14 = vmor %vm2872_vm13, %vm2873_vm12 }
0x2699   :  { %v2869_v18 = vsub.f32 1.0, %v2868_v17 }
0x269b   :  { %v2870_v20 = vmul.f32 %v3910_v30, %v2869_v18 }
0x269d   :  { %v2871_v31 = vadd.f32 %v3910_v30, %v2870_v20 }
0x269f   :  { %v2875_v35 = vsel %vm2874_vm14, %v3910_v30, %v2871_v31 }
0x26a0   :  { %v2880_v36 = vsel %vm2877_vm15, %v2879_v7, %v2875_v35 }
0x26a1   :  { %2901 = vmatmul.f32.vlgmr.msra.gmra.mxu3 %v2880_v36  ;;  %v3641_v36 = vld [vmem:[%s6080_s0 + $0x1f0] sm:$0xff] }
0x26a2   :  { %3269 = vmatpush.msra.mxu3 %v5821_v51 }
0x26a4   :  { %3270 = vmatpush.msra.mxu3 %v5827_v52 }
0x26a6   :  { %3271 = vmatpush.msra.mxu3 %v5833_v53 }
0x26a8   :  { %3272 = vmatpush.msra.mxu3 %v5839_v54 }
0x26aa   :  { %3273 = vmatpush.msra.mxu3 %v5845_v43 }
0x26ac   :  { %3274 = vmatpush.msra.mxu3 %v5851_v10 }
0x26ae   :  { %3275 = vmatpush.msra.mxu3 %v5879_v48 }
0x26b0   :  { %3276 = vmatpush.msra.mxu3 %v5885_v9 }
0x26b2   :  { %3277 = vmatpush.msra.mxu3 %v5891_v11 }
0x26b4   :  { %3278 = vmatpush.msra.mxu3 %v5897_v24 }
0x26b6   :  { %3279 = vmatpush.msra.mxu3 %v5903_v25 }
0x26b8   :  { %3280 = vmatpush.msra.mxu3 %v5909_v26 }
0x26ba   :  { %3281 = vmatpush.msra.mxu3 %v5915_v27 }
0x26bc   :  { %3282 = vmatpush.msra.mxu3 %v5921_v28 }
0x26be   :  { %3283 = vmatpush.msra.mxu3 %v5927_v57 }
0x26c0   :  { %3284 = vmatpush.msra.mxu3 %v5955_v63 }
0x2724   :  { %v2902_v40 = vpop.f32.mrf.mxu3 }
0x2725   :  { %v2903_v41 = vadd.f32 %v3629_v55, %v2902_v40 }
0x2727   :  { %v2905_v46 = vmul.f32 0.1, %v2903_v41 }
0x2729   :  { %v2906_v47 = vadd.f32 %v2905_v46, %v2882_v58 }
0x272b   :  { %3630 = vst [vmem:[%s6081_s3 + $0x1d8] sm:$0xff] %v2906_v47  ;;  %v2909_v61 = vmul.f32 3.0, %v2906_v47  ;;  %v2930_v34 = vmul.f32 0.9, %v2906_v47 }
0x272d   :  { %v3631_v12 = vadd.f32 -2.0, %v2909_v61 }
0x272f   :  { %v3632_v56 = vmul.f32 -1.442695, %v3631_v12 }
0x2731   :  { %3911 = vpow2.f32 %v3632_v56 }
0x2737   :  { %v3912_v13 = vpop.eup %3911 }
0x2738   :  { %v2914_v14 = vadd.f32 1.0, %v3912_v13 }
0x273a   :  { %3913 = vrcp.f32 %v2914_v14  ;;  %v2926_v3 = vand.u32 2147483648, %v2914_v14  ;;  %v2924_v22 = vand.u32 2147483647, %v2914_v14  ;;  %vm2920_vm1 = vweird.f32 %v2914_v14 }
0x273c   :  { %v2927_v4 = vor.u32 1.1754944e-38, %v2926_v3  ;;  %vm2925_vm3 = vcmp.eq.f32.partialorder %v2924_v22, 8.507059e+37 }
0x2740   :  { %v3914_v16 = vpop.eup %3913 }
0x2741   :  { %v2916_v1 = vmul.f32 %v3914_v16, %v2914_v14  ;;  %vm2921_vm0 = vweird.f32 %v3914_v16 }
0x2742   :  { %vm2922_vm2 = vmor %vm2920_vm1, %vm2921_vm0 }
0x2743   :  { %v2917_v2 = vsub.f32 1.0, %v2916_v1 }
0x2745   :  { %v2918_v5 = vmul.f32 %v3914_v16, %v2917_v2 }
0x2747   :  { %v2919_v60 = vadd.f32 %v3914_v16, %v2918_v5 }
0x2749   :  { %v2923_v21 = vsel %vm2922_vm2, %v3914_v16, %v2919_v60 }
0x274a   :  { %v2928_v59 = vsel %vm2925_vm3, %v2927_v4, %v2923_v21 }
0x274b   :  { %2949 = vmatmul.f32.vlgmr.msrb.gmra.mxu0 %v2928_v59  ;;  %v3645_v59 = vld [vmem:[%s6080_s0 + $0x1f8] sm:$0xff] }
0x274c   :  { %3317 = vmatpush.msrb.mxu0 %v5821_v51 }
0x274e   :  { %3318 = vmatpush.msrb.mxu0 %v5827_v52 }
0x2750   :  { %3319 = vmatpush.msrb.mxu0 %v5833_v53 }
0x2752   :  { %3320 = vmatpush.msrb.mxu0 %v5839_v54 }
0x2754   :  { %3321 = vmatpush.msrb.mxu0 %v5845_v43 }
0x2756   :  { %3322 = vmatpush.msrb.mxu0 %v5851_v10 }
0x2758   :  { %3323 = vmatpush.msrb.mxu0 %v5879_v48 }
0x275a   :  { %3324 = vmatpush.msrb.mxu0 %v5885_v9 }
0x275c   :  { %3325 = vmatpush.msrb.mxu0 %v5891_v11 }
0x275e   :  { %3326 = vmatpush.msrb.mxu0 %v5897_v24 }
0x2760   :  { %3327 = vmatpush.msrb.mxu0 %v5903_v25 }
0x2762   :  { %3328 = vmatpush.msrb.mxu0 %v5909_v26 }
0x2764   :  { %3329 = vmatpush.msrb.mxu0 %v5915_v27 }
0x2766   :  { %3330 = vmatpush.msrb.mxu0 %v5921_v28 }
0x2768   :  { %3331 = vmatpush.msrb.mxu0 %v5927_v57 }
0x276a   :  { %3332 = vmatpush.msrb.mxu0 %v5955_v63 }
0x27c8   :  { %v2950_v32 = vpop.f32.mrf.mxu0 }
0x27c9   :  { %v2951_v33 = vadd.f32 %v3633_v23, %v2950_v32 }
0x27cb   :  { %v2953_v62 = vmul.f32 0.1, %v2951_v33 }
0x27cd   :  { %v2954_v0 = vadd.f32 %v2953_v62, %v2930_v34 }
0x27cf   :  { %3634 = vst [vmem:[%s6081_s3 + $0x1e0] sm:$0xff] %v2954_v0  ;;  %v2957_v37 = vmul.f32 3.0, %v2954_v0 }
0x27d1   :  { %v3635_v38 = vadd.f32 -2.0, %v2957_v37 }
0x27d3   :  { %v3636_v39 = vmul.f32 -1.442695, %v3635_v38 }
0x27d5   :  { %3915 = vpow2.f32 %v3636_v39 }
0x27db   :  { %v3916_v6 = vpop.eup %3915 }
0x27dc   :  { %v2962_v50 = vadd.f32 1.0, %v3916_v6 }
0x27de   :  { %3917 = vrcp.f32 %v2962_v50  ;;  %v2974_v45 = vand.u32 2147483648, %v2962_v50  ;;  %v2972_v15 = vand.u32 2147483647, %v2962_v50  ;;  %vm2968_vm5 = vweird.f32 %v2962_v50 }
0x27e0   :  { %v2975_v17 = vor.u32 1.1754944e-38, %v2974_v45  ;;  %vm2973_vm7 = vcmp.eq.f32.partialorder %v2972_v15, 8.507059e+37 }
0x27e4   :  { %v3918_v8 = vpop.eup %3917 }
0x27e5   :  { %v2964_v42 = vmul.f32 %v3918_v8, %v2962_v50  ;;  %vm2969_vm4 = vweird.f32 %v3918_v8 }
0x27e6   :  { %vm2970_vm6 = vmor %vm2968_vm5, %vm2969_vm4 }
0x27e7   :  { %v2965_v44 = vsub.f32 1.0, %v2964_v42 }
0x27e9   :  { %v2966_v29 = vmul.f32 %v3918_v8, %v2965_v44 }
0x27eb   :  { %v2967_v30 = vadd.f32 %v3918_v8, %v2966_v29 }
0x27ed   :  { %v2971_v18 = vsel %vm2970_vm6, %v3918_v8, %v2967_v30 }
0x27ee   :  { %v2976_v19 = vsel %vm2973_vm7, %v2975_v17, %v2971_v18 }
0x27ef   :  { %2997 = vmatmul.f32.vlgmr.msrb.gmra.mxu1 %v2976_v19  ;;  %v3649_v19 = vld [vmem:[%s6080_s0 + $0x200] sm:$0xff] }
0x27f0   :  { %3365 = vmatpush.msrb.mxu1 %v5821_v51  ;;  %v3637_v51 = vld [vmem:[%s6080_s0 + $0x1e8] sm:$0xff] }
0x27f2   :  { %3366 = vmatpush.msrb.mxu1 %v5827_v52 }
0x27f4   :  { %3367 = vmatpush.msrb.mxu1 %v5833_v53 }
0x27f6   :  { %3368 = vmatpush.msrb.mxu1 %v5839_v54  ;;  %v2978_v54 = vmul.f32 0.9, %v2954_v0 }
0x27f8   :  { %3369 = vmatpush.msrb.mxu1 %v5845_v43 }
0x27fa   :  { %3370 = vmatpush.msrb.mxu1 %v5851_v10 }
0x27fc   :  { %3371 = vmatpush.msrb.mxu1 %v5879_v48 }
0x27fe   :  { %3372 = vmatpush.msrb.mxu1 %v5885_v9 }
0x2800   :  { %3373 = vmatpush.msrb.mxu1 %v5891_v11 }
0x2802   :  { %3374 = vmatpush.msrb.mxu1 %v5897_v24 }
0x2804   :  { %3375 = vmatpush.msrb.mxu1 %v5903_v25 }
0x2806   :  { %3376 = vmatpush.msrb.mxu1 %v5909_v26 }
0x2808   :  { %3377 = vmatpush.msrb.mxu1 %v5915_v27 }
0x280a   :  { %3378 = vmatpush.msrb.mxu1 %v5921_v28 }
0x280c   :  { %3379 = vmatpush.msrb.mxu1 %v5927_v57 }
0x280e   :  { %3380 = vmatpush.msrb.mxu1 %v5955_v63 }
0x286c   :  { %v2998_v52 = vpop.f32.mrf.mxu1 }
0x286d   :  { %v2999_v53 = vadd.f32 %v3637_v51, %v2998_v52 }
0x286f   :  { %v3001_v43 = vmul.f32 0.1, %v2999_v53 }
0x2871   :  { %v3002_v10 = vadd.f32 %v3001_v43, %v2978_v54 }
0x2873   :  { %3638 = vst [vmem:[%s6081_s3 + $0x1e8] sm:$0xff] %v3002_v10  ;;  %v3005_v48 = vmul.f32 3.0, %v3002_v10  ;;  %v3026_v41 = vmul.f32 0.9, %v3002_v10 }
0x2875   :  { %v3639_v9 = vadd.f32 -2.0, %v3005_v48 }
0x2877   :  { %v3640_v11 = vmul.f32 -1.442695, %v3639_v9 }
0x2879   :  { %3919 = vpow2.f32 %v3640_v11 }
0x287f   :  { %v3920_v24 = vpop.eup %3919 }
0x2880   :  { %v3010_v25 = vadd.f32 1.0, %v3920_v24 }
0x2882   :  { %3921 = vrcp.f32 %v3010_v25  ;;  %v3022_v57 = vand.u32 2147483648, %v3010_v25  ;;  %v3020_v20 = vand.u32 2147483647, %v3010_v25  ;;  %vm3016_vm9 = vweird.f32 %v3010_v25 }
0x2884   :  { %v3023_v31 = vor.u32 1.1754944e-38, %v3022_v57  ;;  %vm3021_vm11 = vcmp.eq.f32.partialorder %v3020_v20, 8.507059e+37 }
0x2888   :  { %v3922_v26 = vpop.eup %3921 }
0x2889   :  { %v3012_v27 = vmul.f32 %v3922_v26, %v3010_v25  ;;  %vm3017_vm8 = vweird.f32 %v3922_v26 }
0x288a   :  { %vm3018_vm10 = vmor %vm3016_vm9, %vm3017_vm8 }
0x288b   :  { %v3013_v28 = vsub.f32 1.0, %v3012_v27 }
0x288d   :  { %v3014_v63 = vmul.f32 %v3922_v26, %v3013_v28 }
0x288f   :  { %v3015_v49 = vadd.f32 %v3922_v26, %v3014_v63 }
0x2891   :  { %v3019_v7 = vsel %vm3018_vm10, %v3922_v26, %v3015_v49 }
0x2892   :  { %v3024_v35 = vsel %vm3021_vm11, %v3023_v31, %v3019_v7 }
0x2893   :  { %3045 = vmatmul.f32.vlgmr.msrb.gmra.mxu2 %v3024_v35  ;;  %v3653_v35 = vld [vmem:[%s6080_s0 + $0x208] sm:$0xff] }
0x2916   :  { %v3046_v55 = vpop.f32.mrf.mxu2 }
0x2917   :  { %v3047_v40 = vadd.f32 %v3641_v36, %v3046_v55 }
0x2919   :  { %v3049_v58 = vmul.f32 0.1, %v3047_v40 }
0x291b   :  { %v3050_v46 = vadd.f32 %v3049_v58, %v3026_v41 }
0x291d   :  { %3642 = vst [vmem:[%s6081_s3 + $0x1f0] sm:$0xff] %v3050_v46  ;;  %v3053_v47 = vmul.f32 3.0, %v3050_v46  ;;  %v3074_v33 = vmul.f32 0.9, %v3050_v46 }
0x291f   :  { %v3643_v61 = vadd.f32 -2.0, %v3053_v47 }
0x2921   :  { %v3644_v12 = vmul.f32 -1.442695, %v3643_v61 }
0x2923   :  { %3923 = vpow2.f32 %v3644_v12 }
0x2929   :  { %v3924_v56 = vpop.eup %3923 }
0x292a   :  { %v3058_v13 = vadd.f32 1.0, %v3924_v56 }
0x292c   :  { %3925 = vrcp.f32 %v3058_v13  ;;  %v3070_v2 = vand.u32 2147483648, %v3058_v13  ;;  %v3068_v5 = vand.u32 2147483647, %v3058_v13  ;;  %vm3064_vm13 = vweird.f32 %v3058_v13 }
0x292e   :  { %v3071_v60 = vor.u32 1.1754944e-38, %v3070_v2  ;;  %vm3069_vm15 = vcmp.eq.f32.partialorder %v3068_v5, 8.507059e+37 }
0x2932   :  { %v3926_v14 = vpop.eup %3925 }
0x2933   :  { %v3060_v16 = vmul.f32 %v3926_v14, %v3058_v13  ;;  %vm3065_vm12 = vweird.f32 %v3926_v14 }
0x2934   :  { %vm3066_vm14 = vmor %vm3064_vm13, %vm3065_vm12 }
0x2935   :  { %v3061_v1 = vsub.f32 1.0, %v3060_v16 }
0x2937   :  { %v3062_v3 = vmul.f32 %v3926_v14, %v3061_v1 }
0x2939   :  { %v3063_v22 = vadd.f32 %v3926_v14, %v3062_v3 }
0x293b   :  { %v3067_v4 = vsel %vm3066_vm14, %v3926_v14, %v3063_v22 }
0x293c   :  { %v3072_v21 = vsel %vm3069_vm15, %v3071_v60, %v3067_v4 }
0x293d   :  { %3093 = vmatmul.f32.vlgmr.msrb.gmra.mxu3 %v3072_v21  ;;  %v3657_v21 = vld [vmem:[%s6080_s0 + $0x210] sm:$0xff] }
0x29c0   :  { %v3094_v23 = vpop.f32.mrf.mxu3 }
0x29c1   :  { %v3095_v32 = vadd.f32 %v3645_v59, %v3094_v23 }
0x29c3   :  { %v3097_v34 = vmul.f32 0.1, %v3095_v32 }
0x29c5   :  { %v3098_v62 = vadd.f32 %v3097_v34, %v3074_v33 }
0x29c7   :  { %3646 = vst [vmem:[%s6081_s3 + $0x1f8] sm:$0xff] %v3098_v62  ;;  %v3101_v0 = vmul.f32 3.0, %v3098_v62  ;;  %v3122_v53 = vmul.f32 0.9, %v3098_v62 }
0x29c9   :  { %v3647_v37 = vadd.f32 -2.0, %v3101_v0 }
0x29cb   :  { %v3648_v38 = vmul.f32 -1.442695, %v3647_v37 }
0x29cd   :  { %3927 = vpow2.f32 %v3648_v38 }
0x29d3   :  { %v3928_v39 = vpop.eup %3927 }
0x29d4   :  { %v3106_v6 = vadd.f32 1.0, %v3928_v39 }
0x29d6   :  { %3929 = vrcp.f32 %v3106_v6  ;;  %v3118_v44 = vand.u32 2147483648, %v3106_v6  ;;  %v3116_v29 = vand.u32 2147483647, %v3106_v6  ;;  %vm3112_vm1 = vweird.f32 %v3106_v6 }
0x29d8   :  { %v3119_v30 = vor.u32 1.1754944e-38, %v3118_v44  ;;  %vm3117_vm3 = vcmp.eq.f32.partialorder %v3116_v29, 8.507059e+37 }
0x29dc   :  { %v3930_v50 = vpop.eup %3929 }
0x29dd   :  { %v3108_v8 = vmul.f32 %v3930_v50, %v3106_v6  ;;  %vm3113_vm0 = vweird.f32 %v3930_v50 }
0x29de   :  { %vm3114_vm2 = vmor %vm3112_vm1, %vm3113_vm0 }
0x29df   :  { %v3109_v42 = vsub.f32 1.0, %v3108_v8 }
0x29e1   :  { %v3110_v45 = vmul.f32 %v3930_v50, %v3109_v42 }
0x29e3   :  { %v3111_v15 = vadd.f32 %v3930_v50, %v3110_v45 }
0x29e5   :  { %v3115_v17 = vsel %vm3114_vm2, %v3930_v50, %v3111_v15 }
0x29e6   :  { %v3120_v18 = vsel %vm3117_vm3, %v3119_v30, %v3115_v17 }
0x29e7   :  { %3141 = vmatmul.f32.vlgmr.msra.gmra.mxu0 %v3120_v18  ;;  %v3661_v18 = vld [vmem:[%s6080_s0 + $0x218] sm:$0xff] }
0x2a64   :  { %v3142_v51 = vpop.f32.mrf.mxu0 }
0x2a65   :  { %v3143_v52 = vadd.f32 %v3649_v19, %v3142_v51 }
0x2a67   :  { %v3145_v54 = vmul.f32 0.1, %v3143_v52 }
0x2a69   :  { %v3146_v43 = vadd.f32 %v3145_v54, %v3122_v53 }
0x2a6b   :  { %3650 = vst [vmem:[%s6081_s3 + $0x200] sm:$0xff] %v3146_v43  ;;  %v3149_v10 = vmul.f32 3.0, %v3146_v43  ;;  %v3170_v40 = vmul.f32 0.9, %v3146_v43 }
0x2a6d   :  { %v3651_v48 = vadd.f32 -2.0, %v3149_v10 }
0x2a6f   :  { %v3652_v9 = vmul.f32 -1.442695, %v3651_v48 }
0x2a71   :  { %3931 = vpow2.f32 %v3652_v9 }
0x2a77   :  { %v3932_v11 = vpop.eup %3931 }
0x2a78   :  { %v3154_v24 = vadd.f32 1.0, %v3932_v11 }
0x2a7a   :  { %3933 = vrcp.f32 %v3154_v24  ;;  %v3166_v28 = vand.u32 2147483648, %v3154_v24  ;;  %v3164_v63 = vand.u32 2147483647, %v3154_v24  ;;  %vm3160_vm5 = vweird.f32 %v3154_v24 }
0x2a7c   :  { %v3167_v49 = vor.u32 1.1754944e-38, %v3166_v28  ;;  %vm3165_vm7 = vcmp.eq.f32.partialorder %v3164_v63, 8.507059e+37 }
0x2a80   :  { %v3934_v25 = vpop.eup %3933 }
0x2a81   :  { %v3156_v26 = vmul.f32 %v3934_v25, %v3154_v24  ;;  %vm3161_vm4 = vweird.f32 %v3934_v25 }
0x2a82   :  { %vm3162_vm6 = vmor %vm3160_vm5, %vm3161_vm4 }
0x2a83   :  { %v3157_v27 = vsub.f32 1.0, %v3156_v26 }
0x2a85   :  { %v3158_v57 = vmul.f32 %v3934_v25, %v3157_v27 }
0x2a87   :  { %v3159_v20 = vadd.f32 %v3934_v25, %v3158_v57 }
0x2a89   :  { %v3163_v31 = vsel %vm3162_vm6, %v3934_v25, %v3159_v20 }
0x2a8a   :  { %v3168_v7 = vsel %vm3165_vm7, %v3167_v49, %v3163_v31 }
0x2a8b   :  { %3189 = vmatmul.f32.vlgmr.msra.gmra.mxu1 %v3168_v7  ;;  %v3665_v7 = vld [vmem:[%s6080_s0 + $0x220] sm:$0xff] }
0x2b08   :  { %v3190_v36 = vpop.f32.mrf.mxu1 }
0x2b09   :  { %v3191_v55 = vadd.f32 %v3653_v35, %v3190_v36 }
0x2b0b   :  { %v3193_v41 = vmul.f32 0.1, %v3191_v55 }
0x2b0d   :  { %v3194_v58 = vadd.f32 %v3193_v41, %v3170_v40 }
0x2b0f   :  { %3654 = vst [vmem:[%s6081_s3 + $0x208] sm:$0xff] %v3194_v58  ;;  %v3197_v46 = vmul.f32 3.0, %v3194_v58  ;;  %v3218_v32 = vmul.f32 0.9, %v3194_v58 }
0x2b11   :  { %v3655_v47 = vadd.f32 -2.0, %v3197_v46 }
0x2b13   :  { %v3656_v61 = vmul.f32 -1.442695, %v3655_v47 }
0x2b15   :  { %3935 = vpow2.f32 %v3656_v61 }
0x2b1b   :  { %v3936_v12 = vpop.eup %3935 }
0x2b1c   :  { %v3202_v56 = vadd.f32 1.0, %v3936_v12 }
0x2b1e   :  { %3937 = vrcp.f32 %v3202_v56  ;;  %v3214_v1 = vand.u32 2147483648, %v3202_v56  ;;  %v3212_v3 = vand.u32 2147483647, %v3202_v56  ;;  %vm3208_vm9 = vweird.f32 %v3202_v56 }
0x2b20   :  { %v3215_v22 = vor.u32 1.1754944e-38, %v3214_v1  ;;  %vm3213_vm11 = vcmp.eq.f32.partialorder %v3212_v3, 8.507059e+37 }
0x2b24   :  { %v3938_v13 = vpop.eup %3937 }
0x2b25   :  { %v3204_v14 = vmul.f32 %v3938_v13, %v3202_v56  ;;  %vm3209_vm8 = vweird.f32 %v3938_v13 }
0x2b26   :  { %vm3210_vm10 = vmor %vm3208_vm9, %vm3209_vm8 }
0x2b27   :  { %v3205_v16 = vsub.f32 1.0, %v3204_v14 }
0x2b29   :  { %v3206_v2 = vmul.f32 %v3938_v13, %v3205_v16 }
0x2b2b   :  { %v3207_v5 = vadd.f32 %v3938_v13, %v3206_v2 }
0x2b2d   :  { %v3211_v60 = vsel %vm3210_vm10, %v3938_v13, %v3207_v5 }
0x2b2e   :  { %v3216_v4 = vsel %vm3213_vm11, %v3215_v22, %v3211_v60 }
0x2b2f   :  { %3237 = vmatmul.f32.vlgmr.msra.gmra.mxu2 %v3216_v4  ;;  %v3669_v4 = vld [vmem:[%s6080_s0 + $0x228] sm:$0xff] }
0x2bb2   :  { %v3238_v59 = vpop.f32.mrf.mxu2 }
0x2bb3   :  { %v3239_v23 = vadd.f32 %v3657_v21, %v3238_v59 }
0x2bb5   :  { %v3241_v33 = vmul.f32 0.1, %v3239_v23 }
0x2bb7   :  { %v3242_v34 = vadd.f32 %v3241_v33, %v3218_v32 }
0x2bb9   :  { %3658 = vst [vmem:[%s6081_s3 + $0x210] sm:$0xff] %v3242_v34  ;;  %v3245_v62 = vmul.f32 3.0, %v3242_v34  ;;  %v3266_v52 = vmul.f32 0.9, %v3242_v34 }
0x2bbb   :  { %v3659_v0 = vadd.f32 -2.0, %v3245_v62 }
0x2bbd   :  { %v3660_v37 = vmul.f32 -1.442695, %v3659_v0 }
0x2bbf   :  { %3939 = vpow2.f32 %v3660_v37 }
0x2bc5   :  { %v3940_v38 = vpop.eup %3939 }
0x2bc6   :  { %v3250_v39 = vadd.f32 1.0, %v3940_v38 }
0x2bc8   :  { %3941 = vrcp.f32 %v3250_v39  ;;  %v3262_v42 = vand.u32 2147483648, %v3250_v39  ;;  %v3260_v45 = vand.u32 2147483647, %v3250_v39  ;;  %vm3256_vm13 = vweird.f32 %v3250_v39 }
0x2bca   :  { %v3263_v15 = vor.u32 1.1754944e-38, %v3262_v42  ;;  %vm3261_vm15 = vcmp.eq.f32.partialorder %v3260_v45, 8.507059e+37 }
0x2bce   :  { %v3942_v6 = vpop.eup %3941 }
0x2bcf   :  { %v3252_v50 = vmul.f32 %v3942_v6, %v3250_v39  ;;  %vm3257_vm12 = vweird.f32 %v3942_v6 }
0x2bd0   :  { %vm3258_vm14 = vmor %vm3256_vm13, %vm3257_vm12 }
0x2bd1   :  { %v3253_v8 = vsub.f32 1.0, %v3252_v50 }
0x2bd3   :  { %v3254_v44 = vmul.f32 %v3942_v6, %v3253_v8 }
0x2bd5   :  { %v3255_v29 = vadd.f32 %v3942_v6, %v3254_v44 }
0x2bd7   :  { %v3259_v30 = vsel %vm3258_vm14, %v3942_v6, %v3255_v29 }
0x2bd8   :  { %v3264_v17 = vsel %vm3261_vm15, %v3263_v15, %v3259_v30 }
0x2bd9   :  { %3285 = vmatmul.f32.vlgmr.msra.gmra.mxu3 %v3264_v17 }
0x2c5c   :  { %v3286_v19 = vpop.f32.mrf.mxu3 }
0x2c5d   :  { %v3287_v51 = vadd.f32 %v3661_v18, %v3286_v19 }
0x2c5f   :  { %v3289_v53 = vmul.f32 0.1, %v3287_v51 }
0x2c61   :  { %v3290_v54 = vadd.f32 %v3289_v53, %v3266_v52 }
0x2c63   :  { %3662 = vst [vmem:[%s6081_s3 + $0x218] sm:$0xff] %v3290_v54  ;;  %v3293_v43 = vmul.f32 3.0, %v3290_v54  ;;  %v3314_v55 = vmul.f32 0.9, %v3290_v54 }
0x2c65   :  { %v3663_v10 = vadd.f32 -2.0, %v3293_v43 }
0x2c67   :  { %v3664_v48 = vmul.f32 -1.442695, %v3663_v10 }
0x2c69   :  { %3943 = vpow2.f32 %v3664_v48 }
0x2c6f   :  { %v3944_v9 = vpop.eup %3943 }
0x2c70   :  { %v3298_v11 = vadd.f32 1.0, %v3944_v9 }
0x2c72   :  { %3945 = vrcp.f32 %v3298_v11  ;;  %v3310_v27 = vand.u32 2147483648, %v3298_v11  ;;  %v3308_v57 = vand.u32 2147483647, %v3298_v11  ;;  %vm3304_vm1 = vweird.f32 %v3298_v11 }
0x2c74   :  { %v3311_v20 = vor.u32 1.1754944e-38, %v3310_v27  ;;  %vm3309_vm3 = vcmp.eq.f32.partialorder %v3308_v57, 8.507059e+37 }
0x2c78   :  { %v3946_v24 = vpop.eup %3945 }
0x2c79   :  { %v3300_v25 = vmul.f32 %v3946_v24, %v3298_v11  ;;  %vm3305_vm0 = vweird.f32 %v3946_v24 }
0x2c7a   :  { %vm3306_vm2 = vmor %vm3304_vm1, %vm3305_vm0 }
0x2c7b   :  { %v3301_v26 = vsub.f32 1.0, %v3300_v25 }
0x2c7d   :  { %v3302_v28 = vmul.f32 %v3946_v24, %v3301_v26 }
0x2c7f   :  { %v3303_v63 = vadd.f32 %v3946_v24, %v3302_v28 }
0x2c81   :  { %v3307_v49 = vsel %vm3306_vm2, %v3946_v24, %v3303_v63 }
0x2c82   :  { %v3312_v31 = vsel %vm3309_vm3, %v3311_v20, %v3307_v49 }
0x2c83   :  { %3333 = vmatmul.f32.vlgmr.msrb.gmra.mxu0 %v3312_v31 }
0x2d00   :  { %v3334_v35 = vpop.f32.mrf.mxu0 }
0x2d01   :  { %v3335_v36 = vadd.f32 %v3665_v7, %v3334_v35 }
0x2d03   :  { %v3337_v40 = vmul.f32 0.1, %v3335_v36 }
0x2d05   :  { %v3338_v41 = vadd.f32 %v3337_v40, %v3314_v55 }
0x2d07   :  { %3666 = vst [vmem:[%s6081_s3 + $0x220] sm:$0xff] %v3338_v41  ;;  %v3341_v58 = vmul.f32 3.0, %v3338_v41  ;;  %v3362_v23 = vmul.f32 0.9, %v3338_v41 }
0x2d09   :  { %v3667_v46 = vadd.f32 -2.0, %v3341_v58 }
0x2d0b   :  { %v3668_v47 = vmul.f32 -1.442695, %v3667_v46 }
0x2d0d   :  { %3947 = vpow2.f32 %v3668_v47 }
0x2d13   :  { %v3948_v61 = vpop.eup %3947 }
0x2d14   :  { %v3346_v12 = vadd.f32 1.0, %v3948_v61 }
0x2d16   :  { %3949 = vrcp.f32 %v3346_v12  ;;  %v3358_v16 = vand.u32 2147483648, %v3346_v12  ;;  %v3356_v2 = vand.u32 2147483647, %v3346_v12  ;;  %vm3352_vm5 = vweird.f32 %v3346_v12 }
0x2d18   :  { %v3359_v5 = vor.u32 1.1754944e-38, %v3358_v16  ;;  %vm3357_vm7 = vcmp.eq.f32.partialorder %v3356_v2, 8.507059e+37 }
0x2d1c   :  { %v3950_v56 = vpop.eup %3949 }
0x2d1d   :  { %v3348_v13 = vmul.f32 %v3950_v56, %v3346_v12  ;;  %vm3353_vm4 = vweird.f32 %v3950_v56 }
0x2d1e   :  { %vm3354_vm6 = vmor %vm3352_vm5, %vm3353_vm4 }
0x2d1f   :  { %v3349_v14 = vsub.f32 1.0, %v3348_v13 }
0x2d21   :  { %v3350_v1 = vmul.f32 %v3950_v56, %v3349_v14 }
0x2d23   :  { %v3351_v3 = vadd.f32 %v3950_v56, %v3350_v1 }
0x2d25   :  { %v3355_v22 = vsel %vm3354_vm6, %v3950_v56, %v3351_v3 }
0x2d26   :  { %v3360_v60 = vsel %vm3357_vm7, %v3359_v5, %v3355_v22 }
0x2d27   :  { %3381 = vmatmul.f32.vlgmr.msrb.gmra.mxu1 %v3360_v60 }
0x2da4   :  { %v3382_v21 = vpop.f32.mrf.mxu1 }
0x2da5   :  { %v3383_v59 = vadd.f32 %v3669_v4, %v3382_v21 }
0x2da7   :  { %v3385_v32 = vmul.f32 0.1, %v3383_v59 }
0x2da9   :  { %v3386_v33 = vadd.f32 %v3385_v32, %v3362_v23 }
0x2dab   :  { %3670 = vst [vmem:[%s6081_s3 + $0x228] sm:$0xff] %v3386_v33 }

</bundles_post_ra>
